<compile_context>
chip_gen: v5e
topology: v5e:2x2
jax: 0.10.0
libtpu: 0.0.40
codegen_flags: <defaults>
</compile_context>

<pallas_src>
import math
import functools

import jax
import jax.numpy as jnp
from jax.experimental import pallas as pl
from jax.experimental.pallas import tpu as pltpu

# Flip to True on v6e / v7x for ~2x MXU throughput (fp32 accumulation kept);
# left False so the forward matches fp32 reference numerics exactly (and v5e has
# no bf16 VPU, so casts would only add cost there).
USE_BF16_MATMUL = False

_SUBLANE = 8
_VMEM_LIMIT = 32 * 1024 * 1024        # portable across v5e/v6e/v7x

_ACT = {None: None, "relu": jax.nn.relu, "sigmoid": jax.nn.sigmoid}


# ----------------------------------------------------------------------------
# Tiling / packing helpers
# ----------------------------------------------------------------------------

def _round_up(x, m):
    return ((x + m - 1) // m) * m


def _choose_row_tile(m):
    """>=2 balanced tiles for medium M (keeps both v7x TensorCores busy via the
    'parallel' grid axis), balanced tiles for big M, one tile for tiny M."""
    m = max(int(m), 1)
    if m <= 16:
        mp = _round_up(m, _SUBLANE)
        return mp, mp
    if m <= 256:
        tm = _round_up((m + 1) // 2, _SUBLANE)
        return 2 * tm, tm
    n_tiles = -(-m // 128)
    tm = _round_up(-(-m // n_tiles), _SUBLANE)
    return n_tiles * tm, tm


def _pad_rows(a, mp):
    if a.shape[0] == mp:
        return a
    return jnp.pad(a, ((0, mp - a.shape[0]), (0, 0)))


def _width(dims):
    si, vi = dims
    return si + 3 * vi


def pack(s, v):
    """s (M, si) and planar v (M, 3, vi) -> packed (M, si + 3*vi)."""
    if v is None or v.shape[-1] == 0:
        return s
    return jnp.concatenate([s, v.reshape(v.shape[0], 3 * v.shape[-1])], axis=-1)


def unpack(p, dims):
    si, vi = dims
    s = p[:, :si]
    if vi == 0:
        return s, None
    return s, p[:, si:si + 3 * vi].reshape(p.shape[0], 3, vi)


# ----------------------------------------------------------------------------
# In-kernel math
# ----------------------------------------------------------------------------

def _mmk(a, b):
    """a @ b with fp32 accumulation; lane-pads `a` when the weight's K dim was
    zero-padded to the 8-sublane minimum at init time (keeps everything on MXU)."""
    k, kb = a.shape[-1], b.shape[0]
    if k < kb:
        a = jnp.concatenate(
            [a, jnp.zeros(a.shape[:-1] + (kb - k,), a.dtype)], axis=-1)
    if USE_BF16_MATMUL:
        a = a.astype(jnp.bfloat16)
        b = b.astype(jnp.bfloat16)
    return jnp.dot(a, b, preferred_element_type=jnp.float32)


def _apply_stage(st, w_it, s, v3):
    """One GVP or TupleLinear stage on (s, (vx,vy,vz)) values inside a kernel."""
    kind = st["kind"]
    si, vi = st["in"]
    so, vo = st["out"]
    tm = s.shape[0]

    if kind == "tl":                                   # bias-free TupleLinear
        ws = next(w_it)[...]
        s_out = _mmk(s, ws)
        if vo == 0:
            return s_out, None
        if vi == 0:
            z = jnp.zeros((tm, vo), jnp.float32)
            return s_out, (z, z, z)
        wv = next(w_it)[...]
        v_st = jnp.concatenate(list(v3), axis=0)       # (3*tm, vi) sublane-stacked
        vo_st = _mmk(v_st, wv)
        return s_out, (vo_st[:tm], vo_st[tm:2 * tm], vo_st[2 * tm:])

    # kind == "gvp"
    sact = _ACT[st["acts"][0]]
    vact = _ACT[st["acts"][1]]
    if vi == 0:
        ws, bs = next(w_it)[...], next(w_it)[...]
        s_out = _mmk(s, ws) + bs
        if sact is not None:
            s_out = sact(s_out)
        if vo:
            z = jnp.zeros((tm, vo), jnp.float32)
            return s_out, (z, z, z)
        return s_out, None

    wh, wsm, bs = next(w_it)[...], next(w_it)[...], next(w_it)[...]
    v_st = jnp.concatenate(list(v3), axis=0)           # (3*tm, vi)
    vh_st = _mmk(v_st, wh)                             # one MXU pass for x|y|z
    vhx, vhy, vhz = vh_st[:tm], vh_st[tm:2 * tm], vh_st[2 * tm:]
    vn = jnp.sqrt(jnp.maximum(vhx * vhx + vhy * vhy + vhz * vhz, 1e-8))
    s_out = _mmk(jnp.concatenate([s, vn], axis=-1), wsm) + bs   # merged [s|vn] weight

    v_out = None
    if vo:
        wv = next(w_it)[...]
        vo_st = _mmk(vh_st, wv)
        vox, voy, voz = vo_st[:tm], vo_st[tm:2 * tm], vo_st[2 * tm:]
        if st["vg"]:
            wg, bg = next(w_it)[...], next(w_it)[...]
            gin = vact(s_out) if vact is not None else s_out
            gate = jax.nn.sigmoid(_mmk(gin, wg) + bg)
            vox, voy, voz = vox * gate, voy * gate, voz * gate
        elif vact is not None:
            vno = vact(jnp.sqrt(jnp.maximum(
                vox * vox + voy * voy + voz * voz, 1e-8)))
            vox, voy, voz = vox * vno, voy * vno, voz * vno
        v_out = (vox, voy, voz)
    if sact is not None:
        s_out = sact(s_out)
    return s_out, v_out


def _apply_ln(dims, w_it, s, v3):
    sdim, vdim = dims
    g, b = next(w_it)[...], next(w_it)[...]
    mu = jnp.mean(s, axis=-1, keepdims=True)
    sc = s - mu
    var = jnp.mean(sc * sc, axis=-1, keepdims=True)
    s_out = sc * jax.lax.rsqrt(var + 1e-5) * g + b
    if not vdim:
        return s_out, v3
    vw = next(w_it)[...]
    vx, vy, vz = v3
    vn2 = jnp.maximum(vx * vx + vy * vy + vz * vz, 1e-8)
    inv = jax.lax.rsqrt(jnp.mean(vn2, axis=-1, keepdims=True))
    return s_out, (vx * inv * vw, vy * inv * vw, vz * inv * vw)


# ----------------------------------------------------------------------------
# Fused-chain kernel builder
#   spec = {
#     "branches":   [ {"in": (si, vi), "stages": [stage, ...]}, ... ],
#     "tail_stages": [stage, ...]          (optional, runs on concat of branches)
#     "residual":   None | "extra" | ("branch", i)
#     "res_dims":   (si, vi)               (when residual == "extra")
#     "ln":         (s, v), "ln_w": [...]  (optional LayerNorm tail)
#   }
# Ref order: branch inputs..., [extra residual], weights..., output.
# ----------------------------------------------------------------------------

def _build_kernel(spec):
    branches = spec["branches"]
    res = spec.get("residual")
    res_dims = spec.get("res_dims")
    tail_stages = spec.get("tail_stages", [])
    ln_dims = spec.get("ln")
    n_br = len(branches)
    has_extra_res = res == "extra"

    def kernel(*refs):
        b_refs = refs[:n_br]
        idx = n_br
        res_ref = None
        if has_extra_res:
            res_ref = refs[idx]
            idx += 1
        out_ref = refs[-1]
        w_it = iter(refs[idx:-1])

        branch_inputs, branch_vals = [], []
        for br, r in zip(branches, b_refs):
            si, vi = br["in"]
            p = r[...]
            branch_inputs.append(p)
            s = p[:, :si]
            v3 = None
            if vi:
                v3 = (p[:, si:si + vi],
                      p[:, si + vi:si + 2 * vi],
                      p[:, si + 2 * vi:si + 3 * vi])
            for st in br["stages"]:
                s, v3 = _apply_stage(st, w_it, s, v3)
            branch_vals.append((s, v3))

        if n_br == 1:
            s, v3 = branch_vals[0]
        else:
            s = jnp.concatenate([bv[0] for bv in branch_vals], axis=-1)
            vparts = [bv[1] for bv in branch_vals if bv[1] is not None]
            v3 = (tuple(jnp.concatenate([vp[c] for vp in vparts], axis=-1)
                        for c in range(3)) if vparts else None)

        for st in tail_stages:
            s, v3 = _apply_stage(st, w_it, s, v3)

        if res is not None:
            if has_extra_res:
                rsi, rvi = res_dims
                rp = res_ref[...]
            else:
                bidx = res[1]
                rsi, rvi = branches[bidx]["in"]
                rp = branch_inputs[bidx]
            s = s + rp[:, :rsi]
            if rvi:
                v3 = (v3[0] + rp[:, rsi:rsi + rvi],
                      v3[1] + rp[:, rsi + rvi:rsi + 2 * rvi],
                      v3[2] + rp[:, rsi + 2 * rvi:rsi + 3 * rvi])

        if ln_dims is not None:
            s, v3 = _apply_ln(ln_dims, w_it, s, v3)

        if v3 is None:
            out_ref[...] = s
        else:
            out_ref[...] = jnp.concatenate([s, v3[0], v3[1], v3[2]], axis=-1)

    return kernel


def _spec_weights(spec):
    w = []
    for br in spec["branches"]:
        for st in br["stages"]:
            w += st["w"]
    for st in spec.get("tail_stages", []):
        w += st["w"]
    if spec.get("ln") is not None:
        w += spec["ln_w"]
    return w


def _spec_out_dims(spec):
    def chain_out(in_dims, stages):
        d = in_dims
        for st in stages:
            d = st["out"]
        return d
    outs = [chain_out(br["in"], br["stages"]) for br in spec["branches"]]
    d = (sum(o[0] for o in outs), sum(o[1] for o in outs))
    for st in spec.get("tail_stages", []):
        d = st["out"]
    return d


def _stage_cost(st, mp):
    si, vi = st["in"]
    so, vo = st["out"]
    fl = tr = 0
    if st["kind"] == "tl":
        fl += 2 * mp * si * so
        if vi and vo:
            fl += 2 * 3 * mp * max(vi, _SUBLANE) * vo
        return fl, tr
    if vi == 0:
        fl += 2 * mp * max(si, _SUBLANE) * so
        return fl, tr
    h = st["h"]
    fl += 2 * 3 * mp * max(vi, _SUBLANE) * h + 2 * mp * (si + h) * so
    tr += mp * h
    if vo:
        fl += 2 * 3 * mp * max(h, _SUBLANE) * vo
        tr += mp * vo
        if st["vg"]:
            fl += 2 * mp * so * vo
    return fl, tr


def fused_call(spec, inputs, residual=None):
    """inputs: list of (s, planar_v) tuples, one per branch (same row count)."""
    m = inputs[0][0].shape[0]
    mp, tm = _choose_row_tile(m)

    arrs, in_specs = [], []
    nbytes = 0
    for (s, v) in inputs:
        p = _pad_rows(pack(s, v), mp)
        arrs.append(p)
        in_specs.append(pl.BlockSpec((tm, p.shape[1]), lambda i: (i, 0)))
        nbytes += p.size * 4
    if spec.get("residual") == "extra":
        p = _pad_rows(pack(*residual), mp)
        arrs.append(p)
        in_specs.append(pl.BlockSpec((tm, p.shape[1]), lambda i: (i, 0)))
        nbytes += p.size * 4

    for w in _spec_weights(spec):
        arrs.append(w)
        in_specs.append(pl.BlockSpec(w.shape, lambda i: (0, 0)))
        nbytes += w.size * 4

    out_dims = _spec_out_dims(spec)
    out_w = _width(out_dims)
    nbytes += mp * out_w * 4

    flops = trans = 0
    for br in spec["branches"]:
        for st in br["stages"]:
            f, t = _stage_cost(st, mp)
            flops += f
            trans += t
    for st in spec.get("tail_stages", []):
        f, t = _stage_cost(st, mp)
        flops += f
        trans += t
    if spec.get("ln") is not None:
        sdim, vdim = spec["ln"]
        flops += mp * (8 * sdim + 12 * vdim)
        trans += 2 * mp

    out = pl.pallas_call(
        _build_kernel(spec),
        out_shape=jax.ShapeDtypeStruct((mp, out_w), jnp.float32),
        grid=(mp // tm,),
        in_specs=in_specs,
        out_specs=pl.BlockSpec((tm, out_w), lambda i: (i, 0)),
        compiler_params=pltpu.CompilerParams(
            dimension_semantics=("parallel",),
            vmem_limit_bytes=_VMEM_LIMIT),
        cost_estimate=pl.CostEstimate(flops=int(flops),
                                      transcendentals=int(trans),
                                      bytes_accessed=int(nbytes)),
    )(*arrs)

    s_out, v_out = unpack(out[:m], out_dims)
    return (s_out, v_out) if out_dims[1] else s_out


# ----------------------------------------------------------------------------
# Parameter init (PyTorch-style uniform init; K dims zero-padded to >= 8)
# ----------------------------------------------------------------------------

def _kpad(w):
    k = w.shape[0]
    if k >= _SUBLANE:
        return w
    return jnp.pad(w, ((0, _SUBLANE - k), (0, 0)))


def _lin_w(key, din, dout):
    bound = 1.0 / math.sqrt(max(din, 1))
    return jax.random.uniform(key, (din, dout), jnp.float32, -bound, bound)


def _lin_b(key, din, dout):
    bound = 1.0 / math.sqrt(max(din, 1))
    return jax.random.uniform(key, (dout,), jnp.float32, -bound, bound).reshape(1, dout)


def init_gvp(key, in_dims, out_dims, vector_gate=False):
    si, vi = in_dims
    so, vo = out_dims
    ks = jax.random.split(key, 6)
    p = {"in": in_dims, "out": out_dims, "vg": vector_gate}
    if vi:
        h = max(vi, vo)
        p["h"] = h
        p["wh"] = _kpad(_lin_w(ks[0], vi, h))
        p["wsm"] = _lin_w(ks[1], si + h, so)        # merged [s | |wh v|] weight
        p["bs"] = _lin_b(ks[2], si + h, so)
        if vo:
            p["wv"] = _kpad(_lin_w(ks[3], h, vo))
            if vector_gate:
                p["wg"] = _kpad(_lin_w(ks[4], so, vo))
                p["bg"] = _lin_b(ks[5], so, vo)
    else:
        p["ws"] = _kpad(_lin_w(ks[0], si, so))
        p["bs"] = _lin_b(ks[2], si, so)
    return p


def gvp_stage(p, acts=(None, None)):
    si, vi = p["in"]
    st = {"kind": "gvp", "in": p["in"], "out": p["out"], "acts": acts,
          "vg": p["vg"]}
    if vi == 0:
        st["w"] = [p["ws"], p["bs"]]
    else:
        st["h"] = p["h"]
        w = [p["wh"], p["wsm"], p["bs"]]
        if p["out"][1]:
            w.append(p["wv"])
            if p["vg"]:
                w += [p["wg"], p["bg"]]
        st["w"] = w
    return st


def init_gvpblock(key, in_dims, out_dims, n_layers=1,
                  activations=("relu", "sigmoid"), vector_gate=False):
    ks = jax.random.split(key, max(n_layers, 1))
    gvps = []
    if n_layers == 1:
        gvps.append((init_gvp(ks[0], in_dims, out_dims, vector_gate), (None, None)))
    else:
        gvps.append((init_gvp(ks[0], in_dims, out_dims, vector_gate), activations))
        for i in range(n_layers - 2):
            gvps.append((init_gvp(ks[i + 1], out_dims, out_dims, vector_gate),
                         activations))
        gvps.append((init_gvp(ks[n_layers - 1], out_dims, out_dims, vector_gate),
                     (None, None)))
    return gvps


def gvpblock_stages(block):
    return [gvp_stage(p, acts) for p, acts in block]


def _block_in(block):
    return block[0][0]["in"]


def init_tuple_linear(key, in_dims, out_dims):
    si, vi = in_dims
    so, vo = out_dims
    k1, k2 = jax.random.split(key)
    p = {"in": in_dims, "out": out_dims, "ws": _kpad(_lin_w(k1, si, so))}
    if vi and vo:
        p["wv"] = _kpad(_lin_w(k2, vi, vo))
    return p


def tl_stage(p):
    return {"kind": "tl", "in": p["in"], "out": p["out"],
            "w": [p["ws"]] + ([p["wv"]] if "wv" in p else [])}


def init_layernorm(dims):
    s, v = dims
    w = [jnp.ones((1, s), jnp.float32), jnp.zeros((1, s), jnp.float32)]
    if v:
        w.append(jnp.ones((1, v), jnp.float32))
    return {"dims": dims, "w": w}


# ----------------------------------------------------------------------------
# XLA glue: segment ops, small math helpers
# TODO(synk): these data-dependent gathers/scatters stay in XLA; a
#             PrefetchScalarGridSpec fused gather+msg kernel is future work.
# ----------------------------------------------------------------------------

def seg_sum(src, index, num):
    return jax.ops.segment_sum(src, index, num)


def seg_count(index, num):
    return jax.ops.segment_sum(jnp.ones(index.shape, jnp.float32), index, num)


def seg_mean(src, index, num):
    cnt = jnp.maximum(seg_count(index, num), 1.0)
    return seg_sum(src, index, num) / cnt.reshape((num,) + (1,) * (src.ndim - 1))


def seg_min(src, index, num):
    out = jax.ops.segment_min(src, index, num)
    return jnp.where(jnp.isfinite(out), out, 0.0)     # empty segment -> 0 (torch_scatter)


def seg_max(src, index, num):
    out = jax.ops.segment_max(src, index, num)
    return jnp.where(jnp.isfinite(out), out, 0.0)


def seg_std(src, index, num):
    cnt = seg_count(index, num)
    shape = (num,) + (1,) * (src.ndim - 1)
    mean = seg_sum(src, index, num) / jnp.maximum(cnt, 1.0).reshape(shape)
    dev = src - mean[index]
    var = seg_sum(dev * dev, index, num)
    denom = jnp.maximum(cnt - 1.0, 1.0).reshape(shape)
    return jnp.sqrt(var / denom)


def scatter_softmax(src, index, num):
    mx = jax.ops.segment_max(src, index, num)
    mx = jnp.where(jnp.isfinite(mx), mx, 0.0)
    ex = jnp.exp(src - mx[index])
    den = seg_sum(ex, index, num)
    return ex / den[index]


def _norm_no_nan(x, axis=-1, keepdims=False, eps=1e-8, sqrt=True):
    out = jnp.maximum(jnp.sum(jnp.square(x), axis=axis, keepdims=keepdims), eps)
    return jnp.sqrt(out) if sqrt else out


def _normalize(x, axis=-1):
    return jnp.nan_to_num(x / _norm_no_nan(x, axis=axis, keepdims=True))


def _rbf(D, D_min=0.0, D_max=20.0, D_count=16):
    mu = jnp.linspace(D_min, D_max, D_count)[None, :]
    sigma = (D_max - D_min) / D_count
    return jnp.exp(-(((D[:, None] - mu) / sigma) ** 2))


def pna_stats(x, batch_mask, batch_size):
    """GeometricPNA aggregation stats (scatter ops stay in XLA)."""
    s, v = x                                           # v planar (n, 3, vi)
    sm = seg_mean(s, batch_mask, batch_size)
    smi = seg_min(s, batch_mask, batch_size)
    sma = seg_max(s, batch_mask, batch_size)
    sstd = seg_std(s, batch_mask, batch_size)
    vnorm = jnp.sqrt(jnp.maximum(jnp.sum(v * v, axis=1), 1e-8))     # (n, vi)
    vm = seg_mean(v, batch_mask, batch_size)                        # (bs, 3, vi)
    vmi = seg_min(vnorm, batch_mask, batch_size)
    vma = seg_max(vnorm, batch_mask, batch_size)
    vstd = seg_std(vnorm, batch_mask, batch_size)
    z = jnp.concatenate([sm, smi, sma, sstd, vmi, vma, vstd], axis=-1)
    return z, vm


# ----------------------------------------------------------------------------
# GVPTransformerLayer
# ----------------------------------------------------------------------------

def init_layer(key, node_dims, edge_dims, global_dims, dk, dv, de, db, heads,
               n_ff=1, vector_gate=False, attention=True):
    ks = iter(jax.random.split(key, 16))
    p = {"cfg": dict(dk=dk, dv=dv, de=de, db=db, h=heads, attention=attention)}
    if attention:
        # Q | K | Vx share the node input -> one lane-dense fused projection.
        p["qkv"] = init_tuple_linear(next(ks), node_dims,
                                     ((2 * dk[0] + dv[0]) * heads,
                                      (2 * dk[1] + dv[1]) * heads))
        # Ve | b share the edge input -> one fused projection.
        p["veb"] = init_tuple_linear(next(ks), edge_dims,
                                     ((de[0] + db) * heads, de[1] * heads))
    else:
        p["qkv"] = init_tuple_linear(next(ks), node_dims,
                                     (dv[0] * heads, dv[1] * heads))
        p["veb"] = init_tuple_linear(next(ks), edge_dims,
                                     (de[0] * heads, de[1] * heads))
    m_dim = (dv[0] * heads + de[0] * heads, dv[1] * heads + de[1] * heads)
    p["msg"] = init_gvpblock(next(ks), m_dim, m_dim, n_ff, ("relu", None), vector_gate)
    m_dim2 = (m_dim[0] + global_dims[0], m_dim[1] + global_dims[1])
    p["x_out"] = init_gvpblock(next(ks), m_dim2, node_dims, n_ff, ("relu", None),
                               vector_gate)
    p["x_norm"] = init_layernorm(node_dims)
    e_dim = (2 * node_dims[0] + edge_dims[0] + global_dims[0],
             2 * node_dims[1] + edge_dims[1] + global_dims[1])
    if attention:
        e_dim = (e_dim[0] + 3 * heads, e_dim[1])
    p["e_out"] = init_gvpblock(next(ks), e_dim, edge_dims, n_ff, ("relu", None),
                               vector_gate)
    p["e_norm"] = init_layernorm(edge_dims)
    # GeometricPNA uses GVPBlock defaults (n_layers=1, vector_gate=False).
    p["pna_x"] = init_gvpblock(next(ks),
                               (4 * node_dims[0] + 3 * node_dims[1], node_dims[1]),
                               node_dims)
    p["pna_e"] = init_gvpblock(next(ks),
                               (4 * edge_dims[0] + 3 * edge_dims[1], edge_dims[1]),
                               edge_dims)
    p["y"] = init_gvp(next(ks), global_dims, global_dims, vector_gate)
    _dim = (node_dims[0] + edge_dims[0] + global_dims[0],
            node_dims[1] + edge_dims[1] + global_dims[1])
    p["y_out"] = init_gvpblock(next(ks), _dim, global_dims, n_ff, ("relu", None),
                               vector_gate)
    p["y_norm"] = init_layernorm(global_dims)
    return p


def layer_apply(p, x, edge_index, batch_mask, edge_attr, global_attr, batch_size):
    cfg = p["cfg"]
    h = cfg["h"]
    dk, dv_, de_, db = cfg["dk"], cfg["dv"], cfg["de"], cfg["db"]
    node_dims = p["x_norm"]["dims"]
    edge_dims = p["e_norm"]["dims"]
    global_dims = p["y_norm"]["dims"]
    row, col = edge_index[0], edge_index[1]
    n = x[0].shape[0]
    E = row.shape[0]

    # --- fused lane-dense projections (one pallas_call each) ---
    qkv_s, qkv_v = fused_call(
        {"branches": [{"in": p["qkv"]["in"], "stages": [tl_stage(p["qkv"])]}]}, [x])
    veb_s, veb_v = fused_call(
        {"branches": [{"in": p["veb"]["in"], "stages": [tl_stage(p["veb"])]}]},
        [edge_attr])

    if cfg["attention"]:
        nq, ndv = dk[0] * h, dk[1] * h
        qs, ks_, vxs = qkv_s[:, :nq], qkv_s[:, nq:2 * nq], qkv_s[:, 2 * nq:]
        qv, kv, vxv = qkv_v[:, :, :ndv], qkv_v[:, :, ndv:2 * ndv], qkv_v[:, :, 2 * ndv:]
        ves, b = veb_s[:, :de_[0] * h], veb_s[:, de_[0] * h:]
        vev = veb_v

        # TODO(synk): per-edge gather + attention logits + msg GVP could become one
        #             PrefetchScalarGridSpec kernel (row/col in SMEM); XLA glue for now.
        attn_s = (qs[row] * ks_[col]).reshape(E, h, dk[0]).sum(-1)
        attn_v = (qv[row] * kv[col]).reshape(E, 3, h, dk[1]).sum((1, 3))
        attn_e = b.reshape(E, h, db).sum(-1)
        attn = (attn_s / math.sqrt(3 * dk[0])
                + attn_v / math.sqrt(9 * dk[1])
                + attn_e / math.sqrt(3 * db))
        attn = scatter_softmax(attn, row, n)
    else:
        vxs, vxv = qkv_s, qkv_v
        ves, vev = veb_s, veb_v

    mx_s = vxs.reshape(n, h, dv_[0])[col]
    mx_v = vxv.reshape(n, 3, h, dv_[1])[col]
    me_s = ves.reshape(E, h, de_[0])
    me_v = vev.reshape(E, 3, h, de_[1])
    if cfg["attention"]:
        a1 = attn[:, :, None]
        a2 = attn[:, None, :, None]
        mx_s, me_s = mx_s * a1, me_s * a1
        mx_v, me_v = mx_v * a2, me_v * a2
    _m_s = jnp.concatenate([mx_s, me_s], axis=-1).reshape(E, -1)
    _m_v = jnp.concatenate([mx_v, me_v], axis=-1).reshape(E, 3, -1)

    # msg GVPBlock (all n_ff GVPs in one call)
    m_s, m_v = fused_call(
        {"branches": [{"in": _block_in(p["msg"]),
                       "stages": gvpblock_stages(p["msg"])}]}, [(_m_s, _m_v)])
    m_s = seg_mean(m_s, row, n)
    m_v = seg_mean(m_v, row, n)

    g_s, g_v = global_attr
    m_s = jnp.concatenate([m_s, g_s[batch_mask]], axis=-1)
    m_v = jnp.concatenate([m_v, g_v[batch_mask]], axis=-1)

    # x_out GVPBlock + residual + x_norm LayerNorm, fused
    X_out = fused_call(
        {"branches": [{"in": _block_in(p["x_out"]),
                       "stages": gvpblock_stages(p["x_out"])}],
         "residual": "extra", "res_dims": node_dims,
         "ln": node_dims, "ln_w": p["x_norm"]["w"]},
        [(m_s, m_v)], residual=x)

    # edge update
    _e_s = jnp.concatenate([x[0][row], x[0][col], edge_attr[0]], axis=-1)
    _e_v = jnp.concatenate([x[1][row], x[1][col], edge_attr[1]], axis=-1)
    if cfg["attention"]:
        _e_s = jnp.concatenate([_e_s, attn_s, attn_v, attn_e], axis=-1)
    _e_s = jnp.concatenate([_e_s, g_s[batch_mask[row]]], axis=-1)
    _e_v = jnp.concatenate([_e_v, g_v[batch_mask[row]]], axis=-1)

    E_out = fused_call(
        {"branches": [{"in": _block_in(p["e_out"]),
                       "stages": gvpblock_stages(p["e_out"])}],
         "residual": "extra", "res_dims": edge_dims,
         "ln": edge_dims, "ln_w": p["e_norm"]["w"]},
        [(_e_s, _e_v)], residual=edge_attr)

    # global update: pna_x + pna_e + y + y_out + y_norm in a single fused kernel
    zx, vmx = pna_stats(x, batch_mask, batch_size)
    ze, vme = pna_stats(edge_attr, batch_mask[row], batch_size)
    y_out = fused_call(
        {"branches": [
            {"in": _block_in(p["pna_x"]), "stages": gvpblock_stages(p["pna_x"])},
            {"in": _block_in(p["pna_e"]), "stages": gvpblock_stages(p["pna_e"])},
            {"in": p["y"]["in"], "stages": [gvp_stage(p["y"], (None, None))]}],
         "tail_stages": gvpblock_stages(p["y_out"]),
         "residual": ("branch", 2),
         "ln": global_dims, "ln_w": p["y_norm"]["w"]},
        [(zx, vmx), (ze, vme), global_attr])

    return X_out, E_out, y_out


# ----------------------------------------------------------------------------
# GVPTransformerModel
# ----------------------------------------------------------------------------

def init_model(key, node_in_dim, node_h_dim, node_out_nf, edge_in_nf, edge_h_dim,
               edge_out_nf, num_layers, dk, dv, de, db, dy, attn_heads,
               n_feedforward, vector_gate=False, attention=True,
               d_max=20.0, num_rbf=16, reflection_equiv=True):
    if not isinstance(node_in_dim, tuple):
        node_in_dim = (node_in_dim, 0)
    edge_in_dim = (edge_in_nf + 2 * node_in_dim[0] + num_rbf, 1)
    if not reflection_equiv:
        edge_in_dim = (edge_in_dim[0], edge_in_dim[1] + 1)
    ks = iter(jax.random.split(key, num_layers + 4))
    p = {"cfg": dict(dy=dy, d_max=d_max, num_rbf=num_rbf,
                     reflection_equiv=reflection_equiv)}
    p["W_v"] = init_gvp(next(ks), node_in_dim, node_h_dim, vector_gate)
    p["W_e"] = init_gvp(next(ks), edge_in_dim, edge_h_dim, vector_gate)
    p["layers"] = [init_layer(next(ks), node_h_dim, edge_h_dim, dy, dk, dv, de,
                              db, attn_heads, n_feedforward, vector_gate, attention)
                   for _ in range(num_layers)]
    p["W_v_out"] = init_gvp(next(ks), node_h_dim, (node_out_nf, 1), vector_gate)
    p["W_e_out"] = init_gvp(next(ks), edge_h_dim, (edge_out_nf, 0), vector_gate)
    return p


def _single_gvp_call(gvp_params, x):
    spec = {"branches": [{"in": gvp_params["in"],
                          "stages": [gvp_stage(gvp_params, (None, None))]}]}
    return fused_call(spec, [x])


def model_apply(p, h, x, edge_index, batch_mask, batch_size, v=None, edge_attr=None):
    cfg = p["cfg"]
    row, col = edge_index[0], edge_index[1]

    # --- edge features (plain JAX glue) ---
    coord_diff = x[row] - x[col]
    dist = jnp.linalg.norm(coord_diff, axis=-1)
    rbf = _rbf(dist, D_max=cfg["d_max"], D_count=cfg["num_rbf"])
    edge_s = jnp.concatenate([h[row], h[col], rbf], axis=1)
    edge_v = _normalize(coord_diff)[:, :, None]            # planar (E, 3, 1)
    if edge_attr is not None:
        edge_s = jnp.concatenate([edge_s, edge_attr], axis=1)
    # TODO(synk): reflection_equiv=False cross-product edge feature not implemented.
    edge_s = jnp.nan_to_num(edge_s)
    edge_v = jnp.nan_to_num(edge_v)

    h_v = _single_gvp_call(p["W_v"], (h, None) if v is None else (h, v))
    h_e = _single_gvp_call(p["W_e"], (edge_s, edge_v))

    dy = cfg["dy"]
    h_y = (jnp.zeros((batch_size, dy[0]), jnp.float32),
           jnp.zeros((batch_size, 3, dy[1]), jnp.float32))

    for lp in p["layers"]:
        h_v, h_e, h_y = layer_apply(lp, h_v, edge_index, batch_mask, h_e, h_y,
                                    batch_size)

    h_out, vel = _single_gvp_call(p["W_v_out"], h_v)
    edge_out = _single_gvp_call(p["W_e_out"], h_e)
    return h_out, vel[:, :, 0], edge_out


# ----------------------------------------------------------------------------
# Main
# ----------------------------------------------------------------------------

if __name__ == "__main__":
    key = jax.random.PRNGKey(0)
    kh, kx, kp = jax.random.split(key, 3)

    # small graph: 2 graphs x 8 nodes, fully connected per graph (112 edges)
    n_per, bs = 8, 2
    N = n_per * bs
    node_in = 5

    h = jax.random.normal(kh, (N, node_in), jnp.float32)
    x = jax.random.normal(kx, (N, 3), jnp.float32)
    batch_mask = jnp.repeat(jnp.arange(bs, dtype=jnp.int32), n_per)

    rows, cols = [], []
    for g in range(bs):
        for i in range(n_per):
            for j in range(n_per):
                if i != j:
                    rows.append(g * n_per + i)
                    cols.append(g * n_per + j)
    edge_index = jnp.array([rows, cols], dtype=jnp.int32)

    params = init_model(
        kp,
        node_in_dim=node_in,
        node_h_dim=(16, 4),
        node_out_nf=3,
        edge_in_nf=0,
        edge_h_dim=(12, 2),
        edge_out_nf=2,
        num_layers=2,
        dk=(4, 2), dv=(4, 2), de=(4, 2), db=2, dy=(8, 2),
        attn_heads=2, n_feedforward=1,
        vector_gate=False, attention=True,
    )

    fwd = jax.jit(functools.partial(model_apply, params, batch_size=bs))
    h_out, vel, e_out = fwd(h, x, edge_index, batch_mask)
    jax.block_until_ready((h_out, vel, e_out))

    assert h_out.shape == (N, 3)
    assert vel.shape == (N, 3)
    assert e_out.shape == (edge_index.shape[1], 2)
    assert bool(jnp.all(jnp.isfinite(h_out)) & jnp.all(jnp.isfinite(vel))
                & jnp.all(jnp.isfinite(e_out)))
    print("KERNEL_OK")
</pallas_src>

<mosaic_0001>
module attributes {stable_mosaic.version = 11 : i64} {
  func.func @kernel(%arg0: i32, %arg1: memref<56x29xf32, #tpu.memory_space<vmem>>, %arg2: memref<8x2xf32, #tpu.memory_space<vmem>>, %arg3: memref<28x12xf32, #tpu.memory_space<vmem>>, %arg4: memref<1x12xf32, #tpu.memory_space<vmem>>, %arg5: memref<8x2xf32, #tpu.memory_space<vmem>>, %arg6: memref<56x18xf32, #tpu.memory_space<vmem>>) attributes {dimension_semantics = [#tpu.dimension_semantics<parallel>], iteration_bounds = array<i64: 2>, scalar_prefetch = 0 : i64, scratch_operands = 0 : i64, tpu.core_type = #tpu.core_type<tc>, window_params = [{transform_indices = @transform_0, window_bounds = array<i64: 56, 29>}, {pipeline_mode = #tpu.pipeline_mode<synchronous>, transform_indices = @transform_1, window_bounds = array<i64: 8, 2>}, {pipeline_mode = #tpu.pipeline_mode<synchronous>, transform_indices = @transform_2, window_bounds = array<i64: 28, 12>}, {pipeline_mode = #tpu.pipeline_mode<synchronous>, transform_indices = @transform_3, window_bounds = array<i64: 1, 12>}, {pipeline_mode = #tpu.pipeline_mode<synchronous>, transform_indices = @transform_4, window_bounds = array<i64: 8, 2>}, {transform_indices = @transform_5, window_bounds = array<i64: 56, 18>}]} {
    %c0 = arith.constant 0 : index
    %c0_0 = arith.constant 0 : index
    %0 = vector.load %arg1[%c0, %c0_0] : memref<56x29xf32, #tpu.memory_space<vmem>>, vector<56x29xf32>
    %1 = vector.extract_strided_slice %0 {offsets = [0, 0], sizes = [56, 26], strides = [1, 1]} : vector<56x29xf32> to vector<56x26xf32>
    %2 = vector.extract_strided_slice %0 {offsets = [0, 26], sizes = [56, 1], strides = [1, 1]} : vector<56x29xf32> to vector<56x1xf32>
    %3 = vector.extract_strided_slice %0 {offsets = [0, 27], sizes = [56, 1], strides = [1, 1]} : vector<56x29xf32> to vector<56x1xf32>
    %4 = vector.extract_strided_slice %0 {offsets = [0, 28], sizes = [56, 1], strides = [1, 1]} : vector<56x29xf32> to vector<56x1xf32>
    %c0_1 = arith.constant 0 : index
    %c0_2 = arith.constant 0 : index
    %5 = vector.load %arg2[%c0_1, %c0_2] : memref<8x2xf32, #tpu.memory_space<vmem>>, vector<8x2xf32>
    %c0_3 = arith.constant 0 : index
    %c0_4 = arith.constant 0 : index
    %6 = vector.load %arg3[%c0_3, %c0_4] : memref<28x12xf32, #tpu.memory_space<vmem>>, vector<28x12xf32>
    %c0_5 = arith.constant 0 : index
    %c0_6 = arith.constant 0 : index
    %7 = vector.load %arg4[%c0_5, %c0_6] : memref<1x12xf32, #tpu.memory_space<vmem>>, vector<1x12xf32>
    %8 = tpu.concatenate %2, %3, %4 in 0 : vector<56x1xf32>, vector<56x1xf32>, vector<56x1xf32> -> vector<168x1xf32>
    %cst = arith.constant 0.000000e+00 : f32
    %9 = vector.broadcast %cst : f32 to vector<168x7xf32>
    %10 = tpu.concatenate %8, %9 in 1 : vector<168x1xf32>, vector<168x7xf32> -> vector<168x8xf32>
    %cst_7 = arith.constant dense<0.000000e+00> : vector<168x2xf32>
    %11 = tpu.matmul %10, %5, %cst_7 {dimension_numbers = #tpu.dot_dimension_numbers<[1], [0], [0], [1], [0, 0, 1, 1], [], []>} : vector<168x8xf32>, vector<8x2xf32>, vector<168x2xf32> -> vector<168x2xf32>
    %12 = vector.extract_strided_slice %11 {offsets = [0, 0], sizes = [56, 2], strides = [1, 1]} : vector<168x2xf32> to vector<56x2xf32>
    %13 = vector.extract_strided_slice %11 {offsets = [56, 0], sizes = [56, 2], strides = [1, 1]} : vector<168x2xf32> to vector<56x2xf32>
    %14 = vector.extract_strided_slice %11 {offsets = [112, 0], sizes = [56, 2], strides = [1, 1]} : vector<168x2xf32> to vector<56x2xf32>
    %15 = arith.mulf %12, %12 : vector<56x2xf32>
    %16 = arith.mulf %13, %13 : vector<56x2xf32>
    %17 = arith.addf %15, %16 : vector<56x2xf32>
    %18 = arith.mulf %14, %14 : vector<56x2xf32>
    %19 = arith.addf %17, %18 : vector<56x2xf32>
    %cst_8 = arith.constant 9.99999993E-9 : f32
    %20 = vector.broadcast %cst_8 : f32 to vector<56x2xf32>
    %21 = arith.maximumf %19, %20 : vector<56x2xf32>
    %22 = math.sqrt %21 : vector<56x2xf32>
    %23 = tpu.concatenate %1, %22 in 1 : vector<56x26xf32>, vector<56x2xf32> -> vector<56x28xf32>
    %cst_9 = arith.constant dense<0.000000e+00> : vector<56x12xf32>
    %24 = tpu.matmul %23, %6, %cst_9 {dimension_numbers = #tpu.dot_dimension_numbers<[1], [0], [0], [1], [0, 0, 1, 1], [], []>} : vector<56x28xf32>, vector<28x12xf32>, vector<56x12xf32> -> vector<56x12xf32>
    %25 = vector.broadcast %7 : vector<1x12xf32> to vector<56x12xf32>
    %26 = arith.addf %24, %25 : vector<56x12xf32>
    %c0_10 = arith.constant 0 : index
    %c0_11 = arith.constant 0 : index
    %27 = vector.load %arg5[%c0_10, %c0_11] : memref<8x2xf32, #tpu.memory_space<vmem>>, vector<8x2xf32>
    %cst_12 = arith.constant 0.000000e+00 : f32
    %28 = vector.broadcast %cst_12 : f32 to vector<168x6xf32>
    %29 = tpu.concatenate %11, %28 in 1 : vector<168x2xf32>, vector<168x6xf32> -> vector<168x8xf32>
    %cst_13 = arith.constant dense<0.000000e+00> : vector<168x2xf32>
    %30 = tpu.matmul %29, %27, %cst_13 {dimension_numbers = #tpu.dot_dimension_numbers<[1], [0], [0], [1], [0, 0, 1, 1], [], []>} : vector<168x8xf32>, vector<8x2xf32>, vector<168x2xf32> -> vector<168x2xf32>
    %31 = vector.extract_strided_slice %30 {offsets = [0, 0], sizes = [56, 2], strides = [1, 1]} : vector<168x2xf32> to vector<56x2xf32>
    %32 = vector.extract_strided_slice %30 {offsets = [56, 0], sizes = [56, 2], strides = [1, 1]} : vector<168x2xf32> to vector<56x2xf32>
    %33 = vector.extract_strided_slice %30 {offsets = [112, 0], sizes = [56, 2], strides = [1, 1]} : vector<168x2xf32> to vector<56x2xf32>
    %34 = tpu.concatenate %26, %31, %32, %33 in 1 : vector<56x12xf32>, vector<56x2xf32>, vector<56x2xf32>, vector<56x2xf32> -> vector<56x18xf32>
    %c0_14 = arith.constant 0 : index
    %c0_15 = arith.constant 0 : index
    %35 = vector.load %arg6[%c0_14, %c0_15] : memref<56x18xf32, #tpu.memory_space<vmem>>, vector<56x18xf32>
    tpu.vector_store %arg6[%c0_14, %c0_15], %34 {strides = array<i32>} : memref<56x18xf32, #tpu.memory_space<vmem>>, vector<56x18xf32>,
    return
  }
  func.func @transform_0(%arg0: i32) -> (i32, i32) {
    %c0_i32 = arith.constant 0 : i32
    %c0_i32_0 = arith.constant 0 : i32
    return %arg0, %c0_i32 : i32, i32
  }
  func.func @transform_1(%arg0: i32) -> (i32, i32) {
    %c0_i32 = arith.constant 0 : i32
    %c0_i32_0 = arith.constant 0 : i32
    %c0_i32_1 = arith.constant 0 : i32
    return %c0_i32, %c0_i32_0 : i32, i32
  }
  func.func @transform_2(%arg0: i32) -> (i32, i32) {
    %c0_i32 = arith.constant 0 : i32
    %c0_i32_0 = arith.constant 0 : i32
    %c0_i32_1 = arith.constant 0 : i32
    return %c0_i32, %c0_i32_0 : i32, i32
  }
  func.func @transform_3(%arg0: i32) -> (i32, i32) {
    %c0_i32 = arith.constant 0 : i32
    %c0_i32_0 = arith.constant 0 : i32
    %c0_i32_1 = arith.constant 0 : i32
    return %c0_i32, %c0_i32_0 : i32, i32
  }
  func.func @transform_4(%arg0: i32) -> (i32, i32) {
    %c0_i32 = arith.constant 0 : i32
    %c0_i32_0 = arith.constant 0 : i32
    %c0_i32_1 = arith.constant 0 : i32
    return %c0_i32, %c0_i32_0 : i32, i32
  }
  func.func @transform_5(%arg0: i32) -> (i32, i32) {
    %c0_i32 = arith.constant 0 : i32
    %c0_i32_0 = arith.constant 0 : i32
    return %arg0, %c0_i32 : i32, i32
  }
}

module attributes {stable_mosaic.version = 11 : i64} {
  func.func @kernel(%arg0: i32, %arg1: memref<16x5xf32, #tpu.memory_space<vmem>>, %arg2: memref<8x16xf32, #tpu.memory_space<vmem>>, %arg3: memref<1x16xf32, #tpu.memory_space<vmem>>, %arg4: memref<16x28xf32, #tpu.memory_space<vmem>>) attributes {dimension_semantics = [#tpu.dimension_semantics<parallel>], iteration_bounds = array<i64: 1>, scalar_prefetch = 0 : i64, scratch_operands = 0 : i64, tpu.core_type = #tpu.core_type<tc>, window_params = [{transform_indices = @transform_0, window_bounds = array<i64: 16, 5>}, {pipeline_mode = #tpu.pipeline_mode<synchronous>, transform_indices = @transform_1, window_bounds = array<i64: 8, 16>}, {pipeline_mode = #tpu.pipeline_mode<synchronous>, transform_indices = @transform_2, window_bounds = array<i64: 1, 16>}, {transform_indices = @transform_3, window_bounds = array<i64: 16, 28>}]} {
    %c0 = arith.constant 0 : index
    %c0_0 = arith.constant 0 : index
    %0 = vector.load %arg1[%c0, %c0_0] : memref<16x5xf32, #tpu.memory_space<vmem>>, vector<16x5xf32>
    %c0_1 = arith.constant 0 : index
    %c0_2 = arith.constant 0 : index
    %1 = vector.load %arg2[%c0_1, %c0_2] : memref<8x16xf32, #tpu.memory_space<vmem>>, vector<8x16xf32>
    %c0_3 = arith.constant 0 : index
    %c0_4 = arith.constant 0 : index
    %2 = vector.load %arg3[%c0_3, %c0_4] : memref<1x16xf32, #tpu.memory_space<vmem>>, vector<1x16xf32>
    %cst = arith.constant 0.000000e+00 : f32
    %3 = vector.broadcast %cst : f32 to vector<16x3xf32>
    %4 = tpu.concatenate %0, %3 in 1 : vector<16x5xf32>, vector<16x3xf32> -> vector<16x8xf32>
    %cst_5 = arith.constant dense<0.000000e+00> : vector<16x16xf32>
    %5 = tpu.matmul %4, %1, %cst_5 {dimension_numbers = #tpu.dot_dimension_numbers<[1], [0], [0], [1], [0, 0, 1, 1], [], []>} : vector<16x8xf32>, vector<8x16xf32>, vector<16x16xf32> -> vector<16x16xf32>
    %6 = vector.broadcast %2 : vector<1x16xf32> to vector<16x16xf32>
    %7 = arith.addf %5, %6 : vector<16x16xf32>
    %cst_6 = arith.constant 0.000000e+00 : f32
    %8 = vector.broadcast %cst_6 : f32 to vector<16x4xf32>
    %9 = tpu.concatenate %7, %8, %8, %8 in 1 : vector<16x16xf32>, vector<16x4xf32>, vector<16x4xf32>, vector<16x4xf32> -> vector<16x28xf32>
    %c0_7 = arith.constant 0 : index
    %c0_8 = arith.constant 0 : index
    %10 = vector.load %arg4[%c0_7, %c0_8] : memref<16x28xf32, #tpu.memory_space<vmem>>, vector<16x28xf32>
    tpu.vector_store %arg4[%c0_7, %c0_8], %9 {strides = array<i32>} : memref<16x28xf32, #tpu.memory_space<vmem>>, vector<16x28xf32>,
    return
  }
  func.func @transform_0(%arg0: i32) -> (i32, i32) {
    %c0_i32 = arith.constant 0 : i32
    %c0_i32_0 = arith.constant 0 : i32
    return %arg0, %c0_i32 : i32, i32
  }
  func.func @transform_1(%arg0: i32) -> (i32, i32) {
    %c0_i32 = arith.constant 0 : i32
    %c0_i32_0 = arith.constant 0 : i32
    %c0_i32_1 = arith.constant 0 : i32
    return %c0_i32, %c0_i32_0 : i32, i32
  }
  func.func @transform_2(%arg0: i32) -> (i32, i32) {
    %c0_i32 = arith.constant 0 : i32
    %c0_i32_0 = arith.constant 0 : i32
    %c0_i32_1 = arith.constant 0 : i32
    return %c0_i32, %c0_i32_0 : i32, i32
  }
  func.func @transform_3(%arg0: i32) -> (i32, i32) {
    %c0_i32 = arith.constant 0 : i32
    %c0_i32_0 = arith.constant 0 : i32
    return %arg0, %c0_i32 : i32, i32
  }
}

module attributes {stable_mosaic.version = 11 : i64} {
  func.func @kernel(%arg0: i32, %arg1: memref<16x28xf32, #tpu.memory_space<vmem>>, %arg2: memref<16x24xf32, #tpu.memory_space<vmem>>, %arg3: memref<8x12xf32, #tpu.memory_space<vmem>>, %arg4: memref<16x60xf32, #tpu.memory_space<vmem>>) attributes {dimension_semantics = [#tpu.dimension_semantics<parallel>], iteration_bounds = array<i64: 1>, scalar_prefetch = 0 : i64, scratch_operands = 0 : i64, tpu.core_type = #tpu.core_type<tc>, window_params = [{transform_indices = @transform_0, window_bounds = array<i64: 16, 28>}, {pipeline_mode = #tpu.pipeline_mode<synchronous>, transform_indices = @transform_1, window_bounds = array<i64: 16, 24>}, {pipeline_mode = #tpu.pipeline_mode<synchronous>, transform_indices = @transform_2, window_bounds = array<i64: 8, 12>}, {transform_indices = @transform_3, window_bounds = array<i64: 16, 60>}]} {
    %c0 = arith.constant 0 : index
    %c0_0 = arith.constant 0 : index
    %0 = vector.load %arg1[%c0, %c0_0] : memref<16x28xf32, #tpu.memory_space<vmem>>, vector<16x28xf32>
    %1 = vector.extract_strided_slice %0 {offsets = [0, 0], sizes = [16, 16], strides = [1, 1]} : vector<16x28xf32> to vector<16x16xf32>
    %2 = vector.extract_strided_slice %0 {offsets = [0, 16], sizes = [16, 4], strides = [1, 1]} : vector<16x28xf32> to vector<16x4xf32>
    %3 = vector.extract_strided_slice %0 {offsets = [0, 20], sizes = [16, 4], strides = [1, 1]} : vector<16x28xf32> to vector<16x4xf32>
    %4 = vector.extract_strided_slice %0 {offsets = [0, 24], sizes = [16, 4], strides = [1, 1]} : vector<16x28xf32> to vector<16x4xf32>
    %c0_1 = arith.constant 0 : index
    %c0_2 = arith.constant 0 : index
    %5 = vector.load %arg2[%c0_1, %c0_2] : memref<16x24xf32, #tpu.memory_space<vmem>>, vector<16x24xf32>
    %cst = arith.constant dense<0.000000e+00> : vector<16x24xf32>
    %6 = tpu.matmul %1, %5, %cst {dimension_numbers = #tpu.dot_dimension_numbers<[1], [0], [0], [1], [0, 0, 1, 1], [], []>} : vector<16x16xf32>, vector<16x24xf32>, vector<16x24xf32> -> vector<16x24xf32>
    %c0_3 = arith.constant 0 : index
    %c0_4 = arith.constant 0 : index
    %7 = vector.load %arg3[%c0_3, %c0_4] : memref<8x12xf32, #tpu.memory_space<vmem>>, vector<8x12xf32>
    %8 = tpu.concatenate %2, %3, %4 in 0 : vector<16x4xf32>, vector<16x4xf32>, vector<16x4xf32> -> vector<48x4xf32>
    %cst_5 = arith.constant 0.000000e+00 : f32
    %9 = vector.broadcast %cst_5 : f32 to vector<48x4xf32>
    %10 = tpu.concatenate %8, %9 in 1 : vector<48x4xf32>, vector<48x4xf32> -> vector<48x8xf32>
    %cst_6 = arith.constant dense<0.000000e+00> : vector<48x12xf32>
    %11 = tpu.matmul %10, %7, %cst_6 {dimension_numbers = #tpu.dot_dimension_numbers<[1], [0], [0], [1], [0, 0, 1, 1], [], []>} : vector<48x8xf32>, vector<8x12xf32>, vector<48x12xf32> -> vector<48x12xf32>
    %12 = vector.extract_strided_slice %11 {offsets = [0, 0], sizes = [16, 12], strides = [1, 1]} : vector<48x12xf32> to vector<16x12xf32>
    %13 = vector.extract_strided_slice %11 {offsets = [16, 0], sizes = [16, 12], strides = [1, 1]} : vector<48x12xf32> to vector<16x12xf32>
    %14 = vector.extract_strided_slice %11 {offsets = [32, 0], sizes = [16, 12], strides = [1, 1]} : vector<48x12xf32> to vector<16x12xf32>
    %15 = tpu.concatenate %6, %12, %13, %14 in 1 : vector<16x24xf32>, vector<16x12xf32>, vector<16x12xf32>, vector<16x12xf32> -> vector<16x60xf32>
    %c0_7 = arith.constant 0 : index
    %c0_8 = arith.constant 0 : index
    %16 = vector.load %arg4[%c0_7, %c0_8] : memref<16x60xf32, #tpu.memory_space<vmem>>, vector<16x60xf32>
    tpu.vector_store %arg4[%c0_7, %c0_8], %15 {strides = array<i32>} : memref<16x60xf32, #tpu.memory_space<vmem>>, vector<16x60xf32>,
    return
  }
  func.func @transform_0(%arg0: i32) -> (i32, i32) {
    %c0_i32 = arith.constant 0 : i32
    %c0_i32_0 = arith.constant 0 : i32
    return %arg0, %c0_i32 : i32, i32
  }
  func.func @transform_1(%arg0: i32) -> (i32, i32) {
    %c0_i32 = arith.constant 0 : i32
    %c0_i32_0 = arith.constant 0 : i32
    %c0_i32_1 = arith.constant 0 : i32
    return %c0_i32, %c0_i32_0 : i32, i32
  }
  func.func @transform_2(%arg0: i32) -> (i32, i32) {
    %c0_i32 = arith.constant 0 : i32
    %c0_i32_0 = arith.constant 0 : i32
    %c0_i32_1 = arith.constant 0 : i32
    return %c0_i32, %c0_i32_0 : i32, i32
  }
  func.func @transform_3(%arg0: i32) -> (i32, i32) {
    %c0_i32 = arith.constant 0 : i32
    %c0_i32_0 = arith.constant 0 : i32
    return %arg0, %c0_i32 : i32, i32
  }
}

module attributes {stable_mosaic.version = 11 : i64} {
  func.func @kernel(%arg0: i32, %arg1: memref<56x18xf32, #tpu.memory_space<vmem>>, %arg2: memref<12x12xf32, #tpu.memory_space<vmem>>, %arg3: memref<8x4xf32, #tpu.memory_space<vmem>>, %arg4: memref<56x24xf32, #tpu.memory_space<vmem>>) attributes {dimension_semantics = [#tpu.dimension_semantics<parallel>], iteration_bounds = array<i64: 2>, scalar_prefetch = 0 : i64, scratch_operands = 0 : i64, tpu.core_type = #tpu.core_type<tc>, window_params = [{transform_indices = @transform_0, window_bounds = array<i64: 56, 18>}, {pipeline_mode = #tpu.pipeline_mode<synchronous>, transform_indices = @transform_1, window_bounds = array<i64: 12, 12>}, {pipeline_mode = #tpu.pipeline_mode<synchronous>, transform_indices = @transform_2, window_bounds = array<i64: 8, 4>}, {transform_indices = @transform_3, window_bounds = array<i64: 56, 24>}]} {
    %c0 = arith.constant 0 : index
    %c0_0 = arith.constant 0 : index
    %0 = vector.load %arg1[%c0, %c0_0] : memref<56x18xf32, #tpu.memory_space<vmem>>, vector<56x18xf32>
    %1 = vector.extract_strided_slice %0 {offsets = [0, 0], sizes = [56, 12], strides = [1, 1]} : vector<56x18xf32> to vector<56x12xf32>
    %2 = vector.extract_strided_slice %0 {offsets = [0, 12], sizes = [56, 2], strides = [1, 1]} : vector<56x18xf32> to vector<56x2xf32>
    %3 = vector.extract_strided_slice %0 {offsets = [0, 14], sizes = [56, 2], strides = [1, 1]} : vector<56x18xf32> to vector<56x2xf32>
    %4 = vector.extract_strided_slice %0 {offsets = [0, 16], sizes = [56, 2], strides = [1, 1]} : vector<56x18xf32> to vector<56x2xf32>
    %c0_1 = arith.constant 0 : index
    %c0_2 = arith.constant 0 : index
    %5 = vector.load %arg2[%c0_1, %c0_2] : memref<12x12xf32, #tpu.memory_space<vmem>>, vector<12x12xf32>
    %cst = arith.constant dense<0.000000e+00> : vector<56x12xf32>
    %6 = tpu.matmul %1, %5, %cst {dimension_numbers = #tpu.dot_dimension_numbers<[1], [0], [0], [1], [0, 0, 1, 1], [], []>} : vector<56x12xf32>, vector<12x12xf32>, vector<56x12xf32> -> vector<56x12xf32>
    %c0_3 = arith.constant 0 : index
    %c0_4 = arith.constant 0 : index
    %7 = vector.load %arg3[%c0_3, %c0_4] : memref<8x4xf32, #tpu.memory_space<vmem>>, vector<8x4xf32>
    %8 = tpu.concatenate %2, %3, %4 in 0 : vector<56x2xf32>, vector<56x2xf32>, vector<56x2xf32> -> vector<168x2xf32>
    %cst_5 = arith.constant 0.000000e+00 : f32
    %9 = vector.broadcast %cst_5 : f32 to vector<168x6xf32>
    %10 = tpu.concatenate %8, %9 in 1 : vector<168x2xf32>, vector<168x6xf32> -> vector<168x8xf32>
    %cst_6 = arith.constant dense<0.000000e+00> : vector<168x4xf32>
    %11 = tpu.matmul %10, %7, %cst_6 {dimension_numbers = #tpu.dot_dimension_numbers<[1], [0], [0], [1], [0, 0, 1, 1], [], []>} : vector<168x8xf32>, vector<8x4xf32>, vector<168x4xf32> -> vector<168x4xf32>
    %12 = vector.extract_strided_slice %11 {offsets = [0, 0], sizes = [56, 4], strides = [1, 1]} : vector<168x4xf32> to vector<56x4xf32>
    %13 = vector.extract_strided_slice %11 {offsets = [56, 0], sizes = [56, 4], strides = [1, 1]} : vector<168x4xf32> to vector<56x4xf32>
    %14 = vector.extract_strided_slice %11 {offsets = [112, 0], sizes = [56, 4], strides = [1, 1]} : vector<168x4xf32> to vector<56x4xf32>
    %15 = tpu.concatenate %6, %12, %13, %14 in 1 : vector<56x12xf32>, vector<56x4xf32>, vector<56x4xf32>, vector<56x4xf32> -> vector<56x24xf32>
    %c0_7 = arith.constant 0 : index
    %c0_8 = arith.constant 0 : index
    %16 = vector.load %arg4[%c0_7, %c0_8] : memref<56x24xf32, #tpu.memory_space<vmem>>, vector<56x24xf32>
    tpu.vector_store %arg4[%c0_7, %c0_8], %15 {strides = array<i32>} : memref<56x24xf32, #tpu.memory_space<vmem>>, vector<56x24xf32>,
    return
  }
  func.func @transform_0(%arg0: i32) -> (i32, i32) {
    %c0_i32 = arith.constant 0 : i32
    %c0_i32_0 = arith.constant 0 : i32
    return %arg0, %c0_i32 : i32, i32
  }
  func.func @transform_1(%arg0: i32) -> (i32, i32) {
    %c0_i32 = arith.constant 0 : i32
    %c0_i32_0 = arith.constant 0 : i32
    %c0_i32_1 = arith.constant 0 : i32
    return %c0_i32, %c0_i32_0 : i32, i32
  }
  func.func @transform_2(%arg0: i32) -> (i32, i32) {
    %c0_i32 = arith.constant 0 : i32
    %c0_i32_0 = arith.constant 0 : i32
    %c0_i32_1 = arith.constant 0 : i32
    return %c0_i32, %c0_i32_0 : i32, i32
  }
  func.func @transform_3(%arg0: i32) -> (i32, i32) {
    %c0_i32 = arith.constant 0 : i32
    %c0_i32_0 = arith.constant 0 : i32
    return %arg0, %c0_i32 : i32, i32
  }
}

module attributes {stable_mosaic.version = 11 : i64} {
  func.func @kernel(%arg0: i32, %arg1: memref<56x94xf32, #tpu.memory_space<vmem>>, %arg2: memref<56x18xf32, #tpu.memory_space<vmem>>, %arg3: memref<12x12xf32, #tpu.memory_space<vmem>>, %arg4: memref<70x12xf32, #tpu.memory_space<vmem>>, %arg5: memref<1x12xf32, #tpu.memory_space<vmem>>, %arg6: memref<12x2xf32, #tpu.memory_space<vmem>>, %arg7: memref<1x12xf32, #tpu.memory_space<vmem>>, %arg8: memref<1x12xf32, #tpu.memory_space<vmem>>, %arg9: memref<1x2xf32, #tpu.memory_space<vmem>>, %arg10: memref<56x18xf32, #tpu.memory_space<vmem>>) attributes {dimension_semantics = [#tpu.dimension_semantics<parallel>], iteration_bounds = array<i64: 2>, scalar_prefetch = 0 : i64, scratch_operands = 0 : i64, tpu.core_type = #tpu.core_type<tc>, window_params = [{transform_indices = @transform_0, window_bounds = array<i64: 56, 94>}, {transform_indices = @transform_1, window_bounds = array<i64: 56, 18>}, {pipeline_mode = #tpu.pipeline_mode<synchronous>, transform_indices = @transform_2, window_bounds = array<i64: 12, 12>}, {pipeline_mode = #tpu.pipeline_mode<synchronous>, transform_indices = @transform_3, window_bounds = array<i64: 70, 12>}, {pipeline_mode = #tpu.pipeline_mode<synchronous>, transform_indices = @transform_4, window_bounds = array<i64: 1, 12>}, {pipeline_mode = #tpu.pipeline_mode<synchronous>, transform_indices = @transform_5, window_bounds = array<i64: 12, 2>}, {pipeline_mode = #tpu.pipeline_mode<synchronous>, transform_indices = @transform_6, window_bounds = array<i64: 1, 12>}, {pipeline_mode = #tpu.pipeline_mode<synchronous>, transform_indices = @transform_7, window_bounds = array<i64: 1, 12>}, {pipeline_mode = #tpu.pipeline_mode<synchronous>, transform_indices = @transform_8, window_bounds = array<i64: 1, 2>}, {transform_indices = @transform_9, window_bounds = array<i64: 56, 18>}]} {
    %c0 = arith.constant 0 : index
    %c0_0 = arith.constant 0 : index
    %0 = vector.load %arg1[%c0, %c0_0] : memref<56x94xf32, #tpu.memory_space<vmem>>, vector<56x94xf32>
    %1 = vector.extract_strided_slice %0 {offsets = [0, 0], sizes = [56, 58], strides = [1, 1]} : vector<56x94xf32> to vector<56x58xf32>
    %2 = vector.extract_strided_slice %0 {offsets = [0, 58], sizes = [56, 12], strides = [1, 1]} : vector<56x94xf32> to vector<56x12xf32>
    %3 = vector.extract_strided_slice %0 {offsets = [0, 70], sizes = [56, 12], strides = [1, 1]} : vector<56x94xf32> to vector<56x12xf32>
    %4 = vector.extract_strided_slice %0 {offsets = [0, 82], sizes = [56, 12], strides = [1, 1]} : vector<56x94xf32> to vector<56x12xf32>
    %c0_1 = arith.constant 0 : index
    %c0_2 = arith.constant 0 : index
    %5 = vector.load %arg3[%c0_1, %c0_2] : memref<12x12xf32, #tpu.memory_space<vmem>>, vector<12x12xf32>
    %c0_3 = arith.constant 0 : index
    %c0_4 = arith.constant 0 : index
    %6 = vector.load %arg4[%c0_3, %c0_4] : memref<70x12xf32, #tpu.memory_space<vmem>>, vector<70x12xf32>
    %c0_5 = arith.constant 0 : index
    %c0_6 = arith.constant 0 : index
    %7 = vector.load %arg5[%c0_5, %c0_6] : memref<1x12xf32, #tpu.memory_space<vmem>>, vector<1x12xf32>
    %8 = tpu.concatenate %2, %3, %4 in 0 : vector<56x12xf32>, vector<56x12xf32>, vector<56x12xf32> -> vector<168x12xf32>
    %cst = arith.constant dense<0.000000e+00> : vector<168x12xf32>
    %9 = tpu.matmul %8, %5, %cst {dimension_numbers = #tpu.dot_dimension_numbers<[1], [0], [0], [1], [0, 0, 1, 1], [], []>} : vector<168x12xf32>, vector<12x12xf32>, vector<168x12xf32> -> vector<168x12xf32>
    %10 = vector.extract_strided_slice %9 {offsets = [0, 0], sizes = [56, 12], strides = [1, 1]} : vector<168x12xf32> to vector<56x12xf32>
    %11 = vector.extract_strided_slice %9 {offsets = [56, 0], sizes = [56, 12], strides = [1, 1]} : vector<168x12xf32> to vector<56x12xf32>
    %12 = vector.extract_strided_slice %9 {offsets = [112, 0], sizes = [56, 12], strides = [1, 1]} : vector<168x12xf32> to vector<56x12xf32>
    %13 = arith.mulf %10, %10 : vector<56x12xf32>
    %14 = arith.mulf %11, %11 : vector<56x12xf32>
    %15 = arith.addf %13, %14 : vector<56x12xf32>
    %16 = arith.mulf %12, %12 : vector<56x12xf32>
    %17 = arith.addf %15, %16 : vector<56x12xf32>
    %cst_7 = arith.constant 9.99999993E-9 : f32
    %18 = vector.broadcast %cst_7 : f32 to vector<56x12xf32>
    %19 = arith.maximumf %17, %18 : vector<56x12xf32>
    %20 = math.sqrt %19 : vector<56x12xf32>
    %21 = tpu.concatenate %1, %20 in 1 : vector<56x58xf32>, vector<56x12xf32> -> vector<56x70xf32>
    %cst_8 = arith.constant dense<0.000000e+00> : vector<56x12xf32>
    %22 = tpu.matmul %21, %6, %cst_8 {dimension_numbers = #tpu.dot_dimension_numbers<[1], [0], [0], [1], [0, 0, 1, 1], [], []>} : vector<56x70xf32>, vector<70x12xf32>, vector<56x12xf32> -> vector<56x12xf32>
    %23 = vector.broadcast %7 : vector<1x12xf32> to vector<56x12xf32>
    %24 = arith.addf %22, %23 : vector<56x12xf32>
    %c0_9 = arith.constant 0 : index
    %c0_10 = arith.constant 0 : index
    %25 = vector.load %arg6[%c0_9, %c0_10] : memref<12x2xf32, #tpu.memory_space<vmem>>, vector<12x2xf32>
    %cst_11 = arith.constant dense<0.000000e+00> : vector<168x2xf32>
    %26 = tpu.matmul %9, %25, %cst_11 {dimension_numbers = #tpu.dot_dimension_numbers<[1], [0], [0], [1], [0, 0, 1, 1], [], []>} : vector<168x12xf32>, vector<12x2xf32>, vector<168x2xf32> -> vector<168x2xf32>
    %27 = vector.extract_strided_slice %26 {offsets = [0, 0], sizes = [56, 2], strides = [1, 1]} : vector<168x2xf32> to vector<56x2xf32>
    %28 = vector.extract_strided_slice %26 {offsets = [56, 0], sizes = [56, 2], strides = [1, 1]} : vector<168x2xf32> to vector<56x2xf32>
    %29 = vector.extract_strided_slice %26 {offsets = [112, 0], sizes = [56, 2], strides = [1, 1]} : vector<168x2xf32> to vector<56x2xf32>
    %c0_12 = arith.constant 0 : index
    %c0_13 = arith.constant 0 : index
    %30 = vector.load %arg2[%c0_12, %c0_13] : memref<56x18xf32, #tpu.memory_space<vmem>>, vector<56x18xf32>
    %31 = vector.extract_strided_slice %30 {offsets = [0, 0], sizes = [56, 12], strides = [1, 1]} : vector<56x18xf32> to vector<56x12xf32>
    %32 = arith.addf %24, %31 : vector<56x12xf32>
    %33 = vector.extract_strided_slice %30 {offsets = [0, 12], sizes = [56, 2], strides = [1, 1]} : vector<56x18xf32> to vector<56x2xf32>
    %34 = arith.addf %27, %33 : vector<56x2xf32>
    %35 = vector.extract_strided_slice %30 {offsets = [0, 14], sizes = [56, 2], strides = [1, 1]} : vector<56x18xf32> to vector<56x2xf32>
    %36 = arith.addf %28, %35 : vector<56x2xf32>
    %37 = vector.extract_strided_slice %30 {offsets = [0, 16], sizes = [56, 2], strides = [1, 1]} : vector<56x18xf32> to vector<56x2xf32>
    %38 = arith.addf %29, %37 : vector<56x2xf32>
    %c0_14 = arith.constant 0 : index
    %c0_15 = arith.constant 0 : index
    %39 = vector.load %arg7[%c0_14, %c0_15] : memref<1x12xf32, #tpu.memory_space<vmem>>, vector<1x12xf32>
    %c0_16 = arith.constant 0 : index
    %c0_17 = arith.constant 0 : index
    %40 = vector.load %arg8[%c0_16, %c0_17] : memref<1x12xf32, #tpu.memory_space<vmem>>, vector<1x12xf32>
    %cst_18 = arith.constant dense<0.000000e+00> : vector<56xf32>
    %41 = vector.multi_reduction <add>, %32, %cst_18 [1] : vector<56x12xf32> to vector<56xf32>
    %42 = vector.shape_cast %41 : vector<56xf32> to vector<56x1xf32>
    %cst_19 = arith.constant 1.200000e+01 : f32
    %43 = vector.broadcast %cst_19 : f32 to vector<56x1xf32>
    %44 = arith.divf %42, %43 : vector<56x1xf32>
    %45 = vector.broadcast %44 : vector<56x1xf32> to vector<56x12xf32>
    %46 = arith.subf %32, %45 : vector<56x12xf32>
    %47 = arith.mulf %46, %46 : vector<56x12xf32>
    %cst_20 = arith.constant dense<0.000000e+00> : vector<56xf32>
    %48 = vector.multi_reduction <add>, %47, %cst_20 [1] : vector<56x12xf32> to vector<56xf32>
    %49 = vector.shape_cast %48 : vector<56xf32> to vector<56x1xf32>
    %cst_21 = arith.constant 1.200000e+01 : f32
    %50 = vector.broadcast %cst_21 : f32 to vector<56x1xf32>
    %51 = arith.divf %49, %50 : vector<56x1xf32>
    %cst_22 = arith.constant 9.99999974E-6 : f32
    %52 = vector.broadcast %cst_22 : f32 to vector<56x1xf32>
    %53 = arith.addf %51, %52 : vector<56x1xf32>
    %54 = math.rsqrt %53 : vector<56x1xf32>
    %55 = vector.broadcast %54 : vector<56x1xf32> to vector<56x12xf32>
    %56 = arith.mulf %46, %55 : vector<56x12xf32>
    %57 = vector.broadcast %39 : vector<1x12xf32> to vector<56x12xf32>
    %58 = arith.mulf %56, %57 : vector<56x12xf32>
    %59 = vector.broadcast %40 : vector<1x12xf32> to vector<56x12xf32>
    %60 = arith.addf %58, %59 : vector<56x12xf32>
    %c0_23 = arith.constant 0 : index
    %c0_24 = arith.constant 0 : index
    %61 = vector.load %arg9[%c0_23, %c0_24] : memref<1x2xf32, #tpu.memory_space<vmem>>, vector<1x2xf32>
    %62 = arith.mulf %34, %34 : vector<56x2xf32>
    %63 = arith.mulf %36, %36 : vector<56x2xf32>
    %64 = arith.addf %62, %63 : vector<56x2xf32>
    %65 = arith.mulf %38, %38 : vector<56x2xf32>
    %66 = arith.addf %64, %65 : vector<56x2xf32>
    %cst_25 = arith.constant 9.99999993E-9 : f32
    %67 = vector.broadcast %cst_25 : f32 to vector<56x2xf32>
    %68 = arith.maximumf %66, %67 : vector<56x2xf32>
    %cst_26 = arith.constant dense<0.000000e+00> : vector<56xf32>
    %69 = vector.multi_reduction <add>, %68, %cst_26 [1] : vector<56x2xf32> to vector<56xf32>
    %70 = vector.shape_cast %69 : vector<56xf32> to vector<56x1xf32>
    %cst_27 = arith.constant 2.000000e+00 : f32
    %71 = vector.broadcast %cst_27 : f32 to vector<56x1xf32>
    %72 = arith.divf %70, %71 : vector<56x1xf32>
    %73 = math.rsqrt %72 : vector<56x1xf32>
    %74 = vector.broadcast %73 : vector<56x1xf32> to vector<56x2xf32>
    %75 = arith.mulf %34, %74 : vector<56x2xf32>
    %76 = vector.broadcast %61 : vector<1x2xf32> to vector<56x2xf32>
    %77 = arith.mulf %75, %76 : vector<56x2xf32>
    %78 = vector.broadcast %73 : vector<56x1xf32> to vector<56x2xf32>
    %79 = arith.mulf %36, %78 : vector<56x2xf32>
    %80 = vector.broadcast %61 : vector<1x2xf32> to vector<56x2xf32>
    %81 = arith.mulf %79, %80 : vector<56x2xf32>
    %82 = vector.broadcast %73 : vector<56x1xf32> to vector<56x2xf32>
    %83 = arith.mulf %38, %82 : vector<56x2xf32>
    %84 = vector.broadcast %61 : vector<1x2xf32> to vector<56x2xf32>
    %85 = arith.mulf %83, %84 : vector<56x2xf32>
    %86 = tpu.concatenate %60, %77, %81, %85 in 1 : vector<56x12xf32>, vector<56x2xf32>, vector<56x2xf32>, vector<56x2xf32> -> vector<56x18xf32>
    %c0_28 = arith.constant 0 : index
    %c0_29 = arith.constant 0 : index
    %87 = vector.load %arg10[%c0_28, %c0_29] : memref<56x18xf32, #tpu.memory_space<vmem>>, vector<56x18xf32>
    tpu.vector_store %arg10[%c0_28, %c0_29], %86 {strides = array<i32>} : memref<56x18xf32, #tpu.memory_space<vmem>>, vector<56x18xf32>,
    return
  }
  func.func @transform_0(%arg0: i32) -> (i32, i32) {
    %c0_i32 = arith.constant 0 : i32
    %c0_i32_0 = arith.constant 0 : i32
    return %arg0, %c0_i32 : i32, i32
  }
  func.func @transform_1(%arg0: i32) -> (i32, i32) {
    %c0_i32 = arith.constant 0 : i32
    %c0_i32_0 = arith.constant 0 : i32
    return %arg0, %c0_i32 : i32, i32
  }
  func.func @transform_2(%arg0: i32) -> (i32, i32) {
    %c0_i32 = arith.constant 0 : i32
    %c0_i32_0 = arith.constant 0 : i32
    %c0_i32_1 = arith.constant 0 : i32
    return %c0_i32, %c0_i32_0 : i32, i32
  }
  func.func @transform_3(%arg0: i32) -> (i32, i32) {
    %c0_i32 = arith.constant 0 : i32
    %c0_i32_0 = arith.constant 0 : i32
    %c0_i32_1 = arith.constant 0 : i32
    return %c0_i32, %c0_i32_0 : i32, i32
  }
  func.func @transform_4(%arg0: i32) -> (i32, i32) {
    %c0_i32 = arith.constant 0 : i32
    %c0_i32_0 = arith.constant 0 : i32
    %c0_i32_1 = arith.constant 0 : i32
    return %c0_i32, %c0_i32_0 : i32, i32
  }
  func.func @transform_5(%arg0: i32) -> (i32, i32) {
    %c0_i32 = arith.constant 0 : i32
    %c0_i32_0 = arith.constant 0 : i32
    %c0_i32_1 = arith.constant 0 : i32
    return %c0_i32, %c0_i32_0 : i32, i32
  }
  func.func @transform_6(%arg0: i32) -> (i32, i32) {
    %c0_i32 = arith.constant 0 : i32
    %c0_i32_0 = arith.constant 0 : i32
    %c0_i32_1 = arith.constant 0 : i32
    return %c0_i32, %c0_i32_0 : i32, i32
  }
  func.func @transform_7(%arg0: i32) -> (i32, i32) {
    %c0_i32 = arith.constant 0 : i32
    %c0_i32_0 = arith.constant 0 : i32
    %c0_i32_1 = arith.constant 0 : i32
    return %c0_i32, %c0_i32_0 : i32, i32
  }
  func.func @transform_8(%arg0: i32) -> (i32, i32) {
    %c0_i32 = arith.constant 0 : i32
    %c0_i32_0 = arith.constant 0 : i32
    %c0_i32_1 = arith.constant 0 : i32
    return %c0_i32, %c0_i32_0 : i32, i32
  }
  func.func @transform_9(%arg0: i32) -> (i32, i32) {
    %c0_i32 = arith.constant 0 : i32
    %c0_i32_0 = arith.constant 0 : i32
    return %arg0, %c0_i32 : i32, i32
  }
}

module attributes {stable_mosaic.version = 11 : i64} {
  func.func @kernel(%arg0: i32, %arg1: memref<56x40xf32, #tpu.memory_space<vmem>>, %arg2: memref<8x8xf32, #tpu.memory_space<vmem>>, %arg3: memref<24x16xf32, #tpu.memory_space<vmem>>, %arg4: memref<1x16xf32, #tpu.memory_space<vmem>>, %arg5: memref<8x8xf32, #tpu.memory_space<vmem>>, %arg6: memref<56x40xf32, #tpu.memory_space<vmem>>) attributes {dimension_semantics = [#tpu.dimension_semantics<parallel>], iteration_bounds = array<i64: 2>, scalar_prefetch = 0 : i64, scratch_operands = 0 : i64, tpu.core_type = #tpu.core_type<tc>, window_params = [{transform_indices = @transform_0, window_bounds = array<i64: 56, 40>}, {pipeline_mode = #tpu.pipeline_mode<synchronous>, transform_indices = @transform_1, window_bounds = array<i64: 8, 8>}, {pipeline_mode = #tpu.pipeline_mode<synchronous>, transform_indices = @transform_2, window_bounds = array<i64: 24, 16>}, {pipeline_mode = #tpu.pipeline_mode<synchronous>, transform_indices = @transform_3, window_bounds = array<i64: 1, 16>}, {pipeline_mode = #tpu.pipeline_mode<synchronous>, transform_indices = @transform_4, window_bounds = array<i64: 8, 8>}, {transform_indices = @transform_5, window_bounds = array<i64: 56, 40>}]} {
    %c0 = arith.constant 0 : index
    %c0_0 = arith.constant 0 : index
    %0 = vector.load %arg1[%c0, %c0_0] : memref<56x40xf32, #tpu.memory_space<vmem>>, vector<56x40xf32>
    %1 = vector.extract_strided_slice %0 {offsets = [0, 0], sizes = [56, 16], strides = [1, 1]} : vector<56x40xf32> to vector<56x16xf32>
    %2 = vector.extract_strided_slice %0 {offsets = [0, 16], sizes = [56, 8], strides = [1, 1]} : vector<56x40xf32> to vector<56x8xf32>
    %3 = vector.extract_strided_slice %0 {offsets = [0, 24], sizes = [56, 8], strides = [1, 1]} : vector<56x40xf32> to vector<56x8xf32>
    %4 = vector.extract_strided_slice %0 {offsets = [0, 32], sizes = [56, 8], strides = [1, 1]} : vector<56x40xf32> to vector<56x8xf32>
    %c0_1 = arith.constant 0 : index
    %c0_2 = arith.constant 0 : index
    %5 = vector.load %arg2[%c0_1, %c0_2] : memref<8x8xf32, #tpu.memory_space<vmem>>, vector<8x8xf32>
    %c0_3 = arith.constant 0 : index
    %c0_4 = arith.constant 0 : index
    %6 = vector.load %arg3[%c0_3, %c0_4] : memref<24x16xf32, #tpu.memory_space<vmem>>, vector<24x16xf32>
    %c0_5 = arith.constant 0 : index
    %c0_6 = arith.constant 0 : index
    %7 = vector.load %arg4[%c0_5, %c0_6] : memref<1x16xf32, #tpu.memory_space<vmem>>, vector<1x16xf32>
    %8 = tpu.concatenate %2, %3, %4 in 0 : vector<56x8xf32>, vector<56x8xf32>, vector<56x8xf32> -> vector<168x8xf32>
    %cst = arith.constant dense<0.000000e+00> : vector<168x8xf32>
    %9 = tpu.matmul %8, %5, %cst {dimension_numbers = #tpu.dot_dimension_numbers<[1], [0], [0], [1], [0, 0, 1, 1], [], []>} : vector<168x8xf32>, vector<8x8xf32>, vector<168x8xf32> -> vector<168x8xf32>
    %10 = vector.extract_strided_slice %9 {offsets = [0, 0], sizes = [56, 8], strides = [1, 1]} : vector<168x8xf32> to vector<56x8xf32>
    %11 = vector.extract_strided_slice %9 {offsets = [56, 0], sizes = [56, 8], strides = [1, 1]} : vector<168x8xf32> to vector<56x8xf32>
    %12 = vector.extract_strided_slice %9 {offsets = [112, 0], sizes = [56, 8], strides = [1, 1]} : vector<168x8xf32> to vector<56x8xf32>
    %13 = arith.mulf %10, %10 : vector<56x8xf32>
    %14 = arith.mulf %11, %11 : vector<56x8xf32>
    %15 = arith.addf %13, %14 : vector<56x8xf32>
    %16 = arith.mulf %12, %12 : vector<56x8xf32>
    %17 = arith.addf %15, %16 : vector<56x8xf32>
    %cst_7 = arith.constant 9.99999993E-9 : f32
    %18 = vector.broadcast %cst_7 : f32 to vector<56x8xf32>
    %19 = arith.maximumf %17, %18 : vector<56x8xf32>
    %20 = math.sqrt %19 : vector<56x8xf32>
    %21 = tpu.concatenate %1, %20 in 1 : vector<56x16xf32>, vector<56x8xf32> -> vector<56x24xf32>
    %cst_8 = arith.constant dense<0.000000e+00> : vector<56x16xf32>
    %22 = tpu.matmul %21, %6, %cst_8 {dimension_numbers = #tpu.dot_dimension_numbers<[1], [0], [0], [1], [0, 0, 1, 1], [], []>} : vector<56x24xf32>, vector<24x16xf32>, vector<56x16xf32> -> vector<56x16xf32>
    %23 = vector.broadcast %7 : vector<1x16xf32> to vector<56x16xf32>
    %24 = arith.addf %22, %23 : vector<56x16xf32>
    %c0_9 = arith.constant 0 : index
    %c0_10 = arith.constant 0 : index
    %25 = vector.load %arg5[%c0_9, %c0_10] : memref<8x8xf32, #tpu.memory_space<vmem>>, vector<8x8xf32>
    %cst_11 = arith.constant dense<0.000000e+00> : vector<168x8xf32>
    %26 = tpu.matmul %9, %25, %cst_11 {dimension_numbers = #tpu.dot_dimension_numbers<[1], [0], [0], [1], [0, 0, 1, 1], [], []>} : vector<168x8xf32>, vector<8x8xf32>, vector<168x8xf32> -> vector<168x8xf32>
    %27 = vector.extract_strided_slice %26 {offsets = [0, 0], sizes = [56, 8], strides = [1, 1]} : vector<168x8xf32> to vector<56x8xf32>
    %28 = vector.extract_strided_slice %26 {offsets = [56, 0], sizes = [56, 8], strides = [1, 1]} : vector<168x8xf32> to vector<56x8xf32>
    %29 = vector.extract_strided_slice %26 {offsets = [112, 0], sizes = [56, 8], strides = [1, 1]} : vector<168x8xf32> to vector<56x8xf32>
    %30 = tpu.concatenate %24, %27, %28, %29 in 1 : vector<56x16xf32>, vector<56x8xf32>, vector<56x8xf32>, vector<56x8xf32> -> vector<56x40xf32>
    %c0_12 = arith.constant 0 : index
    %c0_13 = arith.constant 0 : index
    %31 = vector.load %arg6[%c0_12, %c0_13] : memref<56x40xf32, #tpu.memory_space<vmem>>, vector<56x40xf32>
    tpu.vector_store %arg6[%c0_12, %c0_13], %30 {strides = array<i32>} : memref<56x40xf32, #tpu.memory_space<vmem>>, vector<56x40xf32>,
    return
  }
  func.func @transform_0(%arg0: i32) -> (i32, i32) {
    %c0_i32 = arith.constant 0 : i32
    %c0_i32_0 = arith.constant 0 : i32
    return %arg0, %c0_i32 : i32, i32
  }
  func.func @transform_1(%arg0: i32) -> (i32, i32) {
    %c0_i32 = arith.constant 0 : i32
    %c0_i32_0 = arith.constant 0 : i32
    %c0_i32_1 = arith.constant 0 : i32
    return %c0_i32, %c0_i32_0 : i32, i32
  }
  func.func @transform_2(%arg0: i32) -> (i32, i32) {
    %c0_i32 = arith.constant 0 : i32
    %c0_i32_0 = arith.constant 0 : i32
    %c0_i32_1 = arith.constant 0 : i32
    return %c0_i32, %c0_i32_0 : i32, i32
  }
  func.func @transform_3(%arg0: i32) -> (i32, i32) {
    %c0_i32 = arith.constant 0 : i32
    %c0_i32_0 = arith.constant 0 : i32
    %c0_i32_1 = arith.constant 0 : i32
    return %c0_i32, %c0_i32_0 : i32, i32
  }
  func.func @transform_4(%arg0: i32) -> (i32, i32) {
    %c0_i32 = arith.constant 0 : i32
    %c0_i32_0 = arith.constant 0 : i32
    %c0_i32_1 = arith.constant 0 : i32
    return %c0_i32, %c0_i32_0 : i32, i32
  }
  func.func @transform_5(%arg0: i32) -> (i32, i32) {
    %c0_i32 = arith.constant 0 : i32
    %c0_i32_0 = arith.constant 0 : i32
    return %arg0, %c0_i32 : i32, i32
  }
}

module attributes {stable_mosaic.version = 11 : i64} {
  func.func @kernel(%arg0: i32, %arg1: memref<16x54xf32, #tpu.memory_space<vmem>>, %arg2: memref<16x28xf32, #tpu.memory_space<vmem>>, %arg3: memref<10x10xf32, #tpu.memory_space<vmem>>, %arg4: memref<34x16xf32, #tpu.memory_space<vmem>>, %arg5: memref<1x16xf32, #tpu.memory_space<vmem>>, %arg6: memref<10x4xf32, #tpu.memory_space<vmem>>, %arg7: memref<1x16xf32, #tpu.memory_space<vmem>>, %arg8: memref<1x16xf32, #tpu.memory_space<vmem>>, %arg9: memref<1x4xf32, #tpu.memory_space<vmem>>, %arg10: memref<16x28xf32, #tpu.memory_space<vmem>>) attributes {dimension_semantics = [#tpu.dimension_semantics<parallel>], iteration_bounds = array<i64: 1>, scalar_prefetch = 0 : i64, scratch_operands = 0 : i64, tpu.core_type = #tpu.core_type<tc>, window_params = [{transform_indices = @transform_0, window_bounds = array<i64: 16, 54>}, {transform_indices = @transform_1, window_bounds = array<i64: 16, 28>}, {pipeline_mode = #tpu.pipeline_mode<synchronous>, transform_indices = @transform_2, window_bounds = array<i64: 10, 10>}, {pipeline_mode = #tpu.pipeline_mode<synchronous>, transform_indices = @transform_3, window_bounds = array<i64: 34, 16>}, {pipeline_mode = #tpu.pipeline_mode<synchronous>, transform_indices = @transform_4, window_bounds = array<i64: 1, 16>}, {pipeline_mode = #tpu.pipeline_mode<synchronous>, transform_indices = @transform_5, window_bounds = array<i64: 10, 4>}, {pipeline_mode = #tpu.pipeline_mode<synchronous>, transform_indices = @transform_6, window_bounds = array<i64: 1, 16>}, {pipeline_mode = #tpu.pipeline_mode<synchronous>, transform_indices = @transform_7, window_bounds = array<i64: 1, 16>}, {pipeline_mode = #tpu.pipeline_mode<synchronous>, transform_indices = @transform_8, window_bounds = array<i64: 1, 4>}, {transform_indices = @transform_9, window_bounds = array<i64: 16, 28>}]} {
    %c0 = arith.constant 0 : index
    %c0_0 = arith.constant 0 : index
    %0 = vector.load %arg1[%c0, %c0_0] : memref<16x54xf32, #tpu.memory_space<vmem>>, vector<16x54xf32>
    %1 = vector.extract_strided_slice %0 {offsets = [0, 0], sizes = [16, 24], strides = [1, 1]} : vector<16x54xf32> to vector<16x24xf32>
    %2 = vector.extract_strided_slice %0 {offsets = [0, 24], sizes = [16, 10], strides = [1, 1]} : vector<16x54xf32> to vector<16x10xf32>
    %3 = vector.extract_strided_slice %0 {offsets = [0, 34], sizes = [16, 10], strides = [1, 1]} : vector<16x54xf32> to vector<16x10xf32>
    %4 = vector.extract_strided_slice %0 {offsets = [0, 44], sizes = [16, 10], strides = [1, 1]} : vector<16x54xf32> to vector<16x10xf32>
    %c0_1 = arith.constant 0 : index
    %c0_2 = arith.constant 0 : index
    %5 = vector.load %arg3[%c0_1, %c0_2] : memref<10x10xf32, #tpu.memory_space<vmem>>, vector<10x10xf32>
    %c0_3 = arith.constant 0 : index
    %c0_4 = arith.constant 0 : index
    %6 = vector.load %arg4[%c0_3, %c0_4] : memref<34x16xf32, #tpu.memory_space<vmem>>, vector<34x16xf32>
    %c0_5 = arith.constant 0 : index
    %c0_6 = arith.constant 0 : index
    %7 = vector.load %arg5[%c0_5, %c0_6] : memref<1x16xf32, #tpu.memory_space<vmem>>, vector<1x16xf32>
    %8 = tpu.concatenate %2, %3, %4 in 0 : vector<16x10xf32>, vector<16x10xf32>, vector<16x10xf32> -> vector<48x10xf32>
    %cst = arith.constant dense<0.000000e+00> : vector<48x10xf32>
    %9 = tpu.matmul %8, %5, %cst {dimension_numbers = #tpu.dot_dimension_numbers<[1], [0], [0], [1], [0, 0, 1, 1], [], []>} : vector<48x10xf32>, vector<10x10xf32>, vector<48x10xf32> -> vector<48x10xf32>
    %10 = vector.extract_strided_slice %9 {offsets = [0, 0], sizes = [16, 10], strides = [1, 1]} : vector<48x10xf32> to vector<16x10xf32>
    %11 = vector.extract_strided_slice %9 {offsets = [16, 0], sizes = [16, 10], strides = [1, 1]} : vector<48x10xf32> to vector<16x10xf32>
    %12 = vector.extract_strided_slice %9 {offsets = [32, 0], sizes = [16, 10], strides = [1, 1]} : vector<48x10xf32> to vector<16x10xf32>
    %13 = arith.mulf %10, %10 : vector<16x10xf32>
    %14 = arith.mulf %11, %11 : vector<16x10xf32>
    %15 = arith.addf %13, %14 : vector<16x10xf32>
    %16 = arith.mulf %12, %12 : vector<16x10xf32>
    %17 = arith.addf %15, %16 : vector<16x10xf32>
    %cst_7 = arith.constant 9.99999993E-9 : f32
    %18 = vector.broadcast %cst_7 : f32 to vector<16x10xf32>
    %19 = arith.maximumf %17, %18 : vector<16x10xf32>
    %20 = math.sqrt %19 : vector<16x10xf32>
    %21 = tpu.concatenate %1, %20 in 1 : vector<16x24xf32>, vector<16x10xf32> -> vector<16x34xf32>
    %cst_8 = arith.constant dense<0.000000e+00> : vector<16x16xf32>
    %22 = tpu.matmul %21, %6, %cst_8 {dimension_numbers = #tpu.dot_dimension_numbers<[1], [0], [0], [1], [0, 0, 1, 1], [], []>} : vector<16x34xf32>, vector<34x16xf32>, vector<16x16xf32> -> vector<16x16xf32>
    %23 = vector.broadcast %7 : vector<1x16xf32> to vector<16x16xf32>
    %24 = arith.addf %22, %23 : vector<16x16xf32>
    %c0_9 = arith.constant 0 : index
    %c0_10 = arith.constant 0 : index
    %25 = vector.load %arg6[%c0_9, %c0_10] : memref<10x4xf32, #tpu.memory_space<vmem>>, vector<10x4xf32>
    %cst_11 = arith.constant dense<0.000000e+00> : vector<48x4xf32>
    %26 = tpu.matmul %9, %25, %cst_11 {dimension_numbers = #tpu.dot_dimension_numbers<[1], [0], [0], [1], [0, 0, 1, 1], [], []>} : vector<48x10xf32>, vector<10x4xf32>, vector<48x4xf32> -> vector<48x4xf32>
    %27 = vector.extract_strided_slice %26 {offsets = [0, 0], sizes = [16, 4], strides = [1, 1]} : vector<48x4xf32> to vector<16x4xf32>
    %28 = vector.extract_strided_slice %26 {offsets = [16, 0], sizes = [16, 4], strides = [1, 1]} : vector<48x4xf32> to vector<16x4xf32>
    %29 = vector.extract_strided_slice %26 {offsets = [32, 0], sizes = [16, 4], strides = [1, 1]} : vector<48x4xf32> to vector<16x4xf32>
    %c0_12 = arith.constant 0 : index
    %c0_13 = arith.constant 0 : index
    %30 = vector.load %arg2[%c0_12, %c0_13] : memref<16x28xf32, #tpu.memory_space<vmem>>, vector<16x28xf32>
    %31 = vector.extract_strided_slice %30 {offsets = [0, 0], sizes = [16, 16], strides = [1, 1]} : vector<16x28xf32> to vector<16x16xf32>
    %32 = arith.addf %24, %31 : vector<16x16xf32>
    %33 = vector.extract_strided_slice %30 {offsets = [0, 16], sizes = [16, 4], strides = [1, 1]} : vector<16x28xf32> to vector<16x4xf32>
    %34 = arith.addf %27, %33 : vector<16x4xf32>
    %35 = vector.extract_strided_slice %30 {offsets = [0, 20], sizes = [16, 4], strides = [1, 1]} : vector<16x28xf32> to vector<16x4xf32>
    %36 = arith.addf %28, %35 : vector<16x4xf32>
    %37 = vector.extract_strided_slice %30 {offsets = [0, 24], sizes = [16, 4], strides = [1, 1]} : vector<16x28xf32> to vector<16x4xf32>
    %38 = arith.addf %29, %37 : vector<16x4xf32>
    %c0_14 = arith.constant 0 : index
    %c0_15 = arith.constant 0 : index
    %39 = vector.load %arg7[%c0_14, %c0_15] : memref<1x16xf32, #tpu.memory_space<vmem>>, vector<1x16xf32>
    %c0_16 = arith.constant 0 : index
    %c0_17 = arith.constant 0 : index
    %40 = vector.load %arg8[%c0_16, %c0_17] : memref<1x16xf32, #tpu.memory_space<vmem>>, vector<1x16xf32>
    %cst_18 = arith.constant dense<0.000000e+00> : vector<16xf32>
    %41 = vector.multi_reduction <add>, %32, %cst_18 [1] : vector<16x16xf32> to vector<16xf32>
    %42 = vector.shape_cast %41 : vector<16xf32> to vector<16x1xf32>
    %cst_19 = arith.constant 1.600000e+01 : f32
    %43 = vector.broadcast %cst_19 : f32 to vector<16x1xf32>
    %44 = arith.divf %42, %43 : vector<16x1xf32>
    %45 = vector.broadcast %44 : vector<16x1xf32> to vector<16x16xf32>
    %46 = arith.subf %32, %45 : vector<16x16xf32>
    %47 = arith.mulf %46, %46 : vector<16x16xf32>
    %cst_20 = arith.constant dense<0.000000e+00> : vector<16xf32>
    %48 = vector.multi_reduction <add>, %47, %cst_20 [1] : vector<16x16xf32> to vector<16xf32>
    %49 = vector.shape_cast %48 : vector<16xf32> to vector<16x1xf32>
    %cst_21 = arith.constant 1.600000e+01 : f32
    %50 = vector.broadcast %cst_21 : f32 to vector<16x1xf32>
    %51 = arith.divf %49, %50 : vector<16x1xf32>
    %cst_22 = arith.constant 9.99999974E-6 : f32
    %52 = vector.broadcast %cst_22 : f32 to vector<16x1xf32>
    %53 = arith.addf %51, %52 : vector<16x1xf32>
    %54 = math.rsqrt %53 : vector<16x1xf32>
    %55 = vector.broadcast %54 : vector<16x1xf32> to vector<16x16xf32>
    %56 = arith.mulf %46, %55 : vector<16x16xf32>
    %57 = vector.broadcast %39 : vector<1x16xf32> to vector<16x16xf32>
    %58 = arith.mulf %56, %57 : vector<16x16xf32>
    %59 = vector.broadcast %40 : vector<1x16xf32> to vector<16x16xf32>
    %60 = arith.addf %58, %59 : vector<16x16xf32>
    %c0_23 = arith.constant 0 : index
    %c0_24 = arith.constant 0 : index
    %61 = vector.load %arg9[%c0_23, %c0_24] : memref<1x4xf32, #tpu.memory_space<vmem>>, vector<1x4xf32>
    %62 = arith.mulf %34, %34 : vector<16x4xf32>
    %63 = arith.mulf %36, %36 : vector<16x4xf32>
    %64 = arith.addf %62, %63 : vector<16x4xf32>
    %65 = arith.mulf %38, %38 : vector<16x4xf32>
    %66 = arith.addf %64, %65 : vector<16x4xf32>
    %cst_25 = arith.constant 9.99999993E-9 : f32
    %67 = vector.broadcast %cst_25 : f32 to vector<16x4xf32>
    %68 = arith.maximumf %66, %67 : vector<16x4xf32>
    %cst_26 = arith.constant dense<0.000000e+00> : vector<16xf32>
    %69 = vector.multi_reduction <add>, %68, %cst_26 [1] : vector<16x4xf32> to vector<16xf32>
    %70 = vector.shape_cast %69 : vector<16xf32> to vector<16x1xf32>
    %cst_27 = arith.constant 4.000000e+00 : f32
    %71 = vector.broadcast %cst_27 : f32 to vector<16x1xf32>
    %72 = arith.divf %70, %71 : vector<16x1xf32>
    %73 = math.rsqrt %72 : vector<16x1xf32>
    %74 = vector.broadcast %73 : vector<16x1xf32> to vector<16x4xf32>
    %75 = arith.mulf %34, %74 : vector<16x4xf32>
    %76 = vector.broadcast %61 : vector<1x4xf32> to vector<16x4xf32>
    %77 = arith.mulf %75, %76 : vector<16x4xf32>
    %78 = vector.broadcast %73 : vector<16x1xf32> to vector<16x4xf32>
    %79 = arith.mulf %36, %78 : vector<16x4xf32>
    %80 = vector.broadcast %61 : vector<1x4xf32> to vector<16x4xf32>
    %81 = arith.mulf %79, %80 : vector<16x4xf32>
    %82 = vector.broadcast %73 : vector<16x1xf32> to vector<16x4xf32>
    %83 = arith.mulf %38, %82 : vector<16x4xf32>
    %84 = vector.broadcast %61 : vector<1x4xf32> to vector<16x4xf32>
    %85 = arith.mulf %83, %84 : vector<16x4xf32>
    %86 = tpu.concatenate %60, %77, %81, %85 in 1 : vector<16x16xf32>, vector<16x4xf32>, vector<16x4xf32>, vector<16x4xf32> -> vector<16x28xf32>
    %c0_28 = arith.constant 0 : index
    %c0_29 = arith.constant 0 : index
    %87 = vector.load %arg10[%c0_28, %c0_29] : memref<16x28xf32, #tpu.memory_space<vmem>>, vector<16x28xf32>
    tpu.vector_store %arg10[%c0_28, %c0_29], %86 {strides = array<i32>} : memref<16x28xf32, #tpu.memory_space<vmem>>, vector<16x28xf32>,
    return
  }
  func.func @transform_0(%arg0: i32) -> (i32, i32) {
    %c0_i32 = arith.constant 0 : i32
    %c0_i32_0 = arith.constant 0 : i32
    return %arg0, %c0_i32 : i32, i32
  }
  func.func @transform_1(%arg0: i32) -> (i32, i32) {
    %c0_i32 = arith.constant 0 : i32
    %c0_i32_0 = arith.constant 0 : i32
    return %arg0, %c0_i32 : i32, i32
  }
  func.func @transform_2(%arg0: i32) -> (i32, i32) {
    %c0_i32 = arith.constant 0 : i32
    %c0_i32_0 = arith.constant 0 : i32
    %c0_i32_1 = arith.constant 0 : i32
    return %c0_i32, %c0_i32_0 : i32, i32
  }
  func.func @transform_3(%arg0: i32) -> (i32, i32) {
    %c0_i32 = arith.constant 0 : i32
    %c0_i32_0 = arith.constant 0 : i32
    %c0_i32_1 = arith.constant 0 : i32
    return %c0_i32, %c0_i32_0 : i32, i32
  }
  func.func @transform_4(%arg0: i32) -> (i32, i32) {
    %c0_i32 = arith.constant 0 : i32
    %c0_i32_0 = arith.constant 0 : i32
    %c0_i32_1 = arith.constant 0 : i32
    return %c0_i32, %c0_i32_0 : i32, i32
  }
  func.func @transform_5(%arg0: i32) -> (i32, i32) {
    %c0_i32 = arith.constant 0 : i32
    %c0_i32_0 = arith.constant 0 : i32
    %c0_i32_1 = arith.constant 0 : i32
    return %c0_i32, %c0_i32_0 : i32, i32
  }
  func.func @transform_6(%arg0: i32) -> (i32, i32) {
    %c0_i32 = arith.constant 0 : i32
    %c0_i32_0 = arith.constant 0 : i32
    %c0_i32_1 = arith.constant 0 : i32
    return %c0_i32, %c0_i32_0 : i32, i32
  }
  func.func @transform_7(%arg0: i32) -> (i32, i32) {
    %c0_i32 = arith.constant 0 : i32
    %c0_i32_0 = arith.constant 0 : i32
    %c0_i32_1 = arith.constant 0 : i32
    return %c0_i32, %c0_i32_0 : i32, i32
  }
  func.func @transform_8(%arg0: i32) -> (i32, i32) {
    %c0_i32 = arith.constant 0 : i32
    %c0_i32_0 = arith.constant 0 : i32
    %c0_i32_1 = arith.constant 0 : i32
    return %c0_i32, %c0_i32_0 : i32, i32
  }
  func.func @transform_9(%arg0: i32) -> (i32, i32) {
    %c0_i32 = arith.constant 0 : i32
    %c0_i32_0 = arith.constant 0 : i32
    return %arg0, %c0_i32 : i32, i32
  }
}

module attributes {stable_mosaic.version = 11 : i64} {
  func.func @kernel(%arg0: i32, %arg1: memref<56x18xf32, #tpu.memory_space<vmem>>, %arg2: memref<8x2xf32, #tpu.memory_space<vmem>>, %arg3: memref<14x2xf32, #tpu.memory_space<vmem>>, %arg4: memref<1x2xf32, #tpu.memory_space<vmem>>, %arg5: memref<56x2xf32, #tpu.memory_space<vmem>>) attributes {dimension_semantics = [#tpu.dimension_semantics<parallel>], iteration_bounds = array<i64: 2>, scalar_prefetch = 0 : i64, scratch_operands = 0 : i64, tpu.core_type = #tpu.core_type<tc>, window_params = [{transform_indices = @transform_0, window_bounds = array<i64: 56, 18>}, {pipeline_mode = #tpu.pipeline_mode<synchronous>, transform_indices = @transform_1, window_bounds = array<i64: 8, 2>}, {pipeline_mode = #tpu.pipeline_mode<synchronous>, transform_indices = @transform_2, window_bounds = array<i64: 14, 2>}, {pipeline_mode = #tpu.pipeline_mode<synchronous>, transform_indices = @transform_3, window_bounds = array<i64: 1, 2>}, {transform_indices = @transform_4, window_bounds = array<i64: 56, 2>}]} {
    %c0 = arith.constant 0 : index
    %c0_0 = arith.constant 0 : index
    %0 = vector.load %arg1[%c0, %c0_0] : memref<56x18xf32, #tpu.memory_space<vmem>>, vector<56x18xf32>
    %1 = vector.extract_strided_slice %0 {offsets = [0, 0], sizes = [56, 12], strides = [1, 1]} : vector<56x18xf32> to vector<56x12xf32>
    %2 = vector.extract_strided_slice %0 {offsets = [0, 12], sizes = [56, 2], strides = [1, 1]} : vector<56x18xf32> to vector<56x2xf32>
    %3 = vector.extract_strided_slice %0 {offsets = [0, 14], sizes = [56, 2], strides = [1, 1]} : vector<56x18xf32> to vector<56x2xf32>
    %4 = vector.extract_strided_slice %0 {offsets = [0, 16], sizes = [56, 2], strides = [1, 1]} : vector<56x18xf32> to vector<56x2xf32>
    %c0_1 = arith.constant 0 : index
    %c0_2 = arith.constant 0 : index
    %5 = vector.load %arg2[%c0_1, %c0_2] : memref<8x2xf32, #tpu.memory_space<vmem>>, vector<8x2xf32>
    %c0_3 = arith.constant 0 : index
    %c0_4 = arith.constant 0 : index
    %6 = vector.load %arg3[%c0_3, %c0_4] : memref<14x2xf32, #tpu.memory_space<vmem>>, vector<14x2xf32>
    %c0_5 = arith.constant 0 : index
    %c0_6 = arith.constant 0 : index
    %7 = vector.load %arg4[%c0_5, %c0_6] : memref<1x2xf32, #tpu.memory_space<vmem>>, vector<1x2xf32>
    %8 = tpu.concatenate %2, %3, %4 in 0 : vector<56x2xf32>, vector<56x2xf32>, vector<56x2xf32> -> vector<168x2xf32>
    %cst = arith.constant 0.000000e+00 : f32
    %9 = vector.broadcast %cst : f32 to vector<168x6xf32>
    %10 = tpu.concatenate %8, %9 in 1 : vector<168x2xf32>, vector<168x6xf32> -> vector<168x8xf32>
    %cst_7 = arith.constant dense<0.000000e+00> : vector<168x2xf32>
    %11 = tpu.matmul %10, %5, %cst_7 {dimension_numbers = #tpu.dot_dimension_numbers<[1], [0], [0], [1], [0, 0, 1, 1], [], []>} : vector<168x8xf32>, vector<8x2xf32>, vector<168x2xf32> -> vector<168x2xf32>
    %12 = vector.extract_strided_slice %11 {offsets = [0, 0], sizes = [56, 2], strides = [1, 1]} : vector<168x2xf32> to vector<56x2xf32>
    %13 = vector.extract_strided_slice %11 {offsets = [56, 0], sizes = [56, 2], strides = [1, 1]} : vector<168x2xf32> to vector<56x2xf32>
    %14 = vector.extract_strided_slice %11 {offsets = [112, 0], sizes = [56, 2], strides = [1, 1]} : vector<168x2xf32> to vector<56x2xf32>
    %15 = arith.mulf %12, %12 : vector<56x2xf32>
    %16 = arith.mulf %13, %13 : vector<56x2xf32>
    %17 = arith.addf %15, %16 : vector<56x2xf32>
    %18 = arith.mulf %14, %14 : vector<56x2xf32>
    %19 = arith.addf %17, %18 : vector<56x2xf32>
    %cst_8 = arith.constant 9.99999993E-9 : f32
    %20 = vector.broadcast %cst_8 : f32 to vector<56x2xf32>
    %21 = arith.maximumf %19, %20 : vector<56x2xf32>
    %22 = math.sqrt %21 : vector<56x2xf32>
    %23 = tpu.concatenate %1, %22 in 1 : vector<56x12xf32>, vector<56x2xf32> -> vector<56x14xf32>
    %cst_9 = arith.constant dense<0.000000e+00> : vector<56x2xf32>
    %24 = tpu.matmul %23, %6, %cst_9 {dimension_numbers = #tpu.dot_dimension_numbers<[1], [0], [0], [1], [0, 0, 1, 1], [], []>} : vector<56x14xf32>, vector<14x2xf32>, vector<56x2xf32> -> vector<56x2xf32>
    %25 = vector.broadcast %7 : vector<1x2xf32> to vector<56x2xf32>
    %26 = arith.addf %24, %25 : vector<56x2xf32>
    %c0_10 = arith.constant 0 : index
    %c0_11 = arith.constant 0 : index
    %27 = vector.load %arg5[%c0_10, %c0_11] : memref<56x2xf32, #tpu.memory_space<vmem>>, vector<56x2xf32>
    tpu.vector_store %arg5[%c0_10, %c0_11], %26 {strides = array<i32>} : memref<56x2xf32, #tpu.memory_space<vmem>>, vector<56x2xf32>,
    return
  }
  func.func @transform_0(%arg0: i32) -> (i32, i32) {
    %c0_i32 = arith.constant 0 : i32
    %c0_i32_0 = arith.constant 0 : i32
    return %arg0, %c0_i32 : i32, i32
  }
  func.func @transform_1(%arg0: i32) -> (i32, i32) {
    %c0_i32 = arith.constant 0 : i32
    %c0_i32_0 = arith.constant 0 : i32
    %c0_i32_1 = arith.constant 0 : i32
    return %c0_i32, %c0_i32_0 : i32, i32
  }
  func.func @transform_2(%arg0: i32) -> (i32, i32) {
    %c0_i32 = arith.constant 0 : i32
    %c0_i32_0 = arith.constant 0 : i32
    %c0_i32_1 = arith.constant 0 : i32
    return %c0_i32, %c0_i32_0 : i32, i32
  }
  func.func @transform_3(%arg0: i32) -> (i32, i32) {
    %c0_i32 = arith.constant 0 : i32
    %c0_i32_0 = arith.constant 0 : i32
    %c0_i32_1 = arith.constant 0 : i32
    return %c0_i32, %c0_i32_0 : i32, i32
  }
  func.func @transform_4(%arg0: i32) -> (i32, i32) {
    %c0_i32 = arith.constant 0 : i32
    %c0_i32_0 = arith.constant 0 : i32
    return %arg0, %c0_i32 : i32, i32
  }
}

module attributes {stable_mosaic.version = 11 : i64} {
  func.func @kernel(%arg0: i32, %arg1: memref<8x88xf32, #tpu.memory_space<vmem>>, %arg2: memref<8x60xf32, #tpu.memory_space<vmem>>, %arg3: memref<8x14xf32, #tpu.memory_space<vmem>>, %arg4: memref<8x4xf32, #tpu.memory_space<vmem>>, %arg5: memref<80x16xf32, #tpu.memory_space<vmem>>, %arg6: memref<1x16xf32, #tpu.memory_space<vmem>>, %arg7: memref<8x4xf32, #tpu.memory_space<vmem>>, %arg8: memref<8x2xf32, #tpu.memory_space<vmem>>, %arg9: memref<56x12xf32, #tpu.memory_space<vmem>>, %arg10: memref<1x12xf32, #tpu.memory_space<vmem>>, %arg11: memref<8x2xf32, #tpu.memory_space<vmem>>, %arg12: memref<8x2xf32, #tpu.memory_space<vmem>>, %arg13: memref<10x8xf32, #tpu.memory_space<vmem>>, %arg14: memref<1x8xf32, #tpu.memory_space<vmem>>, %arg15: memref<8x2xf32, #tpu.memory_space<vmem>>, %arg16: memref<8x8xf32, #tpu.memory_space<vmem>>, %arg17: memref<44x8xf32, #tpu.memory_space<vmem>>, %arg18: memref<1x8xf32, #tpu.memory_space<vmem>>, %arg19: memref<8x2xf32, #tpu.memory_space<vmem>>, %arg20: memref<1x8xf32, #tpu.memory_space<vmem>>, %arg21: memref<1x8xf32, #tpu.memory_space<vmem>>, %arg22: memref<1x2xf32, #tpu.memory_space<vmem>>, %arg23: memref<8x14xf32, #tpu.memory_space<vmem>>) attributes {dimension_semantics = [#tpu.dimension_semantics<parallel>], iteration_bounds = array<i64: 1>, scalar_prefetch = 0 : i64, scratch_operands = 0 : i64, tpu.core_type = #tpu.core_type<tc>, window_params = [{transform_indices = @transform_0, window_bounds = array<i64: 8, 88>}, {transform_indices = @transform_1, window_bounds = array<i64: 8, 60>}, {transform_indices = @transform_2, window_bounds = array<i64: 8, 14>}, {pipeline_mode = #tpu.pipeline_mode<synchronous>, transform_indices = @transform_3, window_bounds = array<i64: 8, 4>}, {pipeline_mode = #tpu.pipeline_mode<synchronous>, transform_indices = @transform_4, window_bounds = array<i64: 80, 16>}, {pipeline_mode = #tpu.pipeline_mode<synchronous>, transform_indices = @transform_5, window_bounds = array<i64: 1, 16>}, {pipeline_mode = #tpu.pipeline_mode<synchronous>, transform_indices = @transform_6, window_bounds = array<i64: 8, 4>}, {pipeline_mode = #tpu.pipeline_mode<synchronous>, transform_indices = @transform_7, window_bounds = array<i64: 8, 2>}, {pipeline_mode = #tpu.pipeline_mode<synchronous>, transform_indices = @transform_8, window_bounds = array<i64: 56, 12>}, {pipeline_mode = #tpu.pipeline_mode<synchronous>, transform_indices = @transform_9, window_bounds = array<i64: 1, 12>}, {pipeline_mode = #tpu.pipeline_mode<synchronous>, transform_indices = @transform_10, window_bounds = array<i64: 8, 2>}, {pipeline_mode = #tpu.pipeline_mode<synchronous>, transform_indices = @transform_11, window_bounds = array<i64: 8, 2>}, {pipeline_mode = #tpu.pipeline_mode<synchronous>, transform_indices = @transform_12, window_bounds = array<i64: 10, 8>}, {pipeline_mode = #tpu.pipeline_mode<synchronous>, transform_indices = @transform_13, window_bounds = array<i64: 1, 8>}, {pipeline_mode = #tpu.pipeline_mode<synchronous>, transform_indices = @transform_14, window_bounds = array<i64: 8, 2>}, {pipeline_mode = #tpu.pipeline_mode<synchronous>, transform_indices = @transform_15, window_bounds = array<i64: 8, 8>}, {pipeline_mode = #tpu.pipeline_mode<synchronous>, transform_indices = @transform_16, window_bounds = array<i64: 44, 8>}, {pipeline_mode = #tpu.pipeline_mode<synchronous>, transform_indices = @transform_17, window_bounds = array<i64: 1, 8>}, {pipeline_mode = #tpu.pipeline_mode<synchronous>, transform_indices = @transform_18, window_bounds = array<i64: 8, 2>}, {pipeline_mode = #tpu.pipeline_mode<synchronous>, transform_indices = @transform_19, window_bounds = array<i64: 1, 8>}, {pipeline_mode = #tpu.pipeline_mode<synchronous>, transform_indices = @transform_20, window_bounds = array<i64: 1, 8>}, {pipeline_mode = #tpu.pipeline_mode<synchronous>, transform_indices = @transform_21, window_bounds = array<i64: 1, 2>}, {transform_indices = @transform_22, window_bounds = array<i64: 8, 14>}]} {
    %c0 = arith.constant 0 : index
    %c0_0 = arith.constant 0 : index
    %0 = vector.load %arg1[%c0, %c0_0] : memref<8x88xf32, #tpu.memory_space<vmem>>, vector<8x88xf32>
    %1 = vector.extract_strided_slice %0 {offsets = [0, 0], sizes = [8, 76], strides = [1, 1]} : vector<8x88xf32> to vector<8x76xf32>
    %2 = vector.extract_strided_slice %0 {offsets = [0, 76], sizes = [8, 4], strides = [1, 1]} : vector<8x88xf32> to vector<8x4xf32>
    %3 = vector.extract_strided_slice %0 {offsets = [0, 80], sizes = [8, 4], strides = [1, 1]} : vector<8x88xf32> to vector<8x4xf32>
    %4 = vector.extract_strided_slice %0 {offsets = [0, 84], sizes = [8, 4], strides = [1, 1]} : vector<8x88xf32> to vector<8x4xf32>
    %c0_1 = arith.constant 0 : index
    %c0_2 = arith.constant 0 : index
    %5 = vector.load %arg4[%c0_1, %c0_2] : memref<8x4xf32, #tpu.memory_space<vmem>>, vector<8x4xf32>
    %c0_3 = arith.constant 0 : index
    %c0_4 = arith.constant 0 : index
    %6 = vector.load %arg5[%c0_3, %c0_4] : memref<80x16xf32, #tpu.memory_space<vmem>>, vector<80x16xf32>
    %c0_5 = arith.constant 0 : index
    %c0_6 = arith.constant 0 : index
    %7 = vector.load %arg6[%c0_5, %c0_6] : memref<1x16xf32, #tpu.memory_space<vmem>>, vector<1x16xf32>
    %8 = tpu.concatenate %2, %3, %4 in 0 : vector<8x4xf32>, vector<8x4xf32>, vector<8x4xf32> -> vector<24x4xf32>
    %cst = arith.constant 0.000000e+00 : f32
    %9 = vector.broadcast %cst : f32 to vector<24x4xf32>
    %10 = tpu.concatenate %8, %9 in 1 : vector<24x4xf32>, vector<24x4xf32> -> vector<24x8xf32>
    %cst_7 = arith.constant dense<0.000000e+00> : vector<24x4xf32>
    %11 = tpu.matmul %10, %5, %cst_7 {dimension_numbers = #tpu.dot_dimension_numbers<[1], [0], [0], [1], [0, 0, 1, 1], [], []>} : vector<24x8xf32>, vector<8x4xf32>, vector<24x4xf32> -> vector<24x4xf32>
    %12 = vector.extract_strided_slice %11 {offsets = [0, 0], sizes = [8, 4], strides = [1, 1]} : vector<24x4xf32> to vector<8x4xf32>
    %13 = vector.extract_strided_slice %11 {offsets = [8, 0], sizes = [8, 4], strides = [1, 1]} : vector<24x4xf32> to vector<8x4xf32>
    %14 = vector.extract_strided_slice %11 {offsets = [16, 0], sizes = [8, 4], strides = [1, 1]} : vector<24x4xf32> to vector<8x4xf32>
    %15 = arith.mulf %12, %12 : vector<8x4xf32>
    %16 = arith.mulf %13, %13 : vector<8x4xf32>
    %17 = arith.addf %15, %16 : vector<8x4xf32>
    %18 = arith.mulf %14, %14 : vector<8x4xf32>
    %19 = arith.addf %17, %18 : vector<8x4xf32>
    %cst_8 = arith.constant 9.99999993E-9 : f32
    %20 = vector.broadcast %cst_8 : f32 to vector<8x4xf32>
    %21 = arith.maximumf %19, %20 : vector<8x4xf32>
    %22 = math.sqrt %21 : vector<8x4xf32>
    %23 = tpu.concatenate %1, %22 in 1 : vector<8x76xf32>, vector<8x4xf32> -> vector<8x80xf32>
    %cst_9 = arith.constant dense<0.000000e+00> : vector<8x16xf32>
    %24 = tpu.matmul %23, %6, %cst_9 {dimension_numbers = #tpu.dot_dimension_numbers<[1], [0], [0], [1], [0, 0, 1, 1], [], []>} : vector<8x80xf32>, vector<80x16xf32>, vector<8x16xf32> -> vector<8x16xf32>
    %25 = vector.broadcast %7 : vector<1x16xf32> to vector<8x16xf32>
    %26 = arith.addf %24, %25 : vector<8x16xf32>
    %c0_10 = arith.constant 0 : index
    %c0_11 = arith.constant 0 : index
    %27 = vector.load %arg7[%c0_10, %c0_11] : memref<8x4xf32, #tpu.memory_space<vmem>>, vector<8x4xf32>
    %cst_12 = arith.constant 0.000000e+00 : f32
    %28 = vector.broadcast %cst_12 : f32 to vector<24x4xf32>
    %29 = tpu.concatenate %11, %28 in 1 : vector<24x4xf32>, vector<24x4xf32> -> vector<24x8xf32>
    %cst_13 = arith.constant dense<0.000000e+00> : vector<24x4xf32>
    %30 = tpu.matmul %29, %27, %cst_13 {dimension_numbers = #tpu.dot_dimension_numbers<[1], [0], [0], [1], [0, 0, 1, 1], [], []>} : vector<24x8xf32>, vector<8x4xf32>, vector<24x4xf32> -> vector<24x4xf32>
    %31 = vector.extract_strided_slice %30 {offsets = [0, 0], sizes = [8, 4], strides = [1, 1]} : vector<24x4xf32> to vector<8x4xf32>
    %32 = vector.extract_strided_slice %30 {offsets = [8, 0], sizes = [8, 4], strides = [1, 1]} : vector<24x4xf32> to vector<8x4xf32>
    %33 = vector.extract_strided_slice %30 {offsets = [16, 0], sizes = [8, 4], strides = [1, 1]} : vector<24x4xf32> to vector<8x4xf32>
    %c0_14 = arith.constant 0 : index
    %c0_15 = arith.constant 0 : index
    %34 = vector.load %arg2[%c0_14, %c0_15] : memref<8x60xf32, #tpu.memory_space<vmem>>, vector<8x60xf32>
    %35 = vector.extract_strided_slice %34 {offsets = [0, 0], sizes = [8, 54], strides = [1, 1]} : vector<8x60xf32> to vector<8x54xf32>
    %36 = vector.extract_strided_slice %34 {offsets = [0, 54], sizes = [8, 2], strides = [1, 1]} : vector<8x60xf32> to vector<8x2xf32>
    %37 = vector.extract_strided_slice %34 {offsets = [0, 56], sizes = [8, 2], strides = [1, 1]} : vector<8x60xf32> to vector<8x2xf32>
    %38 = vector.extract_strided_slice %34 {offsets = [0, 58], sizes = [8, 2], strides = [1, 1]} : vector<8x60xf32> to vector<8x2xf32>
    %c0_16 = arith.constant 0 : index
    %c0_17 = arith.constant 0 : index
    %39 = vector.load %arg8[%c0_16, %c0_17] : memref<8x2xf32, #tpu.memory_space<vmem>>, vector<8x2xf32>
    %c0_18 = arith.constant 0 : index
    %c0_19 = arith.constant 0 : index
    %40 = vector.load %arg9[%c0_18, %c0_19] : memref<56x12xf32, #tpu.memory_space<vmem>>, vector<56x12xf32>
    %c0_20 = arith.constant 0 : index
    %c0_21 = arith.constant 0 : index
    %41 = vector.load %arg10[%c0_20, %c0_21] : memref<1x12xf32, #tpu.memory_space<vmem>>, vector<1x12xf32>
    %42 = tpu.concatenate %36, %37, %38 in 0 : vector<8x2xf32>, vector<8x2xf32>, vector<8x2xf32> -> vector<24x2xf32>
    %cst_22 = arith.constant 0.000000e+00 : f32
    %43 = vector.broadcast %cst_22 : f32 to vector<24x6xf32>
    %44 = tpu.concatenate %42, %43 in 1 : vector<24x2xf32>, vector<24x6xf32> -> vector<24x8xf32>
    %cst_23 = arith.constant dense<0.000000e+00> : vector<24x2xf32>
    %45 = tpu.matmul %44, %39, %cst_23 {dimension_numbers = #tpu.dot_dimension_numbers<[1], [0], [0], [1], [0, 0, 1, 1], [], []>} : vector<24x8xf32>, vector<8x2xf32>, vector<24x2xf32> -> vector<24x2xf32>
    %46 = vector.extract_strided_slice %45 {offsets = [0, 0], sizes = [8, 2], strides = [1, 1]} : vector<24x2xf32> to vector<8x2xf32>
    %47 = vector.extract_strided_slice %45 {offsets = [8, 0], sizes = [8, 2], strides = [1, 1]} : vector<24x2xf32> to vector<8x2xf32>
    %48 = vector.extract_strided_slice %45 {offsets = [16, 0], sizes = [8, 2], strides = [1, 1]} : vector<24x2xf32> to vector<8x2xf32>
    %49 = arith.mulf %46, %46 : vector<8x2xf32>
    %50 = arith.mulf %47, %47 : vector<8x2xf32>
    %51 = arith.addf %49, %50 : vector<8x2xf32>
    %52 = arith.mulf %48, %48 : vector<8x2xf32>
    %53 = arith.addf %51, %52 : vector<8x2xf32>
    %cst_24 = arith.constant 9.99999993E-9 : f32
    %54 = vector.broadcast %cst_24 : f32 to vector<8x2xf32>
    %55 = arith.maximumf %53, %54 : vector<8x2xf32>
    %56 = math.sqrt %55 : vector<8x2xf32>
    %57 = tpu.concatenate %35, %56 in 1 : vector<8x54xf32>, vector<8x2xf32> -> vector<8x56xf32>
    %cst_25 = arith.constant dense<0.000000e+00> : vector<8x12xf32>
    %58 = tpu.matmul %57, %40, %cst_25 {dimension_numbers = #tpu.dot_dimension_numbers<[1], [0], [0], [1], [0, 0, 1, 1], [], []>} : vector<8x56xf32>, vector<56x12xf32>, vector<8x12xf32> -> vector<8x12xf32>
    %59 = vector.broadcast %41 : vector<1x12xf32> to vector<8x12xf32>
    %60 = arith.addf %58, %59 : vector<8x12xf32>
    %c0_26 = arith.constant 0 : index
    %c0_27 = arith.constant 0 : index
    %61 = vector.load %arg11[%c0_26, %c0_27] : memref<8x2xf32, #tpu.memory_space<vmem>>, vector<8x2xf32>
    %cst_28 = arith.constant 0.000000e+00 : f32
    %62 = vector.broadcast %cst_28 : f32 to vector<24x6xf32>
    %63 = tpu.concatenate %45, %62 in 1 : vector<24x2xf32>, vector<24x6xf32> -> vector<24x8xf32>
    %cst_29 = arith.constant dense<0.000000e+00> : vector<24x2xf32>
    %64 = tpu.matmul %63, %61, %cst_29 {dimension_numbers = #tpu.dot_dimension_numbers<[1], [0], [0], [1], [0, 0, 1, 1], [], []>} : vector<24x8xf32>, vector<8x2xf32>, vector<24x2xf32> -> vector<24x2xf32>
    %65 = vector.extract_strided_slice %64 {offsets = [0, 0], sizes = [8, 2], strides = [1, 1]} : vector<24x2xf32> to vector<8x2xf32>
    %66 = vector.extract_strided_slice %64 {offsets = [8, 0], sizes = [8, 2], strides = [1, 1]} : vector<24x2xf32> to vector<8x2xf32>
    %67 = vector.extract_strided_slice %64 {offsets = [16, 0], sizes = [8, 2], strides = [1, 1]} : vector<24x2xf32> to vector<8x2xf32>
    %c0_30 = arith.constant 0 : index
    %c0_31 = arith.constant 0 : index
    %68 = vector.load %arg3[%c0_30, %c0_31] : memref<8x14xf32, #tpu.memory_space<vmem>>, vector<8x14xf32>
    %69 = vector.extract_strided_slice %68 {offsets = [0, 0], sizes = [8, 8], strides = [1, 1]} : vector<8x14xf32> to vector<8x8xf32>
    %70 = vector.extract_strided_slice %68 {offsets = [0, 8], sizes = [8, 2], strides = [1, 1]} : vector<8x14xf32> to vector<8x2xf32>
    %71 = vector.extract_strided_slice %68 {offsets = [0, 10], sizes = [8, 2], strides = [1, 1]} : vector<8x14xf32> to vector<8x2xf32>
    %72 = vector.extract_strided_slice %68 {offsets = [0, 12], sizes = [8, 2], strides = [1, 1]} : vector<8x14xf32> to vector<8x2xf32>
    %c0_32 = arith.constant 0 : index
    %c0_33 = arith.constant 0 : index
    %73 = vector.load %arg12[%c0_32, %c0_33] : memref<8x2xf32, #tpu.memory_space<vmem>>, vector<8x2xf32>
    %c0_34 = arith.constant 0 : index
    %c0_35 = arith.constant 0 : index
    %74 = vector.load %arg13[%c0_34, %c0_35] : memref<10x8xf32, #tpu.memory_space<vmem>>, vector<10x8xf32>
    %c0_36 = arith.constant 0 : index
    %c0_37 = arith.constant 0 : index
    %75 = vector.load %arg14[%c0_36, %c0_37] : memref<1x8xf32, #tpu.memory_space<vmem>>, vector<1x8xf32>
    %76 = tpu.concatenate %70, %71, %72 in 0 : vector<8x2xf32>, vector<8x2xf32>, vector<8x2xf32> -> vector<24x2xf32>
    %cst_38 = arith.constant 0.000000e+00 : f32
    %77 = vector.broadcast %cst_38 : f32 to vector<24x6xf32>
    %78 = tpu.concatenate %76, %77 in 1 : vector<24x2xf32>, vector<24x6xf32> -> vector<24x8xf32>
    %cst_39 = arith.constant dense<0.000000e+00> : vector<24x2xf32>
    %79 = tpu.matmul %78, %73, %cst_39 {dimension_numbers = #tpu.dot_dimension_numbers<[1], [0], [0], [1], [0, 0, 1, 1], [], []>} : vector<24x8xf32>, vector<8x2xf32>, vector<24x2xf32> -> vector<24x2xf32>
    %80 = vector.extract_strided_slice %79 {offsets = [0, 0], sizes = [8, 2], strides = [1, 1]} : vector<24x2xf32> to vector<8x2xf32>
    %81 = vector.extract_strided_slice %79 {offsets = [8, 0], sizes = [8, 2], strides = [1, 1]} : vector<24x2xf32> to vector<8x2xf32>
    %82 = vector.extract_strided_slice %79 {offsets = [16, 0], sizes = [8, 2], strides = [1, 1]} : vector<24x2xf32> to vector<8x2xf32>
    %83 = arith.mulf %80, %80 : vector<8x2xf32>
    %84 = arith.mulf %81, %81 : vector<8x2xf32>
    %85 = arith.addf %83, %84 : vector<8x2xf32>
    %86 = arith.mulf %82, %82 : vector<8x2xf32>
    %87 = arith.addf %85, %86 : vector<8x2xf32>
    %cst_40 = arith.constant 9.99999993E-9 : f32
    %88 = vector.broadcast %cst_40 : f32 to vector<8x2xf32>
    %89 = arith.maximumf %87, %88 : vector<8x2xf32>
    %90 = math.sqrt %89 : vector<8x2xf32>
    %91 = tpu.concatenate %69, %90 in 1 : vector<8x8xf32>, vector<8x2xf32> -> vector<8x10xf32>
    %cst_41 = arith.constant dense<0.000000e+00> : vector<8x8xf32>
    %92 = tpu.matmul %91, %74, %cst_41 {dimension_numbers = #tpu.dot_dimension_numbers<[1], [0], [0], [1], [0, 0, 1, 1], [], []>} : vector<8x10xf32>, vector<10x8xf32>, vector<8x8xf32> -> vector<8x8xf32>
    %93 = vector.broadcast %75 : vector<1x8xf32> to vector<8x8xf32>
    %94 = arith.addf %92, %93 : vector<8x8xf32>
    %c0_42 = arith.constant 0 : index
    %c0_43 = arith.constant 0 : index
    %95 = vector.load %arg15[%c0_42, %c0_43] : memref<8x2xf32, #tpu.memory_space<vmem>>, vector<8x2xf32>
    %cst_44 = arith.constant 0.000000e+00 : f32
    %96 = vector.broadcast %cst_44 : f32 to vector<24x6xf32>
    %97 = tpu.concatenate %79, %96 in 1 : vector<24x2xf32>, vector<24x6xf32> -> vector<24x8xf32>
    %cst_45 = arith.constant dense<0.000000e+00> : vector<24x2xf32>
    %98 = tpu.matmul %97, %95, %cst_45 {dimension_numbers = #tpu.dot_dimension_numbers<[1], [0], [0], [1], [0, 0, 1, 1], [], []>} : vector<24x8xf32>, vector<8x2xf32>, vector<24x2xf32> -> vector<24x2xf32>
    %99 = vector.extract_strided_slice %98 {offsets = [0, 0], sizes = [8, 2], strides = [1, 1]} : vector<24x2xf32> to vector<8x2xf32>
    %100 = vector.extract_strided_slice %98 {offsets = [8, 0], sizes = [8, 2], strides = [1, 1]} : vector<24x2xf32> to vector<8x2xf32>
    %101 = vector.extract_strided_slice %98 {offsets = [16, 0], sizes = [8, 2], strides = [1, 1]} : vector<24x2xf32> to vector<8x2xf32>
    %102 = tpu.concatenate %26, %60, %94 in 1 : vector<8x16xf32>, vector<8x12xf32>, vector<8x8xf32> -> vector<8x36xf32>
    %103 = tpu.concatenate %31, %65, %99 in 1 : vector<8x4xf32>, vector<8x2xf32>, vector<8x2xf32> -> vector<8x8xf32>
    %104 = tpu.concatenate %32, %66, %100 in 1 : vector<8x4xf32>, vector<8x2xf32>, vector<8x2xf32> -> vector<8x8xf32>
    %105 = tpu.concatenate %33, %67, %101 in 1 : vector<8x4xf32>, vector<8x2xf32>, vector<8x2xf32> -> vector<8x8xf32>
    %c0_46 = arith.constant 0 : index
    %c0_47 = arith.constant 0 : index
    %106 = vector.load %arg16[%c0_46, %c0_47] : memref<8x8xf32, #tpu.memory_space<vmem>>, vector<8x8xf32>
    %c0_48 = arith.constant 0 : index
    %c0_49 = arith.constant 0 : index
    %107 = vector.load %arg17[%c0_48, %c0_49] : memref<44x8xf32, #tpu.memory_space<vmem>>, vector<44x8xf32>
    %c0_50 = arith.constant 0 : index
    %c0_51 = arith.constant 0 : index
    %108 = vector.load %arg18[%c0_50, %c0_51] : memref<1x8xf32, #tpu.memory_space<vmem>>, vector<1x8xf32>
    %109 = tpu.concatenate %103, %104, %105 in 0 : vector<8x8xf32>, vector<8x8xf32>, vector<8x8xf32> -> vector<24x8xf32>
    %cst_52 = arith.constant dense<0.000000e+00> : vector<24x8xf32>
    %110 = tpu.matmul %109, %106, %cst_52 {dimension_numbers = #tpu.dot_dimension_numbers<[1], [0], [0], [1], [0, 0, 1, 1], [], []>} : vector<24x8xf32>, vector<8x8xf32>, vector<24x8xf32> -> vector<24x8xf32>
    %111 = vector.extract_strided_slice %110 {offsets = [0, 0], sizes = [8, 8], strides = [1, 1]} : vector<24x8xf32> to vector<8x8xf32>
    %112 = vector.extract_strided_slice %110 {offsets = [8, 0], sizes = [8, 8], strides = [1, 1]} : vector<24x8xf32> to vector<8x8xf32>
    %113 = vector.extract_strided_slice %110 {offsets = [16, 0], sizes = [8, 8], strides = [1, 1]} : vector<24x8xf32> to vector<8x8xf32>
    %114 = arith.mulf %111, %111 : vector<8x8xf32>
    %115 = arith.mulf %112, %112 : vector<8x8xf32>
    %116 = arith.addf %114, %115 : vector<8x8xf32>
    %117 = arith.mulf %113, %113 : vector<8x8xf32>
    %118 = arith.addf %116, %117 : vector<8x8xf32>
    %cst_53 = arith.constant 9.99999993E-9 : f32
    %119 = vector.broadcast %cst_53 : f32 to vector<8x8xf32>
    %120 = arith.maximumf %118, %119 : vector<8x8xf32>
    %121 = math.sqrt %120 : vector<8x8xf32>
    %122 = tpu.concatenate %102, %121 in 1 : vector<8x36xf32>, vector<8x8xf32> -> vector<8x44xf32>
    %cst_54 = arith.constant dense<0.000000e+00> : vector<8x8xf32>
    %123 = tpu.matmul %122, %107, %cst_54 {dimension_numbers = #tpu.dot_dimension_numbers<[1], [0], [0], [1], [0, 0, 1, 1], [], []>} : vector<8x44xf32>, vector<44x8xf32>, vector<8x8xf32> -> vector<8x8xf32>
    %124 = vector.broadcast %108 : vector<1x8xf32> to vector<8x8xf32>
    %125 = arith.addf %123, %124 : vector<8x8xf32>
    %c0_55 = arith.constant 0 : index
    %c0_56 = arith.constant 0 : index
    %126 = vector.load %arg19[%c0_55, %c0_56] : memref<8x2xf32, #tpu.memory_space<vmem>>, vector<8x2xf32>
    %cst_57 = arith.constant dense<0.000000e+00> : vector<24x2xf32>
    %127 = tpu.matmul %110, %126, %cst_57 {dimension_numbers = #tpu.dot_dimension_numbers<[1], [0], [0], [1], [0, 0, 1, 1], [], []>} : vector<24x8xf32>, vector<8x2xf32>, vector<24x2xf32> -> vector<24x2xf32>
    %128 = vector.extract_strided_slice %127 {offsets = [0, 0], sizes = [8, 2], strides = [1, 1]} : vector<24x2xf32> to vector<8x2xf32>
    %129 = vector.extract_strided_slice %127 {offsets = [8, 0], sizes = [8, 2], strides = [1, 1]} : vector<24x2xf32> to vector<8x2xf32>
    %130 = vector.extract_strided_slice %127 {offsets = [16, 0], sizes = [8, 2], strides = [1, 1]} : vector<24x2xf32> to vector<8x2xf32>
    %131 = vector.extract_strided_slice %68 {offsets = [0, 0], sizes = [8, 8], strides = [1, 1]} : vector<8x14xf32> to vector<8x8xf32>
    %132 = arith.addf %125, %131 : vector<8x8xf32>
    %133 = vector.extract_strided_slice %68 {offsets = [0, 8], sizes = [8, 2], strides = [1, 1]} : vector<8x14xf32> to vector<8x2xf32>
    %134 = arith.addf %128, %133 : vector<8x2xf32>
    %135 = vector.extract_strided_slice %68 {offsets = [0, 10], sizes = [8, 2], strides = [1, 1]} : vector<8x14xf32> to vector<8x2xf32>
    %136 = arith.addf %129, %135 : vector<8x2xf32>
    %137 = vector.extract_strided_slice %68 {offsets = [0, 12], sizes = [8, 2], strides = [1, 1]} : vector<8x14xf32> to vector<8x2xf32>
    %138 = arith.addf %130, %137 : vector<8x2xf32>
    %c0_58 = arith.constant 0 : index
    %c0_59 = arith.constant 0 : index
    %139 = vector.load %arg20[%c0_58, %c0_59] : memref<1x8xf32, #tpu.memory_space<vmem>>, vector<1x8xf32>
    %c0_60 = arith.constant 0 : index
    %c0_61 = arith.constant 0 : index
    %140 = vector.load %arg21[%c0_60, %c0_61] : memref<1x8xf32, #tpu.memory_space<vmem>>, vector<1x8xf32>
    %cst_62 = arith.constant dense<0.000000e+00> : vector<8xf32>
    %141 = vector.multi_reduction <add>, %132, %cst_62 [1] : vector<8x8xf32> to vector<8xf32>
    %142 = vector.shape_cast %141 : vector<8xf32> to vector<8x1xf32>
    %cst_63 = arith.constant 8.000000e+00 : f32
    %143 = vector.broadcast %cst_63 : f32 to vector<8x1xf32>
    %144 = arith.divf %142, %143 : vector<8x1xf32>
    %145 = vector.broadcast %144 : vector<8x1xf32> to vector<8x8xf32>
    %146 = arith.subf %132, %145 : vector<8x8xf32>
    %147 = arith.mulf %146, %146 : vector<8x8xf32>
    %cst_64 = arith.constant dense<0.000000e+00> : vector<8xf32>
    %148 = vector.multi_reduction <add>, %147, %cst_64 [1] : vector<8x8xf32> to vector<8xf32>
    %149 = vector.shape_cast %148 : vector<8xf32> to vector<8x1xf32>
    %cst_65 = arith.constant 8.000000e+00 : f32
    %150 = vector.broadcast %cst_65 : f32 to vector<8x1xf32>
    %151 = arith.divf %149, %150 : vector<8x1xf32>
    %cst_66 = arith.constant 9.99999974E-6 : f32
    %152 = vector.broadcast %cst_66 : f32 to vector<8x1xf32>
    %153 = arith.addf %151, %152 : vector<8x1xf32>
    %154 = math.rsqrt %153 : vector<8x1xf32>
    %155 = vector.broadcast %154 : vector<8x1xf32> to vector<8x8xf32>
    %156 = arith.mulf %146, %155 : vector<8x8xf32>
    %157 = vector.broadcast %139 : vector<1x8xf32> to vector<8x8xf32>
    %158 = arith.mulf %156, %157 : vector<8x8xf32>
    %159 = vector.broadcast %140 : vector<1x8xf32> to vector<8x8xf32>
    %160 = arith.addf %158, %159 : vector<8x8xf32>
    %c0_67 = arith.constant 0 : index
    %c0_68 = arith.constant 0 : index
    %161 = vector.load %arg22[%c0_67, %c0_68] : memref<1x2xf32, #tpu.memory_space<vmem>>, vector<1x2xf32>
    %162 = arith.mulf %134, %134 : vector<8x2xf32>
    %163 = arith.mulf %136, %136 : vector<8x2xf32>
    %164 = arith.addf %162, %163 : vector<8x2xf32>
    %165 = arith.mulf %138, %138 : vector<8x2xf32>
    %166 = arith.addf %164, %165 : vector<8x2xf32>
    %cst_69 = arith.constant 9.99999993E-9 : f32
    %167 = vector.broadcast %cst_69 : f32 to vector<8x2xf32>
    %168 = arith.maximumf %166, %167 : vector<8x2xf32>
    %cst_70 = arith.constant dense<0.000000e+00> : vector<8xf32>
    %169 = vector.multi_reduction <add>, %168, %cst_70 [1] : vector<8x2xf32> to vector<8xf32>
    %170 = vector.shape_cast %169 : vector<8xf32> to vector<8x1xf32>
    %cst_71 = arith.constant 2.000000e+00 : f32
    %171 = vector.broadcast %cst_71 : f32 to vector<8x1xf32>
    %172 = arith.divf %170, %171 : vector<8x1xf32>
    %173 = math.rsqrt %172 : vector<8x1xf32>
    %174 = vector.broadcast %173 : vector<8x1xf32> to vector<8x2xf32>
    %175 = arith.mulf %134, %174 : vector<8x2xf32>
    %176 = vector.broadcast %161 : vector<1x2xf32> to vector<8x2xf32>
    %177 = arith.mulf %175, %176 : vector<8x2xf32>
    %178 = vector.broadcast %173 : vector<8x1xf32> to vector<8x2xf32>
    %179 = arith.mulf %136, %178 : vector<8x2xf32>
    %180 = vector.broadcast %161 : vector<1x2xf32> to vector<8x2xf32>
    %181 = arith.mulf %179, %180 : vector<8x2xf32>
    %182 = vector.broadcast %173 : vector<8x1xf32> to vector<8x2xf32>
    %183 = arith.mulf %138, %182 : vector<8x2xf32>
    %184 = vector.broadcast %161 : vector<1x2xf32> to vector<8x2xf32>
    %185 = arith.mulf %183, %184 : vector<8x2xf32>
    %186 = tpu.concatenate %160, %177, %181, %185 in 1 : vector<8x8xf32>, vector<8x2xf32>, vector<8x2xf32>, vector<8x2xf32> -> vector<8x14xf32>
    %c0_72 = arith.constant 0 : index
    %c0_73 = arith.constant 0 : index
    %187 = vector.load %arg23[%c0_72, %c0_73] : memref<8x14xf32, #tpu.memory_space<vmem>>, vector<8x14xf32>
    tpu.vector_store %arg23[%c0_72, %c0_73], %186 {strides = array<i32>} : memref<8x14xf32, #tpu.memory_space<vmem>>, vector<8x14xf32>,
    return
  }
  func.func @transform_0(%arg0: i32) -> (i32, i32) {
    %c0_i32 = arith.constant 0 : i32
    %c0_i32_0 = arith.constant 0 : i32
    return %arg0, %c0_i32 : i32, i32
  }
  func.func @transform_1(%arg0: i32) -> (i32, i32) {
    %c0_i32 = arith.constant 0 : i32
    %c0_i32_0 = arith.constant 0 : i32
    return %arg0, %c0_i32 : i32, i32
  }
  func.func @transform_2(%arg0: i32) -> (i32, i32) {
    %c0_i32 = arith.constant 0 : i32
    %c0_i32_0 = arith.constant 0 : i32
    return %arg0, %c0_i32 : i32, i32
  }
  func.func @transform_3(%arg0: i32) -> (i32, i32) {
    %c0_i32 = arith.constant 0 : i32
    %c0_i32_0 = arith.constant 0 : i32
    %c0_i32_1 = arith.constant 0 : i32
    return %c0_i32, %c0_i32_0 : i32, i32
  }
  func.func @transform_4(%arg0: i32) -> (i32, i32) {
    %c0_i32 = arith.constant 0 : i32
    %c0_i32_0 = arith.constant 0 : i32
    %c0_i32_1 = arith.constant 0 : i32
    return %c0_i32, %c0_i32_0 : i32, i32
  }
  func.func @transform_5(%arg0: i32) -> (i32, i32) {
    %c0_i32 = arith.constant 0 : i32
    %c0_i32_0 = arith.constant 0 : i32
    %c0_i32_1 = arith.constant 0 : i32
    return %c0_i32, %c0_i32_0 : i32, i32
  }
  func.func @transform_6(%arg0: i32) -> (i32, i32) {
    %c0_i32 = arith.constant 0 : i32
    %c0_i32_0 = arith.constant 0 : i32
    %c0_i32_1 = arith.constant 0 : i32
    return %c0_i32, %c0_i32_0 : i32, i32
  }
  func.func @transform_7(%arg0: i32) -> (i32, i32) {
    %c0_i32 = arith.constant 0 : i32
    %c0_i32_0 = arith.constant 0 : i32
    %c0_i32_1 = arith.constant 0 : i32
    return %c0_i32, %c0_i32_0 : i32, i32
  }
  func.func @transform_8(%arg0: i32) -> (i32, i32) {
    %c0_i32 = arith.constant 0 : i32
    %c0_i32_0 = arith.constant 0 : i32
    %c0_i32_1 = arith.constant 0 : i32
    return %c0_i32, %c0_i32_0 : i32, i32
  }
  func.func @transform_9(%arg0: i32) -> (i32, i32) {
    %c0_i32 = arith.constant 0 : i32
    %c0_i32_0 = arith.constant 0 : i32
    %c0_i32_1 = arith.constant 0 : i32
    return %c0_i32, %c0_i32_0 : i32, i32
  }
  func.func @transform_10(%arg0: i32) -> (i32, i32) {
    %c0_i32 = arith.constant 0 : i32
    %c0_i32_0 = arith.constant 0 : i32
    %c0_i32_1 = arith.constant 0 : i32
    return %c0_i32, %c0_i32_0 : i32, i32
  }
  func.func @transform_11(%arg0: i32) -> (i32, i32) {
    %c0_i32 = arith.constant 0 : i32
    %c0_i32_0 = arith.constant 0 : i32
    %c0_i32_1 = arith.constant 0 : i32
    return %c0_i32, %c0_i32_0 : i32, i32
  }
  func.func @transform_12(%arg0: i32) -> (i32, i32) {
    %c0_i32 = arith.constant 0 : i32
    %c0_i32_0 = arith.constant 0 : i32
    %c0_i32_1 = arith.constant 0 : i32
    return %c0_i32, %c0_i32_0 : i32, i32
  }
  func.func @transform_13(%arg0: i32) -> (i32, i32) {
    %c0_i32 = arith.constant 0 : i32
    %c0_i32_0 = arith.constant 0 : i32
    %c0_i32_1 = arith.constant 0 : i32
    return %c0_i32, %c0_i32_0 : i32, i32
  }
  func.func @transform_14(%arg0: i32) -> (i32, i32) {
    %c0_i32 = arith.constant 0 : i32
    %c0_i32_0 = arith.constant 0 : i32
    %c0_i32_1 = arith.constant 0 : i32
    return %c0_i32, %c0_i32_0 : i32, i32
  }
  func.func @transform_15(%arg0: i32) -> (i32, i32) {
    %c0_i32 = arith.constant 0 : i32
    %c0_i32_0 = arith.constant 0 : i32
    %c0_i32_1 = arith.constant 0 : i32
    return %c0_i32, %c0_i32_0 : i32, i32
  }
  func.func @transform_16(%arg0: i32) -> (i32, i32) {
    %c0_i32 = arith.constant 0 : i32
    %c0_i32_0 = arith.constant 0 : i32
    %c0_i32_1 = arith.constant 0 : i32
    return %c0_i32, %c0_i32_0 : i32, i32
  }
  func.func @transform_17(%arg0: i32) -> (i32, i32) {
    %c0_i32 = arith.constant 0 : i32
    %c0_i32_0 = arith.constant 0 : i32
    %c0_i32_1 = arith.constant 0 : i32
    return %c0_i32, %c0_i32_0 : i32, i32
  }
  func.func @transform_18(%arg0: i32) -> (i32, i32) {
    %c0_i32 = arith.constant 0 : i32
    %c0_i32_0 = arith.constant 0 : i32
    %c0_i32_1 = arith.constant 0 : i32
    return %c0_i32, %c0_i32_0 : i32, i32
  }
  func.func @transform_19(%arg0: i32) -> (i32, i32) {
    %c0_i32 = arith.constant 0 : i32
    %c0_i32_0 = arith.constant 0 : i32
    %c0_i32_1 = arith.constant 0 : i32
    return %c0_i32, %c0_i32_0 : i32, i32
  }
  func.func @transform_20(%arg0: i32) -> (i32, i32) {
    %c0_i32 = arith.constant 0 : i32
    %c0_i32_0 = arith.constant 0 : i32
    %c0_i32_1 = arith.constant 0 : i32
    return %c0_i32, %c0_i32_0 : i32, i32
  }
  func.func @transform_21(%arg0: i32) -> (i32, i32) {
    %c0_i32 = arith.constant 0 : i32
    %c0_i32_0 = arith.constant 0 : i32
    %c0_i32_1 = arith.constant 0 : i32
    return %c0_i32, %c0_i32_0 : i32, i32
  }
  func.func @transform_22(%arg0: i32) -> (i32, i32) {
    %c0_i32 = arith.constant 0 : i32
    %c0_i32_0 = arith.constant 0 : i32
    return %arg0, %c0_i32 : i32, i32
  }
}

module attributes {stable_mosaic.version = 11 : i64} {
  func.func @kernel(%arg0: i32, %arg1: memref<16x28xf32, #tpu.memory_space<vmem>>, %arg2: memref<8x4xf32, #tpu.memory_space<vmem>>, %arg3: memref<20x3xf32, #tpu.memory_space<vmem>>, %arg4: memref<1x3xf32, #tpu.memory_space<vmem>>, %arg5: memref<8x1xf32, #tpu.memory_space<vmem>>, %arg6: memref<16x6xf32, #tpu.memory_space<vmem>>) attributes {dimension_semantics = [#tpu.dimension_semantics<parallel>], iteration_bounds = array<i64: 1>, scalar_prefetch = 0 : i64, scratch_operands = 0 : i64, tpu.core_type = #tpu.core_type<tc>, window_params = [{transform_indices = @transform_0, window_bounds = array<i64: 16, 28>}, {pipeline_mode = #tpu.pipeline_mode<synchronous>, transform_indices = @transform_1, window_bounds = array<i64: 8, 4>}, {pipeline_mode = #tpu.pipeline_mode<synchronous>, transform_indices = @transform_2, window_bounds = array<i64: 20, 3>}, {pipeline_mode = #tpu.pipeline_mode<synchronous>, transform_indices = @transform_3, window_bounds = array<i64: 1, 3>}, {pipeline_mode = #tpu.pipeline_mode<synchronous>, transform_indices = @transform_4, window_bounds = array<i64: 8, 1>}, {transform_indices = @transform_5, window_bounds = array<i64: 16, 6>}]} {
    %c0 = arith.constant 0 : index
    %c0_0 = arith.constant 0 : index
    %0 = vector.load %arg1[%c0, %c0_0] : memref<16x28xf32, #tpu.memory_space<vmem>>, vector<16x28xf32>
    %1 = vector.extract_strided_slice %0 {offsets = [0, 0], sizes = [16, 16], strides = [1, 1]} : vector<16x28xf32> to vector<16x16xf32>
    %2 = vector.extract_strided_slice %0 {offsets = [0, 16], sizes = [16, 4], strides = [1, 1]} : vector<16x28xf32> to vector<16x4xf32>
    %3 = vector.extract_strided_slice %0 {offsets = [0, 20], sizes = [16, 4], strides = [1, 1]} : vector<16x28xf32> to vector<16x4xf32>
    %4 = vector.extract_strided_slice %0 {offsets = [0, 24], sizes = [16, 4], strides = [1, 1]} : vector<16x28xf32> to vector<16x4xf32>
    %c0_1 = arith.constant 0 : index
    %c0_2 = arith.constant 0 : index
    %5 = vector.load %arg2[%c0_1, %c0_2] : memref<8x4xf32, #tpu.memory_space<vmem>>, vector<8x4xf32>
    %c0_3 = arith.constant 0 : index
    %c0_4 = arith.constant 0 : index
    %6 = vector.load %arg3[%c0_3, %c0_4] : memref<20x3xf32, #tpu.memory_space<vmem>>, vector<20x3xf32>
    %c0_5 = arith.constant 0 : index
    %c0_6 = arith.constant 0 : index
    %7 = vector.load %arg4[%c0_5, %c0_6] : memref<1x3xf32, #tpu.memory_space<vmem>>, vector<1x3xf32>
    %8 = tpu.concatenate %2, %3, %4 in 0 : vector<16x4xf32>, vector<16x4xf32>, vector<16x4xf32> -> vector<48x4xf32>
    %cst = arith.constant 0.000000e+00 : f32
    %9 = vector.broadcast %cst : f32 to vector<48x4xf32>
    %10 = tpu.concatenate %8, %9 in 1 : vector<48x4xf32>, vector<48x4xf32> -> vector<48x8xf32>
    %cst_7 = arith.constant dense<0.000000e+00> : vector<48x4xf32>
    %11 = tpu.matmul %10, %5, %cst_7 {dimension_numbers = #tpu.dot_dimension_numbers<[1], [0], [0], [1], [0, 0, 1, 1], [], []>} : vector<48x8xf32>, vector<8x4xf32>, vector<48x4xf32> -> vector<48x4xf32>
    %12 = vector.extract_strided_slice %11 {offsets = [0, 0], sizes = [16, 4], strides = [1, 1]} : vector<48x4xf32> to vector<16x4xf32>
    %13 = vector.extract_strided_slice %11 {offsets = [16, 0], sizes = [16, 4], strides = [1, 1]} : vector<48x4xf32> to vector<16x4xf32>
    %14 = vector.extract_strided_slice %11 {offsets = [32, 0], sizes = [16, 4], strides = [1, 1]} : vector<48x4xf32> to vector<16x4xf32>
    %15 = arith.mulf %12, %12 : vector<16x4xf32>
    %16 = arith.mulf %13, %13 : vector<16x4xf32>
    %17 = arith.addf %15, %16 : vector<16x4xf32>
    %18 = arith.mulf %14, %14 : vector<16x4xf32>
    %19 = arith.addf %17, %18 : vector<16x4xf32>
    %cst_8 = arith.constant 9.99999993E-9 : f32
    %20 = vector.broadcast %cst_8 : f32 to vector<16x4xf32>
    %21 = arith.maximumf %19, %20 : vector<16x4xf32>
    %22 = math.sqrt %21 : vector<16x4xf32>
    %23 = tpu.concatenate %1, %22 in 1 : vector<16x16xf32>, vector<16x4xf32> -> vector<16x20xf32>
    %cst_9 = arith.constant dense<0.000000e+00> : vector<16x3xf32>
    %24 = tpu.matmul %23, %6, %cst_9 {dimension_numbers = #tpu.dot_dimension_numbers<[1], [0], [0], [1], [0, 0, 1, 1], [], []>} : vector<16x20xf32>, vector<20x3xf32>, vector<16x3xf32> -> vector<16x3xf32>
    %25 = vector.broadcast %7 : vector<1x3xf32> to vector<16x3xf32>
    %26 = arith.addf %24, %25 : vector<16x3xf32>
    %c0_10 = arith.constant 0 : index
    %c0_11 = arith.constant 0 : index
    %27 = vector.load %arg5[%c0_10, %c0_11] : memref<8x1xf32, #tpu.memory_space<vmem>>, vector<8x1xf32>
    %cst_12 = arith.constant 0.000000e+00 : f32
    %28 = vector.broadcast %cst_12 : f32 to vector<48x4xf32>
    %29 = tpu.concatenate %11, %28 in 1 : vector<48x4xf32>, vector<48x4xf32> -> vector<48x8xf32>
    %cst_13 = arith.constant dense<0.000000e+00> : vector<48x1xf32>
    %30 = tpu.matmul %29, %27, %cst_13 {dimension_numbers = #tpu.dot_dimension_numbers<[1], [0], [0], [1], [0, 0, 1, 1], [], []>} : vector<48x8xf32>, vector<8x1xf32>, vector<48x1xf32> -> vector<48x1xf32>
    %31 = vector.extract_strided_slice %30 {offsets = [0, 0], sizes = [16, 1], strides = [1, 1]} : vector<48x1xf32> to vector<16x1xf32>
    %32 = vector.extract_strided_slice %30 {offsets = [16, 0], sizes = [16, 1], strides = [1, 1]} : vector<48x1xf32> to vector<16x1xf32>
    %33 = vector.extract_strided_slice %30 {offsets = [32, 0], sizes = [16, 1], strides = [1, 1]} : vector<48x1xf32> to vector<16x1xf32>
    %34 = tpu.concatenate %26, %31, %32, %33 in 1 : vector<16x3xf32>, vector<16x1xf32>, vector<16x1xf32>, vector<16x1xf32> -> vector<16x6xf32>
    %c0_14 = arith.constant 0 : index
    %c0_15 = arith.constant 0 : index
    %35 = vector.load %arg6[%c0_14, %c0_15] : memref<16x6xf32, #tpu.memory_space<vmem>>, vector<16x6xf32>
    tpu.vector_store %arg6[%c0_14, %c0_15], %34 {strides = array<i32>} : memref<16x6xf32, #tpu.memory_space<vmem>>, vector<16x6xf32>,
    return
  }
  func.func @transform_0(%arg0: i32) -> (i32, i32) {
    %c0_i32 = arith.constant 0 : i32
    %c0_i32_0 = arith.constant 0 : i32
    return %arg0, %c0_i32 : i32, i32
  }
  func.func @transform_1(%arg0: i32) -> (i32, i32) {
    %c0_i32 = arith.constant 0 : i32
    %c0_i32_0 = arith.constant 0 : i32
    %c0_i32_1 = arith.constant 0 : i32
    return %c0_i32, %c0_i32_0 : i32, i32
  }
  func.func @transform_2(%arg0: i32) -> (i32, i32) {
    %c0_i32 = arith.constant 0 : i32
    %c0_i32_0 = arith.constant 0 : i32
    %c0_i32_1 = arith.constant 0 : i32
    return %c0_i32, %c0_i32_0 : i32, i32
  }
  func.func @transform_3(%arg0: i32) -> (i32, i32) {
    %c0_i32 = arith.constant 0 : i32
    %c0_i32_0 = arith.constant 0 : i32
    %c0_i32_1 = arith.constant 0 : i32
    return %c0_i32, %c0_i32_0 : i32, i32
  }
  func.func @transform_4(%arg0: i32) -> (i32, i32) {
    %c0_i32 = arith.constant 0 : i32
    %c0_i32_0 = arith.constant 0 : i32
    %c0_i32_1 = arith.constant 0 : i32
    return %c0_i32, %c0_i32_0 : i32, i32
  }
  func.func @transform_5(%arg0: i32) -> (i32, i32) {
    %c0_i32 = arith.constant 0 : i32
    %c0_i32_0 = arith.constant 0 : i32
    return %arg0, %c0_i32 : i32, i32
  }
}

</mosaic_0001>

<bundles_post_ra>
// kernel: model_apply.15
= control target key start
LH: loop header
LB: loop body
LE: loop exit
PB: predicated region body
PF: predicated region fallthrough
CT: control target
= control target key end

     0   :  { %vm18_vm0 = vcmask 39936   ;;  %vm24_vm1 = vcmask 64512   ;;  %vm54_vm2 = vcmask 130048   ;;  %vm57_vm3 = vcmask 162816   ;;  %s112_s1 = inlined_call_operand.vmem [shape: f32[8,16], index: 1, kind: input, shape index: {}]   ;;  %s113_s0 = inlined_call_operand.vmem [shape: f32[16,5], index: 0, kind: input, shape index: {}]   ;;  %s114_s2 = inlined_call_operand.vmem [shape: f32[1,16], index: 2, kind: input, shape index: {}]   ;;  %s115_s3 = inlined_call_operand.vmem [shape: f32[16,28], index: 3, kind: output, shape index: {}]  }
   0x1   :  { %v16_v0 = vld [vmem:[%s112_s1] sm:$0xff]  ;;  %v15_v2 = vld [vmem:[%s113_s0 + $0x8] sm:$0xff]  ;;  %vm60_vm4 = vcmask 195584   ;;  %vm63_vm5 = vcmask 228352  }
   0x2   :  { %v14_v1 = vld [vmem:[%s113_s0] sm:$0xff]  ;;  %46 = vmatpush.msra.mxu0 %v16_v0  ;;  %72 = vmatpush.msra.mxu1 %v16_v0  ;;  %v20_v4 = vsel %vm18_vm0, %v15_v2, 0.0 }
   0x3   :  { %v19_v3 = vsel %vm18_vm0, %v14_v1, 0.0  ;;  %71 = vmatmul.msk.f32.vlgmr.msra.gmra.mxu1 %vm24_vm1, %v20_v4  ;;  %v73_v5 = vld [vmem:[%s114_s2] ss:$0 sm:$0xff] }
   0x4   :  { %70 = vmatmul.msk.f32.vlgmr.msra.gmra.mxu0 %vm24_vm1, %v19_v3 }
  0x80   :  { %v51_v7 = vpop.f32.mrf.mxu1 }
  0x81   :  { %v48_v6 = vpop.f32.mrf.mxu0  ;;  %v52_v9 = vadd.f32 %v73_v5, %v51_v7 }
  0x82   :  { %v49_v8 = vadd.f32 %v73_v5, %v48_v6 }
  0x83   :  { %v56_v11 = vsel %vm54_vm2, %v52_v9, 0.0 }
  0x84   :  { %v55_v10 = vsel %vm54_vm2, %v49_v8, 0.0  ;;  %v59_v13 = vsel %vm57_vm3, %v56_v11, 0.0 }
  0x85   :  { %v58_v12 = vsel %vm57_vm3, %v55_v10, 0.0  ;;  %v62_v15 = vsel %vm60_vm4, %v59_v13, 0.0 }
  0x86   :  { %v61_v14 = vsel %vm60_vm4, %v58_v12, 0.0  ;;  %65 = vst.msk [vmem:[%s115_s3 + $0x8] sm:$0xff] %vm63_vm5, %v62_v15 }
  0x87   :  { %64 = vst.msk [vmem:[%s115_s3] sm:$0xff] %vm63_vm5, %v61_v14 }

// kernel: model_apply.16
= control target key start
LH: loop header
LB: loop body
LE: loop exit
PB: predicated region body
PF: predicated region fallthrough
CT: control target
= control target key end

     0   :  { %s1212_s18 = smov 0   ;;  %s1604_s0 = inlined_call_operand.vmem [shape: f32[112,29], index: 0, kind: input, shape index: {}]   ;;  %s1605_s1 = inlined_call_operand.vmem [shape: f32[8,2], index: 1, kind: input, shape index: {}]   ;;  %s1606_s2 = inlined_call_operand.vmem [shape: f32[28,12], index: 2, kind: input, shape index: {}]   ;;  %s1607_s3 = inlined_call_operand.vmem [shape: f32[1,12], index: 3, kind: input, shape index: {}]   ;;  %s1608_s4 = inlined_call_operand.vmem [shape: f32[8,2], index: 4, kind: input, shape index: {}]   ;;  %s1609_s5 = inlined_call_operand.vmem [shape: f32[112,18], index: 5, kind: output, shape index: {}]  }
   0x1 LB: > { %s1072_s19 = sadd.s32 4294967295, %s1173_s18   ;;  %p1076_p0 = scmp.ge.s32.totalorder %s1173_s18, 1  ;;  %s1173_s18 = sphi %s1212_s18, %s15_s18  }
   0x2   : > { %p188_p1 = scmp.lt.s32.totalorder %s1173_s18, 3 }
   0x4   : > { %p189_p2 = pnand %p1076_p0, %p188_p1 }
   0x5   : > { %s216_s20 = smul.u32 (!%p189_p2), 7, %s1072_s19  ;;  %s1175_s25 = smov (!%p189_p2), 102  }
   0x6   : > { %192 = sbr.rel (%p189_p2) target bundleno = 876 (0x36c), region = 40  ;;  %s1176_s26 = smov (!%p189_p2), 127  }
   0x7   : > { %p217_p3 = scmp.lt.s32.totalorder (!%p189_p2), %s216_s20, 13  ;;  %s1177_s27 = smov (!%p189_p2), 126  }
   0x8   : > { %s1178_s13 = smov (!%p189_p2), 26   ;;  %s1179_s16 = smov (!%p189_p2), 14  }
   0x9   : > { %s1180_s17 = smov (!%p189_p2), 16   ;;  %s1181_s19 = smov (!%p189_p2), 12  }
   0xb   : > { %s1611_s20 = smov (!%p217_p3, %s216_s20), 13  ;;  %v235_v6 = vld [vmem:[%s1605_s1] sm:$0xff]  ;;  %vm339_vm0 = vcmask 7168   ;;  %vm361_vm1 = vcmask 64512   ;;  %vm735_vm2 = vcmask 15360   ;;  %vm692_vm3 = vcmask 1043456  }
   0xc   : > { %s1077_s21 = sshll.u32 %s1611_s20, 3  ;;  %440 = vmatpush.msra.mxu0 %v235_v6  ;;  %1131 = vmatpush.msra.mxu3 %v235_v6  ;;  %v1346_v59 = vld [vmem:[%s1608_s4] sm:$0xff]  ;;  %vm659_vm12 = vcmask 211968   ;;  %vm670_vm13 = vcmask 228352  }
   0xd   : > { %s220_s24 = scalar_lea.vmem %s1604_s0, %s1077_s21  ;;  %1136 = vmatpush.msra.mxu2 %v1346_v59 }
   0xe   : > { %v1228_v0 = vld [vmem:[%s220_s24] sm:$0xff]  ;;  %v1230_v1 = vld [vmem:[%s220_s24 + $0x8] sm:$0xff]  ;;  %v1236_v2 = vld [vmem:[%s220_s24 + $0x10] sm:$0xff] }
   0xf   : > { %276 = vrot.lane.b32.xlu0 %v1228_v0, %s1175_s25  ;;  %278 = vrot.lane.b32.xlu1 %v1230_v1, %s1175_s25  ;;  %v1240_v3 = vld [vmem:[%s220_s24 + $0x30] sm:$0xff]  ;;  %v1248_v4 = vld [vmem:[%s220_s24 + $0x18] sm:$0xff] }
  0x10   : > { %280 = vrot.lane.b32.xlu2 %v1236_v2, %s1175_s25  ;;  %v1256_v5 = vld [vmem:[%s220_s24 + $0x20] sm:$0xff]  ;;  %v1271_v7 = vld [vmem:[%s220_s24 + $0x28] sm:$0xff] }
  0x17   : > { %260 = vrot.lane.b32.xlu0 %v1240_v3, %s1176_s26  ;;  %262 = vrot.lane.b32.xlu1 %v1228_v0, %s1177_s27 }
  0x18   : > { %248 = vrot.lane.b32.xlu2 %v1228_v0, %s1176_s26 }
  0x1f   : > { %264 = vrot.lane.b32.xlu0 %v1230_v1, %s1177_s27  ;;  %282 = vrot.lane.b32.xlu1 %v1248_v4, %s1175_s25 }
  0x20   : > { %250 = vrot.lane.b32.xlu2 %v1230_v1, %s1176_s26 }
  0x27   : > { %266 = vrot.lane.b32.xlu0 %v1236_v2, %s1177_s27  ;;  %284 = vrot.lane.b32.xlu1 %v1256_v5, %s1175_s25 }
  0x28   : > { %252 = vrot.lane.b32.xlu2 %v1236_v2, %s1176_s26 }
  0x2f   : > { %268 = vrot.lane.b32.xlu0 %v1248_v4, %s1177_s27  ;;  %286 = vrot.lane.b32.xlu1 %v1271_v7, %s1175_s25 }
  0x30   : > { %254 = vrot.lane.b32.xlu2 %v1248_v4, %s1176_s26 }
  0x37   : > { %288 = vrot.lane.b32.xlu1 %v1240_v3, %s1175_s25 }
  0x6a   : > { %v281_v8 = vpop.permute.xlu2 %280 }
  0x6b   : > { %v342_v18 = vsel %vm339_vm0, %v281_v8, 0.0 }
  0x72   : > { %v249_v12 = vpop.permute.xlu2 %248 }
  0x7a   : > { %v251_v16 = vpop.permute.xlu2 %250 }
  0x81   : > { %v277_v9 = vpop.permute.xlu0 %276  ;;  %v279_v10 = vpop.permute.xlu1 %278 }
  0x82   : > { %v340_v11 = vsel %vm339_vm0, %v277_v9, 0.0  ;;  %v341_v13 = vsel %vm339_vm0, %v279_v10, 0.0  ;;  %v253_v20 = vpop.permute.xlu2 %252 }
  0x83   : > { %1079 = vmatmul.msk.f32.vlgmr.msra.gmra.mxu0 %vm361_vm1, %v340_v11 }
  0x89   : > { %v261_v14 = vpop.permute.xlu0 %260  ;;  %v263_v15 = vpop.permute.xlu1 %262 }
  0x8a   : > { %302 = vrot.lane.b32.xlu0 %v261_v14, %s1175_s25  ;;  %304 = vrot.lane.b32.xlu2 %v263_v15, %s1175_s25  ;;  %v255_v24 = vpop.permute.xlu2 %254 }
  0x8b   : > { %1080 = vmatmul.msk.f32.gmra.mxu0 %vm361_vm1, %v341_v13 }
  0x91   : > { %v265_v17 = vpop.permute.xlu0 %264  ;;  %v283_v19 = vpop.permute.xlu1 %282 }
  0x92   : > { %290 = vrot.lane.b32.xlu0 %v249_v12, %s1175_s25  ;;  %306 = vrot.lane.b32.xlu1 %v265_v17, %s1175_s25  ;;  %v343_v21 = vsel %vm339_vm0, %v283_v19, 0.0 }
  0x93   : > { %1081 = vmatmul.msk.f32.gmra.mxu0 %vm361_vm1, %v342_v18  ;;  %292 = vrot.lane.b32.xlu2 %v251_v16, %s1175_s25 }
  0x99   : > { %v267_v22 = vpop.permute.xlu0 %266  ;;  %v285_v23 = vpop.permute.xlu1 %284 }
  0x9a   : > { %294 = vrot.lane.b32.xlu1 %v253_v20, %s1175_s25  ;;  %308 = vrot.lane.b32.xlu0 %v267_v22, %s1175_s25  ;;  %v344_v25 = vsel %vm339_vm0, %v285_v23, 0.0 }
  0x9b   : > { %1082 = vmatmul.msk.f32.gmra.mxu0 %vm361_vm1, %v343_v21 }
  0xa1   : > { %v269_v26 = vpop.permute.xlu0 %268  ;;  %v287_v27 = vpop.permute.xlu1 %286 }
  0xa2   : > { %256 = vrot.lane.b32.xlu1 %v1256_v5, %s1176_s26  ;;  %296 = vrot.lane.b32.xlu0 %v255_v24, %s1175_s25  ;;  %v345_v28 = vsel %vm339_vm0, %v287_v27, 0.0 }
  0xa3   : > { %310 = vrot.lane.b32.xlu2 %v269_v26, %s1175_s25  ;;  %1083 = vmatmul.msk.f32.gmra.mxu0 %vm361_vm1, %v344_v25 }
  0xa9   : > { %v289_v29 = vpop.permute.xlu1 %288 }
  0xaa   : > { %272 = vrot.lane.b32.xlu1 %v1271_v7, %s1177_s27  ;;  %270 = vrot.lane.b32.xlu0 %v1256_v5, %s1177_s27  ;;  %v346_v30 = vsel %vm339_vm0, %v289_v29, 0.0 }
  0xab   : > { %258 = vrot.lane.b32.xlu2 %v1271_v7, %s1176_s26  ;;  %1084 = vmatmul.msk.f32.gmra.mxu0 %vm361_vm1, %v345_v28  ;;  %s1562_s26 = scalar_lea.vmem %s1609_s5, %s1077_s21 }
  0xb3   : > { %274 = vrot.lane.b32.xlu2 %v1240_v3, %s1177_s27  ;;  %1085 = vmatmul.msk.f32.gmra.mxu0 %vm361_vm1, %v346_v30 }
  0xe4   : > { %v305_v31 = vpop.permute.xlu2 %304 }
  0xe5   : > { %v354_v36 = vsel %vm339_vm0, %v305_v31, 0.0 }
  0xed   : > { %v293_v32 = vpop.permute.xlu2 %292 }
  0xee   : > { %v348_v44 = vsel %vm339_vm0, %v293_v32, 0.0 }
  0xfc   : > { %v303_v33 = vpop.permute.xlu0 %302 }
  0xfd   : > { %v353_v34 = vsel %vm339_vm0, %v303_v33, 0.0  ;;  %v311_v35 = vpop.permute.xlu2 %310 }
  0xfe   : > { %1092 = vmatmul.msk.f32.vlgmr.msra.gmra.mxu3 %vm361_vm1, %v353_v34  ;;  %v357_v50 = vsel %vm339_vm0, %v311_v35, 0.0 }
 0x100   : > { %v1333_v54 = vpop.f32.mrf.mxu0 }
 0x101   : > { %v505_v14 = vmul.f32 %v1333_v54, %v1333_v54 }
 0x104   : > { %v307_v37 = vpop.permute.xlu1 %306  ;;  %v291_v38 = vpop.permute.xlu0 %290 }
 0x105   : > { %v347_v39 = vsel %vm339_vm0, %v291_v38, 0.0  ;;  %v259_v40 = vpop.permute.xlu2 %258  ;;  %v355_v41 = vsel %vm339_vm0, %v307_v37, 0.0 }
 0x106   : > { %1086 = vmatmul.msk.f32.gmra.mxu0 %vm361_vm1, %v347_v39  ;;  %1093 = vmatmul.msk.f32.gmra.mxu3 %vm361_vm1, %v354_v36 }
 0x107   : > { %300 = vrot.lane.b32.xlu1 %v259_v40, %s1175_s25 }
 0x108   : > { %v1335_v55 = vpop.f32.mrf.mxu0 }
 0x109   : > { %v506_v27 = vmul.f32 %v1335_v55, %v1335_v55 }
 0x10c   : > { %v295_v42 = vpop.permute.xlu1 %294  ;;  %v309_v43 = vpop.permute.xlu0 %308 }
 0x10d   : > { %v275_v45 = vpop.permute.xlu2 %274  ;;  %v349_v46 = vsel %vm339_vm0, %v295_v42, 0.0  ;;  %v356_v47 = vsel %vm339_vm0, %v309_v43, 0.0 }
 0x10e   : > { %1087 = vmatmul.msk.f32.gmra.mxu0 %vm361_vm1, %v348_v44  ;;  %1094 = vmatmul.msk.f32.gmra.mxu3 %vm361_vm1, %v355_v41 }
 0x10f   : > { %316 = vrot.lane.b32.xlu1 %v275_v45, %s1175_s25 }
 0x110   : > { %v1337_v56 = vpop.f32.mrf.mxu0 }
 0x111   : > { %v507_v41 = vmul.f32 %v1337_v56, %v1337_v56 }
 0x114   : > { %v257_v48 = vpop.permute.xlu1 %256  ;;  %v297_v49 = vpop.permute.xlu0 %296 }
 0x115   : > { %298 = vrot.lane.b32.xlu0 %v257_v48, %s1175_s25  ;;  %v350_v51 = vsel %vm339_vm0, %v297_v49, 0.0 }
 0x116   : > { %1088 = vmatmul.msk.f32.gmra.mxu0 %vm361_vm1, %v349_v46  ;;  %1095 = vmatmul.msk.f32.gmra.mxu3 %vm361_vm1, %v356_v47 }
 0x118   : > { %v1339_v57 = vpop.f32.mrf.mxu0 }
 0x11c   : > { %v273_v52 = vpop.permute.xlu1 %272  ;;  %v271_v53 = vpop.permute.xlu0 %270 }
 0x11d   : > { %314 = vrot.lane.b32.xlu0 %v273_v52, %s1175_s25  ;;  %312 = vrot.lane.b32.xlu2 %v271_v53, %s1175_s25  ;;  %v238_v52 = vld [vmem:[%s1606_s2 + $0x10] sm:$0xff] }
 0x11e   : > { %1089 = vmatmul.msk.f32.gmra.mxu0 %vm361_vm1, %v350_v51  ;;  %1096 = vmatmul.msk.f32.gmra.mxu3 %vm361_vm1, %v357_v50  ;;  %v239_v51 = vld [vmem:[%s1606_s2 + $0x18] sm:$0xf] }
 0x11f   : > { %1100 = vmatpush.msk.msra.mxu1 %vm692_vm3, %v239_v51  ;;  %1132 = vmatpush.msk.msrb.mxu3 %vm692_vm3, %v239_v51 }
 0x120   : > { %v1341_v58 = vpop.f32.mrf.mxu0 }
 0x121   : > { %709 = vmatpush.msra.mxu1 %v238_v52  ;;  %1133 = vmatpush.msrb.mxu3 %v238_v52 }
 0x128   : > { %v1349_v60 = vpop.f32.mrf.mxu0 }
 0x130   : > { %v1352_v63 = vpop.f32.mrf.mxu0 }
 0x131   : > { %v511_v8 = vmul.f32 %v1352_v63, %v1352_v63 }
 0x177   : > { %v313_v61 = vpop.permute.xlu2 %312 }
 0x178   : > { %v358_v62 = vsel %vm339_vm0, %v313_v61, 0.0 }
 0x179   : > { %1097 = vmatmul.msk.f32.gmra.mxu3 %vm361_vm1, %v358_v62  ;;  %v301_v17 = vpop.permute.xlu1 %300 }
 0x17a   : > { %v352_v25 = vsel %vm339_vm0, %v301_v17, 0.0 }
 0x181   : > { %v1355_v6 = vpop.f32.mrf.mxu3  ;;  %v317_v33 = vpop.permute.xlu1 %316 }
 0x182   : > { %v518_v9 = vmul.f32 %v1355_v6, %v1355_v6  ;;  %v360_v39 = vsel %vm339_vm0, %v317_v33, 0.0 }
 0x183   : > { %v1361_v10 = vpop.f32.mrf.mxu0 }
 0x184   : > { %v1363_v11 = vadd.f32 %v518_v9, %v511_v8  ;;  %v512_v12 = vmul.f32 %v1361_v10, %v1361_v10 }
 0x186   : > { %v519_v18 = vadd.f32 %v512_v12, %v505_v14  ;;  %v237_v12 = vld [vmem:[%s1606_s2 + $0x8] sm:$0xff] }
 0x187   : > { %v299_v13 = vpop.permute.xlu0 %298  ;;  %710 = vmatpush.msra.mxu1 %v237_v12  ;;  %1134 = vmatpush.msrb.mxu3 %v237_v12 }
 0x188   : > { %v351_v15 = vsel %vm339_vm0, %v299_v13, 0.0  ;;  %v508_v13 = vmul.f32 %v1339_v57, %v1339_v57 }
 0x189   : > { %1090 = vmatmul.msk.f32.gmra.mxu0 %vm361_vm1, %v351_v15  ;;  %v1371_v16 = vpop.f32.mrf.mxu3 }
 0x18a   : > { %v526_v19 = vmul.f32 %v1371_v16, %v1371_v16 }
 0x18b   : > { %v466_v20 = vpop.f32.mrf.mxu0 }
 0x18c   : > { %v533_v21 = vadd.f32 %v526_v19, %v519_v18  ;;  %v744_v22 = vsel %vm735_vm2, %v466_v20, 0.0  ;;  %v513_v24 = vmul.f32 %v466_v20, %v466_v20 }
 0x18d   : > { %1116 = vmatmul.msk.f32.vlgmr.msra.gmra.mxu2 %vm361_vm1, %v744_v22 }
 0x18e   : > { %v1377_v23 = vmax.f32 %v533_v21, 1e-08  ;;  %v520_v30 = vadd.f32 %v513_v24, %v506_v27 }
 0x18f   : > { %v315_v26 = vpop.permute.xlu0 %314 }
 0x190   : > { %v359_v28 = vsel %vm339_vm0, %v315_v26, 0.0  ;;  %1153 = vrsqrt.f32 %v1377_v23  ;;  %vm554_vm4 = vcmp.eq.f32.partialorder %v1377_v23, inf  ;;  %v557_v20 = vand.u32 2147483648, %v1377_v23 }
 0x191   : > { %1091 = vmatmul.msk.f32.gmra.mxu0 %vm361_vm1, %v352_v25  ;;  %v1385_v29 = vpop.f32.mrf.mxu3  ;;  %1098 = vmatmul.msk.f32.gmra.mxu3 %vm361_vm1, %v359_v28  ;;  %vm556_vm5 = vcmp.eq.f32.partialorder %v1377_v23, 0.0 }
 0x192   : > { %v527_v31 = vmul.f32 %v1385_v29, %v1385_v29 }
 0x193   : > { %v469_v32 = vpop.f32.mrf.mxu0 }
 0x194   : > { %v534_v34 = vadd.f32 %v527_v31, %v520_v30  ;;  %v745_v35 = vsel %vm735_vm2, %v469_v32, 0.0  ;;  %v514_v38 = vmul.f32 %v469_v32, %v469_v32 }
 0x195   : > { %1117 = vmatmul.msk.f32.gmra.mxu2 %vm361_vm1, %v745_v35 }
 0x196   : > { %v1154_v36 = vpop.eup %1153  ;;  %v1392_v37 = vmax.f32 %v534_v34, 1e-08  ;;  %v521_v44 = vadd.f32 %v514_v38, %v507_v41 }
 0x197   : > { %v548_v40 = vmul.f32 %v1154_v36, %v1377_v23 }
 0x198   : > { %1155 = vrsqrt.f32 %v1392_v37  ;;  %vm566_vm6 = vcmp.eq.f32.partialorder %v1392_v37, inf  ;;  %v569_v34 = vand.u32 2147483648, %v1392_v37  ;;  %vm568_vm7 = vcmp.eq.f32.partialorder %v1392_v37, 0.0 }
 0x199   : > { %v1399_v42 = vpop.f32.mrf.mxu3  ;;  %1099 = vmatmul.msk.f32.gmra.mxu3 %vm361_vm1, %v360_v39  ;;  %v549_v43 = vmul.f32 %v1154_v36, %v548_v40 }
 0x19a   : > { %v528_v45 = vmul.f32 %v1399_v42, %v1399_v42 }
 0x19b   : > { %v472_v46 = vpop.f32.mrf.mxu0  ;;  %v550_v47 = vmul.f32 0.5, %v549_v43 }
 0x19c   : > { %v535_v48 = vadd.f32 %v528_v45, %v521_v44  ;;  %v746_v49 = vsel %vm735_vm2, %v472_v46, 0.0  ;;  %v515_v62 = vmul.f32 %v472_v46, %v472_v46 }
 0x19d   : > { %v551_v50 = vsub.f32 1.5, %v550_v47  ;;  %1118 = vmatmul.msk.f32.gmra.mxu2 %vm361_vm1, %v746_v49 }
 0x19e   : > { %v1156_v53 = vpop.eup %1155  ;;  %v542_v61 = vmax.f32 %v535_v48, 1e-08  ;;  %v522_v18 = vadd.f32 %v515_v62, %v508_v13  ;;  %v236_v62 = vld [vmem:[%s1606_s2] sm:$0xff]  ;;  %v509_v13 = vmul.f32 %v1341_v58, %v1341_v58 }
 0x19f   : > { %v552_v8 = vmul.f32 %v1154_v36, %v551_v50  ;;  %v560_v9 = vmul.f32 %v1156_v53, %v1392_v37  ;;  %711 = vmatpush.msra.mxu1 %v236_v62  ;;  %1135 = vmatpush.msrb.mxu3 %v236_v62 }
 0x1a0   : > { %1157 = vrsqrt.f32 %v542_v61  ;;  %vm578_vm8 = vcmp.eq.f32.partialorder %v542_v61, inf  ;;  %v581_v45 = vand.u32 2147483648, %v542_v61  ;;  %vm580_vm9 = vcmp.eq.f32.partialorder %v542_v61, 0.0 }
 0x1a1   : > { %v1418_v14 = vpop.f32.mrf.mxu3  ;;  %v553_v15 = vmul.f32 %v552_v8, %v1377_v23  ;;  %v561_v17 = vmul.f32 %v1156_v53, %v560_v9  ;;  %835 = vmatpush.msrb.mxu1 %v1346_v59 }
 0x1a2   : > { %v529_v19 = vmul.f32 %v1418_v14, %v1418_v14 }
 0x1a3   : > { %v555_v21 = vsel %vm554_vm4, %v1377_v23, %v553_v15  ;;  %v562_v22 = vmul.f32 0.5, %v561_v17 }
 0x1a4   : > { %v536_v24 = vadd.f32 %v529_v19, %v522_v18  ;;  %v558_v25 = vsel %vm556_vm5, %v557_v20, %v555_v21 }
 0x1a5   : > { %638 = vrot.lane.b32.xlu2 %v558_v25, %s1178_s13  ;;  %v563_v26 = vsub.f32 1.5, %v562_v22 }
 0x1a6   : > { %v1158_v27 = vpop.eup %1157  ;;  %v543_v28 = vmax.f32 %v536_v24, 1e-08  ;;  %v510_v24 = vmul.f32 %v1349_v60, %v1349_v60 }
 0x1a7   : > { %v564_v30 = vmul.f32 %v1156_v53, %v563_v26  ;;  %v572_v31 = vmul.f32 %v1158_v27, %v542_v61 }
 0x1a8   : > { %1159 = vrsqrt.f32 %v543_v28  ;;  %vm590_vm10 = vcmp.eq.f32.partialorder %v543_v28, inf  ;;  %v593_v51 = vand.u32 2147483648, %v543_v28  ;;  %vm592_vm11 = vcmp.eq.f32.partialorder %v543_v28, 0.0 }
 0x1a9   : > { %v565_v32 = vmul.f32 %v564_v30, %v1392_v37  ;;  %v573_v33 = vmul.f32 %v1158_v27, %v572_v31 }
 0x1ab   : > { %v567_v23 = vsel %vm566_vm6, %v1392_v37, %v565_v32  ;;  %v574_v35 = vmul.f32 0.5, %v573_v33  ;;  %v749_v32 = vsel %vm735_vm2, %v1355_v6, 0.0  ;;  %vm1000_vm6 = vcmask 130048  }
 0x1ac   : > { %v570_v36 = vsel %vm568_vm7, %v569_v34, %v567_v23  ;;  %vm1008_vm7 = vcmask 146432  }
 0x1ad   : > { %640 = vrot.lane.b32.xlu0 %v570_v36, %s1178_s13  ;;  %v575_v38 = vsub.f32 1.5, %v574_v35 }
 0x1ae   : > { %v1160_v39 = vpop.eup %1159 }
 0x1af   : > { %v576_v40 = vmul.f32 %v1158_v27, %v575_v38  ;;  %v584_v41 = vmul.f32 %v1160_v39, %v543_v28 }
 0x1b1   : > { %v577_v43 = vmul.f32 %v576_v40, %v542_v61  ;;  %v585_v44 = vmul.f32 %v1160_v39, %v584_v41 }
 0x1b3   : > { %v579_v46 = vsel %vm578_vm8, %v542_v61, %v577_v43  ;;  %v586_v47 = vmul.f32 0.5, %v585_v44  ;;  %v750_v43 = vsel %vm735_vm2, %v1371_v16, 0.0 }
 0x1b4   : > { %v582_v48 = vsel %vm580_vm9, %v581_v45, %v579_v46 }
 0x1b5   : > { %642 = vrot.lane.b32.xlu1 %v582_v48, %s1178_s13  ;;  %v587_v49 = vsub.f32 1.5, %v586_v47 }
 0x1b7   : > { %v588_v37 = vmul.f32 %v1160_v39, %v587_v49 }
 0x1b9   : > { %v589_v50 = vmul.f32 %v588_v37, %v543_v28 }
 0x1bb   : > { %v591_v52 = vsel %vm590_vm10, %v543_v28, %v589_v50 }
 0x1bc   : > { %v594_v53 = vsel %vm592_vm11, %v593_v51, %v591_v52 }
 0x1bd   : > { %644 = vrot.lane.b32.xlu2 %v594_v53, %s1178_s13 }
 0x1fc   : > { %v1443_v9 = vpop.f32.mrf.mxu3 }
 0x1fd   : > { %v530_v17 = vmul.f32 %v1443_v9, %v1443_v9 }
 0x1ff   : > { %v639_v61 = vpop.permute.xlu2 %638 }
 0x200   : > { %v660_v8 = vsel %vm659_vm12, %v1228_v0, %v639_v61 }
 0x201   : > { %1101 = vmatmul.msk.f32.vlgmr.msra.gmra.mxu1 %vm670_vm13, %v660_v8 }
 0x206   : > { %v475_v12 = vpop.f32.mrf.mxu0 }
 0x207   : > { %v516_v15 = vmul.f32 %v475_v12, %v475_v12  ;;  %v747_v59 = vsel %vm735_vm2, %v475_v12, 0.0 }
 0x208   : > { %1119 = vmatmul.msk.f32.gmra.mxu2 %vm361_vm1, %v747_v59 }
 0x209   : > { %v523_v18 = vadd.f32 %v516_v15, %v509_v13 }
 0x20b   : > { %v537_v19 = vadd.f32 %v530_v17, %v523_v18 }
 0x20d   : > { %v544_v20 = vmax.f32 %v537_v19, 1e-08 }
 0x20e   : > { %v478_v0 = vpop.f32.mrf.mxu0 }
 0x20f   : > { %v748_v21 = vsel %vm735_vm2, %v478_v0, 0.0  ;;  %1161 = vrsqrt.f32 %v544_v20  ;;  %v517_v22 = vmul.f32 %v478_v0, %v478_v0  ;;  %vm602_vm14 = vcmp.eq.f32.partialorder %v544_v20, inf }
 0x210   : > { %1120 = vmatmul.msk.f32.gmra.mxu2 %vm361_vm1, %v748_v21  ;;  %v605_v47 = vand.u32 2147483648, %v544_v20  ;;  %vm604_vm15 = vcmp.eq.f32.partialorder %v544_v20, 0.0 }
 0x211   : > { %v524_v27 = vadd.f32 %v517_v22, %v510_v24 }
 0x214   : > { %v1455_v25 = vpop.f32.mrf.mxu3 }
 0x215   : > { %v1162_v26 = vpop.eup %1161  ;;  %v531_v28 = vmul.f32 %v1455_v25, %v1455_v25 }
 0x216   : > { %v596_v30 = vmul.f32 %v1162_v26, %v544_v20 }
 0x217   : > { %v538_v31 = vadd.f32 %v531_v28, %v524_v27  ;;  %v645_v17 = vpop.permute.xlu2 %644 }
 0x218   : > { %1121 = vmatmul.msk.f32.gmra.mxu2 %vm361_vm1, %v749_v32  ;;  %v597_v33 = vmul.f32 %v1162_v26, %v596_v30  ;;  %v736_v30 = vsel %vm735_vm2, %v1333_v54, 0.0  ;;  %v755_v54 = vsel %vm735_vm2, %v1455_v25, 0.0  ;;  %v740_v25 = vsel %vm735_vm2, %v1341_v58, 0.0 }
 0x219   : > { %v545_v34 = vmax.f32 %v538_v31, 1e-08  ;;  %v738_v31 = vsel %vm735_vm2, %v1337_v56, 0.0  ;;  %v741_v56 = vsel %vm735_vm2, %v1349_v60, 0.0  ;;  %v742_v32 = vsel %vm735_vm2, %v1352_v63, 0.0 }
 0x21a   : > { %v598_v23 = vmul.f32 0.5, %v597_v33 }
 0x21b   : > { %1163 = vrsqrt.f32 %v545_v34  ;;  %vm614_vm0 = vcmp.eq.f32.partialorder %v545_v34, inf  ;;  %vm616_vm3 = vcmp.eq.f32.partialorder %v545_v34, 0.0 }
 0x21c   : > { %v1462_v35 = vpop.f32.mrf.mxu3  ;;  %v599_v36 = vsub.f32 1.5, %v598_v23 }
 0x21d   : > { %v532_v38 = vmul.f32 %v1462_v35, %v1462_v35 }
 0x21e   : > { %v600_v39 = vmul.f32 %v1162_v26, %v599_v36 }
 0x21f   : > { %v539_v40 = vadd.f32 %v532_v38, %v1363_v11  ;;  %v641_v41 = vpop.permute.xlu0 %640  ;;  %v861_v11 = vpop.f32.mrf.mxu2 }
 0x220   : > { %1122 = vmatmul.msk.f32.gmra.mxu2 %vm361_vm1, %v750_v43  ;;  %v661_v6 = vsel %vm659_vm12, %v1230_v1, %v641_v41  ;;  %v601_v44 = vmul.f32 %v600_v39, %v544_v20  ;;  %v751_v1 = vsel %vm735_vm2, %v1385_v29, 0.0  ;;  %v617_v29 = vand.u32 2147483648, %v545_v34 }
 0x221   : > { %v1164_v45 = vpop.eup %1163  ;;  %v546_v46 = vmax.f32 %v539_v40, 1e-08  ;;  %1102 = vmatmul.msk.f32.gmra.mxu1 %vm670_vm13, %v661_v6 }
 0x222   : > { %v603_v48 = vsel %vm602_vm14, %v544_v20, %v601_v44  ;;  %v608_v49 = vmul.f32 %v1164_v45, %v545_v34  ;;  %v663_v20 = vsel %vm659_vm12, %v1248_v4, %v645_v17  ;;  %v754_v4 = vsel %vm735_vm2, %v1443_v9, 0.0 }
 0x223   : > { %v606_v37 = vsel %vm604_vm15, %v605_v47, %v603_v48  ;;  %1165 = vrsqrt.f32 %v546_v46  ;;  %vm626_vm4 = vcmp.eq.f32.partialorder %v546_v46, inf  ;;  %v629_v24 = vand.u32 2147483648, %v546_v46 }
 0x224   : > { %646 = vrot.lane.b32.xlu0 %v606_v37, %s1178_s13  ;;  %v609_v16 = vmul.f32 %v1164_v45, %v608_v49  ;;  %vm628_vm5 = vcmp.eq.f32.partialorder %v546_v46, 0.0  ;;  %v756_v9 = vsel %vm735_vm2, %v1462_v35, 0.0 }
 0x226   : > { %v610_v50 = vmul.f32 0.5, %v609_v16 }
 0x227   : > { %v643_v51 = vpop.permute.xlu1 %642  ;;  %v864_v12 = vpop.f32.mrf.mxu2 }
 0x228   : > { %1123 = vmatmul.msk.f32.gmra.mxu2 %vm361_vm1, %v751_v1  ;;  %v662_v52 = vsel %vm659_vm12, %v1236_v2, %v643_v51  ;;  %v611_v53 = vsub.f32 1.5, %v610_v50  ;;  %v752_v2 = vsel %vm735_vm2, %v1399_v42, 0.0  ;;  %v753_v42 = vsel %vm735_vm2, %v1418_v14, 0.0 }
 0x229   : > { %v1166_v62 = vpop.eup %1165  ;;  %1103 = vmatmul.msk.f32.gmra.mxu1 %vm670_vm13, %v662_v52  ;;  %v737_v14 = vsel %vm735_vm2, %v1335_v55, 0.0  ;;  %v739_v55 = vsel %vm735_vm2, %v1339_v57, 0.0  ;;  %v743_v57 = vsel %vm735_vm2, %v1361_v10, 0.0  ;;  %vm992_vm2 = vcmask 113664  }
 0x22a   : > { %v612_v61 = vmul.f32 %v1164_v45, %v611_v53  ;;  %v620_v8 = vmul.f32 %v1166_v62, %v546_v46 }
 0x22c   : > { %939 = vrot.lane.b32.xlu0 %v864_v12, %s1179_s16  ;;  %v613_v13 = vmul.f32 %v612_v61, %v545_v34  ;;  %v621_v15 = vmul.f32 %v1166_v62, %v620_v8  ;;  %v1152_v8 = vld [vmem:[%s1607_s3] ss:$0 sm:$0xff] }
 0x22e   : > { %v615_v59 = vsel %vm614_vm0, %v545_v34, %v613_v13  ;;  %v622_v18 = vmul.f32 0.5, %v621_v15 }
 0x22f   : > { %v618_v19 = vsel %vm616_vm3, %v617_v29, %v615_v59  ;;  %v867_v27 = vpop.f32.mrf.mxu2 }
 0x230   : > { %1124 = vmatmul.msk.f32.gmra.mxu2 %vm361_vm1, %v752_v2  ;;  %648 = vrot.lane.b32.xlu1 %v618_v19, %s1178_s13  ;;  %v623_v0 = vsub.f32 1.5, %v622_v18 }
 0x231   : > { %1104 = vmatmul.msk.f32.gmra.mxu1 %vm670_vm13, %v663_v20 }
 0x232   : > { %v624_v21 = vmul.f32 %v1166_v62, %v623_v0 }
 0x234   : > { %v625_v22 = vmul.f32 %v624_v21, %v546_v46 }
 0x236   : > { %v627_v26 = vsel %vm626_vm4, %v546_v46, %v625_v22 }
 0x237   : > { %v630_v28 = vsel %vm628_vm5, %v629_v24, %v627_v26 }
 0x238   : > { %1125 = vmatmul.msk.f32.gmra.mxu2 %vm361_vm1, %v753_v42  ;;  %650 = vrot.lane.b32.xlu2 %v630_v28, %s1178_s13 }
 0x239   : > { %1108 = vmatmul.msk.f32.vlgmr.msrb.gmra.mxu1 %vm361_vm1, %v736_v30  ;;  %941 = vrot.lane.b32.xlu1 %v867_v27, %s1179_s16 }
 0x240   : > { %937 = vrot.lane.b32.xlu2 %v861_v11, %s1179_s16  ;;  %1126 = vmatmul.msk.f32.gmra.mxu2 %vm361_vm1, %v754_v4 }
 0x241   : > { %1109 = vmatmul.msk.f32.gmra.mxu1 %vm361_vm1, %v737_v14 }
 0x248   : > { %1127 = vmatmul.msk.f32.gmra.mxu2 %vm361_vm1, %v755_v54 }
 0x249   : > { %1110 = vmatmul.msk.f32.gmra.mxu1 %vm361_vm1, %v738_v31 }
 0x250   : > { %1128 = vmatmul.msk.f32.gmra.mxu2 %vm361_vm1, %v756_v9 }
 0x251   : > { %1111 = vmatmul.msk.f32.gmra.mxu1 %vm361_vm1, %v739_v55 }
 0x259   : > { %1112 = vmatmul.msk.f32.gmra.mxu1 %vm361_vm1, %v740_v25 }
 0x261   : > { %1113 = vmatmul.msk.f32.gmra.mxu1 %vm361_vm1, %v741_v56 }
 0x269   : > { %1114 = vmatmul.msk.f32.gmra.mxu1 %vm361_vm1, %v742_v32 }
 0x271   : > { %1115 = vmatmul.msk.f32.gmra.mxu1 %vm361_vm1, %v743_v57  ;;  %vm984_vm1 = vcmask 97280  }
 0x27e   : > { %v1529_v34 = vpop.f32.mrf.mxu1 }
 0x28b   : > { %v870_v33 = vpop.f32.mrf.mxu2 }
 0x28c   : > { %943 = vrot.lane.b32.xlu2 %v870_v33, %s1179_s16 }
 0x292   : > { %v651_v40 = vpop.permute.xlu2 %650 }
 0x293   : > { %v873_v58 = vpop.f32.mrf.mxu2  ;;  %v666_v41 = vsel %vm659_vm12, %v1240_v3, %v651_v40 }
 0x294   : > { %945 = vrot.lane.b32.xlu0 %v873_v58, %s1179_s16 }
 0x296   : > { %v647_v60 = vpop.permute.xlu0 %646 }
 0x297   : > { %v664_v23 = vsel %vm659_vm12, %v1256_v5, %v647_v60 }
 0x298   : > { %1105 = vmatmul.msk.f32.vlgmr.msrb.gmra.mxu3 %vm670_vm13, %v664_v23 }
 0x29a   : > { %v938_v51 = vpop.permute.xlu2 %937 }
 0x29b   : > { %v876_v63 = vpop.f32.mrf.mxu2 }
 0x29c   : > { %947 = vrot.lane.b32.xlu1 %v876_v63, %s1179_s16 }
 0x29e   : > { %v1535_v10 = vpop.f32.mrf.mxu1  ;;  %v940_v12 = vpop.permute.xlu0 %939 }
 0x29f   : > { %v717_v20 = vadd.f32 %v1152_v8, %v1535_v10 }
 0x2a2   : > { %v649_v35 = vpop.permute.xlu1 %648 }
 0x2a3   : > { %v879_v36 = vpop.f32.mrf.mxu2  ;;  %v665_v38 = vsel %vm659_vm12, %v1271_v7, %v649_v35 }
 0x2a4   : > { %963 = vrot.lane.b32.xlu2 %v879_v36, %s1180_s17  ;;  %1106 = vmatmul.msk.f32.gmra.mxu3 %vm670_vm13, %v665_v38  ;;  %v714_v36 = vadd.f32 %v1152_v8, %v1529_v34 }
 0x2a6   : > { %v719_v39 = vpop.f32.mrf.mxu1 }
 0x2a7   : > { %v720_v13 = vadd.f32 %v1152_v8, %v719_v39 }
 0x2ab   : > { %v882_v5 = vpop.f32.mrf.mxu2  ;;  %v942_v53 = vpop.permute.xlu1 %941 }
 0x2ac   : > { %965 = vrot.lane.b32.xlu0 %v882_v5, %s1180_s17  ;;  %1107 = vmatmul.msk.f32.gmra.mxu3 %vm670_vm13, %v666_v41 }
 0x2ae   : > { %v1545_v43 = vpop.f32.mrf.mxu1 }
 0x2af   : > { %v723_v54 = vadd.f32 %v1152_v8, %v1545_v43 }
 0x2b3   : > { %v885_v6 = vpop.f32.mrf.mxu2 }
 0x2b4   : > { %967 = vrot.lane.b32.xlu1 %v885_v6, %s1180_s17 }
 0x2b6   : > { %v837_v7 = vpop.f32.mrf.mxu1 }
 0x2b7   : > { %907 = vrot.lane.b32.xlu0 %v837_v7, %s1181_s19 }
 0x2bb   : > { %v888_v44 = vpop.f32.mrf.mxu2 }
 0x2bc   : > { %969 = vrot.lane.b32.xlu2 %v888_v44, %s1180_s17 }
 0x2be   : > { %v840_v45 = vpop.f32.mrf.mxu1 }
 0x2bf   : > { %909 = vrot.lane.b32.xlu1 %v840_v45, %s1181_s19 }
 0x2c3   : > { %v891_v47 = vpop.f32.mrf.mxu2 }
 0x2c6   : > { %v843_v46 = vpop.f32.mrf.mxu1 }
 0x2c7   : > { %911 = vrot.lane.b32.xlu2 %v843_v46, %s1181_s19 }
 0x2cb   : > { %v894_v49 = vpop.f32.mrf.mxu2 }
 0x2ce   : > { %v846_v3 = vpop.f32.mrf.mxu1 }
 0x2cf   : > { %913 = vrot.lane.b32.xlu0 %v846_v3, %s1181_s19 }
 0x2d3   : > { %v897_v37 = vpop.f32.mrf.mxu2 }
 0x2d6   : > { %v849_v48 = vpop.f32.mrf.mxu1 }
 0x2d7   : > { %915 = vrot.lane.b32.xlu1 %v849_v48, %s1181_s19 }
 0x2de   : > { %v852_v11 = vpop.f32.mrf.mxu1 }
 0x2df   : > { %917 = vrot.lane.b32.xlu2 %v852_v11, %s1181_s19 }
 0x2e6   : > { %v855_v16 = vpop.f32.mrf.mxu1  ;;  %v944_v1 = vpop.permute.xlu2 %943 }
 0x2e7   : > { %919 = vrot.lane.b32.xlu0 %v855_v16, %s1181_s19  ;;  %975 = vrot.lane.b32.xlu2 %v897_v37, %s1180_s17 }
 0x2ee   : > { %v858_v50 = vpop.f32.mrf.mxu1 }
 0x2ef   : > { %971 = vrot.lane.b32.xlu0 %v891_v47, %s1180_s17  ;;  %935 = vrot.lane.b32.xlu1 %v858_v50, %s1179_s16 }
 0x2f7   : > { %973 = vrot.lane.b32.xlu1 %v894_v49, %s1180_s17 }
 0x2fe   : > { %v964_v52 = vpop.permute.xlu2 %963 }
 0x306   : > { %v946_v18 = vpop.permute.xlu0 %945 }
 0x30e   : > { %v948_v61 = vpop.permute.xlu1 %947 }
 0x316   : > { %v970_v62 = vpop.permute.xlu2 %969 }
 0x31b   : > { %v725_v19 = vpop.f32.mrf.mxu3 }
 0x31c   : > { %v726_v63 = vadd.f32 %v1152_v8, %v725_v19 }
 0x31e   : > { %v966_v0 = vpop.permute.xlu0 %965 }
 0x321   : > { %v912_v15 = vpop.permute.xlu2 %911 }
 0x322   : > { %v987_v17 = vsel %vm984_vm1, %v720_v13, %v912_v15 }
 0x323   : > { %v995_v59 = vsel %vm992_vm2, %v987_v17, %v940_v12 }
 0x326   : > { %v968_v29 = vpop.permute.xlu1 %967 }
 0x327   : > { %v1003_v2 = vsel %vm1000_vm6, %v995_v59, %v968_v29  ;;  %v728_v27 = vpop.f32.mrf.mxu3 }
 0x328   : > { %1011 = vst.msk [vmem:[%s1562_s26 + $0x10] sm:$0xff] %vm1008_vm7, %v1003_v2  ;;  %v729_v42 = vadd.f32 %v1152_v8, %v728_v27 }
 0x329   : > { %v908_v28 = vpop.permute.xlu0 %907 }
 0x32a   : > { %v985_v38 = vsel %vm984_vm1, %v714_v36, %v908_v28 }
 0x32f   : > { %v731_v56 = vpop.f32.mrf.mxu3 }
 0x330   : > { %v732_v32 = vadd.f32 %v1152_v8, %v731_v56 }
 0x331   : > { %v910_v21 = vpop.permute.xlu1 %909 }
 0x332   : > { %v986_v22 = vsel %vm984_vm1, %v717_v20, %v910_v21 }
 0x333   : > { %v994_v24 = vsel %vm992_vm2, %v986_v22, %v938_v51 }
 0x334   : > { %v1002_v26 = vsel %vm1000_vm6, %v994_v24, %v966_v0 }
 0x335   : > { %1010 = vst.msk [vmem:[%s1562_s26 + $0x8] sm:$0xff] %vm1008_vm7, %v1002_v26 }
 0x339   : > { %v918_v30 = vpop.permute.xlu2 %917 }
 0x33a   : > { %v990_v4 = vsel %vm984_vm1, %v729_v42, %v918_v30 }
 0x33b   : > { %v998_v14 = vsel %vm992_vm2, %v990_v4, %v946_v18 }
 0x341   : > { %v914_v31 = vpop.permute.xlu0 %913  ;;  %v976_v60 = vpop.permute.xlu2 %975 }
 0x342   : > { %v988_v9 = vsel %vm984_vm1, %v723_v54, %v914_v31 }
 0x343   : > { %v996_v55 = vsel %vm992_vm2, %v988_v9, %v942_v53 }
 0x344   : > { %v1004_v25 = vsel %vm1000_vm6, %v996_v55, %v970_v62 }
 0x345   : > { %1012 = vst.msk [vmem:[%s1562_s26 + $0x18] sm:$0xff] %vm1008_vm7, %v1004_v25 }
 0x349   : > { %v916_v57 = vpop.permute.xlu1 %915 }
 0x34a   : > { %v989_v35 = vsel %vm984_vm1, %v726_v63, %v916_v57 }
 0x34b   : > { %v997_v40 = vsel %vm992_vm2, %v989_v35, %v944_v1 }
 0x359   : > { %v920_v33 = vpop.permute.xlu0 %919 }
 0x35a   : > { %v991_v58 = vsel %vm984_vm1, %v732_v32, %v920_v33 }
 0x35b   : > { %v999_v23 = vsel %vm992_vm2, %v991_v58, %v948_v61 }
 0x35c   : > { %v1007_v10 = vsel %vm1000_vm6, %v999_v23, %v976_v60 }
 0x35d   : > { %1015 = vst.msk [vmem:[%s1562_s26 + $0x30] sm:$0xff] %vm1008_vm7, %v1007_v10 }
 0x361   : > { %v936_v39 = vpop.permute.xlu1 %935  ;;  %v972_v5 = vpop.permute.xlu0 %971 }
 0x362   : > { %v993_v41 = vsel %vm992_vm2, %v985_v38, %v936_v39  ;;  %v1005_v43 = vsel %vm1000_vm6, %v997_v40, %v972_v5 }
 0x363   : > { %v1001_v6 = vsel %vm1000_vm6, %v993_v41, %v964_v52  ;;  %1013 = vst.msk [vmem:[%s1562_s26 + $0x20] sm:$0xff] %vm1008_vm7, %v1005_v43 }
 0x364   : > { %1009 = vst.msk [vmem:[%s1562_s26] sm:$0xff] %vm1008_vm7, %v1001_v6 }
 0x369   : > { %v974_v7 = vpop.permute.xlu1 %973 }
 0x36a   : > { %v1006_v44 = vsel %vm1000_vm6, %v998_v14, %v974_v7 }
 0x36b   : > { %1014 = vst.msk [vmem:[%s1562_s26 + $0x28] sm:$0xff] %vm1008_vm7, %v1006_v44 }
 0x36c PF: > { %s15_s18 = sadd.s32 1, %s1173_s18  }
 0x36d   : > { %p12_p4 = scmp.ge.s32.totalorder %s15_s18, 4  }
 0x36f   :  { %14 = sbr.rel (!%p12_p4) target bundleno = 1 (0x1), region = 70 }

// kernel: model_apply.17
= control target key start
LH: loop header
LB: loop body
LE: loop exit
PB: predicated region body
PF: predicated region fallthrough
CT: control target
= control target key end

     0   :  { %s192_s16 = smov 124   ;;  %s193_s17 = smov 120   ;;  %vm75_vm0 = vcmask 31744   ;;  %vm82_vm1 = vcmask 64512   ;;  %vm18_vm2 = vcmask 130048   ;;  %vm160_vm3 = vcmask 195584   ;;  %s251_s0 = inlined_call_operand.vmem [shape: f32[16,28], index: 0, kind: input, shape index: {}]   ;;  %s252_s2 = inlined_call_operand.vmem [shape: f32[8,12], index: 2, kind: input, shape index: {}]   ;;  %s253_s1 = inlined_call_operand.vmem [shape: f32[16,24], index: 1, kind: input, shape index: {}]   ;;  %s254_s3 = inlined_call_operand.vmem [shape: f32[16,60], index: 3, kind: output, shape index: {}]  }
   0x1   :  { %v15_v0 = vld [vmem:[%s251_s0 + $0x8] sm:$0xff]  ;;  %v14_v1 = vld [vmem:[%s251_s0] sm:$0xff]  ;;  %s194_s18 = smov 112   ;;  %s196_s23 = smov 36   ;;  %vm163_vm4 = vcmask 293888   ;;  %vm166_vm5 = vcmask 392192  }
   0x2   :  { %51 = vrot.lane.b32.xlu1 %v15_v0, %s192_s16  ;;  %49 = vrot.lane.b32.xlu0 %v14_v1, %s192_s16  ;;  %v48_v6 = vld [vmem:[%s252_s2] sm:$0xff]  ;;  %v17_v11 = vld [vmem:[%s253_s1 + $0x8] sm:$0xff]  ;;  %s197_s24 = smov 48   ;;  %vm169_vm6 = vcmask 490496  }
   0x3   :  { %184 = vmatpush.msra.mxu2 %v48_v6  ;;  %116 = vmatpush.msra.mxu1 %v48_v6  ;;  %v16_v12 = vld [vmem:[%s253_s1] sm:$0xff]  ;;  %s195_s1 = smov 24  }
   0x4   :  { %185 = vmatpush.msra.mxu3 %v48_v6  ;;  %39 = vmatpush.msra.mxu0 %v17_v11 }
   0x6   :  { %40 = vmatpush.msra.mxu0 %v16_v12 }
   0x7   :  { %176 = vmatmul.msk.f32.vlgmr.msra.gmra.mxu0 %vm18_vm2, %v14_v1 }
   0xa   :  { %53 = vrot.lane.b32.xlu0 %v14_v1, %s193_s17  ;;  %55 = vrot.lane.b32.xlu1 %v15_v0, %s193_s17 }
   0xf   :  { %177 = vmatmul.msk.f32.gmra.mxu0 %vm18_vm2, %v15_v0 }
  0x12   :  { %57 = vrot.lane.b32.xlu0 %v14_v1, %s194_s18 }
  0x1a   :  { %59 = vrot.lane.b32.xlu0 %v15_v0, %s194_s18 }
  0x74   :  { %v52_v2 = vpop.permute.xlu1 %51  ;;  %v50_v3 = vpop.permute.xlu0 %49 }
  0x75   :  { %63 = vrot.lane.b32.xlu1 %v52_v2, %s194_s18  ;;  %61 = vrot.lane.b32.xlu2 %v50_v3, %s194_s18 }
  0x7c   :  { %v54_v4 = vpop.permute.xlu0 %53  ;;  %v56_v5 = vpop.permute.xlu1 %55 }
  0x7d   :  { %65 = vrot.lane.b32.xlu2 %v54_v4, %s194_s18 }
  0x84   :  { %v58_v7 = vpop.permute.xlu0 %57  ;;  %v42_v29 = vpop.f32.mrf.mxu0 }
  0x85   :  { %67 = vrot.lane.b32.xlu2 %v56_v5, %s194_s18  ;;  %v76_v8 = vsel %vm75_vm0, %v58_v7, 0.0 }
  0x86   :  { %178 = vmatmul.msk.f32.vlgmr.msra.gmra.mxu1 %vm82_vm1, %v76_v8 }
  0x8c   :  { %v60_v9 = vpop.permute.xlu0 %59  ;;  %v45_v35 = vpop.f32.mrf.mxu0 }
  0x8d   :  { %v77_v10 = vsel %vm75_vm0, %v60_v9, 0.0 }
  0x8e   :  { %179 = vmatmul.msk.f32.gmra.mxu1 %vm82_vm1, %v77_v10 }
  0xcf   :  { %v62_v13 = vpop.permute.xlu2 %61 }
  0xd0   :  { %v78_v14 = vsel %vm75_vm0, %v62_v13, 0.0 }
  0xd1   :  { %180 = vmatmul.msk.f32.vlgmr.msra.gmra.mxu2 %vm82_vm1, %v78_v14 }
  0xd7   :  { %v66_v15 = vpop.permute.xlu2 %65 }
  0xd8   :  { %v80_v16 = vsel %vm75_vm0, %v66_v15, 0.0 }
  0xd9   :  { %182 = vmatmul.msk.f32.vlgmr.msra.gmra.mxu3 %vm82_vm1, %v80_v16 }
  0xdf   :  { %v68_v17 = vpop.permute.xlu2 %67 }
  0xe0   :  { %v81_v18 = vsel %vm75_vm0, %v68_v17, 0.0 }
  0xe1   :  { %183 = vmatmul.msk.f32.gmra.mxu3 %vm82_vm1, %v81_v18 }
  0xe7   :  { %v64_v19 = vpop.permute.xlu1 %63 }
  0xe8   :  { %v79_v20 = vsel %vm75_vm0, %v64_v19, 0.0 }
  0xe9   :  { %181 = vmatmul.msk.f32.gmra.mxu2 %vm82_vm1, %v79_v20 }
 0x103   :  { %v118_v21 = vpop.f32.mrf.mxu1 }
 0x104   :  { %138 = vrot.lane.b32.xlu1 %v118_v21, %s195_s1 }
 0x10b   :  { %v121_v22 = vpop.f32.mrf.mxu1 }
 0x10c   :  { %140 = vrot.lane.b32.xlu2 %v121_v22, %s195_s1 }
 0x154   :  { %v124_v23 = vpop.f32.mrf.mxu2 }
 0x155   :  { %146 = vrot.lane.b32.xlu0 %v124_v23, %s196_s23 }
 0x15c   :  { %v130_v24 = vpop.f32.mrf.mxu3 }
 0x15d   :  { %154 = vrot.lane.b32.xlu2 %v130_v24, %s197_s24 }
 0x164   :  { %v133_v25 = vpop.f32.mrf.mxu3 }
 0x165   :  { %156 = vrot.lane.b32.xlu0 %v133_v25, %s197_s24 }
 0x166   :  { %v141_v27 = vpop.permute.xlu2 %140 }
 0x167   :  { %v162_v37 = vsel %vm160_vm3, %v45_v35, %v141_v27 }
 0x16c   :  { %v127_v26 = vpop.f32.mrf.mxu2 }
 0x16d   :  { %148 = vrot.lane.b32.xlu1 %v127_v26, %s196_s23 }
 0x176   :  { %v139_v28 = vpop.permute.xlu1 %138 }
 0x177   :  { %v161_v30 = vsel %vm160_vm3, %v42_v29, %v139_v28 }
 0x1b7   :  { %v155_v32 = vpop.permute.xlu2 %154 }
 0x1c7   :  { %v147_v31 = vpop.permute.xlu0 %146 }
 0x1c8   :  { %v164_v33 = vsel %vm163_vm4, %v161_v30, %v147_v31 }
 0x1c9   :  { %v167_v34 = vsel %vm166_vm5, %v164_v33, %v155_v32 }
 0x1ca   :  { %170 = vst.msk [vmem:[%s254_s3] sm:$0xff] %vm169_vm6, %v167_v34 }
 0x1d7   :  { %v157_v36 = vpop.permute.xlu0 %156 }
 0x1df   :  { %v149_v38 = vpop.permute.xlu1 %148 }
 0x1e0   :  { %v165_v39 = vsel %vm163_vm4, %v162_v37, %v149_v38 }
 0x1e1   :  { %v168_v40 = vsel %vm166_vm5, %v165_v39, %v157_v36 }
 0x1e2   :  { %171 = vst.msk [vmem:[%s254_s3 + $0x8] sm:$0xff] %vm169_vm6, %v168_v40 }

// kernel: mul.24
= control target key start
LH: loop header
LB: loop body
LE: loop exit
PB: predicated region body
PF: predicated region fallthrough
CT: control target
= control target key end

     0   :  { %s320_s0 = inlined_call_operand.vmem [shape: f32[112,8], index: 0, kind: input, shape index: {}]   ;;  %s321_s1 = inlined_call_operand.vmem [shape: f32[112,8], index: 1, kind: input, shape index: {}]   ;;  %s322_s2 = inlined_call_operand.vmem [shape: f32[112,8], index: 2, kind: output, shape index: {}]  }
   0x1   :  { %v3_v0 = vld [vmem:[%s320_s0] sm:$0xff]  ;;  %v140_v2 = vld [vmem:[%s320_s0 + $0x8] sm:$0xff]  ;;  %v143_v5 = vld [vmem:[%s320_s0 + $0x10] sm:$0xff] }
   0x2   :  { %v4_v1 = vld [vmem:[%s321_s1] sm:$0xff]  ;;  %v141_v4 = vld [vmem:[%s321_s1 + $0x8] sm:$0xff]  ;;  %v144_v6 = vld [vmem:[%s321_s1 + $0x10] sm:$0xff] }
   0x3   :  { %v7_v3 = vmul.f32 %v4_v1, %v3_v0  ;;  %v16_v7 = vmul.f32 %v141_v4, %v140_v2  ;;  %v26_v8 = vmul.f32 %v144_v6, %v143_v5  ;;  %v146_v9 = vld [vmem:[%s320_s0 + $0x18] sm:$0xff]  ;;  %v149_v11 = vld [vmem:[%s320_s0 + $0x20] sm:$0xff]  ;;  %v152_v14 = vld [vmem:[%s320_s0 + $0x28] sm:$0xff] }
   0x4   :  { %v147_v10 = vld [vmem:[%s321_s1 + $0x18] sm:$0xff]  ;;  %v150_v13 = vld [vmem:[%s321_s1 + $0x20] sm:$0xff]  ;;  %v153_v15 = vld [vmem:[%s321_s1 + $0x28] sm:$0xff] }
   0x5   :  { %9 = vst [vmem:[%s322_s2] sm:$0xff] %v7_v3  ;;  %v36_v12 = vmul.f32 %v147_v10, %v146_v9  ;;  %v46_v16 = vmul.f32 %v150_v13, %v149_v11  ;;  %v56_v17 = vmul.f32 %v153_v15, %v152_v14  ;;  %v155_v18 = vld [vmem:[%s320_s0 + $0x30] sm:$0xff]  ;;  %v158_v20 = vld [vmem:[%s320_s0 + $0x38] sm:$0xff]  ;;  %v161_v23 = vld [vmem:[%s320_s0 + $0x40] sm:$0xff] }
   0x6   :  { %142 = vst [vmem:[%s322_s2 + $0x8] sm:$0xff] %v16_v7  ;;  %v156_v19 = vld [vmem:[%s321_s1 + $0x30] sm:$0xff]  ;;  %v159_v22 = vld [vmem:[%s321_s1 + $0x38] sm:$0xff]  ;;  %v162_v24 = vld [vmem:[%s321_s1 + $0x40] sm:$0xff] }
   0x7   :  { %145 = vst [vmem:[%s322_s2 + $0x10] sm:$0xff] %v26_v8  ;;  %v66_v21 = vmul.f32 %v156_v19, %v155_v18  ;;  %v76_v25 = vmul.f32 %v159_v22, %v158_v20  ;;  %v86_v26 = vmul.f32 %v162_v24, %v161_v23  ;;  %v164_v27 = vld [vmem:[%s320_s0 + $0x48] sm:$0xff]  ;;  %v167_v29 = vld [vmem:[%s320_s0 + $0x50] sm:$0xff]  ;;  %v170_v32 = vld [vmem:[%s320_s0 + $0x58] sm:$0xff] }
   0x8   :  { %148 = vst [vmem:[%s322_s2 + $0x18] sm:$0xff] %v36_v12  ;;  %v165_v28 = vld [vmem:[%s321_s1 + $0x48] sm:$0xff]  ;;  %v168_v31 = vld [vmem:[%s321_s1 + $0x50] sm:$0xff]  ;;  %v171_v33 = vld [vmem:[%s321_s1 + $0x58] sm:$0xff] }
   0x9   :  { %151 = vst [vmem:[%s322_s2 + $0x20] sm:$0xff] %v46_v16  ;;  %v96_v30 = vmul.f32 %v165_v28, %v164_v27  ;;  %v106_v34 = vmul.f32 %v168_v31, %v167_v29  ;;  %v116_v35 = vmul.f32 %v171_v33, %v170_v32  ;;  %v173_v36 = vld [vmem:[%s320_s0 + $0x60] sm:$0xff]  ;;  %v176_v38 = vld [vmem:[%s320_s0 + $0x68] sm:$0xff] }
   0xa   :  { %154 = vst [vmem:[%s322_s2 + $0x28] sm:$0xff] %v56_v17  ;;  %v174_v37 = vld [vmem:[%s321_s1 + $0x60] sm:$0xff]  ;;  %v177_v40 = vld [vmem:[%s321_s1 + $0x68] sm:$0xff] }
   0xb   :  { %157 = vst [vmem:[%s322_s2 + $0x30] sm:$0xff] %v66_v21  ;;  %v126_v39 = vmul.f32 %v174_v37, %v173_v36  ;;  %v136_v41 = vmul.f32 %v177_v40, %v176_v38 }
   0xc   :  { %160 = vst [vmem:[%s322_s2 + $0x38] sm:$0xff] %v76_v25 }
   0xd   :  { %163 = vst [vmem:[%s322_s2 + $0x40] sm:$0xff] %v86_v26 }
   0xe   :  { %166 = vst [vmem:[%s322_s2 + $0x48] sm:$0xff] %v96_v30 }
   0xf   :  { %169 = vst [vmem:[%s322_s2 + $0x50] sm:$0xff] %v106_v34 }
  0x10   :  { %172 = vst [vmem:[%s322_s2 + $0x58] sm:$0xff] %v116_v35 }
  0x11   :  { %175 = vst [vmem:[%s322_s2 + $0x60] sm:$0xff] %v126_v39 }
  0x12   :  { %178 = vst [vmem:[%s322_s2 + $0x68] sm:$0xff] %v136_v41 }

// kernel: model_apply.18
= control target key start
LH: loop header
LB: loop body
LE: loop exit
PB: predicated region body
PF: predicated region fallthrough
CT: control target
= control target key end

     0   :  { %s764_s12 = smov 0   ;;  %s953_s0 = inlined_call_operand.vmem [shape: f32[112,18], index: 0, kind: input, shape index: {}]   ;;  %s954_s1 = inlined_call_operand.vmem [shape: f32[12,12], index: 1, kind: input, shape index: {}]   ;;  %s955_s2 = inlined_call_operand.vmem [shape: f32[8,4], index: 2, kind: input, shape index: {}]   ;;  %s956_s3 = inlined_call_operand.vmem [shape: f32[112,24], index: 3, kind: output, shape index: {}]  }
   0x1 LB: > { %s676_s13 = sadd.s32 4294967295, %s736_s12   ;;  %p680_p0 = scmp.ge.s32.totalorder %s736_s12, 1  ;;  %s736_s12 = sphi %s764_s12, %s13_s12  }
   0x2   : > { %p138_p1 = scmp.lt.s32.totalorder %s736_s12, 3 }
   0x4   : > { %p139_p2 = pnand %p680_p0, %p138_p1 }
   0x5   : > { %s162_s14 = smul.u32 (!%p139_p2), 7, %s676_s13  ;;  %s738_s19 = smov (!%p139_p2), 126  }
   0x6   : > { %142 = sbr.rel (%p139_p2) target bundleno = 634 (0x27a), region = 32  ;;  %s739_s20 = smov (!%p139_p2), 124  }
   0x7   : > { %p163_p3 = scmp.lt.s32.totalorder (!%p139_p2), %s162_s14, 13  ;;  %s740_s21 = smov (!%p139_p2), 116  }
   0x8   : > { %s741_s24 = smov (!%p139_p2), 12   ;;  %s742_s29 = smov (!%p139_p2), 16  }
   0x9   : > { %s743_s30 = smov (!%p139_p2), 20  }
   0xb   : > { %s958_s14 = smov (!%p163_p3, %s162_s14), 13  ;;  %v247_v19 = vld [vmem:[%s955_s2] sm:$0xff]  ;;  %vm339_vm0 = vcmask 15360   ;;  %vm361_vm1 = vcmask 64512   ;;  %v182_v63 = vld [vmem:[%s954_s1 + $0x8] sm:$0xf] }
   0xc   : > { %s681_s15 = sshll.u32 %s958_s14, 3  ;;  %714 = vmatpush.msra.mxu2 %v247_v19  ;;  %440 = vmatpush.msra.mxu1 %v247_v19  ;;  %vm205_vm2 = vcmask 1043456   ;;  %vm183_vm3 = vcmask 97280   ;;  %vm596_vm4 = vcmask 130048   ;;  %vm604_vm5 = vcmask 162816  }
   0xd   : > { %s166_s18 = scalar_lea.vmem %s953_s0, %s681_s15  ;;  %715 = vmatpush.msra.mxu3 %v247_v19  ;;  %683 = vmatpush.msk.msra.mxu0 %vm205_vm2, %v182_v63  ;;  %s916_s6 = scalar_lea.vmem %s956_s3, %s681_s15  ;;  %vm612_vm6 = vcmask 195584  }
   0xe   : > { %v780_v0 = vld [vmem:[%s166_s18] sm:$0xff]  ;;  %v782_v1 = vld [vmem:[%s166_s18 + $0x8] sm:$0xff]  ;;  %v786_v2 = vld [vmem:[%s166_s18 + $0x10] sm:$0xff] }
   0xf   : > { %248 = vrot.lane.b32.xlu0 %v780_v0, %s738_s19  ;;  %250 = vrot.lane.b32.xlu1 %v782_v1, %s738_s19  ;;  %v792_v3 = vld [vmem:[%s166_s18 + $0x18] sm:$0xff]  ;;  %v796_v4 = vld [vmem:[%s166_s18 + $0x20] sm:$0xff] }
  0x10   : > { %252 = vrot.lane.b32.xlu2 %v786_v2, %s738_s19  ;;  %v799_v5 = vld [vmem:[%s166_s18 + $0x28] sm:$0xff]  ;;  %v807_v7 = vld [vmem:[%s166_s18 + $0x30] sm:$0xff] }
  0x17   : > { %262 = vrot.lane.b32.xlu0 %v780_v0, %s739_s20  ;;  %264 = vrot.lane.b32.xlu1 %v782_v1, %s739_s20 }
  0x18   : > { %266 = vrot.lane.b32.xlu2 %v786_v2, %s739_s20 }
  0x1f   : > { %268 = vrot.lane.b32.xlu1 %v792_v3, %s739_s20  ;;  %254 = vrot.lane.b32.xlu0 %v792_v3, %s738_s19 }
  0x20   : > { %256 = vrot.lane.b32.xlu2 %v796_v4, %s738_s19 }
  0x27   : > { %270 = vrot.lane.b32.xlu0 %v796_v4, %s739_s20  ;;  %272 = vrot.lane.b32.xlu1 %v799_v5, %s739_s20 }
  0x28   : > { %258 = vrot.lane.b32.xlu2 %v799_v5, %s738_s19 }
  0x30   : > { %276 = vrot.lane.b32.xlu2 %v780_v0, %s740_s21 }
  0x6a   : > { %v253_v11 = vpop.permute.xlu2 %252 }
  0x72   : > { %v267_v12 = vpop.permute.xlu2 %266 }
  0x7a   : > { %v257_v14 = vpop.permute.xlu2 %256 }
  0x81   : > { %v249_v6 = vpop.permute.xlu0 %248  ;;  %v251_v9 = vpop.permute.xlu1 %250 }
  0x82   : > { %290 = vrot.lane.b32.xlu1 %v249_v6, %s740_s21  ;;  %v259_v17 = vpop.permute.xlu2 %258  ;;  %v181_v6 = vld [vmem:[%s954_s1] sm:$0xff] }
  0x83   : > { %224 = vmatpush.msra.mxu0 %v181_v6 }
  0x84   : > { %684 = vmatmul.msk.f32.vlgmr.msra.gmra.mxu0 %vm183_vm3, %v780_v0 }
  0x89   : > { %v263_v8 = vpop.permute.xlu0 %262  ;;  %v265_v10 = vpop.permute.xlu1 %264 }
  0x8a   : > { %260 = vrot.lane.b32.xlu1 %v807_v7, %s738_s19  ;;  %304 = vrot.lane.b32.xlu0 %v263_v8, %s740_s21  ;;  %v277_v20 = vpop.permute.xlu2 %276 }
  0x8b   : > { %306 = vrot.lane.b32.xlu2 %v265_v10, %s740_s21  ;;  %v340_v21 = vsel %vm339_vm0, %v277_v20, 0.0 }
  0x8c   : > { %691 = vmatmul.msk.f32.vlgmr.msra.gmra.mxu1 %vm361_vm1, %v340_v21  ;;  %685 = vmatmul.msk.f32.gmra.mxu0 %vm183_vm3, %v782_v1 }
  0x91   : > { %v255_v13 = vpop.permute.xlu0 %254  ;;  %v269_v15 = vpop.permute.xlu1 %268 }
  0x92   : > { %278 = vrot.lane.b32.xlu1 %v782_v1, %s740_s21  ;;  %292 = vrot.lane.b32.xlu0 %v251_v9, %s740_s21 }
  0x93   : > { %294 = vrot.lane.b32.xlu2 %v253_v11, %s740_s21 }
  0x94   : > { %686 = vmatmul.msk.f32.gmra.mxu0 %vm183_vm3, %v786_v2 }
  0x99   : > { %v271_v16 = vpop.permute.xlu0 %270  ;;  %v273_v18 = vpop.permute.xlu1 %272 }
  0x9a   : > { %280 = vrot.lane.b32.xlu1 %v786_v2, %s740_s21  ;;  %274 = vrot.lane.b32.xlu0 %v807_v7, %s739_s20 }
  0x9b   : > { %296 = vrot.lane.b32.xlu2 %v255_v13, %s740_s21 }
  0x9c   : > { %687 = vmatmul.msk.f32.gmra.mxu0 %vm183_vm3, %v792_v3 }
  0xa2   : > { %282 = vrot.lane.b32.xlu1 %v792_v3, %s740_s21  ;;  %308 = vrot.lane.b32.xlu0 %v267_v12, %s740_s21 }
  0xa3   : > { %298 = vrot.lane.b32.xlu2 %v257_v14, %s740_s21 }
  0xa4   : > { %688 = vmatmul.msk.f32.gmra.mxu0 %vm183_vm3, %v796_v4 }
  0xaa   : > { %284 = vrot.lane.b32.xlu1 %v796_v4, %s740_s21  ;;  %310 = vrot.lane.b32.xlu0 %v269_v15, %s740_s21 }
  0xab   : > { %300 = vrot.lane.b32.xlu2 %v259_v17, %s740_s21 }
  0xac   : > { %689 = vmatmul.msk.f32.gmra.mxu0 %vm183_vm3, %v799_v5 }
  0xb2   : > { %286 = vrot.lane.b32.xlu1 %v799_v5, %s740_s21  ;;  %312 = vrot.lane.b32.xlu0 %v271_v16, %s740_s21 }
  0xb4   : > { %690 = vmatmul.msk.f32.gmra.mxu0 %vm183_vm3, %v807_v7 }
  0xba   : > { %288 = vrot.lane.b32.xlu1 %v807_v7, %s740_s21  ;;  %314 = vrot.lane.b32.xlu0 %v273_v18, %s740_s21 }
  0xe5   : > { %v307_v27 = vpop.permute.xlu2 %306 }
  0xe6   : > { %v355_v30 = vsel %vm339_vm0, %v307_v27, 0.0 }
  0xed   : > { %v295_v33 = vpop.permute.xlu2 %294 }
  0xee   : > { %v349_v34 = vsel %vm339_vm0, %v295_v33, 0.0 }
  0xf4   : > { %v291_v22 = vpop.permute.xlu1 %290 }
  0xf5   : > { %v347_v23 = vsel %vm339_vm0, %v291_v22, 0.0  ;;  %v297_v38 = vpop.permute.xlu2 %296 }
  0xf6   : > { %698 = vmatmul.msk.f32.vlgmr.msra.gmra.mxu2 %vm361_vm1, %v347_v23  ;;  %v350_v41 = vsel %vm339_vm0, %v297_v38, 0.0 }
  0xfc   : > { %v261_v24 = vpop.permute.xlu1 %260  ;;  %v305_v25 = vpop.permute.xlu0 %304 }
  0xfd   : > { %v354_v26 = vsel %vm339_vm0, %v305_v25, 0.0  ;;  %302 = vrot.lane.b32.xlu2 %v261_v24, %s740_s21  ;;  %v299_v44 = vpop.permute.xlu2 %298 }
  0xfe   : > { %705 = vmatmul.msk.f32.vlgmr.msra.gmra.mxu3 %vm361_vm1, %v354_v26  ;;  %v351_v47 = vsel %vm339_vm0, %v299_v44, 0.0 }
 0x101   : > { %v226_v24 = vpop.f32.mrf.mxu0 }
 0x104   : > { %v279_v28 = vpop.permute.xlu1 %278  ;;  %v293_v29 = vpop.permute.xlu0 %292 }
 0x105   : > { %v341_v31 = vsel %vm339_vm0, %v279_v28, 0.0  ;;  %v348_v32 = vsel %vm339_vm0, %v293_v29, 0.0  ;;  %v301_v50 = vpop.permute.xlu2 %300 }
 0x106   : > { %692 = vmatmul.msk.f32.gmra.mxu1 %vm361_vm1, %v341_v31  ;;  %699 = vmatmul.msk.f32.gmra.mxu2 %vm361_vm1, %v348_v32  ;;  %v352_v52 = vsel %vm339_vm0, %v301_v50, 0.0 }
 0x107   : > { %706 = vmatmul.msk.f32.gmra.mxu3 %vm361_vm1, %v355_v30 }
 0x109   : > { %v442_v62 = vpop.f32.mrf.mxu1  ;;  %v229_v28 = vpop.f32.mrf.mxu0 }
 0x10a   : > { %512 = vrot.lane.b32.xlu2 %v442_v62, %s741_s24 }
 0x10c   : > { %v281_v35 = vpop.permute.xlu1 %280  ;;  %v275_v36 = vpop.permute.xlu0 %274 }
 0x10d   : > { %v342_v37 = vsel %vm339_vm0, %v281_v35, 0.0  ;;  %316 = vrot.lane.b32.xlu0 %v275_v36, %s740_s21 }
 0x10e   : > { %693 = vmatmul.msk.f32.gmra.mxu1 %vm361_vm1, %v342_v37  ;;  %700 = vmatmul.msk.f32.gmra.mxu2 %vm361_vm1, %v349_v34 }
 0x111   : > { %v232_v32 = vpop.f32.mrf.mxu0 }
 0x114   : > { %v283_v39 = vpop.permute.xlu1 %282  ;;  %v309_v40 = vpop.permute.xlu0 %308 }
 0x115   : > { %v343_v42 = vsel %vm339_vm0, %v283_v39, 0.0  ;;  %v356_v43 = vsel %vm339_vm0, %v309_v40, 0.0 }
 0x116   : > { %694 = vmatmul.msk.f32.gmra.mxu1 %vm361_vm1, %v343_v42  ;;  %707 = vmatmul.msk.f32.gmra.mxu3 %vm361_vm1, %v356_v43 }
 0x117   : > { %701 = vmatmul.msk.f32.gmra.mxu2 %vm361_vm1, %v350_v41 }
 0x11c   : > { %v285_v45 = vpop.permute.xlu1 %284  ;;  %v311_v46 = vpop.permute.xlu0 %310 }
 0x11d   : > { %v344_v48 = vsel %vm339_vm0, %v285_v45, 0.0  ;;  %v357_v49 = vsel %vm339_vm0, %v311_v46, 0.0 }
 0x11e   : > { %695 = vmatmul.msk.f32.gmra.mxu1 %vm361_vm1, %v344_v48  ;;  %708 = vmatmul.msk.f32.gmra.mxu3 %vm361_vm1, %v357_v49  ;;  %v235_v48 = vpop.f32.mrf.mxu0 }
 0x11f   : > { %702 = vmatmul.msk.f32.gmra.mxu2 %vm361_vm1, %v351_v47 }
 0x124   : > { %v287_v51 = vpop.permute.xlu1 %286  ;;  %v313_v56 = vpop.permute.xlu0 %312 }
 0x125   : > { %v345_v53 = vsel %vm339_vm0, %v287_v51, 0.0  ;;  %v358_v57 = vsel %vm339_vm0, %v313_v56, 0.0 }
 0x126   : > { %696 = vmatmul.msk.f32.gmra.mxu1 %vm361_vm1, %v345_v53  ;;  %709 = vmatmul.msk.f32.gmra.mxu3 %vm361_vm1, %v358_v57 }
 0x127   : > { %703 = vmatmul.msk.f32.gmra.mxu2 %vm361_vm1, %v352_v52 }
 0x12c   : > { %v289_v54 = vpop.permute.xlu1 %288  ;;  %v315_v58 = vpop.permute.xlu0 %314 }
 0x12d   : > { %v346_v55 = vsel %vm339_vm0, %v289_v54, 0.0  ;;  %v359_v59 = vsel %vm339_vm0, %v315_v58, 0.0 }
 0x12e   : > { %697 = vmatmul.msk.f32.gmra.mxu1 %vm361_vm1, %v346_v55  ;;  %710 = vmatmul.msk.f32.gmra.mxu3 %vm361_vm1, %v359_v59  ;;  %v238_v55 = vpop.f32.mrf.mxu0 }
 0x157   : > { %v303_v60 = vpop.permute.xlu2 %302 }
 0x158   : > { %v353_v61 = vsel %vm339_vm0, %v303_v60, 0.0 }
 0x159   : > { %704 = vmatmul.msk.f32.gmra.mxu2 %vm361_vm1, %v353_v61  ;;  %v241_v61 = vpop.f32.mrf.mxu0 }
 0x161   : > { %v244_v62 = vpop.f32.mrf.mxu0 }
 0x164   : > { %v513_v22 = vpop.permute.xlu2 %512 }
 0x165   : > { %v589_v38 = vsel %vm183_vm3, %v226_v24, %v513_v22 }
 0x179   : > { %v463_v1 = vpop.f32.mrf.mxu2 }
 0x17f   : > { %v317_v8 = vpop.permute.xlu0 %316 }
 0x180   : > { %v360_v9 = vsel %vm339_vm0, %v317_v8, 0.0 }
 0x181   : > { %711 = vmatmul.msk.f32.gmra.mxu3 %vm361_vm1, %v360_v9  ;;  %v484_v2 = vpop.f32.mrf.mxu3 }
 0x183   : > { %v445_v10 = vpop.f32.mrf.mxu1 }
 0x184   : > { %514 = vrot.lane.b32.xlu0 %v445_v10, %s741_s24 }
 0x189   : > { %v466_v13 = vpop.f32.mrf.mxu2 }
 0x18a   : > { %v487_v14 = vpop.f32.mrf.mxu3 }
 0x18b   : > { %v448_v11 = vpop.f32.mrf.mxu1 }
 0x18c   : > { %516 = vrot.lane.b32.xlu1 %v448_v11, %s741_s24 }
 0x191   : > { %v469_v4 = vpop.f32.mrf.mxu2 }
 0x193   : > { %v451_v0 = vpop.f32.mrf.mxu1 }
 0x194   : > { %518 = vrot.lane.b32.xlu2 %v451_v0, %s741_s24 }
 0x199   : > { %v490_v15 = vpop.f32.mrf.mxu3 }
 0x19a   : > { %v472_v5 = vpop.f32.mrf.mxu2 }
 0x19b   : > { %v454_v12 = vpop.f32.mrf.mxu1 }
 0x19c   : > { %520 = vrot.lane.b32.xlu0 %v454_v12, %s741_s24 }
 0x1a1   : > { %v493_v17 = vpop.f32.mrf.mxu3 }
 0x1a2   : > { %v475_v18 = vpop.f32.mrf.mxu2 }
 0x1a3   : > { %v457_v3 = vpop.f32.mrf.mxu1 }
 0x1a4   : > { %522 = vrot.lane.b32.xlu1 %v457_v3, %s741_s24  ;;  %540 = vrot.lane.b32.xlu0 %v463_v1, %s742_s29 }
 0x1a9   : > { %v496_v19 = vpop.f32.mrf.mxu3 }
 0x1aa   : > { %v478_v7 = vpop.f32.mrf.mxu2 }
 0x1ab   : > { %v460_v16 = vpop.f32.mrf.mxu1 }
 0x1ac   : > { %568 = vrot.lane.b32.xlu1 %v484_v2, %s743_s30  ;;  %572 = vrot.lane.b32.xlu0 %v490_v15, %s743_s30 }
 0x1ad   : > { %524 = vrot.lane.b32.xlu2 %v460_v16, %s741_s24 }
 0x1b1   : > { %v499_v21 = vpop.f32.mrf.mxu3 }
 0x1b4   : > { %542 = vrot.lane.b32.xlu1 %v466_v13, %s742_s29  ;;  %546 = vrot.lane.b32.xlu0 %v472_v5, %s742_s29 }
 0x1b5   : > { %570 = vrot.lane.b32.xlu2 %v487_v14, %s743_s30 }
 0x1bc   : > { %574 = vrot.lane.b32.xlu1 %v493_v17, %s743_s30 }
 0x1bd   : > { %544 = vrot.lane.b32.xlu2 %v469_v4, %s742_s29 }
 0x1c4   : > { %548 = vrot.lane.b32.xlu1 %v475_v18, %s742_s29 }
 0x1c5   : > { %550 = vrot.lane.b32.xlu2 %v478_v7, %s742_s29 }
 0x1cd   : > { %576 = vrot.lane.b32.xlu2 %v496_v19, %s743_s30 }
 0x1dc   : > { %v481_v20 = vpop.f32.mrf.mxu2 }
 0x1dd   : > { %552 = vrot.lane.b32.xlu0 %v481_v20, %s742_s29 }
 0x1e5   : > { %578 = vrot.lane.b32.xlu0 %v499_v21, %s743_s30 }
 0x1ee   : > { %v519_v23 = vpop.permute.xlu2 %518 }
 0x1ef   : > { %v592_v49 = vsel %vm183_vm3, %v235_v48, %v519_v23 }
 0x1f6   : > { %v515_v26 = vpop.permute.xlu0 %514 }
 0x1f7   : > { %v590_v44 = vsel %vm183_vm3, %v229_v28, %v515_v26 }
 0x1fe   : > { %v517_v29 = vpop.permute.xlu1 %516 }
 0x1ff   : > { %v591_v35 = vsel %vm183_vm3, %v232_v32, %v517_v29 }
 0x204   : > { %v502_v25 = vpop.f32.mrf.mxu3 }
 0x205   : > { %580 = vrot.lane.b32.xlu1 %v502_v25, %s743_s30 }
 0x207   : > { %v525_v27 = vpop.permute.xlu2 %524 }
 0x208   : > { %v595_v63 = vsel %vm183_vm3, %v244_v62, %v525_v27 }
 0x20e   : > { %v521_v30 = vpop.permute.xlu0 %520 }
 0x20f   : > { %v571_v31 = vpop.permute.xlu2 %570  ;;  %v593_v56 = vsel %vm183_vm3, %v238_v55, %v521_v30 }
 0x216   : > { %v523_v33 = vpop.permute.xlu1 %522  ;;  %v541_v34 = vpop.permute.xlu0 %540 }
 0x217   : > { %v545_v36 = vpop.permute.xlu2 %544  ;;  %v597_v39 = vsel %vm596_vm4, %v589_v38, %v541_v34  ;;  %v594_v9 = vsel %vm183_vm3, %v241_v61, %v523_v33 }
 0x218   : > { %v599_v37 = vsel %vm596_vm4, %v591_v35, %v545_v36 }
 0x21e   : > { %v569_v40 = vpop.permute.xlu1 %568  ;;  %v573_v41 = vpop.permute.xlu0 %572 }
 0x21f   : > { %v605_v42 = vsel %vm604_vm5, %v597_v39, %v569_v40  ;;  %v607_v43 = vsel %vm604_vm5, %v599_v37, %v573_v41  ;;  %v551_v51 = vpop.permute.xlu2 %550 }
 0x220   : > { %613 = vst.msk [vmem:[%s916_s6] sm:$0xff] %vm612_vm6, %v605_v42  ;;  %v602_v11 = vsel %vm596_vm4, %v594_v9, %v551_v51 }
 0x221   : > { %615 = vst.msk [vmem:[%s916_s6 + $0x10] sm:$0xff] %vm612_vm6, %v607_v43 }
 0x226   : > { %v543_v45 = vpop.permute.xlu1 %542  ;;  %v547_v50 = vpop.permute.xlu0 %546 }
 0x227   : > { %v598_v46 = vsel %vm596_vm4, %v590_v44, %v543_v45  ;;  %v600_v52 = vsel %vm596_vm4, %v592_v49, %v547_v50  ;;  %v577_v57 = vpop.permute.xlu2 %576 }
 0x228   : > { %v606_v47 = vsel %vm604_vm5, %v598_v46, %v571_v31 }
 0x229   : > { %614 = vst.msk [vmem:[%s916_s6 + $0x8] sm:$0xff] %vm612_vm6, %v606_v47 }
 0x22e   : > { %v575_v53 = vpop.permute.xlu1 %574 }
 0x22f   : > { %v608_v54 = vsel %vm604_vm5, %v600_v52, %v575_v53 }
 0x230   : > { %616 = vst.msk [vmem:[%s916_s6 + $0x18] sm:$0xff] %vm612_vm6, %v608_v54 }
 0x236   : > { %v549_v58 = vpop.permute.xlu1 %548 }
 0x237   : > { %v601_v59 = vsel %vm596_vm4, %v593_v56, %v549_v58 }
 0x238   : > { %v609_v60 = vsel %vm604_vm5, %v601_v59, %v577_v57 }
 0x239   : > { %617 = vst.msk [vmem:[%s916_s6 + $0x20] sm:$0xff] %vm612_vm6, %v609_v60 }
 0x24f   : > { %v553_v6 = vpop.permute.xlu0 %552 }
 0x250   : > { %v603_v8 = vsel %vm596_vm4, %v595_v63, %v553_v6 }
 0x257   : > { %v579_v10 = vpop.permute.xlu0 %578 }
 0x258   : > { %v610_v0 = vsel %vm604_vm5, %v602_v11, %v579_v10 }
 0x259   : > { %618 = vst.msk [vmem:[%s916_s6 + $0x28] sm:$0xff] %vm612_vm6, %v610_v0 }
 0x277   : > { %v581_v1 = vpop.permute.xlu1 %580 }
 0x278   : > { %v611_v2 = vsel %vm604_vm5, %v603_v8, %v581_v1 }
 0x279   : > { %619 = vst.msk [vmem:[%s916_s6 + $0x30] sm:$0xff] %vm612_vm6, %v611_v2 }
 0x27a PF: > { %s13_s12 = sadd.s32 1, %s736_s12  }
 0x27b   : > { %p10_p4 = scmp.ge.s32.totalorder %s13_s12, 4  }
 0x27d   :  { %12 = sbr.rel (!%p10_p4) target bundleno = 1 (0x1), region = 62 }

// kernel: div.8
= control target key start
LH: loop header
LB: loop body
LE: loop exit
PB: predicated region body
PF: predicated region fallthrough
CT: control target
= control target key end

     0   :  { %s50_s0 = inlined_call_operand.vmem [shape: f32[112,2], index: 0, kind: input, shape index: {}]   ;;  %s51_s1 = inlined_call_operand.vmem [shape: f32[112,2], index: 1, kind: input, shape index: {}]   ;;  %s52_s2 = inlined_call_operand.vmem [shape: f32[112,2], index: 2, kind: output, shape index: {}]  }
   0x1   :  { %v4_v0 = vld [vmem:[%s51_s1] sm:$0x3] }
   0x2   :  { %24 = vrcp.f32 %v4_v0  ;;  %v18_v3 = vand.u32 2147483648, %v4_v0  ;;  %vm12_vm0 = vweird.f32 %v4_v0  ;;  %v16_v5 = vand.u32 2147483647, %v4_v0  ;;  %v3_v9 = vld [vmem:[%s50_s0] sm:$0x3] }
   0x4   :  { %v19_v7 = vor.u32 1.1754944e-38, %v18_v3  ;;  %vm17_vm3 = vcmp.eq.f32.partialorder %v16_v5, 8.507059e+37 }
   0x8   :  { %v25_v1 = vpop.eup %24 }
   0x9   :  { %v8_v2 = vmul.f32 %v25_v1, %v4_v0  ;;  %vm13_vm1 = vweird.f32 %v25_v1 }
   0xa   :  { %vm14_vm2 = vmor %vm12_vm0, %vm13_vm1 }
   0xb   :  { %v9_v4 = vsub.f32 1.0, %v8_v2 }
   0xd   :  { %v10_v6 = vmul.f32 %v25_v1, %v9_v4 }
   0xf   :  { %v11_v8 = vadd.f32 %v25_v1, %v10_v6 }
  0x11   :  { %v15_v10 = vsel %vm14_vm2, %v25_v1, %v11_v8 }
  0x12   :  { %v20_v11 = vsel %vm17_vm3, %v19_v7, %v15_v10 }
  0x13   :  { %v21_v12 = vmul.f32 %v20_v11, %v3_v9 }
  0x15   :  { %23 = vst [vmem:[%s52_s2] sm:$0x3] %v21_v12 }

// kernel: model_apply.21
= control target key start
LH: loop header
LB: loop body
LE: loop exit
PB: predicated region body
PF: predicated region fallthrough
CT: control target
= control target key end

     0   :  { %s1832_s30 = smov 0   ;;  %s2592_s0 = inlined_call_operand.vmem [shape: f32[112,94], index: 0, kind: input, shape index: {}]   ;;  %s2593_s1 = inlined_call_operand.vmem [shape: f32[112,18], index: 1, kind: input, shape index: {}]   ;;  %s2594_s2 = inlined_call_operand.vmem [shape: f32[12,12], index: 2, kind: input, shape index: {}]   ;;  %s2595_s3 = inlined_call_operand.vmem [shape: f32[70,12], index: 3, kind: input, shape index: {}]   ;;  %s2596_s4 = inlined_call_operand.vmem [shape: f32[1,12], index: 4, kind: input, shape index: {}]   ;;  %s2597_s5 = inlined_call_operand.vmem [shape: f32[12,2], index: 5, kind: input, shape index: {}]   ;;  %s2598_s6 = inlined_call_operand.vmem [shape: f32[1,12], index: 6, kind: input, shape index: {}]   ;;  %s2599_s7 = inlined_call_operand.vmem [shape: f32[1,12], index: 7, kind: input, shape index: {}]   ;;  %s2600_s8 = inlined_call_operand.vmem [shape: f32[1,2], index: 8, kind: input, shape index: {}]   ;;  %s2601_s9 = inlined_call_operand.vmem [shape: f32[112,18], index: 9, kind: output, shape index: {}]  }
   0x1 LB: > { %s1623_s10 = sadd.s32 4294967295, %s1769_s30   ;;  %p1627_p0 = scmp.ge.s32.totalorder %s1769_s30, 1  ;;  %s1769_s30 = sphi %s1832_s30, %s19_s30  }
   0x2   : > { %p299_p1 = scmp.lt.s32.totalorder %s1769_s30, 3 }
   0x4   : > { %p300_p2 = pnand %p1627_p0, %p299_p1 }
   0x5   : > { %s340_s11 = smul.u32 (!%p300_p2), 7, %s1623_s10  ;;  %s1771_s16 = smov (!%p300_p2), 116  }
   0x6   : > { %303 = sbr.rel (%p300_p2) target bundleno = 1163 (0x48b), region = 56  ;;  %s1772_s17 = smov (!%p300_p2), 70  }
   0x7   : > { %p341_p3 = scmp.lt.s32.totalorder (!%p300_p2), %s340_s11, 13  ;;  %s1773_s18 = smov (!%p300_p2), 104  }
   0x8   : > { %s1774_s10 = smov (!%p300_p2), 114   ;;  %s1776_s13 = smov (!%p300_p2), 112  }
   0x9   : > { %s1779_s19 = smov (!%p300_p2), 12   ;;  %s1780_s20 = smov (!%p300_p2), 14  }
   0xb   : > { %s2603_s11 = smov (!%p341_p3, %s340_s11), 13  ;;  %v366_v8 = vld [vmem:[%s2594_s2 + $0x8] sm:$0xf]  ;;  %vm497_vm0 = vcmask 1043456   ;;  %v365_v9 = vld [vmem:[%s2594_s2] sm:$0xff]  ;;  %vm454_vm1 = vcmask 97280  }
   0xc   : > { %s1840_s12 = sshll.u32 %s2603_s11, 3  ;;  %1631 = vmatpush.msk.msra.mxu0 %vm497_vm0, %v366_v8  ;;  %1685 = vmatpush.msk.msra.mxu1 %vm497_vm0, %v366_v8  ;;  %v811_v30 = vld [vmem:[%s2597_s5 + $0x8] sm:$0xf]  ;;  %v810_v31 = vld [vmem:[%s2597_s5] sm:$0xff]  ;;  %s1775_s11 = smov 58   ;;  %vm768_vm12 = vcmask 1045504  }
   0xd   : > { %s344_s15 = scalar_lea.vmem %s2592_s0, %s1840_s12  ;;  %1686 = vmatpush.msk.msra.mxu3 %vm497_vm0, %v366_v8  ;;  %1661 = vmatpush.msk.msra.mxu2 %vm497_vm0, %v811_v30  ;;  %s1972_s29 = scalar_lea.vmem %s2593_s1, %s1840_s12  ;;  %vm735_vm15 = vcmask 474112  }
   0xe   : > { %v1846_v0 = vld [vmem:[%s344_s15 + $0x30] sm:$0xff]  ;;  %v1848_v1 = vld [vmem:[%s344_s15] sm:$0xff]  ;;  %v1858_v3 = vld [vmem:[%s344_s15 + $0x8] sm:$0xff]  ;;  %516 = vmatpush.msra.mxu0 %v365_v9  ;;  %1687 = vmatpush.msra.mxu1 %v365_v9  ;;  %s2496_s26 = scalar_lea.vmem %s2601_s9, %s1840_s12 }
   0xf   : > { %396 = vrot.lane.b32.xlu1 %v1846_v0, %s1771_s16  ;;  %384 = vrot.lane.b32.xlu2 %v1848_v1, %s1771_s16  ;;  %v1856_v2 = vld [vmem:[%s344_s15 + $0x10] sm:$0xff]  ;;  %v1866_v4 = vld [vmem:[%s344_s15 + $0x18] sm:$0xff] }
  0x10   : > { %412 = vrot.lane.b32.xlu0 %v1848_v1, %s1772_s17  ;;  %v1874_v5 = vld [vmem:[%s344_s15 + $0x20] sm:$0xff]  ;;  %v1882_v6 = vld [vmem:[%s344_s15 + $0x28] sm:$0xff]  ;;  %1688 = vmatpush.msra.mxu3 %v365_v9  ;;  %v1993_v53 = vld [vmem:[%s1972_s29 + $0x18] sm:$0xff] }
  0x11   : > { %893 = vmatpush.msra.mxu2 %v810_v31  ;;  %v1975_v49 = vld [vmem:[%s1972_s29 + $0x8] sm:$0xff]  ;;  %v1980_v50 = vld [vmem:[%s1972_s29] sm:$0xff]  ;;  %v2007_v57 = vld [vmem:[%s1972_s29 + $0x10] sm:$0xff] }
  0x12   : > { %1689 = vmatpush.msk.msrb.mxu3 %vm497_vm0, %v811_v30  ;;  %v1990_v52 = vld [vmem:[%s1972_s29 + $0x20] sm:$0xff]  ;;  %v2012_v58 = vld [vmem:[%s1972_s29 + $0x30] sm:$0xff]  ;;  %v2019_v59 = vld [vmem:[%s1972_s29 + $0x28] sm:$0xff]  ;;  %vm746_vm0 = vcmask 572416  }
  0x14   : > { %1690 = vmatpush.msrb.mxu3 %v810_v31 }
  0x17   : > { %416 = vrot.lane.b32.xlu1 %v1856_v2, %s1772_s17  ;;  %398 = vrot.lane.b32.xlu2 %v1848_v1, %s1773_s18 }
  0x18   : > { %414 = vrot.lane.b32.xlu0 %v1858_v3, %s1772_s17 }
  0x1f   : > { %386 = vrot.lane.b32.xlu1 %v1858_v3, %s1771_s16  ;;  %400 = vrot.lane.b32.xlu2 %v1858_v3, %s1773_s18 }
  0x20   : > { %418 = vrot.lane.b32.xlu0 %v1866_v4, %s1772_s17 }
  0x27   : > { %420 = vrot.lane.b32.xlu1 %v1874_v5, %s1772_s17  ;;  %388 = vrot.lane.b32.xlu2 %v1856_v2, %s1771_s16 }
  0x28   : > { %402 = vrot.lane.b32.xlu0 %v1856_v2, %s1773_s18 }
  0x2f   : > { %422 = vrot.lane.b32.xlu1 %v1882_v6, %s1772_s17  ;;  %390 = vrot.lane.b32.xlu2 %v1866_v4, %s1771_s16 }
  0x30   : > { %404 = vrot.lane.b32.xlu0 %v1866_v4, %s1773_s18 }
  0x37   : > { %424 = vrot.lane.b32.xlu1 %v1846_v0, %s1772_s17  ;;  %392 = vrot.lane.b32.xlu2 %v1874_v5, %s1771_s16 }
  0x38   : > { %406 = vrot.lane.b32.xlu0 %v1874_v5, %s1773_s18 }
  0x3f   : > { %408 = vrot.lane.b32.xlu1 %v1882_v6, %s1773_s18 }
  0x69   : > { %v385_v7 = vpop.permute.xlu2 %384 }
  0x6a   : > { %426 = vrot.lane.b32.xlu2 %v385_v7, %s1772_s17 }
  0x71   : > { %v399_v10 = vpop.permute.xlu2 %398 }
  0x72   : > { %410 = vrot.lane.b32.xlu2 %v1846_v0, %s1773_s18  ;;  %440 = vrot.lane.b32.xlu1 %v399_v10, %s1772_s17  ;;  %s1778_s18 = smov 16  }
  0x79   : > { %v401_v11 = vpop.permute.xlu2 %400 }
  0x7a   : > { %442 = vrot.lane.b32.xlu1 %v401_v11, %s1772_s17 }
  0x81   : > { %v397_v12 = vpop.permute.xlu1 %396  ;;  %v389_v18 = vpop.permute.xlu2 %388 }
  0x82   : > { %v413_v13 = vpop.permute.xlu0 %412  ;;  %438 = vrot.lane.b32.xlu0 %v397_v12, %s1772_s17 }
  0x83   : > { %1632 = vmatmul.msk.f32.vlgmr.msra.gmra.mxu0 %vm454_vm1, %v413_v13 }
  0x89   : > { %v417_v14 = vpop.permute.xlu1 %416  ;;  %v391_v21 = vpop.permute.xlu2 %390 }
  0x8a   : > { %v415_v15 = vpop.permute.xlu0 %414  ;;  %394 = vrot.lane.b32.xlu0 %v1882_v6, %s1771_s16 }
  0x8b   : > { %1633 = vmatmul.msk.f32.gmra.mxu0 %vm454_vm1, %v415_v15 }
  0x91   : > { %v387_v16 = vpop.permute.xlu1 %386  ;;  %v393_v24 = vpop.permute.xlu2 %392 }
  0x92   : > { %v419_v17 = vpop.permute.xlu0 %418  ;;  %428 = vrot.lane.b32.xlu0 %v387_v16, %s1772_s17 }
  0x93   : > { %1634 = vmatmul.msk.f32.gmra.mxu0 %vm454_vm1, %v417_v14 }
  0x99   : > { %v421_v19 = vpop.permute.xlu1 %420 }
  0x9a   : > { %v403_v20 = vpop.permute.xlu0 %402  ;;  %430 = vrot.lane.b32.xlu0 %v389_v18, %s1772_s17 }
  0x9b   : > { %1635 = vmatmul.msk.f32.gmra.mxu0 %vm454_vm1, %v419_v17  ;;  %444 = vrot.lane.b32.xlu2 %v403_v20, %s1772_s17 }
  0xa1   : > { %v423_v22 = vpop.permute.xlu1 %422 }
  0xa2   : > { %v405_v23 = vpop.permute.xlu0 %404 }
  0xa3   : > { %446 = vrot.lane.b32.xlu1 %v405_v23, %s1772_s17  ;;  %1636 = vmatmul.msk.f32.gmra.mxu0 %vm454_vm1, %v421_v19 }
  0xa4   : > { %432 = vrot.lane.b32.xlu2 %v391_v21, %s1772_s17 }
  0xa9   : > { %v425_v25 = vpop.permute.xlu1 %424 }
  0xaa   : > { %v407_v26 = vpop.permute.xlu0 %406 }
  0xab   : > { %434 = vrot.lane.b32.xlu1 %v393_v24, %s1772_s17  ;;  %448 = vrot.lane.b32.xlu0 %v407_v26, %s1772_s17 }
  0xac   : > { %1637 = vmatmul.msk.f32.gmra.mxu0 %vm454_vm1, %v423_v22 }
  0xb1   : > { %v409_v27 = vpop.permute.xlu1 %408 }
  0xb2   : > { %450 = vrot.lane.b32.xlu2 %v409_v27, %s1772_s17 }
  0xb4   : > { %1638 = vmatmul.msk.f32.gmra.mxu0 %vm454_vm1, %v425_v25 }
  0xba   : > { %983 = vrot.lane.b32.xlu2 %v2007_v57, %s1771_s16 }
  0xc2   : > { %989 = vrot.lane.b32.xlu2 %v2019_v59, %s1771_s16 }
  0xc4   : > { %v427_v28 = vpop.permute.xlu2 %426 }
  0xc5   : > { %1639 = vmatmul.msk.f32.gmra.mxu0 %vm454_vm1, %v427_v28 }
  0xca   : > { %1009 = vrot.lane.b32.xlu2 %v1975_v49, %s1774_s10 }
  0xcc   : > { %v411_v29 = vpop.permute.xlu2 %410 }
  0xcd   : > { %452 = vrot.lane.b32.xlu1 %v411_v29, %s1772_s17 }
  0xd5   : > { %981 = vrot.lane.b32.xlu1 %v1975_v49, %s1771_s16 }
  0xdd   : > { %987 = vrot.lane.b32.xlu1 %v1990_v52, %s1771_s16 }
  0xe4   : > { %v441_v34 = vpop.permute.xlu1 %440 }
  0xe5   : > { %1007 = vrot.lane.b32.xlu1 %v1980_v50, %s1774_s10 }
  0xec   : > { %v443_v37 = vpop.permute.xlu1 %442 }
  0xed   : > { %1013 = vrot.lane.b32.xlu1 %v1993_v53, %s1774_s10 }
  0xf4   : > { %v439_v32 = vpop.permute.xlu0 %438 }
  0xf5   : > { %1645 = vmatmul.msk.f32.vlgmr.msra.gmra.mxu1 %vm454_vm1, %v439_v32  ;;  %v445_v33 = vpop.permute.xlu2 %444  ;;  %1019 = vrot.lane.b32.xlu1 %v2012_v58, %s1774_s10 }
  0xf6   : > { %1648 = vmatmul.msk.f32.vlgmr.msra.gmra.mxu3 %vm454_vm1, %v445_v33 }
  0xfc   : > { %v395_v35 = vpop.permute.xlu0 %394 }
  0xfd   : > { %1646 = vmatmul.msk.f32.gmra.mxu1 %vm454_vm1, %v441_v34  ;;  %436 = vrot.lane.b32.xlu0 %v395_v35, %s1772_s17 }
  0xfe   : > { %v433_v42 = vpop.permute.xlu2 %432 }
 0x100   : > { %v518_v36 = vpop.f32.mrf.mxu0 }
 0x101   : > { %1662 = vmatmul.msk.f32.vlgmr.msra.gmra.mxu2 %vm454_vm1, %v518_v36  ;;  %v581_v8 = vmul.f32 %v518_v36, %v518_v36 }
 0x104   : > { %v429_v38 = vpop.permute.xlu0 %428 }
 0x105   : > { %1640 = vmatmul.msk.f32.gmra.mxu0 %vm454_vm1, %v429_v38  ;;  %1647 = vmatmul.msk.f32.gmra.mxu1 %vm454_vm1, %v443_v37 }
 0x106   : > { %979 = vrot.lane.b32.xlu0 %v1980_v50, %s1771_s16 }
 0x108   : > { %v1947_v39 = vpop.f32.mrf.mxu0 }
 0x109   : > { %1663 = vmatmul.msk.f32.gmra.mxu2 %vm454_vm1, %v1947_v39  ;;  %v582_v17 = vmul.f32 %v1947_v39, %v1947_v39 }
 0x10c   : > { %v431_v40 = vpop.permute.xlu0 %430  ;;  %v451_v48 = vpop.permute.xlu2 %450 }
 0x10d   : > { %1641 = vmatmul.msk.f32.gmra.mxu0 %vm454_vm1, %v431_v40 }
 0x10e   : > { %985 = vrot.lane.b32.xlu0 %v1993_v53, %s1771_s16 }
 0x110   : > { %v1952_v41 = vpop.f32.mrf.mxu0 }
 0x111   : > { %1664 = vmatmul.msk.f32.gmra.mxu2 %vm454_vm1, %v1952_v41  ;;  %v583_v29 = vmul.f32 %v1952_v41, %v1952_v41 }
 0x115   : > { %v447_v43 = vpop.permute.xlu1 %446  ;;  %1642 = vmatmul.msk.f32.gmra.mxu0 %vm454_vm1, %v433_v42 }
 0x116   : > { %1649 = vmatmul.msk.f32.gmra.mxu3 %vm454_vm1, %v447_v43  ;;  %991 = vrot.lane.b32.xlu0 %v2012_v58, %s1771_s16 }
 0x118   : > { %v1958_v44 = vpop.f32.mrf.mxu0 }
 0x119   : > { %1665 = vmatmul.msk.f32.gmra.mxu2 %vm454_vm1, %v1958_v44 }
 0x11d   : > { %v435_v45 = vpop.permute.xlu1 %434  ;;  %v449_v46 = vpop.permute.xlu0 %448 }
 0x11e   : > { %1643 = vmatmul.msk.f32.gmra.mxu0 %vm454_vm1, %v435_v45  ;;  %1650 = vmatmul.msk.f32.gmra.mxu3 %vm454_vm1, %v449_v46 }
 0x120   : > { %v1964_v47 = vpop.f32.mrf.mxu0 }
 0x121   : > { %1666 = vmatmul.msk.f32.gmra.mxu2 %vm454_vm1, %v1964_v47 }
 0x126   : > { %1651 = vmatmul.msk.f32.gmra.mxu3 %vm454_vm1, %v451_v48 }
 0x129   : > { %v1985_v51 = vpop.f32.mrf.mxu0 }
 0x12a   : > { %1667 = vmatmul.msk.f32.gmra.mxu2 %vm454_vm1, %v1985_v51 }
 0x131   : > { %v536_v54 = vpop.f32.mrf.mxu0 }
 0x132   : > { %1668 = vmatmul.msk.f32.gmra.mxu2 %vm454_vm1, %v536_v54  ;;  %v587_v61 = vmul.f32 %v536_v54, %v536_v54 }
 0x13f   : > { %v453_v55 = vpop.permute.xlu1 %452 }
 0x140   : > { %1652 = vmatmul.msk.f32.gmra.mxu3 %vm454_vm1, %v453_v55 }
 0x142   : > { %v539_v56 = vpop.f32.mrf.mxu0 }
 0x143   : > { %1669 = vmatmul.msk.f32.gmra.mxu2 %vm454_vm1, %v539_v56  ;;  %v588_v9 = vmul.f32 %v539_v56, %v539_v56 }
 0x145   : > { %v595_v11 = vadd.f32 %v588_v9, %v581_v8 }
 0x16f   : > { %v437_v60 = vpop.permute.xlu0 %436 }
 0x170   : > { %1644 = vmatmul.msk.f32.gmra.mxu0 %vm454_vm1, %v437_v60  ;;  %v982_v60 = vpop.permute.xlu1 %981 }
 0x172   : > { %v557_v62 = vpop.f32.mrf.mxu1 }
 0x173   : > { %v594_v63 = vmul.f32 %v557_v62, %v557_v62  ;;  %1675 = vmatmul.msk.f32.vlgmr.msrb.gmra.mxu3 %vm454_vm1, %v557_v62 }
 0x175   : > { %v2027_v7 = vadd.f32 %v594_v63, %v587_v61  ;;  %v584_v61 = vmul.f32 %v1958_v44, %v1958_v44 }
 0x179   : > { %v566_v24 = vpop.f32.mrf.mxu3 }
 0x17a   : > { %v560_v10 = vpop.f32.mrf.mxu1  ;;  %v604_v31 = vmul.f32 %v566_v24, %v566_v24 }
 0x17b   : > { %v602_v12 = vmul.f32 %v560_v10, %v560_v10  ;;  %1676 = vmatmul.msk.f32.gmra.mxu3 %vm454_vm1, %v560_v10 }
 0x17d   : > { %v609_v13 = vadd.f32 %v602_v12, %v595_v11 }
 0x17f   : > { %v616_v14 = vmax.f32 %v609_v13, 1e-08 }
 0x181   : > { %1714 = vrsqrt.f32 %v616_v14  ;;  %vm630_vm2 = vcmp.eq.f32.partialorder %v616_v14, inf  ;;  %v633_v41 = vand.u32 2147483648, %v616_v14  ;;  %vm632_vm3 = vcmp.eq.f32.partialorder %v616_v14, 0.0 }
 0x182   : > { %v542_v15 = vpop.f32.mrf.mxu0  ;;  %v563_v16 = vpop.f32.mrf.mxu1 }
 0x183   : > { %v589_v18 = vmul.f32 %v542_v15, %v542_v15  ;;  %1670 = vmatmul.msk.f32.gmra.mxu2 %vm454_vm1, %v542_v15  ;;  %v603_v19 = vmul.f32 %v563_v16, %v563_v16  ;;  %1677 = vmatmul.msk.f32.gmra.mxu3 %vm454_vm1, %v563_v16 }
 0x184   : > { %v2034_v20 = vpop.f32.mrf.mxu2 }
 0x185   : > { %v596_v21 = vadd.f32 %v589_v18, %v582_v17 }
 0x187   : > { %v1715_v22 = vpop.eup %1714  ;;  %v610_v23 = vadd.f32 %v603_v19, %v596_v21 }
 0x188   : > { %v624_v25 = vmul.f32 %v1715_v22, %v616_v14 }
 0x189   : > { %v617_v26 = vmax.f32 %v610_v23, 1e-08 }
 0x18a   : > { %v545_v27 = vpop.f32.mrf.mxu0  ;;  %v625_v28 = vmul.f32 %v1715_v22, %v624_v25  ;;  %v585_v25 = vmul.f32 %v1964_v47, %v1964_v47 }
 0x18b   : > { %v590_v30 = vmul.f32 %v545_v27, %v545_v27  ;;  %1671 = vmatmul.msk.f32.gmra.mxu2 %vm454_vm1, %v545_v27  ;;  %1678 = vmatmul.msk.f32.gmra.mxu3 %vm454_vm1, %v566_v24  ;;  %1716 = vrsqrt.f32 %v617_v26  ;;  %vm642_vm4 = vcmp.eq.f32.partialorder %v617_v26, inf  ;;  %vm644_vm5 = vcmp.eq.f32.partialorder %v617_v26, 0.0 }
 0x18c   : > { %v898_v32 = vpop.f32.mrf.mxu2  ;;  %v626_v33 = vmul.f32 0.5, %v625_v28  ;;  %v645_v18 = vand.u32 2147483648, %v617_v26 }
 0x18d   : > { %v597_v34 = vadd.f32 %v590_v30, %v583_v29  ;;  %v2049_v63 = vadd.f32 %v982_v60, %v898_v32 }
 0x18e   : > { %v627_v35 = vsub.f32 1.5, %v626_v33 }
 0x18f   : > { %v611_v36 = vadd.f32 %v604_v31, %v597_v34 }
 0x190   : > { %v628_v37 = vmul.f32 %v1715_v22, %v627_v35 }
 0x191   : > { %v1717_v38 = vpop.eup %1716  ;;  %v2040_v39 = vmax.f32 %v611_v36, 1e-08 }
 0x192   : > { %v548_v40 = vpop.f32.mrf.mxu0  ;;  %v629_v42 = vmul.f32 %v628_v37, %v616_v14  ;;  %v636_v43 = vmul.f32 %v1717_v38, %v617_v26 }
 0x193   : > { %1672 = vmatmul.msk.f32.gmra.mxu2 %vm454_vm1, %v548_v40  ;;  %1718 = vrsqrt.f32 %v2040_v39  ;;  %v591_v55 = vmul.f32 %v548_v40, %v548_v40  ;;  %vm654_vm6 = vcmp.eq.f32.partialorder %v2040_v39, inf  ;;  %v657_v35 = vand.u32 2147483648, %v2040_v39 }
 0x194   : > { %v631_v45 = vsel %vm630_vm2, %v616_v14, %v629_v42  ;;  %v2044_v46 = vpop.f32.mrf.mxu2  ;;  %v637_v48 = vmul.f32 %v1717_v38, %v636_v43  ;;  %vm656_vm7 = vcmp.eq.f32.partialorder %v2040_v39, 0.0 }
 0x195   : > { %v634_v54 = vsel %vm632_vm3, %v633_v41, %v631_v45  ;;  %v598_v10 = vadd.f32 %v591_v55, %v584_v61 }
 0x196   : > { %714 = vrot.lane.b32.xlu2 %v634_v54, %s1775_s11  ;;  %v638_v56 = vmul.f32 0.5, %v637_v48 }
 0x198   : > { %v639_v62 = vsub.f32 1.5, %v638_v56 }
 0x199   : > { %v1719_v8 = vpop.eup %1718  ;;  %v569_v9 = vpop.f32.mrf.mxu3 }
 0x19a   : > { %v605_v11 = vmul.f32 %v569_v9, %v569_v9  ;;  %1679 = vmatmul.msk.f32.gmra.mxu3 %vm454_vm1, %v569_v9  ;;  %v640_v12 = vmul.f32 %v1717_v38, %v639_v62  ;;  %v648_v13 = vmul.f32 %v1719_v8, %v2040_v39 }
 0x19b   : > { %v551_v14 = vpop.f32.mrf.mxu0 }
 0x19c   : > { %v612_v15 = vadd.f32 %v605_v11, %v598_v10  ;;  %1673 = vmatmul.msk.f32.gmra.mxu2 %vm454_vm1, %v551_v14  ;;  %v641_v16 = vmul.f32 %v640_v12, %v617_v26  ;;  %v2054_v17 = vpop.f32.mrf.mxu2  ;;  %v649_v44 = vmul.f32 %v1719_v8, %v648_v13  ;;  %v592_v21 = vmul.f32 %v551_v14, %v551_v14  ;;  %v2085_v13 = vpop.permute.xlu2 %983 }
 0x19e   : > { %v619_v19 = vmax.f32 %v612_v15, 1e-08  ;;  %1015 = vrot.lane.b32.xlu2 %v1990_v52, %s1774_s10  ;;  %v643_v22 = vsel %vm642_vm4, %v617_v26, %v641_v16  ;;  %v650_v23 = vmul.f32 0.5, %v649_v44  ;;  %v599_v29 = vadd.f32 %v592_v21, %v585_v25  ;;  %v988_v26 = vpop.permute.xlu1 %987  ;;  %v375_v44 = vld [vmem:[%s2595_s3 + $0x40] sm:$0x3f]  ;;  %v373_v21 = vld [vmem:[%s2595_s3 + $0x30] sm:$0xff] }
 0x19f   : > { %v646_v24 = vsel %vm644_vm5, %v645_v18, %v643_v22  ;;  %1653 = vmatpush.msk.msrb.mxu1 %vm768_vm12, %v375_v44  ;;  %v371_v25 = vld [vmem:[%s2595_s3 + $0x20] sm:$0xff]  ;;  %vm1289_vm4 = vcmask 15360  }
 0x1a0   : > { %716 = vrot.lane.b32.xlu0 %v646_v24, %s1775_s11  ;;  %v651_v27 = vsub.f32 1.5, %v650_v23  ;;  %1720 = vrsqrt.f32 %v619_v19  ;;  %vm666_vm8 = vcmp.eq.f32.partialorder %v619_v19, inf  ;;  %v669_v61 = vand.u32 2147483648, %v619_v19  ;;  %v372_v23 = vld [vmem:[%s2595_s3 + $0x28] sm:$0xff] }
 0x1a1   : > { %v572_v28 = vpop.f32.mrf.mxu3  ;;  %vm668_vm9 = vcmp.eq.f32.partialorder %v619_v19, 0.0 }
 0x1a2   : > { %v606_v30 = vmul.f32 %v572_v28, %v572_v28  ;;  %v652_v31 = vmul.f32 %v1719_v8, %v651_v27  ;;  %1680 = vmatmul.msk.f32.gmra.mxu3 %vm454_vm1, %v572_v28  ;;  %v370_v28 = vld [vmem:[%s2595_s3 + $0x18] sm:$0xff] }
 0x1a4   : > { %v613_v32 = vadd.f32 %v606_v30, %v599_v29  ;;  %v653_v33 = vmul.f32 %v652_v31, %v2040_v39  ;;  %v907_v34 = vpop.f32.mrf.mxu2 }
 0x1a5   : > { %v2065_v47 = vadd.f32 %v988_v26, %v907_v34 }
 0x1a6   : > { %v1721_v36 = vpop.eup %1720  ;;  %v620_v37 = vmax.f32 %v613_v32, 1e-08  ;;  %1035 = vrot.lane.b32.xlu2 %v1980_v50, %s1776_s13  ;;  %v655_v38 = vsel %vm654_vm6, %v2040_v39, %v653_v33  ;;  %v367_v32 = vld [vmem:[%s2595_s3] sm:$0xff] }
 0x1a7   : > { %v658_v40 = vsel %vm656_vm7, %v657_v35, %v655_v38  ;;  %v660_v42 = vmul.f32 %v1721_v36, %v619_v19 }
 0x1a8   : > { %1011 = vrot.lane.b32.xlu0 %v2007_v57, %s1774_s10  ;;  %718 = vrot.lane.b32.xlu1 %v658_v40, %s1775_s11  ;;  %1722 = vrsqrt.f32 %v620_v37  ;;  %vm678_vm10 = vcmp.eq.f32.partialorder %v620_v37, inf  ;;  %v681_v14 = vand.u32 2147483648, %v620_v37  ;;  %vm680_vm11 = vcmp.eq.f32.partialorder %v620_v37, 0.0 }
 0x1a9   : > { %v661_v43 = vmul.f32 %v1721_v36, %v660_v42  ;;  %v2074_v41 = vpop.f32.mrf.mxu3 }
 0x1aa   : > { %1681 = vmatmul.msk.f32.gmra.mxu3 %vm454_vm1, %v2074_v41 }
 0x1ab   : > { %v662_v45 = vmul.f32 0.5, %v661_v43 }
 0x1ad   : > { %v663_v48 = vsub.f32 1.5, %v662_v45  ;;  %v910_v18 = vpop.f32.mrf.mxu2  ;;  %v586_v45 = vmul.f32 %v1985_v51, %v1985_v51 }
 0x1ae   : > { %v1723_v54 = vpop.eup %1722 }
 0x1af   : > { %v664_v55 = vmul.f32 %v1721_v36, %v663_v48  ;;  %v672_v56 = vmul.f32 %v1723_v54, %v620_v37  ;;  %v607_v48 = vmul.f32 %v2074_v41, %v2074_v41 }
 0x1b0   : > { %1039 = vrot.lane.b32.xlu1 %v2007_v57, %s1776_s13  ;;  %1017 = vrot.lane.b32.xlu0 %v2019_v59, %s1774_s10 }
 0x1b1   : > { %v665_v39 = vmul.f32 %v664_v55, %v619_v19  ;;  %v673_v60 = vmul.f32 %v1723_v54, %v672_v56 }
 0x1b3   : > { %v667_v62 = vsel %vm666_vm8, %v619_v19, %v665_v39  ;;  %v674_v8 = vmul.f32 0.5, %v673_v60  ;;  %v990_v19 = vpop.permute.xlu2 %989 }
 0x1b4   : > { %v670_v9 = vsel %vm668_vm9, %v669_v61, %v667_v62  ;;  %v2099_v22 = vadd.f32 %v990_v19, %v910_v18  ;;  %v980_v62 = vpop.permute.xlu0 %979 }
 0x1b5   : > { %720 = vrot.lane.b32.xlu2 %v670_v9, %s1775_s11  ;;  %v675_v10 = vsub.f32 1.5, %v674_v8  ;;  %v1008_v9 = vpop.permute.xlu1 %1007 }
 0x1b7   : > { %v676_v11 = vmul.f32 %v1723_v54, %v675_v10  ;;  %v2138_v10 = vpop.f32.mrf.mxu2 }
 0x1b8   : > { %1045 = vrot.lane.b32.xlu1 %v2019_v59, %s1776_s13  ;;  %v374_v59 = vld [vmem:[%s2595_s3 + $0x38] sm:$0xff] }
 0x1b9   : > { %v677_v12 = vmul.f32 %v676_v11, %v620_v37  ;;  %780 = vmatpush.msrb.mxu1 %v374_v59 }
 0x1bb   : > { %v679_v15 = vsel %vm678_vm10, %v620_v37, %v677_v12  ;;  %781 = vmatpush.msrb.mxu1 %v373_v21  ;;  %v2128_v42 = vpop.permute.xlu2 %1009 }
 0x1bc   : > { %v682_v16 = vsel %vm680_vm11, %v681_v14, %v679_v15  ;;  %v986_v12 = vpop.permute.xlu0 %985 }
 0x1bd   : > { %722 = vrot.lane.b32.xlu0 %v682_v16, %s1775_s11  ;;  %1041 = vrot.lane.b32.xlu2 %v1993_v53, %s1776_s13  ;;  %v1014_v44 = vpop.permute.xlu1 %1013 }
 0x1be   : > { %782 = vmatpush.msrb.mxu1 %v372_v23 }
 0x1c0   : > { %783 = vmatpush.msrb.mxu1 %v371_v25 }
 0x1c2   : > { %784 = vmatpush.msrb.mxu1 %v370_v28 }
 0x1c3   : > { %v578_v53 = vpop.f32.mrf.mxu3 }
 0x1c4   : > { %v608_v24 = vmul.f32 %v578_v53, %v578_v53  ;;  %1682 = vmatmul.msk.f32.gmra.mxu3 %vm454_vm1, %v578_v53  ;;  %v2142_v21 = vpop.permute.xlu0 %991 }
 0x1c5   : > { %1037 = vrot.lane.b32.xlu0 %v1975_v49, %s1776_s13  ;;  %1047 = vrot.lane.b32.xlu2 %v2012_v58, %s1776_s13  ;;  %v369_v58 = vld [vmem:[%s2595_s3 + $0x10] sm:$0xff]  ;;  %v2147_v25 = vpop.permute.xlu1 %1019 }
 0x1c6   : > { %v615_v27 = vadd.f32 %v608_v24, %v2027_v7  ;;  %785 = vmatpush.msrb.mxu1 %v369_v58  ;;  %v368_v7 = vld [vmem:[%s2595_s3 + $0x8] sm:$0xff]  ;;  %v916_v19 = vpop.f32.mrf.mxu2 }
 0x1c8   : > { %v622_v29 = vmax.f32 %v615_v27, 1e-08  ;;  %786 = vmatpush.msrb.mxu1 %v368_v7 }
 0x1ca   : > { %1724 = vrsqrt.f32 %v622_v29  ;;  %787 = vmatpush.msrb.mxu1 %v367_v32  ;;  %vm702_vm13 = vcmp.eq.f32.partialorder %v622_v29, inf  ;;  %v705_v37 = vand.u32 2147483648, %v622_v29  ;;  %vm704_vm14 = vcmp.eq.f32.partialorder %v622_v29, 0.0 }
 0x1cd   : > { %1043 = vrot.lane.b32.xlu0 %v1990_v52, %s1776_s13 }
 0x1d0   : > { %v1725_v30 = vpop.eup %1724 }
 0x1d1   : > { %v696_v31 = vmul.f32 %v1725_v30, %v622_v29 }
 0x1d3   : > { %v697_v33 = vmul.f32 %v1725_v30, %v696_v31 }
 0x1d5   : > { %v698_v34 = vmul.f32 0.5, %v697_v33 }
 0x1d7   : > { %v699_v26 = vsub.f32 1.5, %v698_v34 }
 0x1d9   : > { %v700_v35 = vmul.f32 %v1725_v30, %v699_v26  ;;  %v2159_v26 = vadd.f32 %v2085_v13, %v2044_v46 }
 0x1db   : > { %v701_v36 = vmul.f32 %v700_v35, %v622_v29 }
 0x1dd   : > { %v703_v38 = vsel %vm702_vm13, %v622_v29, %v701_v36 }
 0x1de   : > { %v706_v40 = vsel %vm704_vm14, %v705_v37, %v703_v38  ;;  %v2163_v37 = vadd.f32 %v1008_v9, %v916_v19  ;;  %v2166_v38 = vadd.f32 %v980_v62, %v2034_v20 }
 0x1df   : > { %726 = vrot.lane.b32.xlu2 %v706_v40, %s1775_s11  ;;  %v1249_v40 = vmul.f32 %v2159_v26, %v2159_v26 }
 0x1e0   : > { %v1254_v20 = vmul.f32 %v2163_v37, %v2163_v37 }
 0x1ed   : > { %v554_v43 = vpop.f32.mrf.mxu0 }
 0x1ee   : > { %v593_v54 = vmul.f32 %v554_v43, %v554_v43  ;;  %1674 = vmatmul.msk.f32.gmra.mxu2 %vm454_vm1, %v554_v43 }
 0x1f0   : > { %v600_v55 = vadd.f32 %v593_v54, %v586_v45  ;;  %v715_v56 = vpop.permute.xlu2 %714 }
 0x1f1   : > { %v736_v39 = vsel %vm735_vm15, %v1848_v1, %v715_v56 }
 0x1f2   : > { %v614_v60 = vadd.f32 %v607_v48, %v600_v55  ;;  %1654 = vmatmul.msk.f32.vlgmr.msrb.gmra.mxu1 %vm746_vm0, %v736_v39  ;;  %v1247_v55 = vmul.f32 %v2166_v38, %v2166_v38 }
 0x1f4   : > { %v621_v61 = vmax.f32 %v614_v60, 1e-08 }
 0x1f6   : > { %1726 = vrsqrt.f32 %v621_v61  ;;  %v2140_v15 = vpop.f32.mrf.mxu3  ;;  %vm690_vm2 = vcmp.eq.f32.partialorder %v621_v61, inf  ;;  %v693_v59 = vand.u32 2147483648, %v621_v61  ;;  %vm692_vm3 = vcmp.eq.f32.partialorder %v621_v61, 0.0 }
 0x1f8   : > { %v2145_v24 = vpop.permute.xlu2 %1015 }
 0x1fc   : > { %v1727_v51 = vpop.eup %1726 }
 0x1fd   : > { %v684_v8 = vmul.f32 %v1727_v51, %v621_v61 }
 0x1fe   : > { %v937_v23 = vpop.f32.mrf.mxu3 }
 0x1ff   : > { %v685_v41 = vmul.f32 %v1727_v51, %v684_v8 }
 0x200   : > { %v1036_v30 = vpop.permute.xlu2 %1035 }
 0x201   : > { %v686_v11 = vmul.f32 0.5, %v685_v41  ;;  %v2174_v13 = vadd.f32 %v1036_v30, %v937_v23  ;;  %v2191_v41 = vadd.f32 %v986_v12, %v2054_v17 }
 0x203   : > { %v687_v14 = vsub.f32 1.5, %v686_v11 }
 0x205   : > { %v688_v16 = vmul.f32 %v1727_v51, %v687_v14  ;;  %v1261_v51 = vadd.f32 %v1254_v20, %v1247_v55  ;;  %v2233_v20 = vadd.f32 %v2142_v21, %v2138_v10 }
 0x206   : > { %v919_v27 = vpop.f32.mrf.mxu2  ;;  %v940_v58 = vpop.f32.mrf.mxu3 }
 0x207   : > { %v689_v1 = vmul.f32 %v688_v16, %v621_v61  ;;  %v2205_v17 = vadd.f32 %v2128_v42, %v919_v27 }
 0x209   : > { %v691_v18 = vsel %vm690_vm2, %v621_v61, %v689_v1 }
 0x20a   : > { %v694_v53 = vsel %vm692_vm3, %v693_v59, %v691_v18  ;;  %v1250_v59 = vmul.f32 %v2191_v41, %v2191_v41 }
 0x20b   : > { %724 = vrot.lane.b32.xlu1 %v694_v53, %s1775_s11 }
 0x20e   : > { %v922_v33 = vpop.f32.mrf.mxu2  ;;  %v943_v35 = vpop.f32.mrf.mxu3 }
 0x212   : > { %v717_v28 = vpop.permute.xlu0 %716 }
 0x213   : > { %v737_v29 = vsel %vm735_vm15, %v1858_v3, %v717_v28  ;;  %v721_v3 = vpop.permute.xlu2 %720 }
 0x214   : > { %1655 = vmatmul.msk.f32.gmra.mxu1 %vm746_vm0, %v737_v29  ;;  %v739_v46 = vsel %vm735_vm15, %v1866_v4, %v721_v3  ;;  %v1268_v4 = vmul.f32 %v2174_v13, %v2174_v13  ;;  %v1255_v29 = vmul.f32 %v2205_v17, %v2205_v17 }
 0x216   : > { %v925_v56 = vpop.f32.mrf.mxu2  ;;  %v1275_v14 = vadd.f32 %v1268_v4, %v1261_v51 }
 0x217   : > { %v2187_v8 = vadd.f32 %v1014_v44, %v925_v56 }
 0x218   : > { %v1282_v19 = vmax.f32 %v1275_v14, 1e-08 }
 0x219   : > { %v1257_v16 = vmul.f32 %v2187_v8, %v2187_v8 }
 0x21a   : > { %v719_v7 = vpop.permute.xlu1 %718  ;;  %v1012_v31 = vpop.permute.xlu0 %1011  ;;  %v1290_v23 = vsel %vm1289_vm4, %v1282_v19, 0.0  ;;  %v1252_v19 = vmul.f32 %v2099_v22, %v2099_v22 }
 0x21b   : > { %v738_v32 = vsel %vm735_vm15, %v1856_v2, %v719_v7  ;;  %v2155_v34 = vadd.f32 %v1012_v31, %v922_v33  ;;  %v1042_v60 = vpop.permute.xlu2 %1041  ;;  %v1264_v12 = vadd.f32 %v1257_v16, %v1250_v59 }
 0x21c   : > { %1656 = vmatmul.msk.f32.gmra.mxu1 %vm746_vm0, %v738_v32 }
 0x21d   : > { %v1256_v36 = vmul.f32 %v2155_v34, %v2155_v34  ;;  %v946_v61 = vpop.f32.mrf.mxu3 }
 0x21e   : > { %v2193_v11 = vadd.f32 %v1042_v60, %v946_v61  ;;  %v1253_v60 = vmul.f32 %v2233_v20, %v2233_v20 }
 0x21f   : > { %v1263_v45 = vadd.f32 %v1256_v36, %v1249_v40  ;;  %v928_v30 = vpop.f32.mrf.mxu2 }
 0x220   : > { %v1271_v44 = vmul.f32 %v2193_v11, %v2193_v11  ;;  %v2215_v42 = vadd.f32 %v2145_v24, %v928_v30 }
 0x222   : > { %v1040_v2 = vpop.permute.xlu1 %1039  ;;  %v2179_v54 = vpop.permute.xlu0 %1017  ;;  %v1278_v28 = vadd.f32 %v1271_v44, %v1264_v12 }
 0x223   : > { %v2170_v43 = vadd.f32 %v1040_v2, %v943_v35  ;;  %v1258_v2 = vmul.f32 %v2215_v42, %v2215_v42 }
 0x224   : > { %1657 = vmatmul.msk.f32.gmra.mxu1 %vm746_vm0, %v739_v46  ;;  %v1285_v32 = vmax.f32 %v1278_v28, 1e-08  ;;  %v2261_v28 = vld [vmem:[%s2596_s4] ss:$0 sm:$0xff] }
 0x225   : > { %v1270_v48 = vmul.f32 %v2170_v43, %v2170_v43  ;;  %v949_v53 = vpop.f32.mrf.mxu3 }
 0x226   : > { %v1299_v35 = vsel %vm1289_vm4, %v1285_v32, 0.0 }
 0x227   : > { %v1277_v39 = vadd.f32 %v1270_v48, %v1263_v45  ;;  %v2229_v48 = vadd.f32 %v2147_v25, %v2140_v15 }
 0x229   : > { %v1284_v62 = vmax.f32 %v1277_v39, 1e-08  ;;  %v1260_v4 = vmul.f32 %v2229_v48, %v2229_v48 }
 0x22b   : > { %v1296_v9 = vsel %vm1289_vm4, %v1284_v62, 0.0  ;;  %v1048_v62 = vpop.permute.xlu2 %1047  ;;  %v1267_v10 = vadd.f32 %v1260_v4, %v1253_v60 }
 0x22c   : > { %1297 = vadd.xlane.f32.xlu0 %v1296_v9 }
 0x22d   : > { %v952_v36 = vpop.f32.mrf.mxu3 }
 0x22f   : > { %v723_v1 = vpop.permute.xlu0 %722 }
 0x230   : > { %v740_v18 = vsel %vm735_vm15, %v1874_v5, %v723_v1  ;;  %v1248_v5 = vmul.f32 %v2049_v63, %v2049_v63  ;;  %v1046_v1 = vpop.permute.xlu1 %1045 }
 0x231   : > { %1658 = vmatmul.msk.f32.gmra.mxu1 %vm746_vm0, %v740_v18  ;;  %v2247_v59 = vadd.f32 %v1046_v1, %v952_v36 }
 0x232   : > { %v1262_v33 = vadd.f32 %v1255_v29, %v1248_v5 }
 0x235   : > { %1291 = vadd.xlane.f32.xlu1 %v1290_v23 }
 0x237   : > { %v1038_v7 = vpop.permute.xlu0 %1037 }
 0x238   : > { %v2212_v31 = vadd.f32 %v1038_v7, %v940_v58  ;;  %v1251_v58 = vmul.f32 %v2065_v47, %v2065_v47 }
 0x23a   : > { %v1269_v27 = vmul.f32 %v2212_v31, %v2212_v31  ;;  %v1265_v55 = vadd.f32 %v1258_v2, %v1251_v58  ;;  %v1777_v2 = vmov 2.0  }
 0x23b   : > { %1728 = vrcp.f32 %v1777_v2 }
 0x23c   : > { %v1276_v3 = vadd.f32 %v1269_v27, %v1262_v33 }
 0x23d   : > { %1300 = vadd.xlane.f32.xlu1 %v1299_v35  ;;  %v727_v35 = vpop.permute.xlu2 %726 }
 0x23e   : > { %v1283_v40 = vmax.f32 %v1276_v3, 1e-08  ;;  %v742_v36 = vsel %vm735_vm15, %v1846_v0, %v727_v35 }
 0x23f   : > { %v1044_v46 = vpop.permute.xlu0 %1043 }
 0x240   : > { %v2224_v45 = vadd.f32 %v1044_v46, %v949_v53  ;;  %v1293_v24 = vsel %vm1289_vm4, %v1283_v40, 0.0  ;;  %v1273_v53 = vmul.f32 %v2247_v59, %v2247_v59 }
 0x241   : > { %1294 = vadd.xlane.f32.xlu2 %v1293_v24  ;;  %v1729_v40 = vpop.eup %1728 }
 0x242   : > { %v1272_v56 = vmul.f32 %v2224_v45, %v2224_v45  ;;  %v1312_v46 = vmul.f32 2.0, %v1729_v40  ;;  %vm1316_vm5 = vweird.f32 %v1729_v40 }
 0x244   : > { %v1279_v39 = vadd.f32 %v1272_v56, %v1265_v55 }
 0x246   : > { %v1286_v61 = vmax.f32 %v1279_v39, 1e-08 }
 0x247   : > { %v955_v51 = vpop.f32.mrf.mxu3 }
 0x248   : > { %v2241_v15 = vadd.f32 %v1048_v62, %v955_v51  ;;  %v1302_v25 = vsel %vm1289_vm4, %v1286_v61, 0.0 }
 0x249   : > { %1303 = vadd.xlane.f32.xlu2 %v1302_v25 }
 0x24a   : > { %v1274_v21 = vmul.f32 %v2241_v15, %v2241_v15 }
 0x24c   : > { %v1281_v9 = vadd.f32 %v1274_v21, %v1267_v10 }
 0x24e   : > { %v1288_v14 = vmax.f32 %v1281_v9, 1e-08 }
 0x250   : > { %v1308_v16 = vsel %vm1289_vm4, %v1288_v14, 0.0 }
 0x251   : > { %1309 = vadd.xlane.f32.xlu1 %v1308_v16 }
 0x26f   : > { %v789_v30 = vpop.f32.mrf.mxu1 }
 0x271   : > { %v931_v44 = vpop.f32.mrf.mxu2 }
 0x272   : > { %v2250_v18 = vadd.f32 %v2179_v54, %v931_v44  ;;  %v790_v54 = vadd.f32 %v2261_v28, %v789_v30 }
 0x274   : > { %v1259_v12 = vmul.f32 %v2250_v18, %v2250_v18  ;;  %v2269_v27 = vadd.f32 %v1980_v50, %v790_v54 }
 0x276   : > { %v1266_v23 = vadd.f32 %v1259_v12, %v1252_v19  ;;  %v1065_v3 = vsel %vm454_vm1, %v2269_v27, 0.0  ;;  %v2285_v19 = vld [vmem:[%s2600_s8] ss:$0 sm:$0xff] }
 0x278   : > { %v1280_v29 = vadd.f32 %v1273_v53, %v1266_v23 }
 0x27a   : > { %v1287_v7 = vmax.f32 %v1280_v29, 1e-08 }
 0x27c   : > { %v1305_v5 = vsel %vm1289_vm4, %v1287_v7, 0.0 }
 0x27d   : > { %v725_v32 = vpop.permute.xlu1 %724  ;;  %1306 = vadd.xlane.f32.xlu0 %v1305_v5 }
 0x27e   : > { %v741_v33 = vsel %vm735_vm15, %v1882_v6, %v725_v32  ;;  %v1313_v6 = vsub.f32 1.0, %v1312_v46 }
 0x27f   : > { %1659 = vmatmul.msk.f32.gmra.mxu1 %vm746_vm0, %v741_v33 }
 0x280   : > { %v1314_v58 = vmul.f32 %v1729_v40, %v1313_v6 }
 0x282   : > { %v1315_v24 = vadd.f32 %v1729_v40, %v1314_v58 }
 0x284   : > { %v2276_v50 = vsel %vm1316_vm5, %v1729_v40, %v1315_v24 }
 0x285   : > { %1066 = vadd.xlane.f32.xlu0 %v1065_v3 }
 0x287   : > { %1660 = vmatmul.msk.f32.gmra.mxu1 %vm746_vm0, %v742_v36 }
 0x29f   : > { %v1298_v39 = vpop.xlane.xlu0 %1297 }
 0x2a0   : > { %v1320_v0 = vmul.f32 %v2276_v50, %v1298_v39 }
 0x2a2   : > { %vm1351_vm13 = vweird.f32 %v1320_v0 }
 0x2a8   : > { %v1292_v55 = vpop.xlane.xlu1 %1291 }
 0x2a9   : > { %v1318_v56 = vmul.f32 %v2276_v50, %v1292_v55 }
 0x2ab   : > { %1730 = vrsqrt.f32 %v1318_v56  ;;  %vm1331_vm7 = vweird.f32 %v1318_v56 }
 0x2ac   : > { %1732 = vrsqrt.f32 %v1320_v0 }
 0x2b0   : > { %v1301_v21 = vpop.xlane.xlu1 %1300 }
 0x2b1   : > { %v1731_v4 = vpop.eup %1730  ;;  %v1321_v14 = vmul.f32 %v2276_v50, %v1301_v21 }
 0x2b2   : > { %v1326_v60 = vmul.f32 %v1731_v4, %v1318_v56  ;;  %vm1332_vm6 = vweird.f32 %v1731_v4  ;;  %v1733_v16 = vpop.eup %1732 }
 0x2b3   : > { %vm1333_vm8 = vmor %vm1331_vm7, %vm1332_vm6  ;;  %v1346_v7 = vmul.f32 %v1733_v16, %v1320_v0  ;;  %vm1352_vm12 = vweird.f32 %v1733_v16  ;;  %vm1361_vm0 = vweird.f32 %v1321_v14 }
 0x2b4   : > { %v1327_v61 = vmul.f32 %v1731_v4, %v1326_v60  ;;  %v1295_v62 = vpop.xlane.xlu2 %1294  ;;  %vm1353_vm14 = vmor %vm1351_vm13, %vm1352_vm12 }
 0x2b5   : > { %v1319_v51 = vmul.f32 %v2276_v50, %v1295_v62 }
 0x2b6   : > { %v1328_v25 = vmul.f32 0.5, %v1327_v61 }
 0x2b7   : > { %1734 = vrsqrt.f32 %v1319_v51  ;;  %vm1341_vm10 = vweird.f32 %v1319_v51 }
 0x2b8   : > { %v1329_v10 = vsub.f32 1.5, %v1328_v25  ;;  %1736 = vrsqrt.f32 %v1321_v14 }
 0x2ba   : > { %v1330_v9 = vmul.f32 %v1731_v4, %v1329_v10 }
 0x2bc   : > { %v1334_v1 = vsel %vm1333_vm8, %v1731_v4, %v1330_v9 }
 0x2bd   : > { %v1735_v44 = vpop.eup %1734  ;;  %v1426_v12 = vmul.f32 %v1334_v1, %v2174_v13  ;;  %v1395_v53 = vmul.f32 %v1334_v1, %v2166_v38  ;;  %v1412_v32 = vmul.f32 %v1334_v1, %v2163_v37  ;;  %v1347_v13 = vmul.f32 %v1733_v16, %v1346_v7 }
 0x2be   : > { %v1336_v23 = vmul.f32 %v1735_v44, %v1319_v51  ;;  %vm1342_vm9 = vweird.f32 %v1735_v44  ;;  %v1737_v38 = vpop.eup %1736 }
 0x2bf   : > { %v1433_v29 = vmul.f32 %v2285_v19, %v1426_v12  ;;  %v1405_v30 = vmul.f32 %v2285_v19, %v1395_v53  ;;  %vm1343_vm11 = vmor %vm1341_vm10, %vm1342_vm9  ;;  %v1419_v3 = vmul.f32 %v2285_v19, %v1412_v32  ;;  %v1348_v36 = vmul.f32 0.5, %v1347_v13 }
 0x2c0   : > { %v1337_v54 = vmul.f32 %v1735_v44, %v1336_v23  ;;  %v1356_v2 = vmul.f32 %v1737_v38, %v1321_v14  ;;  %vm1362_vm15 = vweird.f32 %v1737_v38 }
 0x2c1   : > { %1503 = vrot.lane.b32.xlu1 %v1433_v29, %s1778_s18  ;;  %1447 = vrot.lane.b32.xlu2 %v1405_v30, %s1779_s19  ;;  %v1349_v37 = vsub.f32 1.5, %v1348_v36  ;;  %vm1363_vm2 = vmor %vm1361_vm0, %vm1362_vm15  ;;  %vm1531_vm0 = vcmask 113664  }
 0x2c2   : > { %v1338_v5 = vmul.f32 0.5, %v1337_v54  ;;  %v1357_v58 = vmul.f32 %v1737_v38, %v1356_v2 }
 0x2c3   : > { %v1350_v55 = vmul.f32 %v1733_v16, %v1349_v37 }
 0x2c4   : > { %v1339_v33 = vsub.f32 1.5, %v1338_v5  ;;  %v1358_v56 = vmul.f32 0.5, %v1357_v58  ;;  %v1310_v29 = vpop.xlane.xlu1 %1309 }
 0x2c5   : > { %v1354_v60 = vsel %vm1353_vm14, %v1733_v16, %v1350_v55 }
 0x2c6   : > { %v1340_v35 = vmul.f32 %v1735_v44, %v1339_v33  ;;  %v1359_v4 = vsub.f32 1.5, %v1358_v56  ;;  %v1428_v33 = vmul.f32 %v1354_v60, %v2170_v43 }
 0x2c8   : > { %v1344_v40 = vsel %vm1343_vm11, %v1735_v44, %v1340_v35  ;;  %v1360_v61 = vmul.f32 %v1737_v38, %v1359_v4 }
 0x2c9   : > { %1475 = vrot.lane.b32.xlu2 %v1419_v3, %s1780_s20  ;;  %v1396_v46 = vmul.f32 %v1344_v40, %v2049_v63  ;;  %v1427_v24 = vmul.f32 %v1344_v40, %v2212_v31  ;;  %v1414_v63 = vmul.f32 %v1354_v60, %v2155_v34  ;;  %v792_v31 = vpop.f32.mrf.mxu1  ;;  %v1413_v30 = vmul.f32 %v1344_v40, %v2205_v17 }
 0x2ca   : > { %v2304_v51 = vsel %vm1363_vm2, %v1737_v38, %v1360_v61  ;;  %v793_v25 = vadd.f32 %v2261_v28, %v792_v31  ;;  %v1397_v3 = vmul.f32 %v1354_v60, %v2159_v26  ;;  %v1435_v17 = vmul.f32 %v2285_v19, %v1428_v33 }
 0x2cb   : > { %v1406_v6 = vmul.f32 %v2285_v19, %v1396_v46  ;;  %v1434_v39 = vmul.f32 %v2285_v19, %v1427_v24  ;;  %v1421_v62 = vmul.f32 %v2285_v19, %v1414_v63  ;;  %v1398_v0 = vmul.f32 %v2304_v51, %v2191_v41  ;;  %v1304_v41 = vpop.xlane.xlu2 %1303 }
 0x2cc   : > { %v2313_v21 = vadd.f32 %v1975_v49, %v793_v25  ;;  %v1322_v44 = vmul.f32 %v2276_v50, %v1304_v41  ;;  %v1420_v54 = vmul.f32 %v2285_v19, %v1413_v30  ;;  %v1429_v58 = vmul.f32 %v2304_v51, %v2193_v11 }
 0x2cd   : > { %1449 = vrot.lane.b32.xlu0 %v1406_v6, %s1779_s19  ;;  %v1408_v10 = vmul.f32 %v2285_v19, %v1398_v0  ;;  %vm1539_vm2 = vcmask 130048  }
 0x2ce   : > { %v1068_v14 = vsel %vm454_vm1, %v2313_v21, 0.0  ;;  %1738 = vrsqrt.f32 %v1322_v44  ;;  %vm1371_vm4 = vweird.f32 %v1322_v44  ;;  %v1436_v56 = vmul.f32 %v2285_v19, %v1429_v58 }
 0x2d1   : > { %v795_v34 = vpop.f32.mrf.mxu1 }
 0x2d2   : > { %v796_v9 = vadd.f32 %v2261_v28, %v795_v34 }
 0x2d4   : > { %v2319_v16 = vadd.f32 %v2007_v57, %v796_v9  ;;  %v1739_v23 = vpop.eup %1738  ;;  %v1324_v57 = vmul.f32 %v2276_v50, %v1310_v29 }
 0x2d5   : > { %1505 = vrot.lane.b32.xlu0 %v1434_v39, %s1778_s18  ;;  %v1366_v7 = vmul.f32 %v1739_v23, %v1322_v44  ;;  %vm1372_vm3 = vweird.f32 %v1739_v23 }
 0x2d6   : > { %v1071_v1 = vsel %vm454_vm1, %v2319_v16, 0.0  ;;  %vm1373_vm5 = vmor %vm1371_vm4, %vm1372_vm3  ;;  %vm1391_vm10 = vweird.f32 %v1324_v57  ;;  %vm1547_vm3 = vcmask 146432  }
 0x2d7   : > { %v1367_v13 = vmul.f32 %v1739_v23, %v1366_v7  ;;  %v1761_v7 = vld [vmem:[%s1972_s29 + $0x28] sm:$0xff] }
 0x2d9   : > { %v798_v53 = vpop.f32.mrf.mxu1  ;;  %v1368_v36 = vmul.f32 0.5, %v1367_v13 }
 0x2da   : > { %v799_v9 = vadd.f32 %v2261_v28, %v798_v53 }
 0x2db   : > { %v1369_v6 = vsub.f32 1.5, %v1368_v36 }
 0x2dd   : > { %1479 = vrot.lane.b32.xlu0 %v1421_v62, %s1780_s20  ;;  %v1370_v24 = vmul.f32 %v1739_v23, %v1369_v6 }
 0x2df   : > { %v2344_v39 = vsel %vm1373_vm5, %v1739_v23, %v1370_v24 }
 0x2e0   : > { %v1416_v63 = vmul.f32 %v2344_v39, %v2215_v42 }
 0x2e1   : > { %v801_v32 = vpop.f32.mrf.mxu1 }
 0x2e2   : > { %v802_v38 = vadd.f32 %v2261_v28, %v801_v32  ;;  %v1423_v61 = vmul.f32 %v2285_v19, %v1416_v63  ;;  %v1415_v32 = vmul.f32 %v2304_v51, %v2187_v8 }
 0x2e4   : > { %v2336_v40 = vadd.f32 %v1990_v52, %v802_v38  ;;  %v1422_v33 = vmul.f32 %v2285_v19, %v1415_v32 }
 0x2e5   : > { %1453 = vrot.lane.b32.xlu0 %v1408_v10, %s1779_s19 }
 0x2e6   : > { %v1077_v26 = vsel %vm454_vm1, %v2336_v40, 0.0 }
 0x2eb   : > { %1069 = vadd.xlane.f32.xlu1 %v1068_v14  ;;  %v1760_v14 = vld [vmem:[%s1972_s29 + $0x18] sm:$0xff] }
 0x2ec   : > { %v968_v41 = vadd.f32 %v1760_v14, %v799_v9 }
 0x2ee   : > { %v1074_v44 = vsel %vm454_vm1, %v968_v41, 0.0 }
 0x2f0   : > { %v1307_v12 = vpop.xlane.xlu0 %1306 }
 0x2f1   : > { %v1323_v49 = vmul.f32 %v2276_v50, %v1307_v12  ;;  %v1407_v50 = vmul.f32 %v2285_v19, %v1397_v3 }
 0x2f2   : > { %1072 = vadd.xlane.f32.xlu2 %v1071_v1 }
 0x2f3   : > { %1740 = vrsqrt.f32 %v1323_v49  ;;  %vm1381_vm7 = vweird.f32 %v1323_v49 }
 0x2f4   : > { %1742 = vrsqrt.f32 %v1324_v57 }
 0x2f9   : > { %v1741_v5 = vpop.eup %1740 }
 0x2fa   : > { %v1376_v35 = vmul.f32 %v1741_v5, %v1323_v49  ;;  %v1743_v46 = vpop.eup %1742  ;;  %vm1382_vm6 = vweird.f32 %v1741_v5 }
 0x2fb   : > { %v1386_v43 = vmul.f32 %v1743_v46, %v1324_v57  ;;  %vm1383_vm8 = vmor %vm1381_vm7, %vm1382_vm6  ;;  %vm1392_vm9 = vweird.f32 %v1743_v46 }
 0x2fc   : > { %v1377_v2 = vmul.f32 %v1741_v5, %v1376_v35  ;;  %vm1393_vm11 = vmor %vm1391_vm10, %vm1392_vm9  ;;  %v804_v23 = vpop.f32.mrf.mxu1  ;;  %v1399_v35 = vmul.f32 %v2344_v39, %v2065_v47 }
 0x2fd   : > { %v1387_v55 = vmul.f32 %v1743_v46, %v1386_v43 }
 0x2fe   : > { %v1378_v37 = vmul.f32 0.5, %v1377_v2  ;;  %v1409_v36 = vmul.f32 %v2285_v19, %v1399_v35  ;;  %v1430_v35 = vmul.f32 %v2344_v39, %v2224_v45  ;;  %v2478_v45 = vld [vmem:[%s2598_s6] ss:$0 sm:$0xff] }
 0x2ff   : > { %v1388_v4 = vmul.f32 0.5, %v1387_v55 }
 0x300   : > { %v1379_v52 = vsub.f32 1.5, %v1378_v37 }
 0x301   : > { %v1389_v11 = vsub.f32 1.5, %v1388_v4 }
 0x302   : > { %v1380_v60 = vmul.f32 %v1741_v5, %v1379_v52 }
 0x303   : > { %v1390_v0 = vmul.f32 %v1743_v46, %v1389_v11 }
 0x304   : > { %1477 = vrot.lane.b32.xlu1 %v1420_v54, %s1780_s20  ;;  %v2350_v62 = vsel %vm1383_vm8, %v1741_v5, %v1380_v60  ;;  %v1067_v54 = vpop.xlane.xlu0 %1066  ;;  %v807_v37 = vpop.f32.mrf.mxu1 }
 0x305   : > { %v1417_v31 = vmul.f32 %v2350_v62, %v2250_v18  ;;  %v2356_v42 = vsel %vm1393_vm11, %v1743_v46, %v1390_v0  ;;  %v1781_v18 = vmov 12.0  }
 0x306   : > { %v1401_v10 = vmul.f32 %v2356_v42, %v2233_v20  ;;  %1744 = vrcp.f32 %v1781_v18  ;;  %v805_v20 = vadd.f32 %v2261_v28, %v804_v23 }
 0x307   : > { %v1424_v25 = vmul.f32 %v2285_v19, %v1417_v31 }
 0x308   : > { %v1411_v34 = vmul.f32 %v2285_v19, %v1401_v10  ;;  %v2368_v57 = vadd.f32 %v1761_v7, %v805_v20 }
 0x30a   : > { %1507 = vrot.lane.b32.xlu2 %v1435_v17, %s1778_s18  ;;  %v1080_v5 = vsel %vm454_vm1, %v2368_v57, 0.0 }
 0x30c   : > { %1451 = vrot.lane.b32.xlu1 %v1407_v50, %s1779_s19  ;;  %v1745_v1 = vpop.eup %1744 }
 0x30d   : > { %v1087_v12 = vmul.f32 12.0, %v1745_v1  ;;  %vm1091_vm12 = vweird.f32 %v1745_v1 }
 0x30f   : > { %1078 = vadd.xlane.f32.xlu0 %v1077_v26  ;;  %v1088_v49 = vsub.f32 1.0, %v1087_v12  ;;  %v1762_v26 = vld [vmem:[%s1972_s29 + $0x30] sm:$0xff] }
 0x311   : > { %v1089_v29 = vmul.f32 %v1745_v1, %v1088_v49 }
 0x313   : > { %v1090_v30 = vadd.f32 %v1745_v1, %v1089_v29 }
 0x314   : > { %1509 = vrot.lane.b32.xlu1 %v1436_v56, %s1778_s18  ;;  %v1418_v56 = vmul.f32 %v2356_v42, %v2229_v48 }
 0x315   : > { %v2370_v53 = vsel %vm1091_vm12, %v1745_v1, %v1090_v30 }
 0x316   : > { %v1093_v13 = vmul.f32 %v2370_v53, %v1067_v54  ;;  %v1425_v60 = vmul.f32 %v2285_v19, %v1418_v56 }
 0x318   : > { %v2380_v38 = vsub.f32 %v2269_v27, %v1093_v13  ;;  %v1400_v27 = vmul.f32 %v2350_v62, %v2099_v22  ;;  %v808_v22 = vadd.f32 %v2261_v28, %v807_v37 }
 0x31a   : > { %v1107_v3 = vmul.f32 %v2380_v38, %v2380_v38  ;;  %v1410_v47 = vmul.f32 %v2285_v19, %v1400_v27  ;;  %v2406_v58 = vadd.f32 %v1762_v26, %v808_v22 }
 0x31b   : > { %v2387_v17 = vpop.permute.xlu2 %1447 }
 0x31c   : > { %1483 = vrot.lane.b32.xlu1 %v1423_v61, %s1780_s20  ;;  %v1114_v8 = vsel %vm454_vm1, %v1107_v3, 0.0  ;;  %v1083_v24 = vsel %vm454_vm1, %v2406_v58, 0.0 }
 0x323   : > { %1485 = vrot.lane.b32.xlu0 %v1424_v25, %s1780_s20  ;;  %v2393_v51 = vpop.permute.xlu2 %1475 }
 0x32b   : > { %1459 = vrot.lane.b32.xlu0 %v1411_v34, %s1779_s19 }
 0x333   : > { %1075 = vadd.xlane.f32.xlu2 %v1074_v44  ;;  %v2410_v55 = vpop.permute.xlu1 %1503 }
 0x346   : > { %1081 = vadd.xlane.f32.xlu1 %v1080_v5 }
 0x34b   : > { %1481 = vrot.lane.b32.xlu2 %v1422_v33, %s1780_s20 }
 0x353   : > { %1455 = vrot.lane.b32.xlu2 %v1409_v36, %s1779_s19  ;;  %v1437_v36 = vmul.f32 %v2285_v19, %v1430_v35 }
 0x355   : > { %1115 = vadd.xlane.f32.xlu0 %v1114_v8 }
 0x35e   : > { %v1070_v52 = vpop.xlane.xlu1 %1069 }
 0x35f   : > { %1457 = vrot.lane.b32.xlu1 %v1410_v47, %s1779_s19  ;;  %v1094_v14 = vmul.f32 %v2370_v53, %v1070_v52  ;;  %v1431_v47 = vmul.f32 %v2350_v62, %v2247_v59  ;;  %v2484_v59 = vld [vmem:[%s2599_s7] ss:$0 sm:$0xff] }
 0x361   : > { %v2442_v44 = vsub.f32 %v2313_v21, %v1094_v14 }
 0x365   : > { %v1073_v2 = vpop.xlane.xlu2 %1072 }
 0x366   : > { %v1095_v50 = vmul.f32 %v2370_v53, %v1073_v2 }
 0x368   : > { %v2399_v46 = vsub.f32 %v2319_v16, %v1095_v50  ;;  %v2412_v16 = vpop.permute.xlu0 %1449 }
 0x36a   : > { %v1109_v6 = vmul.f32 %v2399_v46, %v2399_v46 }
 0x36c   : > { %v1120_v43 = vsel %vm454_vm1, %v1109_v6, 0.0  ;;  %v1438_v6 = vmul.f32 %v2285_v19, %v1431_v47 }
 0x36d   : > { %1121 = vadd.xlane.f32.xlu0 %v1120_v43  ;;  %v2426_v61 = vpop.permute.xlu2 %1507 }
 0x370   : > { %v2416_v4 = vpop.permute.xlu0 %1505 }
 0x376   : > { %v2419_v28 = vpop.permute.xlu1 %1477 }
 0x378   : > { %v2422_v63 = vpop.permute.xlu0 %1479 }
 0x37c   : > { %1084 = vadd.xlane.f32.xlu2 %v1083_v24 }
 0x37e   : > { %v2424_v11 = vpop.permute.xlu1 %1451 }
 0x380   : > { %v2428_v31 = vpop.permute.xlu0 %1453 }
 0x386   : > { %v2430_v25 = vpop.permute.xlu1 %1509 }
 0x388   : > { %v1079_v18 = vpop.xlane.xlu0 %1078 }
 0x389   : > { %v1097_v49 = vmul.f32 %v2370_v53, %v1079_v18 }
 0x38b   : > { %v2451_v20 = vsub.f32 %v2336_v40, %v1097_v49 }
 0x38d   : > { %v1111_v32 = vmul.f32 %v2451_v20, %v2451_v20 }
 0x38e   : > { %v2439_v1 = vpop.permute.xlu1 %1483 }
 0x38f   : > { %v1126_v40 = vsel %vm454_vm1, %v1111_v32, 0.0 }
 0x394   : > { %1487 = vrot.lane.b32.xlu2 %v1425_v60, %s1780_s20 }
 0x395   : > { %v2444_v12 = vpop.permute.xlu0 %1485 }
 0x39d   : > { %v2459_v54 = vpop.permute.xlu0 %1459 }
 0x3a6   : > { %v1076_v0 = vpop.xlane.xlu2 %1075 }
 0x3a7   : > { %v1096_v48 = vmul.f32 %v2370_v53, %v1076_v0 }
 0x3a9   : > { %v2433_v10 = vsub.f32 %v968_v41, %v1096_v48  ;;  %v1108_v41 = vmul.f32 %v2442_v44, %v2442_v44 }
 0x3ab   : > { %v1110_v34 = vmul.f32 %v2433_v10, %v2433_v10  ;;  %v1117_v7 = vsel %vm454_vm1, %v1108_v41, 0.0 }
 0x3ad   : > { %v1123_v9 = vsel %vm454_vm1, %v1110_v34, 0.0 }
 0x3ae   : > { %1124 = vadd.xlane.f32.xlu1 %v1123_v9  ;;  %v2473_v37 = vpop.permute.xlu2 %1481 }
 0x3b6   : > { %v2500_v0 = vpop.permute.xlu2 %1455 }
 0x3b9   : > { %v1082_v23 = vpop.xlane.xlu1 %1081 }
 0x3ba   : > { %v1098_v29 = vmul.f32 %v2370_v53, %v1082_v23 }
 0x3bc   : > { %v2454_v30 = vsub.f32 %v2368_v57, %v1098_v29 }
 0x3bd   : > { %1118 = vadd.xlane.f32.xlu2 %v1117_v7 }
 0x3be   : > { %v1112_v21 = vmul.f32 %v2454_v30, %v2454_v30 }
 0x3c0   : > { %v1129_v5 = vsel %vm454_vm1, %v1112_v21, 0.0 }
 0x3c1   : > { %1130 = vadd.xlane.f32.xlu0 %v1129_v5 }
 0x3c5   : > { %1127 = vadd.xlane.f32.xlu2 %v1126_v40 }
 0x3c8   : > { %v1116_v13 = vpop.xlane.xlu0 %1115 }
 0x3c9   : > { %v1135_v57 = vmul.f32 %v1116_v13, %v2370_v53 }
 0x3cb   : > { %v1142_v33 = vadd.f32 1e-05, %v1135_v57  ;;  %v1432_v57 = vmul.f32 %v2356_v42, %v2241_v15 }
 0x3cd   : > { %1746 = vrsqrt.f32 %v1142_v33  ;;  %vm1155_vm14 = vweird.f32 %v1142_v33 }
 0x3d3   : > { %v1747_v3 = vpop.eup %1746 }
 0x3d4   : > { %v1150_v8 = vmul.f32 %v1747_v3, %v1142_v33  ;;  %vm1156_vm13 = vweird.f32 %v1747_v3  ;;  %v2528_v33 = vpop.permute.xlu1 %1457 }
 0x3d5   : > { %1511 = vrot.lane.b32.xlu0 %v1437_v36, %s1778_s18  ;;  %vm1157_vm15 = vmor %vm1155_vm14, %vm1156_vm13 }
 0x3d6   : > { %v1151_v27 = vmul.f32 %v1747_v3, %v1150_v8 }
 0x3d8   : > { %v1152_v2 = vmul.f32 0.5, %v1151_v27 }
 0x3da   : > { %v1153_v50 = vsub.f32 1.5, %v1152_v2 }
 0x3dc   : > { %v1154_v43 = vmul.f32 %v1747_v3, %v1153_v50 }
 0x3dd   : > { %1513 = vrot.lane.b32.xlu2 %v1438_v6, %s1778_s18 }
 0x3de   : > { %v1158_v39 = vsel %vm1157_vm15, %v1747_v3, %v1154_v43 }
 0x3df   : > { %v1219_v62 = vmul.f32 %v1158_v39, %v2380_v38 }
 0x3e0   : > { %v1122_v22 = vpop.xlane.xlu0 %1121 }
 0x3e1   : > { %v1229_v26 = vmul.f32 %v2478_v45, %v1219_v62  ;;  %v1137_v24 = vmul.f32 %v1122_v22, %v2370_v53 }
 0x3e3   : > { %v1239_v52 = vadd.f32 %v2484_v59, %v1229_v26  ;;  %v1144_v56 = vadd.f32 1e-05, %v1137_v24 }
 0x3e5   : > { %v1524_v60 = vsel %vm454_vm1, %v1239_v52, %v2387_v17  ;;  %1748 = vrsqrt.f32 %v1144_v56  ;;  %vm1175_vm5 = vweird.f32 %v1144_v56 }
 0x3e6   : > { %v1532_v38 = vsel %vm1531_vm0, %v1524_v60, %v2393_v51 }
 0x3e7   : > { %v1540_v48 = vsel %vm1539_vm2, %v1532_v38, %v2410_v55 }
 0x3e8   : > { %1548 = vst.msk [vmem:[%s2496_s26] sm:$0xff] %vm1547_vm3, %v1540_v48 }
 0x3eb   : > { %v1749_v34 = vpop.eup %1748 }
 0x3ec   : > { %v1170_v17 = vmul.f32 %v1749_v34, %v1144_v56  ;;  %vm1176_vm4 = vweird.f32 %v1749_v34 }
 0x3ed   : > { %vm1177_vm6 = vmor %vm1175_vm5, %vm1176_vm4 }
 0x3ee   : > { %v1171_v9 = vmul.f32 %v1749_v34, %v1170_v17 }
 0x3ef   : > { %v1085_v18 = vpop.xlane.xlu2 %1084 }
 0x3f0   : > { %v1172_v14 = vmul.f32 0.5, %v1171_v9  ;;  %v1099_v49 = vmul.f32 %v2370_v53, %v1085_v18 }
 0x3f2   : > { %v1173_v41 = vsub.f32 1.5, %v1172_v14  ;;  %v2508_v23 = vsub.f32 %v2406_v58, %v1099_v49 }
 0x3f4   : > { %v1174_v51 = vmul.f32 %v1749_v34, %v1173_v41  ;;  %v1113_v55 = vmul.f32 %v2508_v23, %v2508_v23 }
 0x3f6   : > { %v1178_v29 = vsel %vm1177_vm6, %v1749_v34, %v1174_v51  ;;  %v1132_v7 = vsel %vm454_vm1, %v1113_v55, 0.0 }
 0x3f7   : > { %v1221_v21 = vmul.f32 %v1178_v29, %v2399_v46  ;;  %1133 = vadd.xlane.f32.xlu1 %v1132_v7  ;;  %v1439_v46 = vmul.f32 %v2285_v19, %v1432_v57 }
 0x3f9   : > { %v1231_v5 = vmul.f32 %v2478_v45, %v1221_v21 }
 0x3fb   : > { %v1241_v32 = vadd.f32 %v2484_v59, %v1231_v5 }
 0x3fd   : > { %v1526_v58 = vsel %vm454_vm1, %v1241_v32, %v2424_v11 }
 0x3fe   : > { %v1534_v40 = vsel %vm1531_vm0, %v1526_v58, %v2422_v63  ;;  %v2531_v63 = vpop.permute.xlu2 %1487 }
 0x3ff   : > { %v1542_v13 = vsel %vm1539_vm2, %v1534_v40, %v2426_v61 }
 0x400   : > { %1550 = vst.msk [vmem:[%s2496_s26 + $0x10] sm:$0xff] %vm1547_vm3, %v1542_v13 }
 0x410   : > { %1515 = vrot.lane.b32.xlu1 %v1439_v46, %s1778_s18 }
 0x421   : > { %v1125_v35 = vpop.xlane.xlu1 %1124 }
 0x422   : > { %v1138_v11 = vmul.f32 %v1125_v35, %v2370_v53 }
 0x424   : > { %v1145_v3 = vadd.f32 1e-05, %v1138_v11 }
 0x426   : > { %1750 = vrsqrt.f32 %v1145_v3  ;;  %vm1185_vm8 = vweird.f32 %v1145_v3 }
 0x42c   : > { %v1751_v36 = vpop.eup %1750 }
 0x42d   : > { %v1180_v61 = vmul.f32 %v1751_v36, %v1145_v3  ;;  %vm1186_vm7 = vweird.f32 %v1751_v36 }
 0x42e   : > { %vm1187_vm9 = vmor %vm1185_vm8, %vm1186_vm7 }
 0x42f   : > { %v1181_v8 = vmul.f32 %v1751_v36, %v1180_v61 }
 0x430   : > { %v1119_v27 = vpop.xlane.xlu2 %1118 }
 0x431   : > { %v1182_v47 = vmul.f32 0.5, %v1181_v8  ;;  %v1136_v15 = vmul.f32 %v1119_v27, %v2370_v53 }
 0x433   : > { %v1183_v42 = vsub.f32 1.5, %v1182_v47  ;;  %v1143_v19 = vadd.f32 1e-05, %v1136_v15 }
 0x434   : > { %v1131_v2 = vpop.xlane.xlu0 %1130 }
 0x435   : > { %v1184_v50 = vmul.f32 %v1751_v36, %v1183_v42  ;;  %1752 = vrsqrt.f32 %v1143_v19  ;;  %v1140_v6 = vmul.f32 %v1131_v2, %v2370_v53  ;;  %vm1165_vm11 = vweird.f32 %v1143_v19 }
 0x437   : > { %v1188_v43 = vsel %vm1187_vm9, %v1751_v36, %v1184_v50  ;;  %v1147_v39 = vadd.f32 1e-05, %v1140_v6 }
 0x438   : > { %v1222_v62 = vmul.f32 %v1188_v43, %v2433_v10  ;;  %v1128_v22 = vpop.xlane.xlu2 %1127 }
 0x439   : > { %1754 = vrsqrt.f32 %v1147_v39  ;;  %v1139_v26 = vmul.f32 %v1128_v22, %v2370_v53  ;;  %vm1205_vm14 = vweird.f32 %v1147_v39 }
 0x43a   : > { %v1232_v24 = vmul.f32 %v2478_v45, %v1222_v62 }
 0x43b   : > { %v1753_v52 = vpop.eup %1752  ;;  %v1146_v56 = vadd.f32 1e-05, %v1139_v26 }
 0x43c   : > { %v1242_v60 = vadd.f32 %v2484_v59, %v1232_v24  ;;  %v1160_v38 = vmul.f32 %v1753_v52, %v1143_v19  ;;  %vm1166_vm10 = vweird.f32 %v1753_v52 }
 0x43d   : > { %1756 = vrsqrt.f32 %v1146_v56  ;;  %vm1167_vm12 = vmor %vm1165_vm11, %vm1166_vm10  ;;  %vm1195_vm5 = vweird.f32 %v1146_v56 }
 0x43e   : > { %v1527_v48 = vsel %vm454_vm1, %v1242_v60, %v2428_v31  ;;  %v1161_v34 = vmul.f32 %v1753_v52, %v1160_v38 }
 0x43f   : > { %v1755_v17 = vpop.eup %1754  ;;  %v1535_v10 = vsel %vm1531_vm0, %v1527_v48, %v2473_v37 }
 0x440   : > { %v1162_v9 = vmul.f32 0.5, %v1161_v34  ;;  %v1200_v18 = vmul.f32 %v1755_v17, %v1147_v39  ;;  %v1543_v14 = vsel %vm1539_vm2, %v1535_v10, %v2430_v25  ;;  %vm1206_vm13 = vweird.f32 %v1755_v17  ;;  %v1514_v47 = vpop.permute.xlu2 %1513 }
 0x441   : > { %1551 = vst.msk [vmem:[%s2496_s26 + $0x18] sm:$0xff] %vm1547_vm3, %v1543_v14  ;;  %vm1207_vm15 = vmor %vm1205_vm14, %vm1206_vm13 }
 0x442   : > { %v1163_v49 = vsub.f32 1.5, %v1162_v9  ;;  %v1201_v41 = vmul.f32 %v1755_v17, %v1200_v18 }
 0x443   : > { %v1757_v51 = vpop.eup %1756 }
 0x444   : > { %v1164_v55 = vmul.f32 %v1753_v52, %v1163_v49  ;;  %v1202_v29 = vmul.f32 0.5, %v1201_v41  ;;  %v1190_v31 = vmul.f32 %v1757_v51, %v1146_v56  ;;  %vm1196_vm4 = vweird.f32 %v1757_v51 }
 0x445   : > { %vm1197_vm6 = vmor %vm1195_vm5, %vm1196_vm4 }
 0x446   : > { %v1168_v7 = vsel %vm1167_vm12, %v1753_v52, %v1164_v55  ;;  %v1203_v21 = vsub.f32 1.5, %v1202_v29  ;;  %v1191_v37 = vmul.f32 %v1757_v51, %v1190_v31 }
 0x447   : > { %v1220_v5 = vmul.f32 %v1168_v7, %v2442_v44  ;;  %v1512_v19 = vpop.permute.xlu0 %1511 }
 0x448   : > { %v1204_v32 = vmul.f32 %v1755_v17, %v1203_v21  ;;  %v1192_v25 = vmul.f32 0.5, %v1191_v37 }
 0x449   : > { %v1230_v58 = vmul.f32 %v2478_v45, %v1220_v5 }
 0x44a   : > { %v1208_v40 = vsel %vm1207_vm15, %v1755_v17, %v1204_v32  ;;  %v1193_v13 = vsub.f32 1.5, %v1192_v25 }
 0x44b   : > { %v1240_v57 = vadd.f32 %v2484_v59, %v1230_v58  ;;  %v1224_v46 = vmul.f32 %v1208_v40, %v2454_v30 }
 0x44c   : > { %v1194_v35 = vmul.f32 %v1757_v51, %v1193_v13 }
 0x44d   : > { %v1525_v44 = vsel %vm454_vm1, %v1240_v57, %v2412_v16  ;;  %v1234_v11 = vmul.f32 %v2478_v45, %v1224_v46 }
 0x44e   : > { %v1198_v3 = vsel %vm1197_vm6, %v1757_v51, %v1194_v35  ;;  %v1533_v36 = vsel %vm1531_vm0, %v1525_v44, %v2419_v28 }
 0x44f   : > { %v1223_v61 = vmul.f32 %v1198_v3, %v2451_v20  ;;  %v1541_v8 = vsel %vm1539_vm2, %v1533_v36, %v2416_v4  ;;  %v1244_v30 = vadd.f32 %v2484_v59, %v1234_v11 }
 0x450   : > { %1549 = vst.msk [vmem:[%s2496_s26 + $0x8] sm:$0xff] %vm1547_vm3, %v1541_v8 }
 0x451   : > { %v1233_v27 = vmul.f32 %v2478_v45, %v1223_v61  ;;  %v1529_v16 = vsel %vm454_vm1, %v1244_v30, %v2528_v33 }
 0x452   : > { %v1537_v15 = vsel %vm1531_vm0, %v1529_v16, %v2444_v12 }
 0x453   : > { %v1545_v28 = vsel %vm1539_vm2, %v1537_v15, %v1514_v47  ;;  %v1243_v20 = vadd.f32 %v2484_v59, %v1233_v27 }
 0x454   : > { %1553 = vst.msk [vmem:[%s2496_s26 + $0x28] sm:$0xff] %vm1547_vm3, %v1545_v28 }
 0x455   : > { %v1528_v4 = vsel %vm454_vm1, %v1243_v20, %v2500_v0 }
 0x456   : > { %v1536_v42 = vsel %vm1531_vm0, %v1528_v4, %v2439_v1 }
 0x457   : > { %v1544_v2 = vsel %vm1539_vm2, %v1536_v42, %v1512_v19 }
 0x458   : > { %1552 = vst.msk [vmem:[%s2496_s26 + $0x20] sm:$0xff] %vm1547_vm3, %v1544_v2 }
 0x46a   : > { %v1134_v33 = vpop.xlane.xlu1 %1133 }
 0x46b   : > { %v1141_v12 = vmul.f32 %v1134_v33, %v2370_v53 }
 0x46d   : > { %v1148_v50 = vadd.f32 1e-05, %v1141_v12 }
 0x46f   : > { %1758 = vrsqrt.f32 %v1148_v50  ;;  %vm1215_vm8 = vweird.f32 %v1148_v50 }
 0x475   : > { %v1759_v6 = vpop.eup %1758 }
 0x476   : > { %v1210_v43 = vmul.f32 %v1759_v6, %v1148_v50  ;;  %vm1216_vm7 = vweird.f32 %v1759_v6 }
 0x477   : > { %vm1217_vm9 = vmor %vm1215_vm8, %vm1216_vm7 }
 0x478   : > { %v1211_v39 = vmul.f32 %v1759_v6, %v1210_v43 }
 0x47a   : > { %v1212_v62 = vmul.f32 0.5, %v1211_v39 }
 0x47c   : > { %v1213_v22 = vsub.f32 1.5, %v1212_v62 }
 0x47e   : > { %v1214_v0 = vmul.f32 %v1759_v6, %v1213_v22 }
 0x480   : > { %v1218_v1 = vsel %vm1217_vm9, %v1759_v6, %v1214_v0 }
 0x481   : > { %v1225_v26 = vmul.f32 %v1218_v1, %v2508_v23 }
 0x482   : > { %v1516_v56 = vpop.permute.xlu1 %1515 }
 0x483   : > { %v1235_v24 = vmul.f32 %v2478_v45, %v1225_v26 }
 0x485   : > { %v1245_v52 = vadd.f32 %v2484_v59, %v1235_v24 }
 0x487   : > { %v1530_v53 = vsel %vm454_vm1, %v1245_v52, %v2459_v54 }
 0x488   : > { %v1538_v60 = vsel %vm1531_vm0, %v1530_v53, %v2531_v63 }
 0x489   : > { %v1546_v38 = vsel %vm1539_vm2, %v1538_v60, %v1516_v56 }
 0x48a   : > { %1554 = vst.msk [vmem:[%s2496_s26 + $0x30] sm:$0xff] %vm1547_vm3, %v1546_v38 }
 0x48b PF: > { %s19_s30 = sadd.s32 1, %s1769_s30  }
 0x48c   : > { %p16_p4 = scmp.ge.s32.totalorder %s19_s30, 4  }
 0x48e   :  { %18 = sbr.rel (!%p16_p4) target bundleno = 1 (0x1), region = 89 }

// kernel: model_apply.19
= control target key start
LH: loop header
LB: loop body
LE: loop exit
PB: predicated region body
PF: predicated region fallthrough
CT: control target
= control target key end

     0   :  { %s1099_s18 = smov 0   ;;  %s1413_s0 = inlined_call_operand.vmem [shape: f32[112,40], index: 0, kind: input, shape index: {}]   ;;  %s1414_s1 = inlined_call_operand.vmem [shape: f32[8,8], index: 1, kind: input, shape index: {}]   ;;  %s1415_s2 = inlined_call_operand.vmem [shape: f32[24,16], index: 2, kind: input, shape index: {}]   ;;  %s1416_s3 = inlined_call_operand.vmem [shape: f32[1,16], index: 3, kind: input, shape index: {}]   ;;  %s1417_s4 = inlined_call_operand.vmem [shape: f32[8,8], index: 4, kind: input, shape index: {}]   ;;  %s1418_s5 = inlined_call_operand.vmem [shape: f32[112,40], index: 5, kind: output, shape index: {}]  }
   0x1 LB: > { %s965_s19 = sadd.s32 4294967295, %s1062_s18   ;;  %p969_p0 = scmp.ge.s32.totalorder %s1062_s18, 1  ;;  %s1062_s18 = sphi %s1099_s18, %s15_s18  }
   0x2   : > { %p188_p1 = scmp.lt.s32.totalorder %s1062_s18, 3 }
   0x4   : > { %p189_p2 = pnand %p969_p0, %p188_p1 }
   0x5   : > { %s216_s20 = smul.u32 (!%p189_p2), 7, %s965_s19  ;;  %s1064_s25 = smov (!%p189_p2), 112  }
   0x6   : > { %192 = sbr.rel (%p189_p2) target bundleno = 865 (0x361), region = 40  ;;  %s1065_s26 = smov (!%p189_p2), 120  }
   0x7   : > { %p217_p3 = scmp.lt.s32.totalorder (!%p189_p2), %s216_s20, 13  ;;  %s1066_s6 = smov (!%p189_p2), 16  }
   0x8   : > { %s1067_s13 = smov (!%p189_p2), 24   ;;  %s1068_s14 = smov (!%p189_p2), 32  }
   0xb   : > { %s1420_s20 = smov (!%p217_p3, %s216_s20), 13  ;;  %v235_v7 = vld [vmem:[%s1414_s1] sm:$0xff]  ;;  %vm303_vm0 = vcmask 64512   ;;  %vm591_vm11 = vcmask 195584   ;;  %vm580_vm12 = vcmask 130048  }
   0xc   : > { %s970_s21 = sshll.u32 %s1420_s20, 3  ;;  %361 = vmatpush.msra.mxu0 %v235_v7  ;;  %1023 = vmatpush.msra.mxu3 %v235_v7  ;;  %v1207_v39 = vld [vmem:[%s1417_s4] sm:$0xff] }
   0xd   : > { %s220_s24 = scalar_lea.vmem %s1413_s0, %s970_s21  ;;  %1027 = vmatpush.msra.mxu2 %v1207_v39  ;;  %s1372_s22 = scalar_lea.vmem %s1418_s5, %s970_s21 }
   0xe   : > { %v1115_v0 = vld [vmem:[%s220_s24 + $0x8] sm:$0xff]  ;;  %v1117_v1 = vld [vmem:[%s220_s24] sm:$0xff]  ;;  %v1125_v2 = vld [vmem:[%s220_s24 + $0x30] sm:$0xff] }
   0xf   : > { %263 = vrot.lane.b32.xlu1 %v1115_v0, %s1064_s25  ;;  %261 = vrot.lane.b32.xlu0 %v1117_v1, %s1064_s25  ;;  %v1127_v3 = vld [vmem:[%s220_s24 + $0x10] sm:$0xff]  ;;  %v1129_v4 = vld [vmem:[%s220_s24 + $0x18] sm:$0xff] }
  0x10   : > { %247 = vrot.lane.b32.xlu2 %v1117_v1, %s1065_s26  ;;  %v1137_v5 = vld [vmem:[%s220_s24 + $0x20] sm:$0xff]  ;;  %v1145_v6 = vld [vmem:[%s220_s24 + $0x28] sm:$0xff] }
  0x17   : > { %259 = vrot.lane.b32.xlu0 %v1125_v2, %s1065_s26  ;;  %265 = vrot.lane.b32.xlu1 %v1127_v3, %s1064_s25 }
  0x18   : > { %267 = vrot.lane.b32.xlu2 %v1129_v4, %s1064_s25 }
  0x1f   : > { %249 = vrot.lane.b32.xlu0 %v1115_v0, %s1065_s26  ;;  %269 = vrot.lane.b32.xlu1 %v1137_v5, %s1064_s25 }
  0x20   : > { %251 = vrot.lane.b32.xlu2 %v1127_v3, %s1065_s26 }
  0x27   : > { %253 = vrot.lane.b32.xlu1 %v1129_v4, %s1065_s26  ;;  %271 = vrot.lane.b32.xlu0 %v1145_v6, %s1064_s25 }
  0x2f   : > { %273 = vrot.lane.b32.xlu0 %v1125_v2, %s1064_s25 }
  0x6a   : > { %v248_v8 = vpop.permute.xlu2 %247 }
  0x72   : > { %v268_v9 = vpop.permute.xlu2 %267 }
  0x7a   : > { %v252_v12 = vpop.permute.xlu2 %251 }
  0x81   : > { %v264_v10 = vpop.permute.xlu1 %263  ;;  %v262_v11 = vpop.permute.xlu0 %261 }
  0x82   : > { %291 = vrot.lane.b32.xlu0 %v264_v10, %s1064_s25  ;;  %972 = vmatmul.msk.f32.vlgmr.msra.gmra.mxu0 %vm303_vm0, %v262_v11 }
  0x83   : > { %289 = vrot.lane.b32.xlu1 %v262_v11, %s1064_s25 }
  0x89   : > { %v260_v13 = vpop.permute.xlu0 %259  ;;  %v266_v14 = vpop.permute.xlu1 %265 }
  0x8a   : > { %279 = vrot.lane.b32.xlu0 %v252_v12, %s1064_s25  ;;  %973 = vmatmul.msk.f32.gmra.mxu0 %vm303_vm0, %v264_v10 }
  0x8b   : > { %287 = vrot.lane.b32.xlu2 %v260_v13, %s1064_s25 }
  0x91   : > { %v250_v15 = vpop.permute.xlu0 %249  ;;  %v270_v16 = vpop.permute.xlu1 %269 }
  0x92   : > { %255 = vrot.lane.b32.xlu0 %v1137_v5, %s1065_s26  ;;  %974 = vmatmul.msk.f32.gmra.mxu0 %vm303_vm0, %v266_v14 }
  0x93   : > { %275 = vrot.lane.b32.xlu2 %v248_v8, %s1064_s25  ;;  %277 = vrot.lane.b32.xlu1 %v250_v15, %s1064_s25 }
  0x99   : > { %v254_v17 = vpop.permute.xlu1 %253  ;;  %v272_v18 = vpop.permute.xlu0 %271 }
  0x9a   : > { %975 = vmatmul.msk.f32.gmra.mxu0 %vm303_vm0, %v268_v9 }
  0x9b   : > { %295 = vrot.lane.b32.xlu1 %v268_v9, %s1064_s25  ;;  %293 = vrot.lane.b32.xlu2 %v266_v14, %s1064_s25 }
  0xa1   : > { %v274_v19 = vpop.permute.xlu0 %273 }
  0xa2   : > { %976 = vmatmul.msk.f32.gmra.mxu0 %vm303_vm0, %v270_v16 }
  0xa3   : > { %257 = vrot.lane.b32.xlu1 %v1145_v6, %s1065_s26  ;;  %281 = vrot.lane.b32.xlu2 %v254_v17, %s1064_s25 }
  0xaa   : > { %977 = vmatmul.msk.f32.gmra.mxu0 %vm303_vm0, %v272_v18 }
  0xab   : > { %297 = vrot.lane.b32.xlu1 %v270_v16, %s1064_s25 }
  0xb2   : > { %978 = vmatmul.msk.f32.gmra.mxu0 %vm303_vm0, %v274_v19 }
  0xe5   : > { %v288_v20 = vpop.permute.xlu2 %287 }
  0xe6   : > { %985 = vmatmul.msk.f32.vlgmr.msra.gmra.mxu3 %vm303_vm0, %v288_v20 }
  0xed   : > { %v276_v21 = vpop.permute.xlu2 %275 }
  0xee   : > { %979 = vmatmul.msk.f32.gmra.mxu0 %vm303_vm0, %v276_v21 }
  0xf4   : > { %v292_v22 = vpop.permute.xlu0 %291 }
  0xf5   : > { %v290_v23 = vpop.permute.xlu1 %289  ;;  %v294_v25 = vpop.permute.xlu2 %293 }
  0xf6   : > { %986 = vmatmul.msk.f32.gmra.mxu3 %vm303_vm0, %v290_v23 }
  0xfc   : > { %v280_v24 = vpop.permute.xlu0 %279 }
  0xfd   : > { %v282_v29 = vpop.permute.xlu2 %281 }
  0xfe   : > { %987 = vmatmul.msk.f32.gmra.mxu3 %vm303_vm0, %v292_v22 }
  0xff   : > { %v1191_v32 = vpop.f32.mrf.mxu0 }
 0x100   : > { %v426_v45 = vmul.f32 %v1191_v32, %v1191_v32 }
 0x104   : > { %v256_v26 = vpop.permute.xlu0 %255 }
 0x105   : > { %v278_v27 = vpop.permute.xlu1 %277  ;;  %283 = vrot.lane.b32.xlu2 %v256_v26, %s1064_s25 }
 0x106   : > { %980 = vmatmul.msk.f32.gmra.mxu0 %vm303_vm0, %v278_v27  ;;  %988 = vmatmul.msk.f32.gmra.mxu3 %vm303_vm0, %v294_v25 }
 0x107   : > { %v1193_v33 = vpop.f32.mrf.mxu0 }
 0x108   : > { %v427_v53 = vmul.f32 %v1193_v33, %v1193_v33 }
 0x10d   : > { %v296_v28 = vpop.permute.xlu1 %295  ;;  %299 = vrot.lane.b32.xlu2 %v272_v18, %s1064_s25 }
 0x10e   : > { %981 = vmatmul.msk.f32.gmra.mxu0 %vm303_vm0, %v280_v24  ;;  %989 = vmatmul.msk.f32.gmra.mxu3 %vm303_vm0, %v296_v28 }
 0x10f   : > { %v1195_v34 = vpop.f32.mrf.mxu0 }
 0x110   : > { %v428_v9 = vmul.f32 %v1195_v34, %v1195_v34 }
 0x115   : > { %v258_v30 = vpop.permute.xlu1 %257 }
 0x116   : > { %285 = vrot.lane.b32.xlu0 %v258_v30, %s1064_s25  ;;  %982 = vmatmul.msk.f32.gmra.mxu0 %vm303_vm0, %v282_v29 }
 0x117   : > { %v1197_v35 = vpop.f32.mrf.mxu0 }
 0x118   : > { %v429_v25 = vmul.f32 %v1197_v35, %v1197_v35 }
 0x11d   : > { %v298_v31 = vpop.permute.xlu1 %297 }
 0x11e   : > { %301 = vrot.lane.b32.xlu0 %v274_v19, %s1064_s25  ;;  %990 = vmatmul.msk.f32.gmra.mxu3 %vm303_vm0, %v298_v31 }
 0x11f   : > { %v1199_v36 = vpop.f32.mrf.mxu0 }
 0x127   : > { %v1201_v37 = vpop.f32.mrf.mxu0 }
 0x12f   : > { %v1211_v41 = vpop.f32.mrf.mxu0 }
 0x15f   : > { %v284_v38 = vpop.permute.xlu2 %283 }
 0x160   : > { %983 = vmatmul.msk.f32.gmra.mxu0 %vm303_vm0, %v284_v38 }
 0x167   : > { %v300_v40 = vpop.permute.xlu2 %299 }
 0x168   : > { %991 = vmatmul.msk.f32.gmra.mxu3 %vm303_vm0, %v300_v40 }
 0x169   : > { %v1213_v42 = vpop.f32.mrf.mxu3 }
 0x16b   : > { %v1215_v43 = vpop.f32.mrf.mxu0 }
 0x16c   : > { %v433_v44 = vmul.f32 %v1215_v43, %v1215_v43 }
 0x16e   : > { %v440_v47 = vadd.f32 %v433_v44, %v426_v45 }
 0x179   : > { %v1221_v46 = vpop.f32.mrf.mxu3 }
 0x17a   : > { %v447_v48 = vmul.f32 %v1221_v46, %v1221_v46 }
 0x17c   : > { %v454_v49 = vadd.f32 %v447_v48, %v440_v47 }
 0x17e   : > { %v461_v50 = vmax.f32 %v454_v49, 1e-08 }
 0x180   : > { %1042 = vrsqrt.f32 %v461_v50  ;;  %vm475_vm1 = vcmp.eq.f32.partialorder %v461_v50, inf  ;;  %v478_v20 = vand.u32 2147483648, %v461_v50  ;;  %vm477_vm2 = vcmp.eq.f32.partialorder %v461_v50, 0.0 }
 0x181   : > { %v1225_v51 = vpop.f32.mrf.mxu3 }
 0x182   : > { %v448_v54 = vmul.f32 %v1225_v51, %v1225_v51 }
 0x183   : > { %v387_v52 = vpop.f32.mrf.mxu0 }
 0x184   : > { %v434_v55 = vmul.f32 %v387_v52, %v387_v52  ;;  %1008 = vmatmul.msk.f32.vlgmr.msra.gmra.mxu2 %vm303_vm0, %v387_v52 }
 0x186   : > { %v1043_v56 = vpop.eup %1042  ;;  %v441_v57 = vadd.f32 %v434_v55, %v427_v53 }
 0x187   : > { %v469_v58 = vmul.f32 %v1043_v56, %v461_v50 }
 0x188   : > { %v455_v59 = vadd.f32 %v448_v54, %v441_v57  ;;  %v286_v60 = vpop.permute.xlu0 %285 }
 0x189   : > { %984 = vmatmul.msk.f32.gmra.mxu0 %vm303_vm0, %v286_v60  ;;  %v1233_v61 = vpop.f32.mrf.mxu3  ;;  %v470_v62 = vmul.f32 %v1043_v56, %v469_v58 }
 0x18a   : > { %v462_v63 = vmax.f32 %v455_v59, 1e-08  ;;  %v449_v12 = vmul.f32 %v1233_v61, %v1233_v61 }
 0x18b   : > { %v390_v7 = vpop.f32.mrf.mxu0  ;;  %v471_v8 = vmul.f32 0.5, %v470_v62 }
 0x18c   : > { %v435_v10 = vmul.f32 %v390_v7, %v390_v7  ;;  %1009 = vmatmul.msk.f32.gmra.mxu2 %vm303_vm0, %v390_v7  ;;  %1044 = vrsqrt.f32 %v462_v63  ;;  %vm487_vm3 = vcmp.eq.f32.partialorder %v462_v63, inf  ;;  %v490_v52 = vand.u32 2147483648, %v462_v63 }
 0x18d   : > { %v472_v11 = vsub.f32 1.5, %v471_v8  ;;  %vm489_vm4 = vcmp.eq.f32.partialorder %v462_v63, 0.0 }
 0x18e   : > { %v442_v13 = vadd.f32 %v435_v10, %v428_v9 }
 0x18f   : > { %v473_v14 = vmul.f32 %v1043_v56, %v472_v11 }
 0x190   : > { %v456_v15 = vadd.f32 %v449_v12, %v442_v13  ;;  %v302_v16 = vpop.permute.xlu0 %301 }
 0x191   : > { %992 = vmatmul.msk.f32.gmra.mxu3 %vm303_vm0, %v302_v16  ;;  %v474_v17 = vmul.f32 %v473_v14, %v461_v50  ;;  %v1241_v21 = vpop.f32.mrf.mxu3  ;;  %v238_v16 = vld [vmem:[%s1415_s2 + $0x10] sm:$0xff] }
 0x192   : > { %v1045_v18 = vpop.eup %1044  ;;  %v463_v19 = vmax.f32 %v456_v15, 1e-08  ;;  %v450_v29 = vmul.f32 %v1241_v21, %v1241_v21  ;;  %626 = vmatpush.msra.mxu1 %v238_v16  ;;  %1024 = vmatpush.msrb.mxu3 %v238_v16 }
 0x193   : > { %v393_v22 = vpop.f32.mrf.mxu0  ;;  %v476_v23 = vsel %vm475_vm1, %v461_v50, %v474_v17  ;;  %v481_v24 = vmul.f32 %v1045_v18, %v462_v63 }
 0x194   : > { %v436_v26 = vmul.f32 %v393_v22, %v393_v22  ;;  %1010 = vmatmul.msk.f32.gmra.mxu2 %vm303_vm0, %v393_v22  ;;  %v479_v27 = vsel %vm477_vm2, %v478_v20, %v476_v23  ;;  %1046 = vrsqrt.f32 %v463_v19  ;;  %vm499_vm5 = vcmp.eq.f32.partialorder %v463_v19, inf }
 0x195   : > { %559 = vrot.lane.b32.xlu1 %v479_v27, %s1066_s6  ;;  %v482_v28 = vmul.f32 %v1045_v18, %v481_v24  ;;  %v502_v7 = vand.u32 2147483648, %v463_v19  ;;  %vm501_vm6 = vcmp.eq.f32.partialorder %v463_v19, 0.0  ;;  %v236_v27 = vld [vmem:[%s1415_s2] sm:$0xff]  ;;  %vm901_vm2 = vcmask 326656  }
 0x196   : > { %v443_v30 = vadd.f32 %v436_v26, %v429_v25  ;;  %v237_v26 = vld [vmem:[%s1415_s2 + $0x8] sm:$0xff] }
 0x197   : > { %v483_v31 = vmul.f32 0.5, %v482_v28  ;;  %627 = vmatpush.msra.mxu1 %v237_v26  ;;  %1025 = vmatpush.msrb.mxu3 %v237_v26 }
 0x198   : > { %v457_v38 = vadd.f32 %v450_v29, %v443_v30 }
 0x199   : > { %v484_v40 = vsub.f32 1.5, %v483_v31  ;;  %628 = vmatpush.msra.mxu1 %v236_v27  ;;  %1026 = vmatpush.msrb.mxu3 %v236_v27 }
 0x19a   : > { %v1047_v44 = vpop.eup %1046  ;;  %v464_v45 = vmax.f32 %v457_v38, 1e-08 }
 0x19b   : > { %v485_v47 = vmul.f32 %v1045_v18, %v484_v40  ;;  %v493_v48 = vmul.f32 %v1047_v44, %v463_v19  ;;  %730 = vmatpush.msrb.mxu1 %v1207_v39  ;;  %v431_v39 = vmul.f32 %v1201_v37, %v1201_v37 }
 0x19c   : > { %1048 = vrsqrt.f32 %v464_v45  ;;  %vm511_vm7 = vcmp.eq.f32.partialorder %v464_v45, inf  ;;  %v514_v13 = vand.u32 2147483648, %v464_v45  ;;  %vm513_vm8 = vcmp.eq.f32.partialorder %v464_v45, 0.0 }
 0x19d   : > { %v486_v49 = vmul.f32 %v485_v47, %v462_v63  ;;  %v494_v50 = vmul.f32 %v1047_v44, %v493_v48 }
 0x19f   : > { %v488_v53 = vsel %vm487_vm3, %v462_v63, %v486_v49  ;;  %v495_v54 = vmul.f32 0.5, %v494_v50 }
 0x1a0   : > { %v491_v55 = vsel %vm489_vm4, %v490_v52, %v488_v53 }
 0x1a1   : > { %561 = vrot.lane.b32.xlu2 %v491_v55, %s1066_s6  ;;  %v496_v56 = vsub.f32 1.5, %v495_v54  ;;  %v1255_v17 = vpop.f32.mrf.mxu3 }
 0x1a2   : > { %v1049_v57 = vpop.eup %1048  ;;  %v451_v22 = vmul.f32 %v1255_v17, %v1255_v17 }
 0x1a3   : > { %v497_v58 = vmul.f32 %v1047_v44, %v496_v56  ;;  %v505_v59 = vmul.f32 %v1049_v57, %v464_v45 }
 0x1a5   : > { %v498_v60 = vmul.f32 %v497_v58, %v463_v19  ;;  %v506_v62 = vmul.f32 %v1049_v57, %v505_v59 }
 0x1a7   : > { %v500_v8 = vsel %vm499_vm5, %v463_v19, %v498_v60  ;;  %v507_v9 = vmul.f32 0.5, %v506_v62  ;;  %v430_v19 = vmul.f32 %v1199_v36, %v1199_v36 }
 0x1a8   : > { %v503_v10 = vsel %vm501_vm6, %v502_v7, %v500_v8  ;;  %v432_v7 = vmul.f32 %v1211_v41, %v1211_v41  ;;  %v439_v8 = vmul.f32 %v1213_v42, %v1213_v42 }
 0x1a9   : > { %563 = vrot.lane.b32.xlu0 %v503_v10, %s1066_s6  ;;  %v508_v11 = vsub.f32 1.5, %v507_v9 }
 0x1ab   : > { %v509_v63 = vmul.f32 %v1049_v57, %v508_v11  ;;  %v446_v11 = vadd.f32 %v439_v8, %v432_v7 }
 0x1ad   : > { %v510_v12 = vmul.f32 %v509_v63, %v464_v45 }
 0x1af   : > { %v512_v14 = vsel %vm511_vm7, %v464_v45, %v510_v12 }
 0x1b0   : > { %v515_v15 = vsel %vm513_vm8, %v514_v13, %v512_v14 }
 0x1b1   : > { %565 = vrot.lane.b32.xlu1 %v515_v15, %s1066_s6 }
 0x1dd   : > { %v396_v18 = vpop.f32.mrf.mxu0 }
 0x1de   : > { %v437_v20 = vmul.f32 %v396_v18, %v396_v18  ;;  %1011 = vmatmul.msk.f32.gmra.mxu2 %vm303_vm0, %v396_v18 }
 0x1e0   : > { %v444_v23 = vadd.f32 %v437_v20, %v430_v19 }
 0x1e2   : > { %v458_v24 = vadd.f32 %v451_v22, %v444_v23 }
 0x1e4   : > { %v465_v25 = vmax.f32 %v458_v24, 1e-08 }
 0x1e6   : > { %1050 = vrsqrt.f32 %v465_v25  ;;  %vm523_vm9 = vcmp.eq.f32.partialorder %v465_v25, inf  ;;  %v526_v45 = vand.u32 2147483648, %v465_v25  ;;  %vm525_vm10 = vcmp.eq.f32.partialorder %v465_v25, 0.0 }
 0x1eb   : > { %v1270_v49 = vpop.f32.mrf.mxu3 }
 0x1ec   : > { %v1051_v28 = vpop.eup %1050  ;;  %v452_v56 = vmul.f32 %v1270_v49, %v1270_v49 }
 0x1ed   : > { %v517_v29 = vmul.f32 %v1051_v28, %v465_v25 }
 0x1ef   : > { %v518_v30 = vmul.f32 %v1051_v28, %v517_v29 }
 0x1f1   : > { %v519_v31 = vmul.f32 0.5, %v518_v30 }
 0x1f3   : > { %v520_v38 = vsub.f32 1.5, %v519_v31 }
 0x1f5   : > { %v521_v40 = vmul.f32 %v1051_v28, %v520_v38 }
 0x1f7   : > { %v522_v44 = vmul.f32 %v521_v40, %v465_v25 }
 0x1f9   : > { %v524_v47 = vsel %vm523_vm9, %v465_v25, %v522_v44 }
 0x1fa   : > { %v527_v48 = vsel %vm525_vm10, %v526_v45, %v524_v47 }
 0x1fb   : > { %567 = vrot.lane.b32.xlu2 %v527_v48, %s1066_s6  ;;  %v562_v59 = vpop.permute.xlu2 %561 }
 0x206   : > { %v399_v50 = vpop.f32.mrf.mxu0 }
 0x207   : > { %v438_v52 = vmul.f32 %v399_v50, %v399_v50  ;;  %v560_v53 = vpop.permute.xlu1 %559  ;;  %v1274_v54 = vpop.f32.mrf.mxu2  ;;  %1012 = vmatmul.msk.f32.gmra.mxu2 %vm303_vm0, %v399_v50 }
 0x208   : > { %v581_v55 = vsel %vm580_vm12, %v1117_v1, %v560_v53  ;;  %v582_v1 = vsel %vm580_vm12, %v1115_v0, %v562_v59 }
 0x209   : > { %v445_v57 = vadd.f32 %v438_v52, %v431_v39  ;;  %993 = vmatmul.msk.f32.vlgmr.msra.gmra.mxu1 %vm591_vm11, %v581_v55 }
 0x20b   : > { %v459_v58 = vadd.f32 %v452_v56, %v445_v57 }
 0x20d   : > { %v466_v60 = vmax.f32 %v459_v58, 1e-08 }
 0x20f   : > { %v759_v62 = vpop.f32.mrf.mxu2  ;;  %1013 = vmatmul.msk.f32.gmra.mxu2 %vm303_vm0, %v1213_v42  ;;  %1052 = vrsqrt.f32 %v466_v60  ;;  %vm535_vm13 = vcmp.eq.f32.partialorder %v466_v60, inf  ;;  %v538_v23 = vand.u32 2147483648, %v466_v60  ;;  %vm537_vm14 = vcmp.eq.f32.partialorder %v466_v60, 0.0 }
 0x210   : > { %834 = vrot.lane.b32.xlu2 %v759_v62, %s1067_s13 }
 0x211   : > { %994 = vmatmul.msk.f32.gmra.mxu1 %vm591_vm11, %v582_v1 }
 0x214   : > { %v423_v9 = vpop.f32.mrf.mxu3 }
 0x215   : > { %v1053_v10 = vpop.eup %1052  ;;  %v453_v63 = vmul.f32 %v423_v9, %v423_v9 }
 0x216   : > { %v529_v12 = vmul.f32 %v1053_v10, %v466_v60 }
 0x217   : > { %v460_v13 = vadd.f32 %v453_v63, %v446_v11  ;;  %1014 = vmatmul.msk.f32.gmra.mxu2 %vm303_vm0, %v1221_v46  ;;  %v762_v30 = vpop.f32.mrf.mxu2 }
 0x218   : > { %v530_v14 = vmul.f32 %v1053_v10, %v529_v12  ;;  %v1041_v12 = vld [vmem:[%s1416_s3] ss:$0 sm:$0xff] }
 0x219   : > { %v467_v15 = vmax.f32 %v460_v13, 1e-08 }
 0x21a   : > { %v531_v0 = vmul.f32 0.5, %v530_v14 }
 0x21b   : > { %v564_v16 = vpop.permute.xlu0 %563  ;;  %1054 = vrsqrt.f32 %v467_v15  ;;  %vm547_vm15 = vcmp.eq.f32.partialorder %v467_v15, inf  ;;  %v550_v38 = vand.u32 2147483648, %v467_v15  ;;  %vm549_vm1 = vcmp.eq.f32.partialorder %v467_v15, 0.0 }
 0x21c   : > { %v583_v18 = vsel %vm580_vm12, %v1127_v3, %v564_v16  ;;  %v532_v42 = vsub.f32 1.5, %v531_v0 }
 0x21d   : > { %995 = vmatmul.msk.f32.gmra.mxu1 %vm591_vm11, %v583_v18 }
 0x21e   : > { %v533_v19 = vmul.f32 %v1053_v10, %v532_v42 }
 0x21f   : > { %1015 = vmatmul.msk.f32.gmra.mxu2 %vm303_vm0, %v1225_v51 }
 0x220   : > { %v534_v20 = vmul.f32 %v533_v19, %v466_v60 }
 0x221   : > { %v1055_v22 = vpop.eup %1054 }
 0x222   : > { %v536_v46 = vsel %vm535_vm13, %v466_v60, %v534_v20  ;;  %v541_v24 = vmul.f32 %v1055_v22, %v467_v15 }
 0x223   : > { %v566_v25 = vpop.permute.xlu1 %565  ;;  %v539_v26 = vsel %vm537_vm14, %v538_v23, %v536_v46 }
 0x224   : > { %569 = vrot.lane.b32.xlu0 %v539_v26, %s1066_s6  ;;  %v584_v3 = vsel %vm580_vm12, %v1129_v4, %v566_v25  ;;  %v542_v27 = vmul.f32 %v1055_v22, %v541_v24 }
 0x225   : > { %996 = vmatmul.msk.f32.gmra.mxu1 %vm591_vm11, %v584_v3 }
 0x226   : > { %v543_v28 = vmul.f32 0.5, %v542_v27 }
 0x227   : > { %1016 = vmatmul.msk.f32.gmra.mxu2 %vm303_vm0, %v1233_v61 }
 0x228   : > { %v544_v51 = vsub.f32 1.5, %v543_v28 }
 0x22a   : > { %v545_v29 = vmul.f32 %v1055_v22, %v544_v51 }
 0x22c   : > { %836 = vrot.lane.b32.xlu0 %v762_v30, %s1067_s13  ;;  %v546_v31 = vmul.f32 %v545_v29, %v467_v15 }
 0x22d   : > { %1000 = vmatmul.msk.f32.vlgmr.msrb.gmra.mxu1 %vm303_vm0, %v1191_v32 }
 0x22e   : > { %v548_v40 = vsel %vm547_vm15, %v467_v15, %v546_v31 }
 0x22f   : > { %1017 = vmatmul.msk.f32.gmra.mxu2 %vm303_vm0, %v1241_v21  ;;  %v551_v4 = vsel %vm549_vm1, %v550_v38, %v548_v40 }
 0x230   : > { %571 = vrot.lane.b32.xlu1 %v551_v4, %s1066_s6 }
 0x235   : > { %1001 = vmatmul.msk.f32.gmra.mxu1 %vm303_vm0, %v1193_v33 }
 0x237   : > { %1018 = vmatmul.msk.f32.gmra.mxu2 %vm303_vm0, %v1255_v17 }
 0x238   : > { %832 = vrot.lane.b32.xlu1 %v1274_v54, %s1067_s13 }
 0x23d   : > { %1002 = vmatmul.msk.f32.gmra.mxu1 %vm303_vm0, %v1195_v34 }
 0x23f   : > { %1019 = vmatmul.msk.f32.gmra.mxu2 %vm303_vm0, %v1270_v49 }
 0x245   : > { %1003 = vmatmul.msk.f32.gmra.mxu1 %vm303_vm0, %v1197_v35 }
 0x247   : > { %1020 = vmatmul.msk.f32.gmra.mxu2 %vm303_vm0, %v423_v9 }
 0x24d   : > { %1004 = vmatmul.msk.f32.gmra.mxu1 %vm303_vm0, %v1199_v36 }
 0x255   : > { %1005 = vmatmul.msk.f32.gmra.mxu1 %vm303_vm0, %v1201_v37  ;;  %v568_v32 = vpop.permute.xlu2 %567 }
 0x256   : > { %v585_v33 = vsel %vm580_vm12, %v1137_v5, %v568_v32 }
 0x257   : > { %997 = vmatmul.msk.f32.vlgmr.msrb.gmra.mxu3 %vm591_vm11, %v585_v33 }
 0x25d   : > { %1006 = vmatmul.msk.f32.gmra.mxu1 %vm303_vm0, %v1211_v41 }
 0x261   : > { %v765_v34 = vpop.f32.mrf.mxu2 }
 0x262   : > { %838 = vrot.lane.b32.xlu1 %v765_v34, %s1067_s13 }
 0x265   : > { %1007 = vmatmul.msk.f32.gmra.mxu1 %vm303_vm0, %v1215_v43  ;;  %vm893_vm0 = vcmask 261120  }
 0x26a   : > { %v835_v59 = vpop.permute.xlu2 %834 }
 0x286   : > { %v1336_v35 = vpop.f32.mrf.mxu1 }
 0x28a   : > { %v768_v36 = vpop.f32.mrf.mxu2 }
 0x28b   : > { %840 = vrot.lane.b32.xlu2 %v768_v36, %s1067_s13 }
 0x28e   : > { %v633_v37 = vpop.f32.mrf.mxu1 }
 0x28f   : > { %v634_v0 = vadd.f32 %v1041_v12, %v633_v37 }
 0x292   : > { %v771_v61 = vpop.f32.mrf.mxu2 }
 0x293   : > { %842 = vrot.lane.b32.xlu0 %v771_v61, %s1067_s13 }
 0x296   : > { %v570_v5 = vpop.permute.xlu0 %569 }
 0x297   : > { %v586_v21 = vsel %vm580_vm12, %v1145_v6, %v570_v5 }
 0x298   : > { %998 = vmatmul.msk.f32.gmra.mxu3 %vm591_vm11, %v586_v21  ;;  %v631_v21 = vadd.f32 %v1041_v12, %v1336_v35 }
 0x29a   : > { %v1343_v41 = vpop.f32.mrf.mxu1  ;;  %v774_v17 = vpop.f32.mrf.mxu2 }
 0x29b   : > { %858 = vrot.lane.b32.xlu1 %v774_v17, %s1068_s14  ;;  %v637_v46 = vadd.f32 %v1041_v12, %v1343_v41 }
 0x29e   : > { %v837_v1 = vpop.permute.xlu0 %836 }
 0x2a2   : > { %v777_v43 = vpop.f32.mrf.mxu2  ;;  %v572_v44 = vpop.permute.xlu1 %571 }
 0x2a3   : > { %v639_v45 = vpop.f32.mrf.mxu1  ;;  %860 = vrot.lane.b32.xlu2 %v777_v43, %s1068_s14  ;;  %v587_v47 = vsel %vm580_vm12, %v1125_v2, %v572_v44 }
 0x2a4   : > { %999 = vmatmul.msk.f32.gmra.mxu3 %vm591_vm11, %v587_v47  ;;  %v640_v14 = vadd.f32 %v1041_v12, %v639_v45 }
 0x2aa   : > { %v780_v48 = vpop.f32.mrf.mxu2  ;;  %v833_v62 = vpop.permute.xlu1 %832 }
 0x2ab   : > { %v732_v6 = vpop.f32.mrf.mxu1  ;;  %862 = vrot.lane.b32.xlu0 %v780_v48, %s1068_s14 }
 0x2ac   : > { %802 = vrot.lane.b32.xlu2 %v732_v6, %s1066_s6 }
 0x2b2   : > { %v783_v49 = vpop.f32.mrf.mxu2 }
 0x2b3   : > { %v735_v50 = vpop.f32.mrf.mxu1  ;;  %864 = vrot.lane.b32.xlu1 %v783_v49, %s1068_s14 }
 0x2b4   : > { %804 = vrot.lane.b32.xlu0 %v735_v50, %s1066_s6 }
 0x2ba   : > { %v786_v2 = vpop.f32.mrf.mxu2 }
 0x2bb   : > { %v738_v39 = vpop.f32.mrf.mxu1 }
 0x2bc   : > { %806 = vrot.lane.b32.xlu1 %v738_v39, %s1066_s6 }
 0x2c2   : > { %v789_v54 = vpop.f32.mrf.mxu2 }
 0x2c3   : > { %v741_v52 = vpop.f32.mrf.mxu1 }
 0x2c4   : > { %808 = vrot.lane.b32.xlu2 %v741_v52, %s1066_s6 }
 0x2ca   : > { %v792_v56 = vpop.f32.mrf.mxu2 }
 0x2cb   : > { %v744_v53 = vpop.f32.mrf.mxu1 }
 0x2cc   : > { %810 = vrot.lane.b32.xlu0 %v744_v53, %s1066_s6 }
 0x2d3   : > { %v747_v55 = vpop.f32.mrf.mxu1 }
 0x2d4   : > { %812 = vrot.lane.b32.xlu1 %v747_v55, %s1066_s6  ;;  %v839_v8 = vpop.permute.xlu1 %838 }
 0x2da   : > { %v642_v27 = vpop.f32.mrf.mxu3 }
 0x2db   : > { %v750_v57 = vpop.f32.mrf.mxu1  ;;  %v643_v51 = vadd.f32 %v1041_v12, %v642_v27 }
 0x2dc   : > { %870 = vrot.lane.b32.xlu1 %v792_v56, %s1068_s14  ;;  %814 = vrot.lane.b32.xlu2 %v750_v57, %s1066_s6 }
 0x2e3   : > { %v753_v58 = vpop.f32.mrf.mxu1 }
 0x2e4   : > { %866 = vrot.lane.b32.xlu2 %v786_v2, %s1068_s14  ;;  %830 = vrot.lane.b32.xlu0 %v753_v58, %s1067_s13 }
 0x2e5   : > { %v841_v60 = vpop.permute.xlu2 %840 }
 0x2ec   : > { %868 = vrot.lane.b32.xlu0 %v789_v54, %s1068_s14 }
 0x2fd   : > { %v861_v7 = vpop.permute.xlu2 %860 }
 0x305   : > { %v843_v9 = vpop.permute.xlu0 %842 }
 0x306   : > { %v803_v10 = vpop.permute.xlu2 %802 }
 0x307   : > { %v879_v41 = vsel %vm580_vm12, %v631_v21, %v803_v10 }
 0x30d   : > { %v859_v11 = vpop.permute.xlu1 %858 }
 0x31b   : > { %v645_v29 = vpop.f32.mrf.mxu3 }
 0x31c   : > { %v646_v45 = vadd.f32 %v1041_v12, %v645_v29 }
 0x31d   : > { %v863_v63 = vpop.permute.xlu0 %862 }
 0x31e   : > { %v809_v13 = vpop.permute.xlu2 %808 }
 0x31f   : > { %v882_v15 = vsel %vm580_vm12, %v640_v14, %v809_v13 }
 0x320   : > { %v889_v18 = vsel %vm591_vm11, %v882_v15, %v837_v1 }
 0x325   : > { %v865_v16 = vpop.permute.xlu1 %864 }
 0x326   : > { %v897_v42 = vsel %vm893_vm0, %v889_v18, %v865_v16  ;;  %v805_v19 = vpop.permute.xlu0 %804 }
 0x327   : > { %905 = vst.msk [vmem:[%s1372_s22 + $0x18] sm:$0xff] %vm901_vm2, %v897_v42  ;;  %v880_v20 = vsel %vm580_vm12, %v634_v0, %v805_v19  ;;  %v648_v32 = vpop.f32.mrf.mxu3 }
 0x328   : > { %v887_v22 = vsel %vm591_vm11, %v880_v20, %v833_v62  ;;  %v649_v34 = vadd.f32 %v1041_v12, %v648_v32 }
 0x329   : > { %v895_v23 = vsel %vm893_vm0, %v887_v22, %v861_v7 }
 0x32a   : > { %903 = vst.msk [vmem:[%s1372_s22 + $0x8] sm:$0xff] %vm901_vm2, %v895_v23 }
 0x32e   : > { %v807_v24 = vpop.permute.xlu1 %806 }
 0x32f   : > { %v881_v25 = vsel %vm580_vm12, %v637_v46, %v807_v24 }
 0x330   : > { %v888_v26 = vsel %vm591_vm11, %v881_v25, %v835_v59 }
 0x331   : > { %v896_v3 = vsel %vm893_vm0, %v888_v26, %v863_v63 }
 0x332   : > { %904 = vst.msk [vmem:[%s1372_s22 + $0x10] sm:$0xff] %vm901_vm2, %v896_v3 }
 0x336   : > { %v815_v28 = vpop.permute.xlu2 %814 }
 0x337   : > { %v885_v36 = vsel %vm580_vm12, %v649_v34, %v815_v28 }
 0x338   : > { %v892_v61 = vsel %vm591_vm11, %v885_v36, %v843_v9 }
 0x33e   : > { %v811_v30 = vpop.permute.xlu0 %810  ;;  %v867_v40 = vpop.permute.xlu2 %866 }
 0x33f   : > { %v883_v31 = vsel %vm580_vm12, %v643_v51, %v811_v30 }
 0x340   : > { %v890_v38 = vsel %vm591_vm11, %v883_v31, %v839_v8 }
 0x341   : > { %v898_v4 = vsel %vm893_vm0, %v890_v38, %v867_v40 }
 0x342   : > { %906 = vst.msk [vmem:[%s1372_s22 + $0x20] sm:$0xff] %vm901_vm2, %v898_v4 }
 0x346   : > { %v813_v33 = vpop.permute.xlu1 %812 }
 0x347   : > { %v884_v47 = vsel %vm580_vm12, %v646_v45, %v813_v33 }
 0x348   : > { %v891_v6 = vsel %vm591_vm11, %v884_v47, %v841_v60 }
 0x34e   : > { %v871_v37 = vpop.permute.xlu1 %870 }
 0x34f   : > { %v900_v5 = vsel %vm893_vm0, %v892_v61, %v871_v37 }
 0x350   : > { %908 = vst.msk [vmem:[%s1372_s22 + $0x30] sm:$0xff] %vm901_vm2, %v900_v5 }
 0x356   : > { %v831_v17 = vpop.permute.xlu0 %830 }
 0x357   : > { %v886_v43 = vsel %vm591_vm11, %v879_v41, %v831_v17 }
 0x358   : > { %v894_v44 = vsel %vm893_vm0, %v886_v43, %v859_v11 }
 0x359   : > { %902 = vst.msk [vmem:[%s1372_s22] sm:$0xff] %vm901_vm2, %v894_v44 }
 0x35e   : > { %v869_v48 = vpop.permute.xlu0 %868 }
 0x35f   : > { %v899_v49 = vsel %vm893_vm0, %v891_v6, %v869_v48 }
 0x360   : > { %907 = vst.msk [vmem:[%s1372_s22 + $0x28] sm:$0xff] %vm901_vm2, %v899_v49 }
 0x361 PF: > { %s15_s18 = sadd.s32 1, %s1062_s18  }
 0x362   : > { %p12_p4 = scmp.ge.s32.totalorder %s15_s18, 4  }
 0x364   :  { %14 = sbr.rel (!%p12_p4) target bundleno = 1 (0x1), region = 70 }

// kernel: model_apply.20
= control target key start
LH: loop header
LB: loop body
LE: loop exit
PB: predicated region body
PF: predicated region fallthrough
CT: control target
= control target key end

     0   :  { %s503_s13 = smov 108   ;;  %s504_s14 = smov 104   ;;  %vm77_vm0 = vcmask 1041408   ;;  %vm64_vm1 = vcmask 80896   ;;  %vm166_vm6 = vcmask 277504   ;;  %vm160_vm7 = vcmask 195584   ;;  %s730_s0 = inlined_call_operand.vmem [shape: f32[16,54], index: 0, kind: input, shape index: {}]   ;;  %s731_s2 = inlined_call_operand.vmem [shape: f32[10,10], index: 2, kind: input, shape index: {}]   ;;  %s732_s5 = inlined_call_operand.vmem [shape: f32[10,4], index: 5, kind: input, shape index: {}]   ;;  %s733_s1 = inlined_call_operand.vmem [shape: f32[16,28], index: 1, kind: input, shape index: {}]   ;;  %s734_s4 = inlined_call_operand.vmem [shape: f32[1,16], index: 4, kind: input, shape index: {}]   ;;  %s735_s3 = inlined_call_operand.vmem [shape: f32[34,16], index: 3, kind: input, shape index: {}]   ;;  %s736_s8 = inlined_call_operand.vmem [shape: f32[1,4], index: 8, kind: input, shape index: {}]   ;;  %s737_s6 = inlined_call_operand.vmem [shape: f32[1,16], index: 6, kind: input, shape index: {}]   ;;  %s738_s7 = inlined_call_operand.vmem [shape: f32[1,16], index: 7, kind: input, shape index: {}]   ;;  %s739_s9 = inlined_call_operand.vmem [shape: f32[16,28], index: 9, kind: output, shape index: {}]  }
   0x1   :  { %v565_v0 = vld [vmem:[%s730_s0] sm:$0xff]  ;;  %v570_v1 = vld [vmem:[%s730_s0 + $0x8] sm:$0xff]  ;;  %s505_s15 = smov 118   ;;  %s506_s23 = smov 112   ;;  %v39_v57 = vld [vmem:[%s735_s3 + $0x18] sm:$0xff]  ;;  %vm364_vm8 = vcmask 31744  }
   0x2   :  { %48 = vrot.lane.b32.xlu0 %v565_v0, %s503_s13  ;;  %50 = vrot.lane.b32.xlu1 %v570_v1, %s503_s13  ;;  %v35_v2 = vld [vmem:[%s731_s2 + $0x8] sm:$0x3]  ;;  %v34_v3 = vld [vmem:[%s731_s2] sm:$0xff]  ;;  %vm289_vm9 = vcmask 130048   ;;  %s509_s16 = smov 20   ;;  %s510_s17 = smov 16  }
   0x3   :  { %52 = vrot.lane.b32.xlu2 %v565_v0, %s504_s14  ;;  %453 = vmatpush.msk.msra.mxu0 %vm77_vm0, %v35_v2  ;;  %v200_v10 = vld [vmem:[%s732_s5 + $0x8] sm:$0x3]  ;;  %v199_v11 = vld [vmem:[%s732_s5] sm:$0xff]  ;;  %v38_v58 = vld [vmem:[%s735_s3 + $0x10] sm:$0xff] }
   0x4   :  { %470 = vmatpush.msk.msra.mxu3 %vm77_vm0, %v35_v2  ;;  %463 = vmatpush.msk.msra.mxu2 %vm77_vm0, %v200_v10  ;;  %v613_v18 = vld [vmem:[%s733_s1] sm:$0xff]  ;;  %v620_v20 = vld [vmem:[%s733_s1 + $0x8] sm:$0xff]  ;;  %s507_s1 = smov 24  }
   0x5   :  { %96 = vmatpush.msra.mxu0 %v34_v3  ;;  %v40_v56 = vld [vmem:[%s735_s3 + $0x20] sm:$0x3]  ;;  %v37_v59 = vld [vmem:[%s735_s3 + $0x8] sm:$0xff] }
   0x6   :  { %471 = vmatpush.msra.mxu3 %v34_v3  ;;  %237 = vmatpush.msra.mxu2 %v199_v11  ;;  %v36_v60 = vld [vmem:[%s735_s3] sm:$0xff] }
   0x7   :  { %460 = vmatpush.msk.msra.mxu1 %vm77_vm0, %v40_v56 }
   0x8   :  { %472 = vmatpush.msk.msrb.mxu3 %vm77_vm0, %v200_v10 }
   0x9   :  { %188 = vmatpush.msra.mxu1 %v39_v57 }
   0xa   :  { %44 = vrot.lane.b32.xlu0 %v565_v0, %s505_s15  ;;  %46 = vrot.lane.b32.xlu1 %v570_v1, %s505_s15 }
   0xb   :  { %54 = vrot.lane.b32.xlu2 %v570_v1, %s504_s14  ;;  %473 = vmatpush.msrb.mxu3 %v199_v11 }
   0xc   :  { %189 = vmatpush.msra.mxu1 %v38_v58 }
   0xe   :  { %190 = vmatpush.msra.mxu1 %v37_v59 }
  0x10   :  { %191 = vmatpush.msra.mxu1 %v36_v60 }
  0x5d   :  { %v53_v4 = vpop.permute.xlu2 %52 }
  0x5e   :  { %454 = vmatmul.msk.f32.vlgmr.msra.gmra.mxu0 %vm64_vm1, %v53_v4 }
  0x65   :  { %v55_v5 = vpop.permute.xlu2 %54 }
  0x66   :  { %455 = vmatmul.msk.f32.gmra.mxu0 %vm64_vm1, %v55_v5 }
  0x74   :  { %v49_v6 = vpop.permute.xlu0 %48  ;;  %v51_v7 = vpop.permute.xlu1 %50 }
  0x75   :  { %60 = vrot.lane.b32.xlu0 %v49_v6, %s504_s14  ;;  %62 = vrot.lane.b32.xlu2 %v51_v7, %s504_s14 }
  0x7c   :  { %v45_v8 = vpop.permute.xlu0 %44  ;;  %v47_v9 = vpop.permute.xlu1 %46 }
  0x7d   :  { %56 = vrot.lane.b32.xlu1 %v45_v8, %s504_s14  ;;  %58 = vrot.lane.b32.xlu0 %v47_v9, %s504_s14 }
  0x85   :  { %263 = vrot.lane.b32.xlu0 %v613_v18, %s506_s23 }
  0x8d   :  { %273 = vrot.lane.b32.xlu0 %v620_v20, %s503_s13 }
  0xcf   :  { %v63_v15 = vpop.permute.xlu2 %62 }
  0xdb   :  { %v98_v12 = vpop.f32.mrf.mxu0 }
  0xdc   :  { %464 = vmatmul.msk.f32.vlgmr.msra.gmra.mxu2 %vm64_vm1, %v98_v12  ;;  %v116_v22 = vmul.f32 %v98_v12, %v98_v12 }
  0xe3   :  { %v101_v13 = vpop.f32.mrf.mxu0 }
  0xe4   :  { %465 = vmatmul.msk.f32.gmra.mxu2 %vm64_vm1, %v101_v13  ;;  %v117_v30 = vmul.f32 %v101_v13, %v101_v13 }
  0xe7   :  { %v61_v14 = vpop.permute.xlu0 %60 }
  0xe8   :  { %458 = vmatmul.msk.f32.vlgmr.msra.gmra.mxu3 %vm64_vm1, %v61_v14 }
  0xef   :  { %v57_v16 = vpop.permute.xlu1 %56  ;;  %v59_v17 = vpop.permute.xlu0 %58 }
  0xf0   :  { %456 = vmatmul.msk.f32.gmra.mxu0 %vm64_vm1, %v57_v16  ;;  %459 = vmatmul.msk.f32.gmra.mxu3 %vm64_vm1, %v63_v15 }
  0xf7   :  { %v264_v4 = vpop.permute.xlu0 %263 }
  0xf8   :  { %457 = vmatmul.msk.f32.gmra.mxu0 %vm64_vm1, %v59_v17 }
  0xff   :  { %v274_v11 = vpop.permute.xlu0 %273 }
 0x15f   :  { %v239_v61 = vpop.f32.mrf.mxu2 }
 0x160   :  { %v660_v13 = vadd.f32 %v264_v4, %v239_v61  ;;  %v484_v61 = vld [vmem:[%s736_s8] ss:$0 sm:$0xff] }
 0x167   :  { %v242_v62 = vpop.f32.mrf.mxu2 }
 0x16b   :  { %v110_v19 = vpop.f32.mrf.mxu3 }
 0x16c   :  { %468 = vmatmul.msk.f32.vlgmr.msrb.gmra.mxu3 %vm64_vm1, %v110_v19  ;;  %v122_v24 = vmul.f32 %v110_v19, %v110_v19  ;;  %v352_v19 = vmul.f32 %v660_v13, %v660_v13 }
 0x16d   :  { %v104_v21 = vpop.f32.mrf.mxu0 }
 0x16e   :  { %v118_v23 = vmul.f32 %v104_v21, %v104_v21  ;;  %466 = vmatmul.msk.f32.gmra.mxu2 %vm64_vm1, %v104_v21 }
 0x170   :  { %v120_v25 = vadd.f32 %v118_v23, %v116_v22 }
 0x172   :  { %v124_v26 = vadd.f32 %v122_v24, %v120_v25 }
 0x173   :  { %v113_v27 = vpop.f32.mrf.mxu3 }
 0x174   :  { %v126_v28 = vmax.f32 %v124_v26, 1e-08  ;;  %469 = vmatmul.msk.f32.gmra.mxu3 %vm64_vm1, %v113_v27  ;;  %v123_v32 = vmul.f32 %v113_v27, %v113_v27 }
 0x175   :  { %v107_v29 = vpop.f32.mrf.mxu0 }
 0x176   :  { %v119_v31 = vmul.f32 %v107_v29, %v107_v29  ;;  %467 = vmatmul.msk.f32.gmra.mxu2 %vm64_vm1, %v107_v29  ;;  %487 = vrsqrt.f32 %v126_v28  ;;  %vm135_vm2 = vcmp.eq.f32.partialorder %v126_v28, inf  ;;  %v138_v46 = vand.u32 2147483648, %v126_v28 }
 0x177   :  { %vm137_vm3 = vcmp.eq.f32.partialorder %v126_v28, 0.0 }
 0x178   :  { %v121_v33 = vadd.f32 %v119_v31, %v117_v30 }
 0x17a   :  { %v125_v34 = vadd.f32 %v123_v32, %v121_v33 }
 0x17c   :  { %v488_v35 = vpop.eup %487  ;;  %v127_v36 = vmax.f32 %v125_v34, 1e-08 }
 0x17d   :  { %v129_v37 = vmul.f32 %v488_v35, %v126_v28 }
 0x17e   :  { %489 = vrsqrt.f32 %v127_v36  ;;  %vm147_vm4 = vcmp.eq.f32.partialorder %v127_v36, inf  ;;  %v150_v53 = vand.u32 2147483648, %v127_v36  ;;  %vm149_vm5 = vcmp.eq.f32.partialorder %v127_v36, 0.0 }
 0x17f   :  { %v130_v38 = vmul.f32 %v488_v35, %v129_v37 }
 0x181   :  { %v131_v39 = vmul.f32 0.5, %v130_v38  ;;  %v483_v38 = vld [vmem:[%s734_s4] ss:$0 sm:$0xff] }
 0x183   :  { %v132_v40 = vsub.f32 1.5, %v131_v39 }
 0x184   :  { %v490_v41 = vpop.eup %489 }
 0x185   :  { %v133_v42 = vmul.f32 %v488_v35, %v132_v40  ;;  %v141_v43 = vmul.f32 %v490_v41, %v127_v36  ;;  %v508_v35 = vmov 4.0  }
 0x186   :  { %491 = vrcp.f32 %v508_v35 }
 0x187   :  { %v134_v44 = vmul.f32 %v133_v42, %v126_v28  ;;  %v142_v45 = vmul.f32 %v490_v41, %v141_v43 }
 0x189   :  { %v136_v47 = vsel %vm135_vm2, %v126_v28, %v134_v44  ;;  %v143_v48 = vmul.f32 0.5, %v142_v45 }
 0x18a   :  { %v139_v49 = vsel %vm137_vm3, %v138_v46, %v136_v47 }
 0x18b   :  { %154 = vrot.lane.b32.xlu1 %v139_v49, %s507_s1  ;;  %v144_v50 = vsub.f32 1.5, %v143_v48 }
 0x18d   :  { %v145_v51 = vmul.f32 %v490_v41, %v144_v50 }
 0x18f   :  { %v146_v52 = vmul.f32 %v145_v51, %v127_v36 }
 0x191   :  { %v148_v54 = vsel %vm147_vm4, %v127_v36, %v146_v52  ;;  %v492_v36 = vpop.eup %491 }
 0x192   :  { %v151_v55 = vsel %vm149_vm5, %v150_v53, %v148_v54  ;;  %v372_v37 = vmul.f32 4.0, %v492_v36  ;;  %vm376_vm10 = vweird.f32 %v492_v36 }
 0x193   :  { %265 = vrot.lane.b32.xlu1 %v620_v20, %s506_s23  ;;  %156 = vrot.lane.b32.xlu2 %v151_v55, %s507_s1 }
 0x194   :  { %v373_v40 = vsub.f32 1.0, %v372_v37 }
 0x196   :  { %v374_v43 = vmul.f32 %v492_v36, %v373_v40 }
 0x198   :  { %v375_v46 = vadd.f32 %v492_v36, %v374_v43 }
 0x19a   :  { %v377_v49 = vsel %vm376_vm10, %v492_v36, %v375_v46 }
 0x19b   :  { %279 = vrot.lane.b32.xlu1 %v613_v18, %s504_s14  ;;  %271 = vrot.lane.b32.xlu2 %v613_v18, %s503_s13 }
 0x1a3   :  { %281 = vrot.lane.b32.xlu2 %v620_v20, %s504_s14 }
 0x1ed   :  { %v157_v63 = vpop.permute.xlu2 %156 }
 0x1ee   :  { %v162_v9 = vsel %vm160_vm7, %v570_v1, %v157_v63 }
 0x1ef   :  { %v251_v7 = vpop.f32.mrf.mxu3 }
 0x1f1   :  { %v245_v5 = vpop.f32.mrf.mxu2 }
 0x1f5   :  { %v272_v6 = vpop.permute.xlu2 %271 }
 0x1f6   :  { %v658_v12 = vadd.f32 %v272_v6, %v245_v5 }
 0x1f7   :  { %v254_v23 = vpop.f32.mrf.mxu3 }
 0x1f9   :  { %v248_v10 = vpop.f32.mrf.mxu2 }
 0x1fa   :  { %v664_v15 = vadd.f32 %v274_v11, %v248_v10 }
 0x1fc   :  { %v355_v21 = vmul.f32 %v664_v15, %v664_v15 }
 0x1fd   :  { %v155_v2 = vpop.permute.xlu1 %154  ;;  %v282_v16 = vpop.permute.xlu2 %281 }
 0x1fe   :  { %v161_v3 = vsel %vm160_vm7, %v565_v0, %v155_v2  ;;  %v354_v0 = vmul.f32 %v658_v12, %v658_v12  ;;  %v676_v25 = vadd.f32 %v282_v16, %v254_v23 }
 0x1ff   :  { %461 = vmatmul.msk.f32.vlgmr.msra.gmra.mxu1 %vm166_vm6, %v161_v3 }
 0x200   :  { %v356_v24 = vadd.f32 %v354_v0, %v352_v19  ;;  %v359_v29 = vmul.f32 %v676_v25, %v676_v25 }
 0x205   :  { %v266_v8 = vpop.permute.xlu1 %265 }
 0x206   :  { %v662_v14 = vadd.f32 %v266_v8, %v242_v62 }
 0x207   :  { %462 = vmatmul.msk.f32.gmra.mxu1 %vm166_vm6, %v162_v9  ;;  %vm441_vm6 = vcmask 162816  }
 0x208   :  { %v353_v1 = vmul.f32 %v662_v14, %v662_v14 }
 0x20a   :  { %v357_v27 = vadd.f32 %v355_v21, %v353_v1  ;;  %v511_v1 = vmov 16.0  }
 0x20c   :  { %v361_v32 = vadd.f32 %v359_v29, %v357_v27 }
 0x20d   :  { %v280_v17 = vpop.permute.xlu1 %279 }
 0x20e   :  { %v674_v22 = vadd.f32 %v280_v17, %v251_v7  ;;  %v363_v33 = vmax.f32 %v361_v32, 1e-08 }
 0x210   :  { %v358_v26 = vmul.f32 %v674_v22, %v674_v22  ;;  %v368_v34 = vsel %vm364_vm8, %v363_v33, 0.0 }
 0x212   :  { %v360_v28 = vadd.f32 %v358_v26, %v356_v24 }
 0x214   :  { %v362_v30 = vmax.f32 %v360_v28, 1e-08 }
 0x216   :  { %v365_v31 = vsel %vm364_vm8, %v362_v30, 0.0 }
 0x217   :  { %366 = vadd.xlane.f32.xlu2 %v365_v31 }
 0x21f   :  { %369 = vadd.xlane.f32.xlu2 %v368_v34 }
 0x27c   :  { %v193_v39 = vpop.f32.mrf.mxu1 }
 0x27d   :  { %v194_v41 = vadd.f32 %v483_v38, %v193_v39 }
 0x27f   :  { %v686_v42 = vadd.f32 %v613_v18, %v194_v41 }
 0x281   :  { %v290_v44 = vsel %vm289_vm9, %v686_v42, 0.0 }
 0x282   :  { %291 = vadd.xlane.f32.xlu0 %v290_v44 }
 0x284   :  { %v196_v45 = vpop.f32.mrf.mxu1 }
 0x285   :  { %v197_v47 = vadd.f32 %v483_v38, %v196_v45 }
 0x287   :  { %v691_v48 = vadd.f32 %v620_v20, %v197_v47 }
 0x289   :  { %v293_v50 = vsel %vm289_vm9, %v691_v48, 0.0 }
 0x28a   :  { %294 = vadd.xlane.f32.xlu1 %v293_v50  ;;  %v367_v51 = vpop.xlane.xlu2 %366 }
 0x28b   :  { %v378_v18 = vmul.f32 %v377_v49, %v367_v51 }
 0x28d   :  { %493 = vrsqrt.f32 %v378_v18  ;;  %vm386_vm12 = vweird.f32 %v378_v18 }
 0x292   :  { %v370_v52 = vpop.xlane.xlu2 %369 }
 0x293   :  { %v494_v53 = vpop.eup %493  ;;  %v379_v54 = vmul.f32 %v377_v49, %v370_v52 }
 0x294   :  { %v381_v55 = vmul.f32 %v494_v53, %v378_v18  ;;  %vm387_vm11 = vweird.f32 %v494_v53  ;;  %v485_v18 = vld [vmem:[%s737_s6] ss:$0 sm:$0xff] }
 0x295   :  { %495 = vrsqrt.f32 %v379_v54  ;;  %vm388_vm13 = vmor %vm386_vm12, %vm387_vm11  ;;  %vm396_vm15 = vweird.f32 %v379_v54  ;;  %vm446_vm11 = vcmask 228352  }
 0x296   :  { %v382_v56 = vmul.f32 %v494_v53, %v381_v55  ;;  %497 = vrcp.f32 %v511_v1  ;;  %v486_v55 = vld [vmem:[%s738_s7] ss:$0 sm:$0xff] }
 0x298   :  { %v383_v57 = vmul.f32 0.5, %v382_v56 }
 0x29a   :  { %v384_v58 = vsub.f32 1.5, %v383_v57 }
 0x29b   :  { %v496_v59 = vpop.eup %495 }
 0x29c   :  { %v385_v20 = vmul.f32 %v494_v53, %v384_v58  ;;  %v391_v60 = vmul.f32 %v496_v59, %v379_v54  ;;  %vm397_vm14 = vweird.f32 %v496_v59  ;;  %v498_v21 = vpop.eup %497 }
 0x29d   :  { %vm398_vm0 = vmor %vm396_vm15, %vm397_vm14  ;;  %v297_v23 = vmul.f32 16.0, %v498_v21  ;;  %vm301_vm1 = vweird.f32 %v498_v21 }
 0x29e   :  { %v392_v62 = vmul.f32 %v496_v59, %v391_v60  ;;  %v389_v63 = vsel %vm388_vm13, %v494_v53, %v385_v20 }
 0x29f   :  { %v407_v2 = vmul.f32 %v389_v63, %v658_v12  ;;  %v400_v3 = vmul.f32 %v389_v63, %v660_v13  ;;  %v411_v9 = vmul.f32 %v389_v63, %v674_v22  ;;  %v298_v24 = vsub.f32 1.0, %v297_v23 }
 0x2a0   :  { %v393_v4 = vmul.f32 0.5, %v392_v62 }
 0x2a1   :  { %v409_v5 = vmul.f32 %v484_v61, %v407_v2  ;;  %v405_v6 = vmul.f32 %v484_v61, %v400_v3  ;;  %v413_v0 = vmul.f32 %v484_v61, %v411_v9  ;;  %v299_v22 = vmul.f32 %v498_v21, %v298_v24 }
 0x2a2   :  { %v394_v7 = vsub.f32 1.5, %v393_v4 }
 0x2a3   :  { %425 = vrot.lane.b32.xlu1 %v409_v5, %s509_s16  ;;  %417 = vrot.lane.b32.xlu2 %v405_v6, %s510_s17  ;;  %v300_v26 = vadd.f32 %v498_v21, %v299_v22 }
 0x2a4   :  { %v395_v8 = vmul.f32 %v496_v59, %v394_v7 }
 0x2a6   :  { %v399_v10 = vsel %vm398_vm0, %v496_v59, %v395_v8 }
 0x2a7   :  { %v401_v11 = vmul.f32 %v399_v10, %v662_v14  ;;  %v408_v12 = vmul.f32 %v399_v10, %v664_v15  ;;  %v412_v13 = vmul.f32 %v399_v10, %v676_v25  ;;  %v302_v14 = vsel %vm301_vm1, %v498_v21, %v300_v26 }
 0x2a9   :  { %v406_v16 = vmul.f32 %v484_v61, %v401_v11  ;;  %v410_v17 = vmul.f32 %v484_v61, %v408_v12  ;;  %v414_v19 = vmul.f32 %v484_v61, %v412_v13 }
 0x2ab   :  { %433 = vrot.lane.b32.xlu2 %v413_v0, %s507_s1  ;;  %419 = vrot.lane.b32.xlu0 %v406_v16, %s510_s17 }
 0x2f5   :  { %v292_v27 = vpop.xlane.xlu0 %291 }
 0x2f6   :  { %v303_v15 = vmul.f32 %v302_v14, %v292_v27 }
 0x2f8   :  { %v305_v25 = vsub.f32 %v686_v42, %v303_v15 }
 0x2fa   :  { %v307_v28 = vmul.f32 %v305_v25, %v305_v25 }
 0x2fc   :  { %v309_v29 = vsel %vm289_vm9, %v307_v28, 0.0 }
 0x2fd   :  { %v295_v30 = vpop.xlane.xlu1 %294  ;;  %310 = vadd.xlane.f32.xlu0 %v309_v29  ;;  %v418_v49 = vpop.permute.xlu2 %417 }
 0x2fe   :  { %v304_v31 = vmul.f32 %v302_v14, %v295_v30 }
 0x300   :  { %v306_v32 = vsub.f32 %v691_v48, %v304_v31 }
 0x302   :  { %v308_v33 = vmul.f32 %v306_v32, %v306_v32 }
 0x304   :  { %v312_v34 = vsel %vm289_vm9, %v308_v33, 0.0 }
 0x305   :  { %313 = vadd.xlane.f32.xlu1 %v312_v34  ;;  %v434_v61 = vpop.permute.xlu2 %433 }
 0x311   :  { %427 = vrot.lane.b32.xlu0 %v410_v17, %s509_s16 }
 0x315   :  { %v426_v36 = vpop.permute.xlu1 %425 }
 0x31d   :  { %v420_v35 = vpop.permute.xlu0 %419 }
 0x31e   :  { %435 = vrot.lane.b32.xlu1 %v414_v19, %s507_s1 }
 0x370   :  { %v311_v37 = vpop.xlane.xlu0 %310 }
 0x371   :  { %v315_v38 = vmul.f32 %v311_v37, %v302_v14 }
 0x373   :  { %v317_v39 = vadd.f32 1e-05, %v315_v38 }
 0x375   :  { %499 = vrsqrt.f32 %v317_v39  ;;  %vm325_vm3 = vweird.f32 %v317_v39 }
 0x378   :  { %v314_v40 = vpop.xlane.xlu1 %313 }
 0x379   :  { %v316_v41 = vmul.f32 %v314_v40, %v302_v14 }
 0x37b   :  { %v500_v42 = vpop.eup %499  ;;  %v318_v43 = vadd.f32 1e-05, %v316_v41 }
 0x37c   :  { %v320_v44 = vmul.f32 %v500_v42, %v317_v39  ;;  %vm326_vm2 = vweird.f32 %v500_v42 }
 0x37d   :  { %501 = vrsqrt.f32 %v318_v43  ;;  %vm327_vm4 = vmor %vm325_vm3, %vm326_vm2  ;;  %vm335_vm8 = vweird.f32 %v318_v43 }
 0x37e   :  { %v321_v45 = vmul.f32 %v500_v42, %v320_v44 }
 0x380   :  { %v322_v46 = vmul.f32 0.5, %v321_v45 }
 0x382   :  { %v323_v47 = vsub.f32 1.5, %v322_v46 }
 0x383   :  { %v502_v48 = vpop.eup %501  ;;  %v428_v7 = vpop.permute.xlu0 %427 }
 0x384   :  { %v324_v50 = vmul.f32 %v500_v42, %v323_v47  ;;  %v330_v51 = vmul.f32 %v502_v48, %v318_v43  ;;  %vm336_vm5 = vweird.f32 %v502_v48 }
 0x385   :  { %vm337_vm10 = vmor %vm335_vm8, %vm336_vm5 }
 0x386   :  { %v328_v52 = vsel %vm327_vm4, %v500_v42, %v324_v50  ;;  %v331_v53 = vmul.f32 %v502_v48, %v330_v51 }
 0x387   :  { %v339_v54 = vmul.f32 %v328_v52, %v305_v25 }
 0x388   :  { %v332_v56 = vmul.f32 0.5, %v331_v53 }
 0x389   :  { %v344_v57 = vmul.f32 %v485_v18, %v339_v54 }
 0x38a   :  { %v333_v58 = vsub.f32 1.5, %v332_v56 }
 0x38b   :  { %v349_v59 = vadd.f32 %v486_v55, %v344_v57 }
 0x38c   :  { %v334_v20 = vmul.f32 %v502_v48, %v333_v58 }
 0x38d   :  { %v439_v60 = vsel %vm289_vm9, %v349_v59, %v418_v49 }
 0x38e   :  { %v338_v62 = vsel %vm337_vm10, %v502_v48, %v334_v20  ;;  %v442_v63 = vsel %vm441_vm6, %v439_v60, %v426_v36 }
 0x38f   :  { %v340_v2 = vmul.f32 %v338_v62, %v306_v32  ;;  %v444_v3 = vsel %vm160_vm7, %v442_v63, %v434_v61 }
 0x390   :  { %447 = vst.msk [vmem:[%s739_s9] sm:$0xff] %vm446_vm11, %v444_v3  ;;  %v436_v9 = vpop.permute.xlu1 %435 }
 0x391   :  { %v345_v4 = vmul.f32 %v485_v18, %v340_v2 }
 0x393   :  { %v350_v5 = vadd.f32 %v486_v55, %v345_v4 }
 0x395   :  { %v440_v6 = vsel %vm289_vm9, %v350_v5, %v420_v35 }
 0x396   :  { %v443_v8 = vsel %vm441_vm6, %v440_v6, %v428_v7 }
 0x397   :  { %v445_v10 = vsel %vm160_vm7, %v443_v8, %v436_v9 }
 0x398   :  { %448 = vst.msk [vmem:[%s739_s9 + $0x8] sm:$0xff] %vm446_vm11, %v445_v10 }

// kernel: model_apply.29
= control target key start
LH: loop header
LB: loop body
LE: loop exit
PB: predicated region body
PF: predicated region fallthrough
CT: control target
= control target key end

     0   :  { %s872_s15 = smov 0   ;;  %s1041_s0 = inlined_call_operand.vmem [shape: f32[112,18], index: 0, kind: input, shape index: {}]   ;;  %s1042_s1 = inlined_call_operand.vmem [shape: f32[8,2], index: 1, kind: input, shape index: {}]   ;;  %s1043_s2 = inlined_call_operand.vmem [shape: f32[14,2], index: 2, kind: input, shape index: {}]   ;;  %s1044_s3 = inlined_call_operand.vmem [shape: f32[1,2], index: 3, kind: input, shape index: {}]   ;;  %s1045_s4 = inlined_call_operand.vmem [shape: f32[112,2], index: 4, kind: output, shape index: {}]  }
   0x1 LB: > { %s768_s16 = sadd.s32 4294967295, %s841_s15   ;;  %p772_p0 = scmp.ge.s32.totalorder %s841_s15, 1  ;;  %s841_s15 = sphi %s872_s15, %s14_s15  }
   0x2   : > { %p163_p1 = scmp.lt.s32.totalorder %s841_s15, 3 }
   0x4   : > { %p164_p2 = pnand %p772_p0, %p163_p1 }
   0x5   : > { %s189_s17 = smul.u32 (!%p164_p2), 7, %s768_s16  ;;  %s843_s22 = smov (!%p164_p2), 126  }
   0x6   : > { %167 = sbr.rel (%p164_p2) target bundleno = 765 (0x2fd), region = 36  ;;  %s844_s23 = smov (!%p164_p2), 124  }
   0x7   : > { %p190_p3 = scmp.lt.s32.totalorder (!%p164_p2), %s189_s17, 13  ;;  %s845_s24 = smov (!%p164_p2), 116  }
   0x8   : > { %s846_s27 = smov (!%p164_p2), 12  }
   0xb   : > { %s1047_s17 = smov (!%p190_p3, %s189_s17), 13  ;;  %v208_v19 = vld [vmem:[%s1042_s1] sm:$0xff]  ;;  %vm310_vm0 = vcmask 15360   ;;  %vm332_vm1 = vcmask 64512   ;;  %vm663_vm6 = vcmask 1045504   ;;  %vm630_vm15 = vcmask 97280  }
   0xc   : > { %s773_s18 = sshll.u32 %s1047_s17, 3  ;;  %806 = vmatpush.msra.mxu2 %v208_v19  ;;  %411 = vmatpush.msra.mxu0 %v208_v19 }
   0xd   : > { %s193_s21 = scalar_lea.vmem %s1041_s0, %s773_s18  ;;  %807 = vmatpush.msra.mxu3 %v208_v19  ;;  %s199_s10 = scalar_lea.vmem %s1045_s4, %s773_s18 }
   0xe   : > { %v888_v0 = vld [vmem:[%s193_s21] sm:$0xff]  ;;  %v890_v1 = vld [vmem:[%s193_s21 + $0x8] sm:$0xff]  ;;  %v892_v2 = vld [vmem:[%s193_s21 + $0x10] sm:$0xff] }
   0xf   : > { %219 = vrot.lane.b32.xlu0 %v888_v0, %s843_s22  ;;  %221 = vrot.lane.b32.xlu1 %v890_v1, %s843_s22  ;;  %v900_v3 = vld [vmem:[%s193_s21 + $0x18] sm:$0xff]  ;;  %v904_v4 = vld [vmem:[%s193_s21 + $0x20] sm:$0xff] }
  0x10   : > { %223 = vrot.lane.b32.xlu2 %v892_v2, %s843_s22  ;;  %v907_v5 = vld [vmem:[%s193_s21 + $0x28] sm:$0xff]  ;;  %v915_v8 = vld [vmem:[%s193_s21 + $0x30] sm:$0xff] }
  0x17   : > { %233 = vrot.lane.b32.xlu0 %v888_v0, %s844_s23  ;;  %235 = vrot.lane.b32.xlu1 %v890_v1, %s844_s23 }
  0x18   : > { %237 = vrot.lane.b32.xlu2 %v892_v2, %s844_s23 }
  0x1f   : > { %239 = vrot.lane.b32.xlu1 %v900_v3, %s844_s23  ;;  %225 = vrot.lane.b32.xlu0 %v900_v3, %s843_s22 }
  0x20   : > { %227 = vrot.lane.b32.xlu2 %v904_v4, %s843_s22 }
  0x27   : > { %241 = vrot.lane.b32.xlu0 %v904_v4, %s844_s23  ;;  %243 = vrot.lane.b32.xlu1 %v907_v5, %s844_s23 }
  0x28   : > { %229 = vrot.lane.b32.xlu2 %v907_v5, %s843_s22 }
  0x30   : > { %247 = vrot.lane.b32.xlu2 %v888_v0, %s845_s24 }
  0x6a   : > { %v224_v11 = vpop.permute.xlu2 %223 }
  0x72   : > { %v238_v12 = vpop.permute.xlu2 %237 }
  0x7a   : > { %v228_v14 = vpop.permute.xlu2 %227 }
  0x81   : > { %v220_v6 = vpop.permute.xlu0 %219  ;;  %v222_v7 = vpop.permute.xlu1 %221 }
  0x82   : > { %261 = vrot.lane.b32.xlu1 %v220_v6, %s845_s24  ;;  %v230_v16 = vpop.permute.xlu2 %229 }
  0x89   : > { %v234_v9 = vpop.permute.xlu0 %233  ;;  %v236_v10 = vpop.permute.xlu1 %235 }
  0x8a   : > { %275 = vrot.lane.b32.xlu0 %v234_v9, %s845_s24  ;;  %231 = vrot.lane.b32.xlu1 %v915_v8, %s843_s22  ;;  %v248_v20 = vpop.permute.xlu2 %247 }
  0x8b   : > { %277 = vrot.lane.b32.xlu2 %v236_v10, %s845_s24  ;;  %v311_v21 = vsel %vm310_vm0, %v248_v20, 0.0 }
  0x8c   : > { %775 = vmatmul.msk.f32.vlgmr.msra.gmra.mxu0 %vm332_vm1, %v311_v21 }
  0x91   : > { %v226_v13 = vpop.permute.xlu0 %225  ;;  %v240_v15 = vpop.permute.xlu1 %239 }
  0x92   : > { %263 = vrot.lane.b32.xlu0 %v222_v7, %s845_s24  ;;  %249 = vrot.lane.b32.xlu1 %v890_v1, %s845_s24 }
  0x93   : > { %265 = vrot.lane.b32.xlu2 %v224_v11, %s845_s24 }
  0x99   : > { %v242_v17 = vpop.permute.xlu0 %241  ;;  %v244_v18 = vpop.permute.xlu1 %243 }
  0x9a   : > { %245 = vrot.lane.b32.xlu0 %v915_v8, %s844_s23  ;;  %251 = vrot.lane.b32.xlu1 %v892_v2, %s845_s24 }
  0x9b   : > { %267 = vrot.lane.b32.xlu2 %v226_v13, %s845_s24 }
  0xa2   : > { %279 = vrot.lane.b32.xlu0 %v238_v12, %s845_s24  ;;  %253 = vrot.lane.b32.xlu1 %v900_v3, %s845_s24 }
  0xa3   : > { %269 = vrot.lane.b32.xlu2 %v228_v14, %s845_s24 }
  0xaa   : > { %281 = vrot.lane.b32.xlu0 %v240_v15, %s845_s24  ;;  %255 = vrot.lane.b32.xlu1 %v904_v4, %s845_s24 }
  0xab   : > { %271 = vrot.lane.b32.xlu2 %v230_v16, %s845_s24 }
  0xb2   : > { %283 = vrot.lane.b32.xlu0 %v242_v17, %s845_s24  ;;  %257 = vrot.lane.b32.xlu1 %v907_v5, %s845_s24 }
  0xba   : > { %285 = vrot.lane.b32.xlu0 %v244_v18, %s845_s24  ;;  %259 = vrot.lane.b32.xlu1 %v915_v8, %s845_s24 }
  0xe5   : > { %v278_v27 = vpop.permute.xlu2 %277 }
  0xe6   : > { %v326_v28 = vsel %vm310_vm0, %v278_v27, 0.0 }
  0xed   : > { %v266_v33 = vpop.permute.xlu2 %265 }
  0xee   : > { %v320_v34 = vsel %vm310_vm0, %v266_v33, 0.0 }
  0xf4   : > { %v262_v22 = vpop.permute.xlu1 %261 }
  0xf5   : > { %v318_v23 = vsel %vm310_vm0, %v262_v22, 0.0  ;;  %v268_v38 = vpop.permute.xlu2 %267 }
  0xf6   : > { %782 = vmatmul.msk.f32.vlgmr.msra.gmra.mxu2 %vm332_vm1, %v318_v23  ;;  %v321_v39 = vsel %vm310_vm0, %v268_v38, 0.0 }
  0xfc   : > { %v276_v24 = vpop.permute.xlu0 %275  ;;  %v232_v25 = vpop.permute.xlu1 %231 }
  0xfd   : > { %v325_v26 = vsel %vm310_vm0, %v276_v24, 0.0  ;;  %273 = vrot.lane.b32.xlu2 %v232_v25, %s845_s24  ;;  %v270_v44 = vpop.permute.xlu2 %269 }
  0xfe   : > { %789 = vmatmul.msk.f32.vlgmr.msra.gmra.mxu3 %vm332_vm1, %v325_v26  ;;  %v322_v45 = vsel %vm310_vm0, %v270_v44, 0.0 }
 0x104   : > { %v264_v29 = vpop.permute.xlu0 %263  ;;  %v250_v30 = vpop.permute.xlu1 %249 }
 0x105   : > { %v319_v31 = vsel %vm310_vm0, %v264_v29, 0.0  ;;  %v312_v32 = vsel %vm310_vm0, %v250_v30, 0.0  ;;  %v272_v50 = vpop.permute.xlu2 %271 }
 0x106   : > { %783 = vmatmul.msk.f32.gmra.mxu2 %vm332_vm1, %v319_v31  ;;  %790 = vmatmul.msk.f32.gmra.mxu3 %vm332_vm1, %v326_v28  ;;  %v323_v51 = vsel %vm310_vm0, %v272_v50, 0.0 }
 0x107   : > { %776 = vmatmul.msk.f32.gmra.mxu0 %vm332_vm1, %v312_v32 }
 0x109   : > { %v413_v62 = vpop.f32.mrf.mxu0 }
 0x10a   : > { %v476_v6 = vmul.f32 %v413_v62, %v413_v62 }
 0x10c   : > { %v246_v35 = vpop.permute.xlu0 %245  ;;  %v252_v36 = vpop.permute.xlu1 %251 }
 0x10d   : > { %287 = vrot.lane.b32.xlu0 %v246_v35, %s845_s24  ;;  %v313_v37 = vsel %vm310_vm0, %v252_v36, 0.0 }
 0x10e   : > { %784 = vmatmul.msk.f32.gmra.mxu2 %vm332_vm1, %v320_v34 }
 0x10f   : > { %777 = vmatmul.msk.f32.gmra.mxu0 %vm332_vm1, %v313_v37 }
 0x114   : > { %v280_v40 = vpop.permute.xlu0 %279  ;;  %v254_v41 = vpop.permute.xlu1 %253 }
 0x115   : > { %v327_v42 = vsel %vm310_vm0, %v280_v40, 0.0  ;;  %v314_v43 = vsel %vm310_vm0, %v254_v41, 0.0 }
 0x116   : > { %791 = vmatmul.msk.f32.gmra.mxu3 %vm332_vm1, %v327_v42  ;;  %785 = vmatmul.msk.f32.gmra.mxu2 %vm332_vm1, %v321_v39 }
 0x117   : > { %778 = vmatmul.msk.f32.gmra.mxu0 %vm332_vm1, %v314_v43 }
 0x11c   : > { %v282_v46 = vpop.permute.xlu0 %281  ;;  %v256_v47 = vpop.permute.xlu1 %255 }
 0x11d   : > { %v328_v48 = vsel %vm310_vm0, %v282_v46, 0.0  ;;  %v315_v49 = vsel %vm310_vm0, %v256_v47, 0.0 }
 0x11e   : > { %792 = vmatmul.msk.f32.gmra.mxu3 %vm332_vm1, %v328_v48  ;;  %786 = vmatmul.msk.f32.gmra.mxu2 %vm332_vm1, %v322_v45 }
 0x11f   : > { %779 = vmatmul.msk.f32.gmra.mxu0 %vm332_vm1, %v315_v49 }
 0x124   : > { %v284_v52 = vpop.permute.xlu0 %283  ;;  %v258_v53 = vpop.permute.xlu1 %257 }
 0x125   : > { %v329_v54 = vsel %vm310_vm0, %v284_v52, 0.0  ;;  %v316_v55 = vsel %vm310_vm0, %v258_v53, 0.0 }
 0x126   : > { %793 = vmatmul.msk.f32.gmra.mxu3 %vm332_vm1, %v329_v54  ;;  %787 = vmatmul.msk.f32.gmra.mxu2 %vm332_vm1, %v323_v51 }
 0x127   : > { %780 = vmatmul.msk.f32.gmra.mxu0 %vm332_vm1, %v316_v55 }
 0x12c   : > { %v286_v56 = vpop.permute.xlu0 %285  ;;  %v260_v60 = vpop.permute.xlu1 %259 }
 0x12d   : > { %v330_v57 = vsel %vm310_vm0, %v286_v56, 0.0  ;;  %v317_v61 = vsel %vm310_vm0, %v260_v60, 0.0 }
 0x12e   : > { %794 = vmatmul.msk.f32.gmra.mxu3 %vm332_vm1, %v330_v57 }
 0x12f   : > { %781 = vmatmul.msk.f32.gmra.mxu0 %vm332_vm1, %v317_v61 }
 0x157   : > { %v274_v58 = vpop.permute.xlu2 %273 }
 0x158   : > { %v324_v59 = vsel %vm310_vm0, %v274_v58, 0.0 }
 0x159   : > { %788 = vmatmul.msk.f32.gmra.mxu2 %vm332_vm1, %v324_v59 }
 0x179   : > { %v434_v63 = vpop.f32.mrf.mxu2 }
 0x17a   : > { %v483_v7 = vmul.f32 %v434_v63, %v434_v63 }
 0x17c   : > { %v490_v12 = vadd.f32 %v483_v7, %v476_v6 }
 0x17f   : > { %v288_v9 = vpop.permute.xlu0 %287 }
 0x180   : > { %v331_v10 = vsel %vm310_vm0, %v288_v9, 0.0 }
 0x181   : > { %v455_v11 = vpop.f32.mrf.mxu3  ;;  %795 = vmatmul.msk.f32.gmra.mxu3 %vm332_vm1, %v331_v10  ;;  %vm641_vm1 = vcmask 113664  }
 0x182   : > { %v497_v13 = vmul.f32 %v455_v11, %v455_v11 }
 0x184   : > { %v504_v14 = vadd.f32 %v497_v13, %v490_v12  ;;  %v416_v15 = vpop.f32.mrf.mxu0 }
 0x185   : > { %v477_v17 = vmul.f32 %v416_v15, %v416_v15 }
 0x186   : > { %v511_v16 = vmax.f32 %v504_v14, 1e-08 }
 0x188   : > { %821 = vrsqrt.f32 %v511_v16  ;;  %vm525_vm2 = vcmp.eq.f32.partialorder %v511_v16, inf  ;;  %v528_v43 = vand.u32 2147483648, %v511_v16  ;;  %vm527_vm3 = vcmp.eq.f32.partialorder %v511_v16, 0.0 }
 0x189   : > { %v437_v18 = vpop.f32.mrf.mxu2  ;;  %v458_v19 = vpop.f32.mrf.mxu3 }
 0x18a   : > { %v484_v20 = vmul.f32 %v437_v18, %v437_v18  ;;  %v498_v21 = vmul.f32 %v458_v19, %v458_v19 }
 0x18c   : > { %v491_v22 = vadd.f32 %v484_v20, %v477_v17  ;;  %v419_v25 = vpop.f32.mrf.mxu0 }
 0x18d   : > { %v478_v31 = vmul.f32 %v419_v25, %v419_v25 }
 0x18e   : > { %v822_v23 = vpop.eup %821  ;;  %v505_v24 = vadd.f32 %v498_v21, %v491_v22 }
 0x18f   : > { %v519_v26 = vmul.f32 %v822_v23, %v511_v16 }
 0x190   : > { %v512_v27 = vmax.f32 %v505_v24, 1e-08 }
 0x191   : > { %v440_v28 = vpop.f32.mrf.mxu2  ;;  %v520_v29 = vmul.f32 %v822_v23, %v519_v26 }
 0x192   : > { %823 = vrsqrt.f32 %v512_v27  ;;  %v485_v32 = vmul.f32 %v440_v28, %v440_v28  ;;  %vm537_vm4 = vcmp.eq.f32.partialorder %v512_v27, inf  ;;  %v540_v60 = vand.u32 2147483648, %v512_v27 }
 0x193   : > { %v521_v30 = vmul.f32 0.5, %v520_v29  ;;  %vm539_vm5 = vcmp.eq.f32.partialorder %v512_v27, 0.0 }
 0x194   : > { %v422_v34 = vpop.f32.mrf.mxu0  ;;  %v492_v37 = vadd.f32 %v485_v32, %v478_v31 }
 0x195   : > { %v522_v33 = vsub.f32 1.5, %v521_v30  ;;  %v479_v48 = vmul.f32 %v422_v34, %v422_v34 }
 0x197   : > { %v523_v35 = vmul.f32 %v822_v23, %v522_v33  ;;  %v210_v23 = vld [vmem:[%s1043_s2 + $0x8] sm:$0x3f] }
 0x198   : > { %v824_v36 = vpop.eup %823  ;;  %796 = vmatpush.msk.msra.mxu1 %vm663_vm6, %v210_v23 }
 0x199   : > { %v461_v38 = vpop.f32.mrf.mxu3  ;;  %v524_v39 = vmul.f32 %v523_v35, %v511_v16  ;;  %v531_v40 = vmul.f32 %v824_v36, %v512_v27  ;;  %v443_v41 = vpop.f32.mrf.mxu2 }
 0x19a   : > { %v499_v42 = vmul.f32 %v461_v38, %v461_v38  ;;  %v486_v49 = vmul.f32 %v443_v41, %v443_v41 }
 0x19b   : > { %v526_v44 = vsel %vm525_vm2, %v511_v16, %v524_v39  ;;  %v532_v45 = vmul.f32 %v824_v36, %v531_v40 }
 0x19c   : > { %v506_v46 = vadd.f32 %v499_v42, %v492_v37  ;;  %v529_v47 = vsel %vm527_vm3, %v528_v43, %v526_v44  ;;  %v425_v52 = vpop.f32.mrf.mxu0  ;;  %v493_v54 = vadd.f32 %v486_v49, %v479_v48 }
 0x19d   : > { %609 = vrot.lane.b32.xlu2 %v529_v47, %s846_s27  ;;  %v533_v50 = vmul.f32 0.5, %v532_v45  ;;  %v480_v62 = vmul.f32 %v425_v52, %v425_v52 }
 0x19e   : > { %v513_v51 = vmax.f32 %v506_v46, 1e-08 }
 0x19f   : > { %v534_v53 = vsub.f32 1.5, %v533_v50 }
 0x1a0   : > { %825 = vrsqrt.f32 %v513_v51  ;;  %vm549_vm7 = vcmp.eq.f32.partialorder %v513_v51, inf  ;;  %v552_v28 = vand.u32 2147483648, %v513_v51  ;;  %vm551_vm8 = vcmp.eq.f32.partialorder %v513_v51, 0.0 }
 0x1a1   : > { %v535_v55 = vmul.f32 %v824_v36, %v534_v53  ;;  %v464_v56 = vpop.f32.mrf.mxu3  ;;  %v446_v57 = vpop.f32.mrf.mxu2 }
 0x1a2   : > { %v500_v58 = vmul.f32 %v464_v56, %v464_v56  ;;  %v487_v63 = vmul.f32 %v446_v57, %v446_v57 }
 0x1a3   : > { %v536_v59 = vmul.f32 %v535_v55, %v512_v27 }
 0x1a4   : > { %v507_v61 = vadd.f32 %v500_v58, %v493_v54  ;;  %v494_v12 = vadd.f32 %v487_v63, %v480_v62  ;;  %v428_v13 = vpop.f32.mrf.mxu0 }
 0x1a5   : > { %v538_v6 = vsel %vm537_vm4, %v512_v27, %v536_v59  ;;  %v481_v20 = vmul.f32 %v428_v13, %v428_v13 }
 0x1a6   : > { %v826_v7 = vpop.eup %825  ;;  %v541_v9 = vsel %vm539_vm5, %v540_v60, %v538_v6  ;;  %v514_v10 = vmax.f32 %v507_v61, 1e-08 }
 0x1a7   : > { %611 = vrot.lane.b32.xlu0 %v541_v9, %s846_s27  ;;  %v543_v11 = vmul.f32 %v826_v7, %v513_v51 }
 0x1a8   : > { %827 = vrsqrt.f32 %v514_v10  ;;  %vm561_vm9 = vcmp.eq.f32.partialorder %v514_v10, inf  ;;  %v564_v43 = vand.u32 2147483648, %v514_v10  ;;  %vm563_vm10 = vcmp.eq.f32.partialorder %v514_v10, 0.0 }
 0x1a9   : > { %v544_v14 = vmul.f32 %v826_v7, %v543_v11  ;;  %v467_v15 = vpop.f32.mrf.mxu3  ;;  %v449_v16 = vpop.f32.mrf.mxu2 }
 0x1aa   : > { %v501_v17 = vmul.f32 %v467_v15, %v467_v15  ;;  %v488_v21 = vmul.f32 %v449_v16, %v449_v16 }
 0x1ab   : > { %v545_v18 = vmul.f32 0.5, %v544_v14 }
 0x1ac   : > { %v508_v19 = vadd.f32 %v501_v17, %v494_v12  ;;  %v495_v29 = vadd.f32 %v488_v21, %v481_v20  ;;  %v431_v11 = vpop.f32.mrf.mxu0 }
 0x1ad   : > { %v546_v22 = vsub.f32 1.5, %v545_v18  ;;  %v482_v13 = vmul.f32 %v431_v11, %v431_v11 }
 0x1ae   : > { %v828_v24 = vpop.eup %827  ;;  %v515_v25 = vmax.f32 %v508_v19, 1e-08 }
 0x1af   : > { %v547_v26 = vmul.f32 %v826_v7, %v546_v22  ;;  %v555_v27 = vmul.f32 %v828_v24, %v514_v10  ;;  %v209_v7 = vld [vmem:[%s1043_s2] sm:$0xff] }
 0x1b0   : > { %829 = vrsqrt.f32 %v515_v25  ;;  %vm573_vm11 = vcmp.eq.f32.partialorder %v515_v25, inf  ;;  %v576_v53 = vand.u32 2147483648, %v515_v25  ;;  %vm575_vm12 = vcmp.eq.f32.partialorder %v515_v25, 0.0  ;;  %682 = vmatpush.msra.mxu1 %v209_v7 }
 0x1b1   : > { %v548_v30 = vmul.f32 %v547_v26, %v513_v51  ;;  %v556_v31 = vmul.f32 %v828_v24, %v555_v27  ;;  %v470_v32 = vpop.f32.mrf.mxu3 }
 0x1b2   : > { %v502_v33 = vmul.f32 %v470_v32, %v470_v32 }
 0x1b3   : > { %v550_v34 = vsel %vm549_vm7, %v513_v51, %v548_v30  ;;  %v557_v35 = vmul.f32 0.5, %v556_v31 }
 0x1b4   : > { %v553_v36 = vsel %vm551_vm8, %v552_v28, %v550_v34  ;;  %v509_v37 = vadd.f32 %v502_v33, %v495_v29 }
 0x1b5   : > { %613 = vrot.lane.b32.xlu1 %v553_v36, %s846_s27  ;;  %v558_v38 = vsub.f32 1.5, %v557_v35 }
 0x1b6   : > { %v830_v39 = vpop.eup %829  ;;  %v516_v40 = vmax.f32 %v509_v37, 1e-08 }
 0x1b7   : > { %v559_v41 = vmul.f32 %v828_v24, %v558_v38  ;;  %v567_v42 = vmul.f32 %v830_v39, %v515_v25 }
 0x1b8   : > { %831 = vrsqrt.f32 %v516_v40  ;;  %vm585_vm13 = vcmp.eq.f32.partialorder %v516_v40, inf  ;;  %v588_v61 = vand.u32 2147483648, %v516_v40  ;;  %vm587_vm14 = vcmp.eq.f32.partialorder %v516_v40, 0.0 }
 0x1b9   : > { %v560_v44 = vmul.f32 %v559_v41, %v514_v10  ;;  %v568_v45 = vmul.f32 %v830_v39, %v567_v42 }
 0x1bb   : > { %v562_v46 = vsel %vm561_vm9, %v514_v10, %v560_v44  ;;  %v569_v47 = vmul.f32 0.5, %v568_v45 }
 0x1bc   : > { %v565_v48 = vsel %vm563_vm10, %v564_v43, %v562_v46 }
 0x1bd   : > { %615 = vrot.lane.b32.xlu2 %v565_v48, %s846_s27  ;;  %v570_v49 = vsub.f32 1.5, %v569_v47 }
 0x1be   : > { %v832_v50 = vpop.eup %831 }
 0x1bf   : > { %v571_v51 = vmul.f32 %v830_v39, %v570_v49  ;;  %v579_v52 = vmul.f32 %v832_v50, %v516_v40 }
 0x1c1   : > { %v572_v54 = vmul.f32 %v571_v51, %v515_v25  ;;  %v580_v55 = vmul.f32 %v832_v50, %v579_v52 }
 0x1c3   : > { %v574_v56 = vsel %vm573_vm11, %v515_v25, %v572_v54  ;;  %v581_v57 = vmul.f32 0.5, %v580_v55 }
 0x1c4   : > { %v577_v58 = vsel %vm575_vm12, %v576_v53, %v574_v56 }
 0x1c5   : > { %617 = vrot.lane.b32.xlu0 %v577_v58, %s846_s27  ;;  %v582_v59 = vsub.f32 1.5, %v581_v57 }
 0x1c7   : > { %v583_v60 = vmul.f32 %v832_v50, %v582_v59 }
 0x1c9   : > { %v584_v62 = vmul.f32 %v583_v60, %v516_v40 }
 0x1cb   : > { %v586_v63 = vsel %vm585_vm13, %v516_v40, %v584_v62 }
 0x1cc   : > { %v589_v6 = vsel %vm587_vm14, %v588_v61, %v586_v63 }
 0x1cd   : > { %619 = vrot.lane.b32.xlu1 %v589_v6, %s846_s27 }
 0x1dc   : > { %v452_v12 = vpop.f32.mrf.mxu2 }
 0x1dd   : > { %v489_v14 = vmul.f32 %v452_v12, %v452_v12 }
 0x1df   : > { %v496_v15 = vadd.f32 %v489_v14, %v482_v13 }
 0x1f7   : > { %v610_v9 = vpop.permute.xlu2 %609 }
 0x1f8   : > { %v631_v10 = vsel %vm630_vm15, %v888_v0, %v610_v9 }
 0x1f9   : > { %797 = vmatmul.msk.f32.vlgmr.msra.gmra.mxu1 %vm641_vm1, %v631_v10 }
 0x204   : > { %v473_v16 = vpop.f32.mrf.mxu3 }
 0x205   : > { %v503_v17 = vmul.f32 %v473_v16, %v473_v16 }
 0x207   : > { %v510_v18 = vadd.f32 %v503_v17, %v496_v15 }
 0x209   : > { %v517_v19 = vmax.f32 %v510_v18, 1e-08 }
 0x20b   : > { %833 = vrsqrt.f32 %v517_v19  ;;  %vm597_vm2 = vcmp.eq.f32.partialorder %v517_v19, inf  ;;  %v600_v28 = vand.u32 2147483648, %v517_v19  ;;  %vm599_vm3 = vcmp.eq.f32.partialorder %v517_v19, 0.0 }
 0x211   : > { %v834_v20 = vpop.eup %833 }
 0x212   : > { %v591_v21 = vmul.f32 %v834_v20, %v517_v19 }
 0x214   : > { %v592_v22 = vmul.f32 %v834_v20, %v591_v21 }
 0x216   : > { %v593_v23 = vmul.f32 0.5, %v592_v22 }
 0x217   : > { %v616_v33 = vpop.permute.xlu2 %615 }
 0x218   : > { %v594_v24 = vsub.f32 1.5, %v593_v23 }
 0x219   : > { %v612_v25 = vpop.permute.xlu0 %611 }
 0x21a   : > { %v632_v0 = vsel %vm630_vm15, %v890_v1, %v612_v25  ;;  %v595_v26 = vmul.f32 %v834_v20, %v594_v24  ;;  %v634_v1 = vsel %vm630_vm15, %v900_v3, %v616_v33 }
 0x21b   : > { %798 = vmatmul.msk.f32.gmra.mxu1 %vm641_vm1, %v632_v0 }
 0x21c   : > { %v596_v27 = vmul.f32 %v595_v26, %v517_v19 }
 0x21e   : > { %v598_v29 = vsel %vm597_vm2, %v517_v19, %v596_v27 }
 0x21f   : > { %v601_v30 = vsel %vm599_vm3, %v600_v28, %v598_v29 }
 0x220   : > { %621 = vrot.lane.b32.xlu2 %v601_v30, %s846_s27 }
 0x227   : > { %v614_v31 = vpop.permute.xlu1 %613 }
 0x228   : > { %v633_v32 = vsel %vm630_vm15, %v892_v2, %v614_v31  ;;  %v820_v2 = vld [vmem:[%s1044_s3] ss:$0 sm:$0xff] }
 0x229   : > { %799 = vmatmul.msk.f32.gmra.mxu1 %vm641_vm1, %v633_v32 }
 0x231   : > { %800 = vmatmul.msk.f32.gmra.mxu1 %vm641_vm1, %v634_v1 }
 0x237   : > { %v618_v34 = vpop.permute.xlu0 %617 }
 0x238   : > { %v635_v35 = vsel %vm630_vm15, %v904_v4, %v618_v34 }
 0x239   : > { %801 = vmatmul.msk.f32.gmra.mxu1 %vm641_vm1, %v635_v35 }
 0x23f   : > { %v620_v36 = vpop.permute.xlu1 %619 }
 0x240   : > { %v636_v37 = vsel %vm630_vm15, %v907_v5, %v620_v36 }
 0x241   : > { %802 = vmatmul.msk.f32.gmra.mxu1 %vm641_vm1, %v636_v37 }
 0x276   : > { %v684_v3 = vpop.f32.mrf.mxu1 }
 0x277   : > { %v685_v38 = vadd.f32 %v820_v2, %v684_v3 }
 0x279   : > { %705 = vst.msk [vmem:[%s199_s10] sm:$0xff] %vm310_vm0, %v685_v38 }
 0x27a   : > { %v622_v4 = vpop.permute.xlu2 %621 }
 0x27b   : > { %v637_v39 = vsel %vm630_vm15, %v915_v8, %v622_v4 }
 0x27c   : > { %803 = vmatmul.msk.f32.gmra.mxu1 %vm641_vm1, %v637_v39 }
 0x298   : > { %v687_v5 = vpop.f32.mrf.mxu1 }
 0x299   : > { %v688_v40 = vadd.f32 %v820_v2, %v687_v5 }
 0x29b   : > { %706 = vst.msk [vmem:[%s199_s10 + $0x8] sm:$0xff] %vm310_vm0, %v688_v40 }
 0x2a6   : > { %v690_v41 = vpop.f32.mrf.mxu1 }
 0x2a7   : > { %v691_v42 = vadd.f32 %v820_v2, %v690_v41 }
 0x2a9   : > { %707 = vst.msk [vmem:[%s199_s10 + $0x10] sm:$0xff] %vm310_vm0, %v691_v42 }
 0x2ae   : > { %v693_v43 = vpop.f32.mrf.mxu1 }
 0x2af   : > { %v694_v44 = vadd.f32 %v820_v2, %v693_v43 }
 0x2b1   : > { %708 = vst.msk [vmem:[%s199_s10 + $0x18] sm:$0xff] %vm310_vm0, %v694_v44 }
 0x2b6   : > { %v696_v45 = vpop.f32.mrf.mxu1 }
 0x2b7   : > { %v697_v46 = vadd.f32 %v820_v2, %v696_v45 }
 0x2b9   : > { %709 = vst.msk [vmem:[%s199_s10 + $0x20] sm:$0xff] %vm310_vm0, %v697_v46 }
 0x2be   : > { %v699_v47 = vpop.f32.mrf.mxu1 }
 0x2bf   : > { %v700_v8 = vadd.f32 %v820_v2, %v699_v47 }
 0x2c1   : > { %710 = vst.msk [vmem:[%s199_s10 + $0x28] sm:$0xff] %vm310_vm0, %v700_v8 }
 0x2f9   : > { %v702_v48 = vpop.f32.mrf.mxu1 }
 0x2fa   : > { %v703_v49 = vadd.f32 %v820_v2, %v702_v48 }
 0x2fc   : > { %711 = vst.msk [vmem:[%s199_s10 + $0x30] sm:$0xff] %vm310_vm0, %v703_v49 }
 0x2fd PF: > { %s14_s15 = sadd.s32 1, %s841_s15  }
 0x2fe   : > { %p11_p4 = scmp.ge.s32.totalorder %s14_s15, 4  }
 0x300   :  { %13 = sbr.rel (!%p11_p4) target bundleno = 1 (0x1), region = 66 }

// kernel: model_apply.28
= control target key start
LH: loop header
LB: loop body
LE: loop exit
PB: predicated region body
PF: predicated region fallthrough
CT: control target
= control target key end

     0   :  { %s328_s22 = smov 120   ;;  %s329_s23 = smov 112   ;;  %vm55_vm0 = vcmask 31744   ;;  %vm62_vm1 = vcmask 64512   ;;  %vm173_vm6 = vcmask 1043456   ;;  %vm166_vm7 = vcmask 162816   ;;  %s435_s0 = inlined_call_operand.vmem [shape: f32[16,28], index: 0, kind: input, shape index: {}]   ;;  %s436_s1 = inlined_call_operand.vmem [shape: f32[8,4], index: 1, kind: input, shape index: {}]   ;;  %s437_s4 = inlined_call_operand.vmem [shape: f32[8,1], index: 4, kind: input, shape index: {}]   ;;  %s438_s2 = inlined_call_operand.vmem [shape: f32[20,3], index: 2, kind: input, shape index: {}]   ;;  %s439_s3 = inlined_call_operand.vmem [shape: f32[1,3], index: 3, kind: input, shape index: {}]   ;;  %s440_s5 = inlined_call_operand.vmem [shape: f32[16,6], index: 5, kind: output, shape index: {}]  }
   0x1   :  { %v368_v0 = vld [vmem:[%s435_s0] sm:$0xff]  ;;  %v373_v1 = vld [vmem:[%s435_s0 + $0x8] sm:$0xff]  ;;  %s330_s24 = smov 124   ;;  %s332_s27 = smov 16   ;;  %vm160_vm8 = vcmask 130048   ;;  %vm284_vm9 = vcmask 23552  }
   0x2   :  { %33 = vrot.lane.b32.xlu0 %v368_v0, %s328_s22  ;;  %35 = vrot.lane.b32.xlu1 %v373_v1, %s328_s22  ;;  %v22_v3 = vld [vmem:[%s436_s1] sm:$0xff]  ;;  %s333_s9 = smov 5   ;;  %s334_s10 = smov 4   ;;  %vm289_vm10 = vcmask 39936   ;;  %vm292_vm11 = vcmask 48128  }
   0x3   :  { %37 = vrot.lane.b32.xlu2 %v368_v0, %s329_s23  ;;  %96 = vmatpush.msra.mxu0 %v22_v3  ;;  %v200_v11 = vld [vmem:[%s437_s4] sm:$0xff]  ;;  %s331_s4 = smov 3  }
   0x4   :  { %314 = vmatpush.msra.mxu3 %v22_v3  ;;  %240 = vmatpush.msra.mxu2 %v200_v11 }
   0x6   :  { %315 = vmatpush.msrb.mxu3 %v200_v11 }
   0xa   :  { %29 = vrot.lane.b32.xlu0 %v368_v0, %s330_s24  ;;  %31 = vrot.lane.b32.xlu1 %v373_v1, %s330_s24 }
   0xb   :  { %39 = vrot.lane.b32.xlu2 %v373_v1, %s329_s23 }
  0x5d   :  { %v38_v2 = vpop.permute.xlu2 %37 }
  0x5e   :  { %v56_v4 = vsel %vm55_vm0, %v38_v2, 0.0 }
  0x5f   :  { %299 = vmatmul.msk.f32.vlgmr.msra.gmra.mxu0 %vm62_vm1, %v56_v4  ;;  %v25_v4 = vld [vmem:[%s438_s2 + $0x10] sm:$0xf] }
  0x60   :  { %305 = vmatpush.msk.msra.mxu1 %vm173_vm6, %v25_v4 }
  0x65   :  { %v40_v5 = vpop.permute.xlu2 %39 }
  0x66   :  { %v57_v6 = vsel %vm55_vm0, %v40_v5, 0.0  ;;  %v24_v5 = vld [vmem:[%s438_s2 + $0x8] sm:$0xff] }
  0x67   :  { %300 = vmatmul.msk.f32.gmra.mxu0 %vm62_vm1, %v57_v6  ;;  %191 = vmatpush.msra.mxu1 %v24_v5  ;;  %v23_v6 = vld [vmem:[%s438_s2] sm:$0xff] }
  0x69   :  { %192 = vmatpush.msra.mxu1 %v23_v6 }
  0x74   :  { %v34_v7 = vpop.permute.xlu0 %33  ;;  %v36_v8 = vpop.permute.xlu1 %35 }
  0x75   :  { %45 = vrot.lane.b32.xlu0 %v34_v7, %s329_s23  ;;  %47 = vrot.lane.b32.xlu2 %v36_v8, %s329_s23 }
  0x7c   :  { %v30_v9 = vpop.permute.xlu0 %29  ;;  %v32_v10 = vpop.permute.xlu1 %31 }
  0x7d   :  { %41 = vrot.lane.b32.xlu1 %v30_v9, %s329_s23  ;;  %43 = vrot.lane.b32.xlu0 %v32_v10, %s329_s23 }
  0xcf   :  { %v48_v18 = vpop.permute.xlu2 %47 }
  0xd0   :  { %v61_v19 = vsel %vm55_vm0, %v48_v18, 0.0 }
  0xdc   :  { %v98_v12 = vpop.f32.mrf.mxu0 }
  0xdd   :  { %v201_v13 = vsel %vm55_vm0, %v98_v12, 0.0  ;;  %v116_v27 = vmul.f32 %v98_v12, %v98_v12 }
  0xde   :  { %308 = vmatmul.msk.f32.vlgmr.msra.gmra.mxu2 %vm62_vm1, %v201_v13 }
  0xe4   :  { %v101_v14 = vpop.f32.mrf.mxu0 }
  0xe5   :  { %v202_v15 = vsel %vm55_vm0, %v101_v14, 0.0  ;;  %v117_v38 = vmul.f32 %v101_v14, %v101_v14 }
  0xe6   :  { %309 = vmatmul.msk.f32.gmra.mxu2 %vm62_vm1, %v202_v15 }
  0xe7   :  { %v46_v16 = vpop.permute.xlu0 %45 }
  0xe8   :  { %v60_v17 = vsel %vm55_vm0, %v46_v16, 0.0  ;;  %v323_v16 = vld [vmem:[%s439_s3] ss:$0 sm:$0xff] }
  0xe9   :  { %303 = vmatmul.msk.f32.vlgmr.msra.gmra.mxu3 %vm62_vm1, %v60_v17 }
  0xef   :  { %v42_v20 = vpop.permute.xlu1 %41  ;;  %v44_v22 = vpop.permute.xlu0 %43 }
  0xf0   :  { %v58_v21 = vsel %vm55_vm0, %v42_v20, 0.0  ;;  %v59_v23 = vsel %vm55_vm0, %v44_v22, 0.0 }
  0xf1   :  { %301 = vmatmul.msk.f32.gmra.mxu0 %vm62_vm1, %v58_v21  ;;  %304 = vmatmul.msk.f32.gmra.mxu3 %vm62_vm1, %v61_v19 }
  0xf9   :  { %302 = vmatmul.msk.f32.gmra.mxu0 %vm62_vm1, %v59_v23 }
 0x161   :  { %v242_v34 = vpop.f32.mrf.mxu2 }
 0x162   :  { %262 = vrot.lane.b32.xlu0 %v242_v34, %s331_s4 }
 0x169   :  { %v245_v63 = vpop.f32.mrf.mxu2 }
 0x16c   :  { %v110_v24 = vpop.f32.mrf.mxu3 }
 0x16d   :  { %v205_v25 = vsel %vm55_vm0, %v110_v24, 0.0  ;;  %v122_v30 = vmul.f32 %v110_v24, %v110_v24 }
 0x16e   :  { %v104_v26 = vpop.f32.mrf.mxu0  ;;  %312 = vmatmul.msk.f32.vlgmr.msrb.gmra.mxu3 %vm62_vm1, %v205_v25 }
 0x16f   :  { %v118_v28 = vmul.f32 %v104_v26, %v104_v26  ;;  %v203_v29 = vsel %vm55_vm0, %v104_v26, 0.0 }
 0x170   :  { %310 = vmatmul.msk.f32.gmra.mxu2 %vm62_vm1, %v203_v29 }
 0x171   :  { %v120_v31 = vadd.f32 %v118_v28, %v116_v27 }
 0x173   :  { %v124_v32 = vadd.f32 %v122_v30, %v120_v31 }
 0x174   :  { %v113_v33 = vpop.f32.mrf.mxu3 }
 0x175   :  { %v126_v35 = vmax.f32 %v124_v32, 1e-08  ;;  %v206_v36 = vsel %vm55_vm0, %v113_v33, 0.0  ;;  %v123_v41 = vmul.f32 %v113_v33, %v113_v33 }
 0x176   :  { %v107_v37 = vpop.f32.mrf.mxu0  ;;  %313 = vmatmul.msk.f32.gmra.mxu3 %vm62_vm1, %v206_v36 }
 0x177   :  { %v119_v39 = vmul.f32 %v107_v37, %v107_v37  ;;  %v204_v40 = vsel %vm55_vm0, %v107_v37, 0.0  ;;  %324 = vrsqrt.f32 %v126_v35  ;;  %vm135_vm2 = vcmp.eq.f32.partialorder %v126_v35, inf }
 0x178   :  { %311 = vmatmul.msk.f32.gmra.mxu2 %vm62_vm1, %v204_v40  ;;  %v138_v55 = vand.u32 2147483648, %v126_v35  ;;  %vm137_vm3 = vcmp.eq.f32.partialorder %v126_v35, 0.0 }
 0x179   :  { %v121_v42 = vadd.f32 %v119_v39, %v117_v38 }
 0x17b   :  { %v125_v43 = vadd.f32 %v123_v41, %v121_v42 }
 0x17d   :  { %v325_v44 = vpop.eup %324  ;;  %v127_v45 = vmax.f32 %v125_v43, 1e-08 }
 0x17e   :  { %v129_v46 = vmul.f32 %v325_v44, %v126_v35 }
 0x17f   :  { %326 = vrsqrt.f32 %v127_v45  ;;  %vm147_vm4 = vcmp.eq.f32.partialorder %v127_v45, inf  ;;  %v150_v62 = vand.u32 2147483648, %v127_v45  ;;  %vm149_vm5 = vcmp.eq.f32.partialorder %v127_v45, 0.0 }
 0x180   :  { %v130_v47 = vmul.f32 %v325_v44, %v129_v46 }
 0x182   :  { %v131_v48 = vmul.f32 0.5, %v130_v47 }
 0x184   :  { %v132_v49 = vsub.f32 1.5, %v131_v48 }
 0x185   :  { %v327_v50 = vpop.eup %326 }
 0x186   :  { %v133_v51 = vmul.f32 %v325_v44, %v132_v49  ;;  %v141_v52 = vmul.f32 %v327_v50, %v127_v45 }
 0x188   :  { %v134_v53 = vmul.f32 %v133_v51, %v126_v35  ;;  %v142_v54 = vmul.f32 %v327_v50, %v141_v52 }
 0x18a   :  { %v136_v56 = vsel %vm135_vm2, %v126_v35, %v134_v53  ;;  %v143_v57 = vmul.f32 0.5, %v142_v54 }
 0x18b   :  { %v139_v58 = vsel %vm137_vm3, %v138_v55, %v136_v56 }
 0x18c   :  { %154 = vrot.lane.b32.xlu1 %v139_v58, %s332_s27  ;;  %v144_v59 = vsub.f32 1.5, %v143_v57 }
 0x18e   :  { %v145_v60 = vmul.f32 %v327_v50, %v144_v59 }
 0x190   :  { %v146_v61 = vmul.f32 %v145_v60, %v127_v45 }
 0x192   :  { %v148_v2 = vsel %vm147_vm4, %v127_v45, %v146_v61 }
 0x193   :  { %v151_v3 = vsel %vm149_vm5, %v150_v62, %v148_v2 }
 0x194   :  { %156 = vrot.lane.b32.xlu2 %v151_v3, %s332_s27  ;;  %264 = vrot.lane.b32.xlu1 %v245_v63, %s331_s4 }
 0x1d4   :  { %v263_v20 = vpop.permute.xlu0 %262 }
 0x1ee   :  { %v157_v13 = vpop.permute.xlu2 %156 }
 0x1ef   :  { %v162_v14 = vsel %vm160_vm8, %v373_v1, %v157_v13 }
 0x1f1   :  { %v254_v7 = vpop.f32.mrf.mxu3 }
 0x1f2   :  { %278 = vrot.lane.b32.xlu1 %v254_v7, %s333_s9 }
 0x1f3   :  { %v248_v8 = vpop.f32.mrf.mxu2 }
 0x1f4   :  { %270 = vrot.lane.b32.xlu2 %v248_v8, %s334_s10 }
 0x1f9   :  { %v257_v9 = vpop.f32.mrf.mxu3 }
 0x1fb   :  { %v251_v10 = vpop.f32.mrf.mxu2 }
 0x1fc   :  { %280 = vrot.lane.b32.xlu2 %v257_v9, %s333_s9  ;;  %272 = vrot.lane.b32.xlu0 %v251_v10, %s334_s10 }
 0x1fe   :  { %v155_v11 = vpop.permute.xlu1 %154 }
 0x1ff   :  { %v161_v12 = vsel %vm160_vm8, %v368_v0, %v155_v11 }
 0x200   :  { %306 = vmatmul.msk.f32.vlgmr.msra.gmra.mxu1 %vm166_vm7, %v161_v12 }
 0x206   :  { %v265_v15 = vpop.permute.xlu1 %264 }
 0x208   :  { %307 = vmatmul.msk.f32.gmra.mxu1 %vm166_vm7, %v162_v14 }
 0x24e   :  { %v271_v19 = vpop.permute.xlu2 %270 }
 0x256   :  { %v281_v27 = vpop.permute.xlu2 %280 }
 0x264   :  { %v279_v22 = vpop.permute.xlu1 %278 }
 0x26e   :  { %v273_v26 = vpop.permute.xlu0 %272 }
 0x27d   :  { %v194_v17 = vpop.f32.mrf.mxu1 }
 0x27e   :  { %v195_v18 = vadd.f32 %v323_v16, %v194_v17 }
 0x280   :  { %v285_v21 = vsel %vm284_vm9, %v195_v18, %v263_v20 }
 0x281   :  { %v287_v0 = vsel %vm55_vm0, %v285_v21, %v271_v19 }
 0x282   :  { %v290_v23 = vsel %vm289_vm10, %v287_v0, %v279_v22 }
 0x283   :  { %293 = vst.msk [vmem:[%s440_s5] sm:$0xff] %vm292_vm11, %v290_v23 }
 0x285   :  { %v197_v1 = vpop.f32.mrf.mxu1 }
 0x286   :  { %v198_v24 = vadd.f32 %v323_v16, %v197_v1 }
 0x288   :  { %v286_v25 = vsel %vm284_vm9, %v198_v24, %v265_v15 }
 0x289   :  { %v288_v28 = vsel %vm55_vm0, %v286_v25, %v273_v26 }
 0x28a   :  { %v291_v29 = vsel %vm289_vm10, %v288_v28, %v281_v27 }
 0x28b   :  { %294 = vst.msk [vmem:[%s440_s5 + $0x8] sm:$0xff] %vm292_vm11, %v291_v29 }

// kernel: model_apply.22
= control target key start
LH: loop header
LB: loop body
LE: loop exit
PB: predicated region body
PF: predicated region fallthrough
CT: control target
= control target key end

     0   :  { %s889_s30 = smov 126   ;;  %s892_s24 = smov 120   ;;  %vm252_vm0 = vcmask 15360   ;;  %vm102_vm1 = vcmask 64512   ;;  %vm98_vm2 = vcmask 31744   ;;  %vm313_vm5 = vcmask 441344   ;;  %s1274_s1 = inlined_call_operand.vmem [shape: f32[8,60], index: 1, kind: input, shape index: {}]   ;;  %s1275_s0 = inlined_call_operand.vmem [shape: f32[8,88], index: 0, kind: input, shape index: {}]   ;;  %s1276_s2 = inlined_call_operand.vmem [shape: f32[8,14], index: 2, kind: input, shape index: {}]   ;;  %s1277_s7 = inlined_call_operand.vmem [shape: f32[8,2], index: 7, kind: input, shape index: {}]   ;;  %s1278_s3 = inlined_call_operand.vmem [shape: f32[8,4], index: 3, kind: input, shape index: {}]   ;;  %s1279_s6 = inlined_call_operand.vmem [shape: f32[8,4], index: 6, kind: input, shape index: {}]   ;;  %s1280_s10 = inlined_call_operand.vmem [shape: f32[8,2], index: 10, kind: input, shape index: {}]   ;;  %s1281_s8 = inlined_call_operand.vmem [shape: f32[56,12], index: 8, kind: input, shape index: {}]   ;;  %s1282_s11 = inlined_call_operand.vmem [shape: f32[8,2], index: 11, kind: input, shape index: {}]   ;;  %s1283_s9 = inlined_call_operand.vmem [shape: f32[1,12], index: 9, kind: input, shape index: {}]   ;;  %s1284_s14 = inlined_call_operand.vmem [shape: f32[8,2], index: 14, kind: input, shape index: {}]   ;;  %s1285_s4 = inlined_call_operand.vmem [shape: f32[80,16], index: 4, kind: input, shape index: {}]   ;;  %s1286_s5 = inlined_call_operand.vmem [shape: f32[1,16], index: 5, kind: input, shape index: {}]   ;;  %s1287_s12 = inlined_call_operand.vmem [shape: f32[10,8], index: 12, kind: input, shape index: {}]   ;;  %s1288_s13 = inlined_call_operand.vmem [shape: f32[1,8], index: 13, kind: input, shape index: {}]   ;;  %s1289_s15 = inlined_call_operand.vmem [shape: f32[8,8], index: 15, kind: input, shape index: {}]   ;;  %s1290_s18 = inlined_call_operand.vmem [shape: f32[8,2], index: 18, kind: input, shape index: {}]   ;;  %s1291_s16 = inlined_call_operand.vmem [shape: f32[44,8], index: 16, kind: input, shape index: {}]   ;;  %s1292_s17 = inlined_call_operand.vmem [shape: f32[1,8], index: 17, kind: input, shape index: {}]   ;;  %s1293_s21 = inlined_call_operand.vmem [shape: f32[1,2], index: 21, kind: input, shape index: {}]   ;;  %s1294_s19 = inlined_call_operand.vmem [shape: f32[1,8], index: 19, kind: input, shape index: {}]   ;;  %s1295_s20 = inlined_call_operand.vmem [shape: f32[1,8], index: 20, kind: input, shape index: {}]   ;;  %s1296_s22 = inlined_call_operand.vmem [shape: f32[8,14], index: 22, kind: output, shape index: {}]  }
   0x1   :  { %1297 = sst [smem:[#allocation2_spill]] %s1274_s1  ;;  %s891_s1 = smov 124   ;;  %v236_v46 = vld [vmem:[%s1281_s8 + $0x30] sm:$0xff]  ;;  %v235_v47 = vld [vmem:[%s1281_s8 + $0x28] sm:$0xff]  ;;  %v234_v48 = vld [vmem:[%s1281_s8 + $0x20] sm:$0xff]  ;;  %vm318_vm6 = vcmask 457728  }
   0x2   :  { %1298 = sst [smem:[#allocation3_spill]] %s1275_s0  ;;  %v382_v51 = vld [vmem:[%s1282_s11] sm:$0xff]  ;;  %v233_v52 = vld [vmem:[%s1281_s8 + $0x18] sm:$0xff]  ;;  %v232_v53 = vld [vmem:[%s1281_s8 + $0x10] sm:$0xff]  ;;  %vm160_vm11 = vcmask 621568   ;;  %vm165_vm12 = vcmask 654336  }
   0x3   :  { %1299 = sst [smem:[#allocation4_spill]] %s1276_s2  ;;  %v231_v54 = vld [vmem:[%s1281_s8 + $0x8] sm:$0xff]  ;;  %v230_v55 = vld [vmem:[%s1281_s8] sm:$0xff]  ;;  %s895_s8 = smov 76   ;;  %vm468_vm13 = vcmask 1041408   ;;  %vm464_vm14 = vcmask 80896  }
   0x4   :  { %1300 = sst [smem:[#allocation5_spill]] %s1277_s7  ;;  %s896_s7 = smov 4   ;;  %vm552_vm15 = vcmask 48128  }
   0x5   :  { %1301 = sst [smem:[#allocation6_spill]] %s1278_s3  ;;  %s890_s3 = smov 74  }
   0x6   :  { %1302 = sst [smem:[#allocation7_spill]] %s1279_s6 }
   0x7   :  { %1303 = sst [smem:[#allocation8_spill]] %s1280_s10  ;;  %s893_s10 = smov 52  }
   0x8   :  { %s1304_s29 = sld [smem:[#allocation2_spill]] }
   0x9   :  { %s1305_s6 = sld [smem:[#allocation3_spill]] }
   0xa   :  { %s1306_s2 = sld [smem:[#allocation4_spill]] }
   0xb   :  { %s1307_s28 = sld [smem:[#allocation5_spill]] }
   0xc   :  { %s1309_s0 = sld [smem:[#allocation7_spill]] }
   0xd   :  { %s1310_s26 = sld [smem:[#allocation8_spill]] }
   0xe   :  { %v1026_v0 = vld [vmem:[%s1304_s29] sm:$0xff] }
   0xf   :  { %239 = vrot.lane.b32.xlu0 %v1026_v0, %s889_s30  ;;  %243 = vrot.lane.b32.xlu1 %v1026_v0, %s890_s3  ;;  %v1034_v1 = vld [vmem:[%s1305_s6] sm:$0xff]  ;;  %s894_s6 = smov 54  }
  0x10   :  { %v1043_v4 = vld [vmem:[%s1306_s2] sm:$0xff]  ;;  %s902_s2 = smov 116  }
  0x11   :  { %v229_v7 = vld [vmem:[%s1307_s28] sm:$0xff] }
  0x12   :  { %280 = vmatpush.msra.mxu3 %v229_v7  ;;  %v189_v30 = vld [vmem:[%s1309_s0] sm:$0xff] }
  0x13   :  { %217 = vmatpush.msra.mxu2 %v189_v30  ;;  %v342_v45 = vld [vmem:[%s1310_s26] sm:$0xff] }
  0x14   :  { %846 = vmatpush.msrb.mxu3 %v382_v51 }
  0x15   :  { %370 = vmatpush.msrb.mxu2 %v342_v45 }
  0x17   :  { %241 = vrot.lane.b32.xlu0 %v1026_v0, %s891_s1 }
  0x1f   :  { %87 = vrot.lane.b32.xlu0 %v1034_v1, %s892_s24 }
  0x27   :  { %389 = vrot.lane.b32.xlu0 %v1043_v4, %s891_s1 }
  0x81   :  { %v240_v2 = vpop.permute.xlu0 %239  ;;  %v244_v5 = vpop.permute.xlu1 %243 }
  0x82   :  { %245 = vrot.lane.b32.xlu1 %v240_v2, %s890_s3  ;;  %v253_v6 = vsel %vm252_vm0, %v244_v5, 0.0 }
  0x83   :  { %823 = vmatmul.msk.f32.vlgmr.msra.gmra.mxu3 %vm102_vm1, %v253_v6 }
  0x89   :  { %v242_v3 = vpop.permute.xlu0 %241 }
  0x8a   :  { %247 = vrot.lane.b32.xlu2 %v242_v3, %s890_s3  ;;  %387 = vrot.lane.b32.xlu1 %v1043_v4, %s889_s30  ;;  %s1308_s3 = sld [smem:[#allocation6_spill]] }
  0x90   :  { %v72_v15 = vld [vmem:[%s1308_s3] sm:$0xff] }
  0x91   :  { %v88_v8 = vpop.permute.xlu0 %87  ;;  %127 = vmatpush.msra.mxu0 %v72_v15 }
  0x92   :  { %85 = vrot.lane.b32.xlu2 %v1034_v1, %s891_s1  ;;  %s897_s1 = smov 8  }
  0x93   :  { %331 = vmatpush.msrb.mxu0 %v236_v46 }
  0x95   :  { %332 = vmatpush.msrb.mxu0 %v235_v47 }
  0x97   :  { %333 = vmatpush.msrb.mxu0 %v234_v48 }
  0x99   :  { %v390_v44 = vpop.permute.xlu0 %389  ;;  %334 = vmatpush.msrb.mxu0 %v233_v52 }
  0x9a   :  { %89 = vrot.lane.b32.xlu2 %v1034_v1, %s893_s10 }
  0x9b   :  { %335 = vmatpush.msrb.mxu0 %v232_v53 }
  0x9d   :  { %336 = vmatpush.msrb.mxu0 %v231_v54 }
  0x9f   :  { %337 = vmatpush.msrb.mxu0 %v230_v55  ;;  %v79_v55 = vld [vmem:[%s1285_s4 + $0x30] sm:$0xff] }
  0xa2   :  { %93 = vrot.lane.b32.xlu2 %v88_v8, %s893_s10 }
  0xe4   :  { %v248_v9 = vpop.permute.xlu2 %247 }
  0xe5   :  { %v255_v13 = vsel %vm252_vm0, %v248_v9, 0.0 }
  0xec   :  { %v86_v10 = vpop.permute.xlu2 %85 }
  0xed   :  { %91 = vrot.lane.b32.xlu1 %v86_v10, %s893_s10  ;;  %s903_s10 = smov 36  }
  0xf4   :  { %v246_v11 = vpop.permute.xlu1 %245  ;;  %v90_v14 = vpop.permute.xlu2 %89 }
  0xf5   :  { %v254_v12 = vsel %vm252_vm0, %v246_v11, 0.0  ;;  %391 = vrot.lane.b32.xlu1 %v1043_v4, %s892_s24  ;;  %v99_v16 = vsel %vm98_vm2, %v90_v14, 0.0 }
  0xf6   :  { %824 = vmatmul.msk.f32.gmra.mxu3 %vm102_vm1, %v254_v12  ;;  %816 = vmatmul.msk.f32.vlgmr.msra.gmra.mxu0 %vm102_vm1, %v99_v16 }
  0xf7   :  { %427 = vmatpush.msra.mxu0 %v382_v51 }
  0xfc   :  { %v388_v17 = vpop.permute.xlu1 %387  ;;  %v94_v20 = vpop.permute.xlu2 %93 }
  0xfd   :  { %393 = vrot.lane.b32.xlu2 %v388_v17, %s892_s24  ;;  %v101_v21 = vsel %vm98_vm2, %v94_v20, 0.0 }
  0xfe   :  { %825 = vmatmul.msk.f32.gmra.mxu3 %vm102_vm1, %v255_v13 }
 0x106   :  { %v282_v22 = vpop.f32.mrf.mxu3 }
 0x107   :  { %v291_v25 = vmul.f32 %v282_v22, %v282_v22  ;;  %v343_v58 = vsel %vm252_vm0, %v282_v22, 0.0 }
 0x157   :  { %v394_v59 = vpop.permute.xlu2 %393 }
 0x158   :  { %v401_v60 = vsel %vm252_vm0, %v394_v59, 0.0  ;;  %v75_v59 = vld [vmem:[%s1285_s4 + $0x10] sm:$0xff] }
 0x159   :  { %831 = vmatmul.msk.f32.vlgmr.msrb.gmra.mxu3 %vm102_vm1, %v401_v60  ;;  %v74_v60 = vld [vmem:[%s1285_s4 + $0x8] sm:$0xff] }
 0x15f   :  { %v92_v18 = vpop.permute.xlu1 %91 }
 0x160   :  { %v100_v19 = vsel %vm98_vm2, %v92_v18, 0.0 }
 0x161   :  { %817 = vmatmul.msk.f32.gmra.mxu0 %vm102_vm1, %v100_v19 }
 0x167   :  { %v1127_v3 = vpop.permute.xlu1 %391 }
 0x168   :  { %v400_v5 = vsel %vm252_vm0, %v1127_v3, 0.0 }
 0x169   :  { %818 = vmatmul.msk.f32.gmra.mxu0 %vm102_vm1, %v101_v21 }
 0x173   :  { %v1079_v37 = vpop.f32.mrf.mxu0 }
 0x174   :  { %v190_v39 = vsel %vm98_vm2, %v1079_v37, 0.0  ;;  %v138_v8 = vmul.f32 %v1079_v37, %v1079_v37 }
 0x175   :  { %820 = vmatmul.msk.f32.vlgmr.msra.gmra.mxu2 %vm102_vm1, %v190_v39  ;;  %v82_v39 = vld [vmem:[%s1285_s4 + $0x48] sm:$0xff] }
 0x176   :  { %175 = vmatpush.msra.mxu1 %v82_v39 }
 0x179   :  { %v1068_v23 = vpop.f32.mrf.mxu3 }
 0x17a   :  { %v292_v24 = vmul.f32 %v1068_v23, %v1068_v23  ;;  %v344_v61 = vsel %vm252_vm0, %v1068_v23, 0.0 }
 0x17c   :  { %v293_v27 = vadd.f32 %v292_v24, %v291_v25 }
 0x181   :  { %v1072_v26 = vpop.f32.mrf.mxu3 }
 0x182   :  { %v294_v28 = vmul.f32 %v1072_v26, %v1072_v26  ;;  %v345_v62 = vsel %vm252_vm0, %v1072_v26, 0.0  ;;  %v492_v26 = vld [vmem:[%s1284_s14] sm:$0xff] }
 0x184   :  { %v295_v29 = vadd.f32 %v294_v28, %v293_v27 }
 0x186   :  { %v296_v31 = vmax.f32 %v295_v29, 1e-08 }
 0x188   :  { %873 = vrsqrt.f32 %v296_v31  ;;  %vm304_vm3 = vcmp.eq.f32.partialorder %v296_v31, inf  ;;  %v307_v41 = vand.u32 2147483648, %v296_v31  ;;  %vm306_vm4 = vcmp.eq.f32.partialorder %v296_v31, 0.0 }
 0x18e   :  { %v874_v32 = vpop.eup %873 }
 0x18f   :  { %v298_v33 = vmul.f32 %v874_v32, %v296_v31 }
 0x191   :  { %v299_v34 = vmul.f32 %v874_v32, %v298_v33 }
 0x193   :  { %v300_v35 = vmul.f32 0.5, %v299_v34 }
 0x195   :  { %v301_v36 = vsub.f32 1.5, %v300_v35 }
 0x197   :  { %v302_v38 = vmul.f32 %v874_v32, %v301_v36 }
 0x199   :  { %v303_v40 = vmul.f32 %v302_v38, %v296_v31 }
 0x19b   :  { %v305_v42 = vsel %vm304_vm3, %v296_v31, %v303_v40  ;;  %v81_v40 = vld [vmem:[%s1285_s4 + $0x40] sm:$0xff] }
 0x19c   :  { %v308_v43 = vsel %vm306_vm4, %v307_v41, %v305_v42  ;;  %v80_v42 = vld [vmem:[%s1285_s4 + $0x38] sm:$0xff]  ;;  %176 = vmatpush.msra.mxu1 %v81_v40 }
 0x19d   :  { %310 = vrot.lane.b32.xlu0 %v308_v43, %s894_s6 }
 0x19e   :  { %177 = vmatpush.msra.mxu1 %v80_v42 }
 0x1a0   :  { %178 = vmatpush.msra.mxu1 %v79_v55  ;;  %v867_v55 = vld [vmem:[%s1286_s5] ss:$0 sm:$0xff] }
 0x1a5   :  { %395 = vrot.lane.b32.xlu0 %v390_v44, %s892_s24 }
 0x1dc   :  { %v432_v29 = vpop.f32.mrf.mxu3 }
 0x1dd   :  { %v439_v32 = vmul.f32 %v432_v29, %v432_v29  ;;  %v494_v37 = vsel %vm252_vm0, %v432_v29, 0.0 }
 0x1de   :  { %v132_v49 = vpop.f32.mrf.mxu0 }
 0x1df   :  { %v191_v50 = vsel %vm98_vm2, %v132_v49, 0.0  ;;  %v139_v9 = vmul.f32 %v132_v49, %v132_v49 }
 0x1e0   :  { %821 = vmatmul.msk.f32.gmra.mxu2 %vm102_vm1, %v191_v50 }
 0x1e1   :  { %v140_v10 = vadd.f32 %v139_v9, %v138_v8 }
 0x1e6   :  { %v135_v56 = vpop.f32.mrf.mxu0 }
 0x1e7   :  { %v192_v57 = vsel %vm98_vm2, %v135_v56, 0.0  ;;  %v141_v11 = vmul.f32 %v135_v56, %v135_v56  ;;  %v78_v56 = vld [vmem:[%s1285_s4 + $0x28] sm:$0xff] }
 0x1e8   :  { %822 = vmatmul.msk.f32.gmra.mxu2 %vm102_vm1, %v192_v57  ;;  %v77_v57 = vld [vmem:[%s1285_s4 + $0x20] sm:$0xff]  ;;  %179 = vmatpush.msra.mxu1 %v78_v56 }
 0x1ea   :  { %180 = vmatpush.msra.mxu1 %v77_v57 }
 0x1f0   :  { %827 = vmatmul.msk.f32.vlgmr.msrb.gmra.mxu2 %vm102_vm1, %v343_v58  ;;  %v76_v58 = vld [vmem:[%s1285_s4 + $0x18] sm:$0xff] }
 0x1f1   :  { %181 = vmatpush.msra.mxu1 %v76_v58 }
 0x1f3   :  { %182 = vmatpush.msra.mxu1 %v75_v59 }
 0x1f5   :  { %183 = vmatpush.msra.mxu1 %v74_v60 }
 0x1f8   :  { %828 = vmatmul.msk.f32.gmra.mxu2 %vm102_vm1, %v344_v61  ;;  %v1136_v17 = vpop.f32.mrf.mxu2  ;;  %v73_v61 = vld [vmem:[%s1285_s4] sm:$0xff]  ;;  %s898_s4 = smov 6  }
 0x1f9   :  { %184 = vmatpush.msra.mxu1 %v73_v61 }
 0x200   :  { %829 = vmatmul.msk.f32.gmra.mxu2 %vm102_vm1, %v345_v62 }
 0x20f   :  { %v311_v63 = vpop.permute.xlu0 %310 }
 0x210   :  { %v314_v2 = vsel %vm313_vm5, %v1026_v0, %v311_v63  ;;  %v142_v0 = vadd.f32 %v141_v11, %v140_v10  ;;  %v384_v63 = vld [vmem:[%s1287_s12 + $0x8] sm:$0x3]  ;;  %vm539_vm5 = vcmask 130048  }
 0x211   :  { %826 = vmatmul.msk.f32.vlgmr.msrb.gmra.mxu0 %vm318_vm6, %v314_v2  ;;  %833 = vmatpush.msk.msrb.mxu1 %vm468_vm13, %v384_v63  ;;  %vm541_vm6 = vcmask 228352  }
 0x212   :  { %v143_v12 = vmax.f32 %v142_v0, 1e-08  ;;  %520 = vmatpush.msrb.mxu0 %v492_v26 }
 0x214   :  { %875 = vrsqrt.f32 %v143_v12  ;;  %vm151_vm7 = vcmp.eq.f32.partialorder %v143_v12, inf  ;;  %v154_v20 = vand.u32 2147483648, %v143_v12  ;;  %vm153_vm8 = vcmp.eq.f32.partialorder %v143_v12, 0.0 }
 0x217   :  { %v396_v6 = vpop.permute.xlu0 %395 }
 0x218   :  { %v402_v7 = vsel %vm252_vm0, %v396_v6, 0.0 }
 0x219   :  { %830 = vmatmul.msk.f32.vlgmr.msra.gmra.mxu0 %vm102_vm1, %v400_v5  ;;  %832 = vmatmul.msk.f32.gmra.mxu3 %vm102_vm1, %v402_v7  ;;  %v383_v5 = vld [vmem:[%s1287_s12] sm:$0xff]  ;;  %s899_s12 = smov 16  }
 0x21a   :  { %v876_v13 = vpop.eup %875  ;;  %487 = vmatpush.msrb.mxu1 %v383_v5 }
 0x21b   :  { %v145_v14 = vmul.f32 %v876_v13, %v143_v12 }
 0x21d   :  { %v146_v15 = vmul.f32 %v876_v13, %v145_v14 }
 0x21f   :  { %v147_v16 = vmul.f32 0.5, %v146_v15 }
 0x221   :  { %v148_v18 = vsub.f32 1.5, %v147_v16 }
 0x223   :  { %v149_v19 = vmul.f32 %v876_v13, %v148_v18 }
 0x225   :  { %v150_v21 = vmul.f32 %v149_v19, %v143_v12 }
 0x227   :  { %v152_v22 = vsel %vm151_vm7, %v143_v12, %v150_v21  ;;  %v574_v12 = vld [vmem:[%s1289_s15] sm:$0xff]  ;;  %s900_s15 = smov 28   ;;  %vm639_vm7 = vcmask 293888  }
 0x228   :  { %v155_v23 = vsel %vm153_vm8, %v154_v20, %v152_v22  ;;  %v868_v20 = vld [vmem:[%s1288_s13] ss:$0 sm:$0xff]  ;;  %s901_s13 = smov 118   ;;  %vm644_vm8 = vcmask 359424  }
 0x229   :  { %157 = vrot.lane.b32.xlu1 %v155_v23, %s895_s8 }
 0x263   :  { %v1138_v24 = vpop.f32.mrf.mxu2 }
 0x26b   :  { %v1140_v25 = vpop.f32.mrf.mxu2 }
 0x273   :  { %v372_v27 = vpop.f32.mrf.mxu2 }
 0x274   :  { %544 = vrot.lane.b32.xlu0 %v372_v27, %s896_s7 }
 0x27b   :  { %v375_v54 = vpop.f32.mrf.mxu2 }
 0x283   :  { %v378_v9 = vpop.f32.mrf.mxu2 }
 0x28e   :  { %v1146_v28 = vpop.f32.mrf.mxu0 }
 0x296   :  { %v429_v30 = vpop.f32.mrf.mxu0 }
 0x297   :  { %v493_v31 = vsel %vm252_vm0, %v429_v30, 0.0  ;;  %v438_v33 = vmul.f32 %v429_v30, %v429_v30 }
 0x298   :  { %835 = vmatmul.msk.f32.vlgmr.msrb.gmra.mxu0 %vm102_vm1, %v493_v31 }
 0x299   :  { %v440_v35 = vadd.f32 %v439_v32, %v438_v33  ;;  %v580_v32 = vld [vmem:[%s1291_s16 + $0x28] sm:$0xf]  ;;  %v579_v33 = vld [vmem:[%s1291_s16 + $0x20] sm:$0xff] }
 0x29b   :  { %v158_v62 = vpop.permute.xlu1 %157 }
 0x29c   :  { %v435_v34 = vpop.f32.mrf.mxu3  ;;  %v161_v2 = vsel %vm160_vm11, %v1034_v1, %v158_v62  ;;  %v866_v1 = vld [vmem:[%s1283_s9] ss:$0 sm:$0xff]  ;;  %s905_s9 = smov 10  }
 0x29d   :  { %v441_v36 = vmul.f32 %v435_v34, %v435_v34  ;;  %v495_v43 = vsel %vm252_vm0, %v435_v34, 0.0  ;;  %819 = vmatmul.msk.f32.vlgmr.msra.gmra.mxu1 %vm165_vm12, %v161_v2  ;;  %v340_v11 = vadd.f32 %v866_v1, %v1146_v28 }
 0x29e   :  { %606 = vmatpush.msra.mxu1 %v574_v12 }
 0x29f   :  { %v442_v38 = vadd.f32 %v441_v36, %v440_v35  ;;  %v578_v35 = vld [vmem:[%s1291_s16 + $0x18] sm:$0xff] }
 0x2a0   :  { %836 = vmatmul.msk.f32.gmra.mxu0 %vm102_vm1, %v494_v37 }
 0x2a1   :  { %v443_v41 = vmax.f32 %v442_v38, 1e-08  ;;  %v577_v38 = vld [vmem:[%s1291_s16 + $0x10] sm:$0xff] }
 0x2a3   :  { %877 = vrsqrt.f32 %v443_v41  ;;  %vm451_vm9 = vcmp.eq.f32.partialorder %v443_v41, inf  ;;  %v454_v51 = vand.u32 2147483648, %v443_v41  ;;  %vm453_vm10 = vcmp.eq.f32.partialorder %v443_v41, 0.0 }
 0x2a8   :  { %837 = vmatmul.msk.f32.gmra.mxu0 %vm102_vm1, %v495_v43  ;;  %v575_v43 = vld [vmem:[%s1291_s16] sm:$0xff] }
 0x2a9   :  { %v878_v44 = vpop.eup %877 }
 0x2aa   :  { %v445_v45 = vmul.f32 %v878_v44, %v443_v41 }
 0x2ac   :  { %v446_v46 = vmul.f32 %v878_v44, %v445_v45 }
 0x2ae   :  { %v447_v47 = vmul.f32 0.5, %v446_v46 }
 0x2b0   :  { %v448_v48 = vsub.f32 1.5, %v447_v47 }
 0x2b2   :  { %v449_v49 = vmul.f32 %v878_v44, %v448_v48 }
 0x2b4   :  { %v450_v50 = vmul.f32 %v449_v49, %v443_v41 }
 0x2b6   :  { %v452_v52 = vsel %vm451_vm9, %v443_v41, %v450_v50  ;;  %v576_v41 = vld [vmem:[%s1291_s16 + $0x8] sm:$0xff] }
 0x2b7   :  { %v455_v53 = vsel %vm453_vm10, %v454_v51, %v452_v52 }
 0x2b8   :  { %457 = vrot.lane.b32.xlu2 %v455_v53, %s897_s1 }
 0x2c0   :  { %555 = vrot.lane.b32.xlu2 %v375_v54, %s896_s7 }
 0x2e6   :  { %v545_v13 = vpop.permute.xlu0 %544 }
 0x2e7   :  { %v551_v14 = vsel %vm98_vm2, %v1136_v17, %v545_v13 }
 0x312   :  { %v458_v6 = vpop.permute.xlu2 %457 }
 0x313   :  { %v460_v7 = vsel %vm102_vm1, %v1043_v4, %v458_v6 }
 0x314   :  { %834 = vmatmul.msk.f32.vlgmr.msrb.gmra.mxu1 %vm464_vm14, %v460_v7 }
 0x315   :  { %v522_v8 = vpop.f32.mrf.mxu0 }
 0x316   :  { %548 = vrot.lane.b32.xlu1 %v522_v8, %s898_s4 }
 0x31a   :  { %v1206_v16 = vpop.f32.mrf.mxu1  ;;  %v556_v19 = vpop.permute.xlu2 %555 }
 0x31b   :  { %v562_v21 = vsel %vm98_vm2, %v1138_v24, %v556_v19  ;;  %v672_v24 = vld [vmem:[%s1290_s18] sm:$0xff]  ;;  %v187_v57 = vadd.f32 %v867_v55, %v1206_v16  ;;  %v904_v16 = vmov 2.0  }
 0x31c   :  { %697 = vmatpush.msra.mxu3 %v672_v24 }
 0x31d   :  { %v525_v10 = vpop.f32.mrf.mxu0 }
 0x31e   :  { %565 = vrot.lane.b32.xlu1 %v378_v9, %s896_s7  ;;  %559 = vrot.lane.b32.xlu0 %v525_v10, %s898_s4 }
 0x325   :  { %v528_v0 = vpop.f32.mrf.mxu0 }
 0x326   :  { %532 = vrot.lane.b32.xlu0 %v340_v11, %s899_s12  ;;  %569 = vrot.lane.b32.xlu2 %v528_v0, %s898_s4 }
 0x32e   :  { %710 = vrot.lane.b32.xlu0 %v1043_v4, %s901_s13 }
 0x380   :  { %v570_v29 = vpop.permute.xlu2 %569 }
 0x388   :  { %v549_v15 = vpop.permute.xlu1 %548 }
 0x389   :  { %v553_v18 = vsel %vm552_vm15, %v551_v14, %v549_v15 }
 0x38a   :  { %838 = vmatmul.msk.f32.vlgmr.msra.gmra.mxu1 %vm102_vm1, %v553_v18 }
 0x390   :  { %v560_v22 = vpop.permute.xlu0 %559  ;;  %v566_v27 = vpop.permute.xlu1 %565 }
 0x391   :  { %v489_v23 = vpop.f32.mrf.mxu1  ;;  %v563_v26 = vsel %vm552_vm15, %v562_v21, %v560_v22  ;;  %v572_v28 = vsel %vm98_vm2, %v1140_v25, %v566_v27  ;;  %vm648_vm2 = vcmask 1043456  }
 0x392   :  { %v490_v17 = vadd.f32 %v868_v20, %v489_v23  ;;  %839 = vmatmul.msk.f32.gmra.mxu1 %vm102_vm1, %v563_v26  ;;  %v573_v30 = vsel %vm552_vm15, %v572_v28, %v570_v29  ;;  %841 = vmatpush.msk.msra.mxu2 %vm648_vm2, %v580_v32 }
 0x394   :  { %536 = vrot.lane.b32.xlu1 %v490_v17, %s900_s15  ;;  %663 = vmatpush.msra.mxu2 %v579_v33 }
 0x396   :  { %664 = vmatpush.msra.mxu2 %v578_v35 }
 0x398   :  { %665 = vmatpush.msra.mxu2 %v577_v38  ;;  %v533_v56 = vpop.permute.xlu0 %532 }
 0x399   :  { %v540_v60 = vsel %vm539_vm5, %v187_v57, %v533_v56 }
 0x39a   :  { %840 = vmatmul.msk.f32.gmra.mxu1 %vm102_vm1, %v573_v30  ;;  %666 = vmatpush.msra.mxu2 %v576_v41 }
 0x39c   :  { %714 = vrot.lane.b32.xlu1 %v1043_v4, %s902_s2  ;;  %667 = vmatpush.msra.mxu2 %v575_v43 }
 0x3a0   :  { %v711_v2 = vpop.permute.xlu0 %710 }
 0x406   :  { %v537_v58 = vpop.permute.xlu1 %536 }
 0x407   :  { %v608_v31 = vpop.f32.mrf.mxu1  ;;  %v542_v61 = vsel %vm541_vm6, %v540_v60, %v537_v58 }
 0x408   :  { %843 = vmatmul.msk.f32.vlgmr.msra.gmra.mxu3 %vm102_vm1, %v608_v31  ;;  %v617_v36 = vmul.f32 %v608_v31, %v608_v31 }
 0x40e   :  { %v715_v8 = vpop.permute.xlu1 %714 }
 0x40f   :  { %v611_v25 = vpop.f32.mrf.mxu1 }
 0x410   :  { %844 = vmatmul.msk.f32.gmra.mxu3 %vm102_vm1, %v611_v25  ;;  %v618_v34 = vmul.f32 %v611_v25, %v611_v25 }
 0x412   :  { %v619_v39 = vadd.f32 %v618_v34, %v617_v36 }
 0x417   :  { %v614_v37 = vpop.f32.mrf.mxu1 }
 0x418   :  { %v620_v40 = vmul.f32 %v614_v37, %v614_v37  ;;  %845 = vmatmul.msk.f32.gmra.mxu3 %vm102_vm1, %v614_v37 }
 0x41a   :  { %v621_v42 = vadd.f32 %v620_v40, %v619_v39 }
 0x41c   :  { %v622_v44 = vmax.f32 %v621_v42, 1e-08  ;;  %v906_v42 = vmov 8.0  }
 0x41e   :  { %879 = vrsqrt.f32 %v622_v44  ;;  %vm630_vm3 = vcmp.eq.f32.partialorder %v622_v44, inf  ;;  %v633_v52 = vand.u32 2147483648, %v622_v44  ;;  %vm632_vm4 = vcmp.eq.f32.partialorder %v622_v44, 0.0 }
 0x41f   :  { %881 = vrcp.f32 %v904_v16 }
 0x424   :  { %v880_v45 = vpop.eup %879 }
 0x425   :  { %v624_v46 = vmul.f32 %v880_v45, %v622_v44  ;;  %v882_v18 = vpop.eup %881 }
 0x426   :  { %v768_v19 = vmul.f32 2.0, %v882_v18  ;;  %vm772_vm9 = vweird.f32 %v882_v18 }
 0x427   :  { %v625_v47 = vmul.f32 %v880_v45, %v624_v46 }
 0x428   :  { %v769_v20 = vsub.f32 1.0, %v768_v19 }
 0x429   :  { %v626_v48 = vmul.f32 0.5, %v625_v47 }
 0x42a   :  { %v770_v21 = vmul.f32 %v882_v18, %v769_v20 }
 0x42b   :  { %v627_v49 = vsub.f32 1.5, %v626_v48 }
 0x42c   :  { %v771_v23 = vadd.f32 %v882_v18, %v770_v21 }
 0x42d   :  { %v628_v50 = vmul.f32 %v880_v45, %v627_v49 }
 0x42e   :  { %v773_v27 = vsel %vm772_vm9, %v882_v18, %v771_v23 }
 0x42f   :  { %v629_v51 = vmul.f32 %v628_v50, %v622_v44 }
 0x431   :  { %v631_v53 = vsel %vm630_vm3, %v622_v44, %v629_v51  ;;  %vm808_vm3 = vcmask 97280  }
 0x432   :  { %v634_v54 = vsel %vm632_vm4, %v633_v52, %v631_v53  ;;  %vm810_vm4 = vcmask 113664  }
 0x433   :  { %636 = vrot.lane.b32.xlu2 %v634_v54, %s903_s10 }
 0x48b   :  { %v699_v59 = vpop.f32.mrf.mxu3 }
 0x48c   :  { %v709_v7 = vadd.f32 %v699_v59, %v1127_v3  ;;  %v869_v3 = vld [vmem:[%s1292_s17] ss:$0 sm:$0xff] }
 0x48d   :  { %v637_v62 = vpop.permute.xlu2 %636 }
 0x48e   :  { %v640_v63 = vsel %vm639_vm7, %v542_v61, %v637_v62  ;;  %v758_v1 = vmul.f32 %v709_v7, %v709_v7 }
 0x48f   :  { %842 = vmatmul.msk.f32.vlgmr.msra.gmra.mxu2 %vm644_vm8, %v640_v63  ;;  %v871_v63 = vld [vmem:[%s1294_s19] ss:$0 sm:$0xff] }
 0x493   :  { %v702_v5 = vpop.f32.mrf.mxu3 }
 0x494   :  { %v713_v6 = vadd.f32 %v711_v2, %v702_v5 }
 0x496   :  { %v759_v9 = vmul.f32 %v713_v6, %v713_v6 }
 0x498   :  { %v760_v0 = vadd.f32 %v759_v9, %v758_v1 }
 0x49b   :  { %v705_v10 = vpop.f32.mrf.mxu3 }
 0x49c   :  { %v717_v11 = vadd.f32 %v715_v8, %v705_v10 }
 0x49e   :  { %v761_v12 = vmul.f32 %v717_v11, %v717_v11 }
 0x4a0   :  { %v762_v13 = vadd.f32 %v761_v12, %v760_v0 }
 0x4a2   :  { %v763_v14 = vmax.f32 %v762_v13, 1e-08 }
 0x4a4   :  { %v764_v15 = vsel %vm252_vm0, %v763_v14, 0.0 }
 0x4a5   :  { %765 = vadd.xlane.f32.xlu0 %v764_v15 }
 0x512   :  { %v669_v22 = vpop.f32.mrf.mxu2 }
 0x513   :  { %v670_v26 = vadd.f32 %v869_v3, %v669_v22 }
 0x515   :  { %v708_v17 = vadd.f32 %v670_v26, %v1043_v4  ;;  %v870_v4 = vld [vmem:[%s1293_s21] ss:$0 sm:$0xff]  ;;  %s907_s21 = smov 12  }
 0x517   :  { %v720_v28 = vsel %vm102_vm1, %v708_v17, 0.0 }
 0x518   :  { %v766_v29 = vpop.xlane.xlu0 %765  ;;  %721 = vadd.xlane.f32.xlu2 %v720_v28 }
 0x519   :  { %v774_v30 = vmul.f32 %v773_v27, %v766_v29 }
 0x51b   :  { %883 = vrsqrt.f32 %v774_v30  ;;  %vm781_vm10 = vweird.f32 %v774_v30 }
 0x51c   :  { %885 = vrcp.f32 %v906_v42 }
 0x521   :  { %v884_v24 = vpop.eup %883 }
 0x522   :  { %v776_v31 = vmul.f32 %v884_v24, %v774_v30  ;;  %vm782_vm0 = vweird.f32 %v884_v24  ;;  %v886_v43 = vpop.eup %885 }
 0x523   :  { %vm783_vm11 = vmor %vm781_vm10, %vm782_vm0  ;;  %v724_v44 = vmul.f32 8.0, %v886_v43  ;;  %vm728_vm12 = vweird.f32 %v886_v43 }
 0x524   :  { %v777_v25 = vmul.f32 %v884_v24, %v776_v31 }
 0x525   :  { %v725_v45 = vsub.f32 1.0, %v724_v44 }
 0x526   :  { %v778_v32 = vmul.f32 0.5, %v777_v25 }
 0x527   :  { %v726_v46 = vmul.f32 %v886_v43, %v725_v45 }
 0x528   :  { %v779_v33 = vsub.f32 1.5, %v778_v32 }
 0x529   :  { %v727_v47 = vadd.f32 %v886_v43, %v726_v46 }
 0x52a   :  { %v780_v34 = vmul.f32 %v884_v24, %v779_v33 }
 0x52b   :  { %v729_v48 = vsel %vm728_vm12, %v886_v43, %v727_v47 }
 0x52c   :  { %v784_v35 = vsel %vm783_vm11, %v884_v24, %v780_v34 }
 0x52d   :  { %v790_v36 = vmul.f32 %v784_v35, %v713_v6  ;;  %v785_v37 = vmul.f32 %v784_v35, %v709_v7  ;;  %v792_v38 = vmul.f32 %v784_v35, %v717_v11  ;;  %v872_v6 = vld [vmem:[%s1295_s20] ss:$0 sm:$0xff] }
 0x52f   :  { %v791_v39 = vmul.f32 %v870_v4, %v790_v36  ;;  %v789_v40 = vmul.f32 %v870_v4, %v785_v37  ;;  %v793_v41 = vmul.f32 %v870_v4, %v792_v38 }
 0x531   :  { %799 = vrot.lane.b32.xlu0 %v791_v39, %s905_s9  ;;  %795 = vrot.lane.b32.xlu2 %v789_v40, %s897_s1 }
 0x58b   :  { %v722_v49 = vpop.xlane.xlu2 %721 }
 0x58c   :  { %v730_v50 = vmul.f32 %v729_v48, %v722_v49 }
 0x58e   :  { %v731_v51 = vsub.f32 %v708_v17, %v730_v50 }
 0x590   :  { %v732_v52 = vmul.f32 %v731_v51, %v731_v51 }
 0x592   :  { %v733_v53 = vsel %vm102_vm1, %v732_v52, 0.0 }
 0x593   :  { %734 = vadd.xlane.f32.xlu1 %v733_v53  ;;  %v796_v9 = vpop.permute.xlu2 %795 }
 0x5a3   :  { %v800_v10 = vpop.permute.xlu0 %799 }
 0x5ac   :  { %803 = vrot.lane.b32.xlu1 %v793_v41, %s907_s21 }
 0x606   :  { %v735_v54 = vpop.xlane.xlu1 %734 }
 0x607   :  { %v736_v55 = vmul.f32 %v735_v54, %v729_v48 }
 0x609   :  { %v737_v56 = vadd.f32 1e-05, %v736_v55 }
 0x60b   :  { %887 = vrsqrt.f32 %v737_v56  ;;  %vm744_vm15 = vweird.f32 %v737_v56 }
 0x611   :  { %v888_v57 = vpop.eup %887 }
 0x612   :  { %v739_v58 = vmul.f32 %v888_v57, %v737_v56  ;;  %vm745_vm13 = vweird.f32 %v888_v57 }
 0x613   :  { %vm746_vm2 = vmor %vm744_vm15, %vm745_vm13 }
 0x614   :  { %v740_v59 = vmul.f32 %v888_v57, %v739_v58 }
 0x616   :  { %v741_v60 = vmul.f32 0.5, %v740_v59 }
 0x618   :  { %v742_v61 = vsub.f32 1.5, %v741_v60 }
 0x61a   :  { %v743_v62 = vmul.f32 %v888_v57, %v742_v61 }
 0x61c   :  { %v747_v2 = vsel %vm746_vm2, %v888_v57, %v743_v62 }
 0x61d   :  { %v748_v5 = vmul.f32 %v747_v2, %v731_v51 }
 0x61e   :  { %v804_v11 = vpop.permute.xlu1 %803 }
 0x61f   :  { %v752_v7 = vmul.f32 %v871_v63, %v748_v5 }
 0x621   :  { %v756_v8 = vadd.f32 %v872_v6, %v752_v7 }
 0x623   :  { %v806_v1 = vsel %vm102_vm1, %v756_v8, %v796_v9 }
 0x624   :  { %v807_v0 = vsel %vm464_vm14, %v806_v1, %v800_v10 }
 0x625   :  { %v809_v12 = vsel %vm808_vm3, %v807_v0, %v804_v11 }
 0x626   :  { %811 = vst.msk [vmem:[%s1296_s22] sm:$0xff] %vm810_vm4, %v809_v12 }

</bundles_post_ra>
